<compile_context>
chip_gen: v6e
topology: v6e:2x2x1
jax: 0.10.0
libtpu: 0.0.40
codegen_flags: <defaults>
</compile_context>

<pallas_src>
import functools

import numpy as np
import jax
import jax.numpy as jnp
from jax import lax
from jax.experimental import pallas as pl
from jax.experimental.pallas import tpu as pltpu


def residual_kernel(x_ref, w3_ref, w1_ref, mask_ref, o_ref, p_ref, *, W, R):
    """Whole batch in one call.

    x_ref   : (M, Cin)    f32   flattened input, rows ordered (n, h, w)
    w3_ref  : (Cin, 9*R)  bf16  3x3 weights, lane group t = dy*3 + dx
    w1_ref  : (R, Cout)   bf16  1x1 weights
    mask_ref: (M, 9*R)    f32   0/1 zero-padding mask (input-side)
    o_ref   : (M, Cout)   f32   x + block(x)
    p_ref   : (M, 9*R)    f32   VMEM scratch for per-tap partial products
    """
    M = x_ref.shape[0]

    # ReLU in f32 on the VPU; single cast to bf16 for the MXU.
    a_bf = jnp.maximum(x_ref[...], 0.0).astype(jnp.bfloat16)

    # All nine 3x3 taps in one MXU call; the mask multiply reproduces the
    # conv's zero padding (and zeroes every roll-wraparound / batch-seam row).
    p_ref[...] = (
        jnp.dot(a_bf, w3_ref[...], preferred_element_type=jnp.float32)
        * mask_ref[...])

    # Tap (dy, dx) contributes p[m + d, tap] to output row m, with
    # d = (dy-1)*W + (dx-1): bring it to row m with one sublane roll per tap
    # (XLU slot, runs beside the VPU adds).
    acc = p_ref[:, 4 * R:5 * R]                       # centre tap, d == 0
    for dy in range(3):
        for dx in range(3):
            t = dy * 3 + dx
            d = (dy - 1) * W + (dx - 1)
            if d == 0:
                continue
            acc = acc + pltpu.roll(p_ref[:, t * R:(t + 1) * R],
                                   shift=(-d) % M, axis=0)

    # ReLU -> 1x1 conv (second MXU call) -> residual add; only the MXU inputs
    # are bf16, everything else stays f32.
    h1_bf = jnp.maximum(acc, 0.0).astype(jnp.bfloat16)
    y = jnp.dot(h1_bf, w1_ref[...], preferred_element_type=jnp.float32)
    o_ref[...] = (x_ref[...] + y).astype(o_ref.dtype)
    # TODO(synk): at realistic feature-map sizes, tile over H with a +-1 row
    # halo, set vmem_limit_bytes per chip (v7x has only 64 MiB), split a large
    # batch across v7x's two TensorCores (CORE_PARALLEL), and present
    # lane-dense (H, W*C) I/O slabs; at 2x16x16x32 one step fits trivially.


def _padding_mask(N, H, W, R):
    """(N*H*W, 9*R) f32 0/1 mask: input row j may contribute to tap (dy, dx)
    iff its target pixel (h-(dy-1), w-(dx-1)) lies inside the same image."""
    j = np.arange(N * H * W)
    h = (j // W) % H
    w = j % W
    cols = []
    for dy in range(3):
        for dx in range(3):
            oh, ow = dy - 1, dx - 1
            valid = ((h - oh >= 0) & (h - oh < H) &
                     (w - ow >= 0) & (w - ow < W))
            cols.append(np.repeat(valid[:, None], R, axis=1))
    return jnp.asarray(np.concatenate(cols, axis=1), dtype=jnp.float32)


def residual_forward(x_nhwc, w3_hwio, w1_io):
    """x_nhwc: (N,H,W,Cin) f32; w3_hwio: (3,3,Cin,R) f32; w1_io: (R,Cout) f32."""
    N, H, W, Cin = x_nhwc.shape
    R = w3_hwio.shape[-1]
    Cout = w1_io.shape[-1]
    M = N * H * W

    # Free row-major flatten; the channel dim stays on the lane axis.
    x2 = x_nhwc.reshape(M, Cin)

    # Wrapper-side weight prep (done once): dense (Cin, 9*R) slab, bf16 cast.
    w3_wide = jnp.transpose(w3_hwio, (2, 0, 1, 3)).reshape(Cin, 9 * R)
    w3_wide = w3_wide.astype(jnp.bfloat16)
    w1_bf = w1_io.astype(jnp.bfloat16)

    mask = _padding_mask(N, H, W, R)

    out2 = pl.pallas_call(
        functools.partial(residual_kernel, W=W, R=R),
        out_shape=jax.ShapeDtypeStruct((M, Cout), x_nhwc.dtype),
        grid_spec=pltpu.PrefetchScalarGridSpec(
            num_scalar_prefetch=0,
            grid=(1,),                      # whole fused batch in one step
            in_specs=[
                pl.BlockSpec((M, Cin), lambda i: (0, 0)),
                pl.BlockSpec((Cin, 9 * R), lambda i: (0, 0)),
                pl.BlockSpec((R, Cout), lambda i: (0, 0)),
                pl.BlockSpec((M, 9 * R), lambda i: (0, 0)),
            ],
            out_specs=pl.BlockSpec((M, Cout), lambda i: (0, 0)),
            scratch_shapes=[pltpu.VMEM((M, 9 * R), jnp.float32)],
        ),
        compiler_params=pltpu.CompilerParams(
            dimension_semantics=("arbitrary",)),
    )(x2, w3_wide, w1_bf, mask)
    return out2.reshape(N, H, W, Cout)


def residual_reference(x_nhwc, w3_hwio, w1_io):
    """Pure-JAX f32 reference (matches PyTorch Residual.forward semantics)."""
    a = jnp.maximum(x_nhwc, 0.0)
    y = lax.conv_general_dilated(
        a, w3_hwio, window_strides=(1, 1), padding="SAME",
        dimension_numbers=("NHWC", "HWIO", "NHWC"))
    y = jnp.maximum(y, 0.0)
    y = lax.conv_general_dilated(
        y, w1_io[None, None], window_strides=(1, 1), padding="VALID",
        dimension_numbers=("NHWC", "HWIO", "NHWC"))
    return x_nhwc + y


if __name__ == "__main__":
    # Residual(in_channels=32, num_hiddens=32, num_residual_hiddens=16)
    # (in_channels must equal num_hiddens for the residual add to be valid)
    N, H, W = 2, 16, 16
    in_channels = 32
    num_hiddens = 32
    num_residual_hiddens = 16

    key = jax.random.PRNGKey(0)
    kx, k3, k1 = jax.random.split(key, 3)

    # Input built directly in NHWC (equivalent NCHW shape: (2, 32, 16, 16)).
    x = jax.random.normal(kx, (N, H, W, in_channels), dtype=jnp.float32)

    # PyTorch Conv2d weights are OIHW; build OIHW then convert to HWIO.
    w3_oihw = 0.1 * jax.random.normal(
        k3, (num_residual_hiddens, in_channels, 3, 3), dtype=jnp.float32)
    w1_oihw = 0.1 * jax.random.normal(
        k1, (num_hiddens, num_residual_hiddens, 1, 1), dtype=jnp.float32)

    w3_hwio = jnp.transpose(w3_oihw, (2, 3, 1, 0))        # (3,3,Cin,R)
    w1_io = jnp.transpose(w1_oihw[:, :, 0, 0], (1, 0))    # (R,Cout)

    out = residual_forward(x, w3_hwio, w1_io)
    out = jax.block_until_ready(out)

    ref = residual_reference(x, w3_hwio, w1_io)
    ref = jax.block_until_ready(ref)

    assert out.shape == (N, H, W, num_hiddens)
    # Tolerance reflects bf16 MXU inputs with f32 accumulation.
    assert jnp.allclose(out, ref, atol=3e-2, rtol=3e-2), "mismatch vs reference"

    print("KERNEL_OK")
</pallas_src>

<mosaic_0001>
module attributes {stable_mosaic.version = 11 : i64} {
  func.func @residual_kernel(%arg0: i32, %arg1: memref<512x32xf32, #tpu.memory_space<vmem>>, %arg2: memref<32x144xbf16, #tpu.memory_space<vmem>>, %arg3: memref<16x32xbf16, #tpu.memory_space<vmem>>, %arg4: memref<512x144xf32, #tpu.memory_space<vmem>>, %arg5: memref<512x32xf32, #tpu.memory_space<vmem>>, %arg6: memref<512x144xf32, #tpu.memory_space<vmem>>) attributes {dimension_semantics = [#tpu.dimension_semantics<arbitrary>], iteration_bounds = array<i64: 1>, scalar_prefetch = 0 : i64, scratch_operands = 1 : i64, tpu.core_type = #tpu.core_type<tc>, window_params = [{pipeline_mode = #tpu.pipeline_mode<synchronous>, transform_indices = @transform_0, window_bounds = array<i64: 512, 32>}, {pipeline_mode = #tpu.pipeline_mode<synchronous>, transform_indices = @transform_1, window_bounds = array<i64: 32, 144>}, {pipeline_mode = #tpu.pipeline_mode<synchronous>, transform_indices = @transform_2, window_bounds = array<i64: 16, 32>}, {pipeline_mode = #tpu.pipeline_mode<synchronous>, transform_indices = @transform_3, window_bounds = array<i64: 512, 144>}, {pipeline_mode = #tpu.pipeline_mode<synchronous>, transform_indices = @transform_4, window_bounds = array<i64: 512, 32>}]} {
    %c0 = arith.constant 0 : index
    %c0_0 = arith.constant 0 : index
    %0 = vector.load %arg1[%c0, %c0_0] : memref<512x32xf32, #tpu.memory_space<vmem>>, vector<512x32xf32>
    %cst = arith.constant 0.000000e+00 : f32
    %1 = vector.broadcast %cst : f32 to vector<512x32xf32>
    %2 = arith.maximumf %0, %1 : vector<512x32xf32>
    %3 = arith.truncf %2 : vector<512x32xf32> to vector<512x32xbf16>
    %c0_1 = arith.constant 0 : index
    %c0_2 = arith.constant 0 : index
    %4 = vector.load %arg2[%c0_1, %c0_2] : memref<32x144xbf16, #tpu.memory_space<vmem>>, vector<32x144xbf16>
    %cst_3 = arith.constant dense<0.000000e+00> : vector<512x144xf32>
    %5 = tpu.matmul %3, %4, %cst_3 {dimension_numbers = #tpu.dot_dimension_numbers<[1], [0], [0], [1], [0, 0, 1, 1], [], []>} : vector<512x32xbf16>, vector<32x144xbf16>, vector<512x144xf32> -> vector<512x144xf32>
    %c0_4 = arith.constant 0 : index
    %c0_5 = arith.constant 0 : index
    %6 = vector.load %arg4[%c0_4, %c0_5] : memref<512x144xf32, #tpu.memory_space<vmem>>, vector<512x144xf32>
    %7 = arith.mulf %5, %6 : vector<512x144xf32>
    %c0_6 = arith.constant 0 : index
    %c0_7 = arith.constant 0 : index
    %8 = vector.load %arg6[%c0_6, %c0_7] : memref<512x144xf32, #tpu.memory_space<vmem>>, vector<512x144xf32>
    tpu.vector_store %arg6[%c0_6, %c0_7], %7 {strides = array<i32>} : memref<512x144xf32, #tpu.memory_space<vmem>>, vector<512x144xf32>,
    %c0_8 = arith.constant 0 : index
    %c64 = arith.constant 64 : index
    %9 = vector.load %arg6[%c0_8, %c64] : memref<512x144xf32, #tpu.memory_space<vmem>>, vector<512x16xf32>
    %c0_9 = arith.constant 0 : index
    %c0_10 = arith.constant 0 : index
    %10 = vector.load %arg6[%c0_9, %c0_10] : memref<512x144xf32, #tpu.memory_space<vmem>>, vector<512x16xf32>
    %c17_i32 = arith.constant 17 : i32
    %11 = tpu.dynamic_rotate %10 by %c17_i32 dim 0 : vector<512x16xf32>, i32 -> vector<512x16xf32>
    %12 = arith.addf %9, %11 : vector<512x16xf32>
    %c0_11 = arith.constant 0 : index
    %c16 = arith.constant 16 : index
    %13 = vector.load %arg6[%c0_11, %c16] : memref<512x144xf32, #tpu.memory_space<vmem>>, vector<512x16xf32>
    %c16_i32 = arith.constant 16 : i32
    %14 = tpu.dynamic_rotate %13 by %c16_i32 dim 0 : vector<512x16xf32>, i32 -> vector<512x16xf32>
    %15 = arith.addf %12, %14 : vector<512x16xf32>
    %c0_12 = arith.constant 0 : index
    %c32 = arith.constant 32 : index
    %16 = vector.load %arg6[%c0_12, %c32] : memref<512x144xf32, #tpu.memory_space<vmem>>, vector<512x16xf32>
    %c15_i32 = arith.constant 15 : i32
    %17 = tpu.dynamic_rotate %16 by %c15_i32 dim 0 : vector<512x16xf32>, i32 -> vector<512x16xf32>
    %18 = arith.addf %15, %17 : vector<512x16xf32>
    %c0_13 = arith.constant 0 : index
    %c48 = arith.constant 48 : index
    %19 = vector.load %arg6[%c0_13, %c48] : memref<512x144xf32, #tpu.memory_space<vmem>>, vector<512x16xf32>
    %c1_i32 = arith.constant 1 : i32
    %20 = tpu.dynamic_rotate %19 by %c1_i32 dim 0 : vector<512x16xf32>, i32 -> vector<512x16xf32>
    %21 = arith.addf %18, %20 : vector<512x16xf32>
    %c0_14 = arith.constant 0 : index
    %c80 = arith.constant 80 : index
    %22 = vector.load %arg6[%c0_14, %c80] : memref<512x144xf32, #tpu.memory_space<vmem>>, vector<512x16xf32>
    %c511_i32 = arith.constant 511 : i32
    %23 = tpu.dynamic_rotate %22 by %c511_i32 dim 0 : vector<512x16xf32>, i32 -> vector<512x16xf32>
    %24 = arith.addf %21, %23 : vector<512x16xf32>
    %c0_15 = arith.constant 0 : index
    %c96 = arith.constant 96 : index
    %25 = vector.load %arg6[%c0_15, %c96] : memref<512x144xf32, #tpu.memory_space<vmem>>, vector<512x16xf32>
    %c497_i32 = arith.constant 497 : i32
    %26 = tpu.dynamic_rotate %25 by %c497_i32 dim 0 : vector<512x16xf32>, i32 -> vector<512x16xf32>
    %27 = arith.addf %24, %26 : vector<512x16xf32>
    %c0_16 = arith.constant 0 : index
    %c112 = arith.constant 112 : index
    %28 = vector.load %arg6[%c0_16, %c112] : memref<512x144xf32, #tpu.memory_space<vmem>>, vector<512x16xf32>
    %c496_i32 = arith.constant 496 : i32
    %29 = tpu.dynamic_rotate %28 by %c496_i32 dim 0 : vector<512x16xf32>, i32 -> vector<512x16xf32>
    %30 = arith.addf %27, %29 : vector<512x16xf32>
    %c0_17 = arith.constant 0 : index
    %c128 = arith.constant 128 : index
    %31 = vector.load %arg6[%c0_17, %c128] : memref<512x144xf32, #tpu.memory_space<vmem>>, vector<512x16xf32>
    %c495_i32 = arith.constant 495 : i32
    %32 = tpu.dynamic_rotate %31 by %c495_i32 dim 0 : vector<512x16xf32>, i32 -> vector<512x16xf32>
    %33 = arith.addf %30, %32 : vector<512x16xf32>
    %cst_18 = arith.constant 0.000000e+00 : f32
    %34 = vector.broadcast %cst_18 : f32 to vector<512x16xf32>
    %35 = arith.maximumf %33, %34 : vector<512x16xf32>
    %36 = arith.truncf %35 : vector<512x16xf32> to vector<512x16xbf16>
    %c0_19 = arith.constant 0 : index
    %c0_20 = arith.constant 0 : index
    %37 = vector.load %arg3[%c0_19, %c0_20] : memref<16x32xbf16, #tpu.memory_space<vmem>>, vector<16x32xbf16>
    %cst_21 = arith.constant dense<0.000000e+00> : vector<512x32xf32>
    %38 = tpu.matmul %36, %37, %cst_21 {dimension_numbers = #tpu.dot_dimension_numbers<[1], [0], [0], [1], [0, 0, 1, 1], [], []>} : vector<512x16xbf16>, vector<16x32xbf16>, vector<512x32xf32> -> vector<512x32xf32>
    %c0_22 = arith.constant 0 : index
    %c0_23 = arith.constant 0 : index
    %39 = vector.load %arg1[%c0_22, %c0_23] : memref<512x32xf32, #tpu.memory_space<vmem>>, vector<512x32xf32>
    %40 = arith.addf %39, %38 : vector<512x32xf32>
    %c0_24 = arith.constant 0 : index
    %c0_25 = arith.constant 0 : index
    %41 = vector.load %arg5[%c0_24, %c0_25] : memref<512x32xf32, #tpu.memory_space<vmem>>, vector<512x32xf32>
    tpu.vector_store %arg5[%c0_24, %c0_25], %40 {strides = array<i32>} : memref<512x32xf32, #tpu.memory_space<vmem>>, vector<512x32xf32>,
    return
  }
  func.func @transform_0(%arg0: i32) -> (i32, i32) {
    %c0_i32 = arith.constant 0 : i32
    %c0_i32_0 = arith.constant 0 : i32
    %c0_i32_1 = arith.constant 0 : i32
    return %c0_i32, %c0_i32_0 : i32, i32
  }
  func.func @transform_1(%arg0: i32) -> (i32, i32) {
    %c0_i32 = arith.constant 0 : i32
    %c0_i32_0 = arith.constant 0 : i32
    %c0_i32_1 = arith.constant 0 : i32
    return %c0_i32, %c0_i32_0 : i32, i32
  }
  func.func @transform_2(%arg0: i32) -> (i32, i32) {
    %c0_i32 = arith.constant 0 : i32
    %c0_i32_0 = arith.constant 0 : i32
    %c0_i32_1 = arith.constant 0 : i32
    return %c0_i32, %c0_i32_0 : i32, i32
  }
  func.func @transform_3(%arg0: i32) -> (i32, i32) {
    %c0_i32 = arith.constant 0 : i32
    %c0_i32_0 = arith.constant 0 : i32
    %c0_i32_1 = arith.constant 0 : i32
    return %c0_i32, %c0_i32_0 : i32, i32
  }
  func.func @transform_4(%arg0: i32) -> (i32, i32) {
    %c0_i32 = arith.constant 0 : i32
    %c0_i32_0 = arith.constant 0 : i32
    %c0_i32_1 = arith.constant 0 : i32
    return %c0_i32, %c0_i32_0 : i32, i32
  }
}

</mosaic_0001>

<bundles_post_ra>
// kernel: tpu_custom_call.1
= control target key start
LH: loop header
LB: loop body
LE: loop exit
PB: predicated region body
PF: predicated region fallthrough
CT: control target
= control target key end

     0   :  { %v6633_v1 = vmov 0   ;;  %vm202_vm0 = vcmask 261120   ;;  %vm909_vm1 = vcmask 130048   ;;  %s6634_s28 = smov 112   ;;  %s6635_s18 = smov 96   ;;  %s12721_s1 = inlined_call_operand.vmem [shape: bf16[32,144], index: 1, kind: input, shape index: {}]   ;;  %s12722_s0 = inlined_call_operand.vmem [shape: f32[512,32], index: 0, kind: input, shape index: {}]   ;;  %s12723_s3 = inlined_call_operand.vmem [shape: f32[512,144], index: 3, kind: input, shape index: {}]   ;;  %s12724_s2 = inlined_call_operand.vmem [shape: bf16[16,32], index: 2, kind: input, shape index: {}]   ;;  %s12725_s4 = inlined_call_operand.vmem [shape: f32[512,32], index: 4, kind: output, shape index: {}]  }
   0x1   :  { %v6418_v0 = vld [vmem:[%s12721_s1 + $0x14] ss:$8 sps:$4 sm:$0xff]   ;;  %331 = vmatprep.mubr.bf16.mxu0 %v6633_v1  ;;  %571 = vmatprep.mubr.bf16.mxu1 %v6633_v1  ;;  %v6420_v2 = vld [vmem:[%s12721_s1 + $0x10] ss:$8 sps:$4 sm:$0xff]   ;;  %v6421_v3 = vld [vmem:[%s12721_s1 + $0x4] ss:$8 sps:$4 sm:$0xff]  }
   0x2   :  { %311 = vmatprep.subr.bf16.mxu0 %v6418_v0  ;;  %6406 = vmatprep.subr.bf16.mxu1 %v6418_v0  ;;  %v6423_v4 = vld [vmem:[%s12721_s1] ss:$8 sps:$4 sm:$0xff]   ;;  %v20_v15 = vld [vmem:[%s12722_s0 + $0x10] sm:$0xff]  ;;  %v21_v16 = vld [vmem:[%s12722_s0 + $0x18] sm:$0xff]  ;;  %s6636_s9 = smov 64   ;;  %s6640_s5 = smov 16  }
   0x3   :  { %v18_v5 = vld [vmem:[%s12722_s0] sm:$0xff]  ;;  %312 = vmatpush1.bf16.msra.mxu0 %v6420_v2  ;;  %6408 = vmatpush1.bf16.msra.mxu1 %v6420_v2  ;;  %v19_v6 = vld [vmem:[%s12722_s0 + $0x8] sm:$0xff]  ;;  %v68_v17 = vld [vmem:[%s12722_s0 + $0x190] sm:$0xff]  ;;  %v84_v19 = vmax.f32 %v20_v15, 0.0  ;;  %v85_v20 = vmax.f32 %v21_v16, 0.0 }
   0x4   :  { %v82_v7 = vmax.f32 %v18_v5, 0.0  ;;  %v66_v8 = vld [vmem:[%s12722_s0 + $0x180] sm:$0xff]  ;;  %v67_v9 = vld [vmem:[%s12722_s0 + $0x188] sm:$0xff]  ;;  %313 = vmatprep.subr.bf16.mxu0 %v6421_v3  ;;  %6407 = vmatprep.subr.bf16.mxu1 %v6421_v3  ;;  %v83_v10 = vmax.f32 %v19_v6, 0.0  ;;  %v69_v18 = vld [vmem:[%s12722_s0 + $0x198] sm:$0xff]  ;;  %v132_v21 = vmax.f32 %v68_v17, 0.0 }
   0x5   :  { %v130_v11 = vmax.f32 %v66_v8, 0.0  ;;  %v131_v12 = vmax.f32 %v67_v9, 0.0  ;;  %v133_v22 = vmax.f32 %v69_v18, 0.0  ;;  %v147_v23 = vpack.c.bf16 %v85_v20, %v84_v19  ;;  %v22_v25 = vld [vmem:[%s12722_s0 + $0x20] sm:$0xff]  ;;  %v23_v26 = vld [vmem:[%s12722_s0 + $0x28] sm:$0xff]  ;;  %v24_v35 = vld [vmem:[%s12722_s0 + $0x30] sm:$0xff] }
   0x6   :  { %v146_v13 = vpack.c.bf16 %v83_v10, %v82_v7  ;;  %v70_v27 = vld [vmem:[%s12722_s0 + $0x1a0] sm:$0xff]  ;;  %v71_v28 = vld [vmem:[%s12722_s0 + $0x1a8] sm:$0xff]  ;;  %v86_v29 = vmax.f32 %v22_v25, 0.0  ;;  %v87_v30 = vmax.f32 %v23_v26, 0.0  ;;  %v25_v36 = vld [vmem:[%s12722_s0 + $0x38] sm:$0xff]  ;;  %v88_v39 = vmax.f32 %v24_v35, 0.0 }
   0x7   :  { %v170_v14 = vpack.c.bf16 %v131_v12, %v130_v11  ;;  %314 = vmatpush1.bf16.msra.mxu0 %v6423_v4  ;;  %6409 = vmatpush1.bf16.msra.mxu1 %v6423_v4  ;;  %v171_v24 = vpack.c.bf16 %v133_v22, %v132_v21  ;;  %v134_v31 = vmax.f32 %v70_v27, 0.0  ;;  %v135_v32 = vmax.f32 %v71_v28, 0.0  ;;  %v72_v37 = vld [vmem:[%s12722_s0 + $0x1b0] sm:$0xff]  ;;  %v73_v38 = vld [vmem:[%s12722_s0 + $0x1b8] sm:$0xff]  ;;  %v26_v45 = vld [vmem:[%s12722_s0 + $0x40] sm:$0xff] }
   0x8   :  { %v148_v33 = vpack.c.bf16 %v87_v30, %v86_v29  ;;  %v89_v40 = vmax.f32 %v25_v36, 0.0  ;;  %v136_v41 = vmax.f32 %v72_v37, 0.0  ;;  %v137_v42 = vmax.f32 %v73_v38, 0.0  ;;  %v27_v46 = vld [vmem:[%s12722_s0 + $0x48] sm:$0xff]  ;;  %v74_v47 = vld [vmem:[%s12722_s0 + $0x1c0] sm:$0xff]  ;;  %v28_v55 = vld [vmem:[%s12722_s0 + $0x50] sm:$0xff] }
   0x9   :  { %v172_v34 = vpack.c.bf16 %v135_v32, %v134_v31  ;;  %v75_v48 = vld [vmem:[%s12722_s0 + $0x1c8] sm:$0xff]  ;;  %v90_v49 = vmax.f32 %v26_v45, 0.0  ;;  %v91_v50 = vmax.f32 %v27_v46, 0.0  ;;  %v138_v51 = vmax.f32 %v74_v47, 0.0  ;;  %v29_v56 = vld [vmem:[%s12722_s0 + $0x58] sm:$0xff]  ;;  %v76_v57 = vld [vmem:[%s12722_s0 + $0x1d0] sm:$0xff] }
   0xa   :  { %6242 = vmatmul.mubr.msk.bf16.vlgmr.msra.gmra.mxu0 %vm202_vm0, %v146_v13  ;;  %6266 = vmatmul.mubr.msk.bf16.vlgmr.msra.gmra.mxu1 %vm202_vm0, %v170_v14  ;;  %v149_v43 = vpack.c.bf16 %v89_v40, %v88_v39  ;;  %v173_v44 = vpack.c.bf16 %v137_v42, %v136_v41  ;;  %v139_v52 = vmax.f32 %v75_v48, 0.0  ;;  %v77_v58 = vld [vmem:[%s12722_s0 + $0x1d8] sm:$0xff]  ;;  %v92_v59 = vmax.f32 %v28_v55, 0.0  ;;  %v30_v2 = vld [vmem:[%s12722_s0 + $0x60] sm:$0xff]  ;;  %v31_v3 = vld [vmem:[%s12722_s0 + $0x68] sm:$0xff] }
   0xb   :  { %341 = vmatprep.mubr.bf16.mxu0 %v6633_v1  ;;  %581 = vmatprep.mubr.bf16.mxu1 %v6633_v1  ;;  %v150_v53 = vpack.c.bf16 %v91_v50, %v90_v49  ;;  %v93_v60 = vmax.f32 %v29_v56, 0.0  ;;  %v140_v61 = vmax.f32 %v76_v57, 0.0  ;;  %v141_v62 = vmax.f32 %v77_v58, 0.0  ;;  %v78_v4 = vld [vmem:[%s12722_s0 + $0x1e0] sm:$0xff]  ;;  %v79_v5 = vld [vmem:[%s12722_s0 + $0x1e8] sm:$0xff]  ;;  %v32_v12 = vld [vmem:[%s12722_s0 + $0x70] sm:$0xff] }
   0xc   :  { %v174_v54 = vpack.c.bf16 %v139_v52, %v138_v51  ;;  %v94_v6 = vmax.f32 %v30_v2, 0.0  ;;  %v95_v7 = vmax.f32 %v31_v3, 0.0  ;;  %v142_v8 = vmax.f32 %v78_v4, 0.0  ;;  %v33_v13 = vld [vmem:[%s12722_s0 + $0x78] sm:$0xff]  ;;  %v80_v14 = vld [vmem:[%s12722_s0 + $0x1f0] sm:$0xff]  ;;  %v34_v22 = vld [vmem:[%s12722_s0 + $0x80] sm:$0xff] }
   0xd   :  { %v151_v63 = vpack.c.bf16 %v93_v60, %v92_v59  ;;  %v175_v0 = vpack.c.bf16 %v141_v62, %v140_v61  ;;  %v143_v9 = vmax.f32 %v79_v5, 0.0  ;;  %v81_v15 = vld [vmem:[%s12722_s0 + $0x1f8] sm:$0xff]  ;;  %v96_v16 = vmax.f32 %v32_v12, 0.0  ;;  %v36_v27 = vld [vmem:[%s12722_s0 + $0x90] sm:$0xff]  ;;  %v38_v32 = vld [vmem:[%s12722_s0 + $0xa0] sm:$0xff] }
   0xe   :  { %v152_v10 = vpack.c.bf16 %v95_v7, %v94_v6  ;;  %v97_v17 = vmax.f32 %v33_v13, 0.0  ;;  %v144_v18 = vmax.f32 %v80_v14, 0.0  ;;  %v145_v19 = vmax.f32 %v81_v15, 0.0  ;;  %v37_v28 = vld [vmem:[%s12722_s0 + $0x98] sm:$0xff]  ;;  %v40_v37 = vld [vmem:[%s12722_s0 + $0xb0] sm:$0xff]  ;;  %v42_v42 = vld [vmem:[%s12722_s0 + $0xc0] sm:$0xff] }
   0xf   :  { %v176_v11 = vpack.c.bf16 %v143_v9, %v142_v8  ;;  %v100_v29 = vmax.f32 %v36_v27, 0.0  ;;  %v101_v30 = vmax.f32 %v37_v28, 0.0  ;;  %v41_v38 = vld [vmem:[%s12722_s0 + $0xb8] sm:$0xff]  ;;  %v104_v39 = vmax.f32 %v40_v37, 0.0  ;;  %v44_v47 = vld [vmem:[%s12722_s0 + $0xd0] sm:$0xff]  ;;  %v46_v52 = vld [vmem:[%s12722_s0 + $0xe0] sm:$0xff] }
  0x10   :  { %v153_v20 = vpack.c.bf16 %v97_v17, %v96_v16  ;;  %v177_v21 = vpack.c.bf16 %v145_v19, %v144_v18  ;;  %v105_v40 = vmax.f32 %v41_v38, 0.0  ;;  %v45_v48 = vld [vmem:[%s12722_s0 + $0xd8] sm:$0xff]  ;;  %v108_v49 = vmax.f32 %v44_v47, 0.0  ;;  %v48_v57 = vld [vmem:[%s12722_s0 + $0xf0] sm:$0xff]  ;;  %v50_v62 = vld [vmem:[%s12722_s0 + $0x100] sm:$0xff] }
  0x11   :  { %v155_v31 = vpack.c.bf16 %v101_v30, %v100_v29  ;;  %v109_v50 = vmax.f32 %v45_v48, 0.0  ;;  %v49_v58 = vld [vmem:[%s12722_s0 + $0xf8] sm:$0xff]  ;;  %v112_v59 = vmax.f32 %v48_v57, 0.0  ;;  %v52_v4 = vld [vmem:[%s12722_s0 + $0x110] sm:$0xff]  ;;  %v54_v9 = vld [vmem:[%s12722_s0 + $0x120] sm:$0xff] }
  0x12   :  { %6243 = vmatmul.mubr.msk.bf16.gmra.mxu0 %vm202_vm0, %v147_v23  ;;  %6267 = vmatmul.mubr.msk.bf16.gmra.mxu1 %vm202_vm0, %v171_v24  ;;  %v35_v23 = vld [vmem:[%s12722_s0 + $0x88] sm:$0xff]  ;;  %v98_v24 = vmax.f32 %v34_v22, 0.0  ;;  %v157_v41 = vpack.c.bf16 %v105_v40, %v104_v39  ;;  %v113_v60 = vmax.f32 %v49_v58, 0.0  ;;  %v53_v5 = vld [vmem:[%s12722_s0 + $0x118] sm:$0xff]  ;;  %v116_v6 = vmax.f32 %v52_v4, 0.0  ;;  %v56_v14 = vld [vmem:[%s12722_s0 + $0x130] sm:$0xff] }
  0x13   :  { %351 = vmatprep.mubr.bf16.mxu0 %v6633_v1  ;;  %591 = vmatprep.mubr.bf16.mxu1 %v6633_v1  ;;  %v99_v25 = vmax.f32 %v35_v23, 0.0  ;;  %v159_v51 = vpack.c.bf16 %v109_v50, %v108_v49  ;;  %v117_v7 = vmax.f32 %v53_v5, 0.0  ;;  %v57_v15 = vld [vmem:[%s12722_s0 + $0x138] sm:$0xff]  ;;  %v120_v16 = vmax.f32 %v56_v14, 0.0  ;;  %v58_v19 = vld [vmem:[%s12722_s0 + $0x140] sm:$0xff]  ;;  %v63_v30 = vld [vmem:[%s12722_s0 + $0x168] sm:$0xff] }
  0x14   :  { %v161_v61 = vpack.c.bf16 %v113_v60, %v112_v59  ;;  %v121_v17 = vmax.f32 %v57_v15, 0.0  ;;  %v62_v29 = vld [vmem:[%s12722_s0 + $0x160] sm:$0xff]  ;;  %v654_v48 = vld [vmem:[%s12723_s3 + $0x10] sm:$0xff]  ;;  %v657_v4 = vld [vmem:[%s12723_s3 + $0x28] sm:$0xff] }
  0x15   :  { %v154_v26 = vpack.c.bf16 %v99_v25, %v98_v24  ;;  %v163_v8 = vpack.c.bf16 %v117_v7, %v116_v6  ;;  %v60_v24 = vld [vmem:[%s12722_s0 + $0x150] sm:$0xff]  ;;  %v61_v25 = vld [vmem:[%s12722_s0 + $0x158] sm:$0xff]  ;;  %v652_v39 = vld [vmem:[%s12723_s3] sm:$0xff] }
  0x16   :  { %v165_v18 = vpack.c.bf16 %v121_v17, %v120_v16  ;;  %v125_v27 = vmax.f32 %v61_v25, 0.0  ;;  %v748_v40 = vld [vmem:[%s12723_s3 + $0x300] sm:$0xff]  ;;  %v750_v49 = vld [vmem:[%s12723_s3 + $0x310] sm:$0xff]  ;;  %v753_v5 = vld [vmem:[%s12723_s3 + $0x328] sm:$0xff] }
  0x17   :  { %v656_v60 = vld [vmem:[%s12723_s3 + $0x20] sm:$0xff]  ;;  %v659_v17 = vld [vmem:[%s12723_s3 + $0x38] sm:$0xff] }
  0x1a   :  { %6244 = vmatmul.mubr.msk.bf16.gmra.mxu0 %vm202_vm0, %v148_v33  ;;  %6268 = vmatmul.mubr.msk.bf16.gmra.mxu1 %vm202_vm0, %v172_v34  ;;  %v39_v33 = vld [vmem:[%s12722_s0 + $0xa8] sm:$0xff]  ;;  %v102_v34 = vmax.f32 %v38_v32, 0.0  ;;  %v127_v32 = vmax.f32 %v63_v30, 0.0 }
  0x1b   :  { %361 = vmatprep.mubr.bf16.mxu0 %v6633_v1  ;;  %601 = vmatprep.mubr.bf16.mxu1 %v6633_v1  ;;  %v103_v35 = vmax.f32 %v39_v33, 0.0  ;;  %v661_v30 = vld [vmem:[%s12723_s3 + $0x48] sm:$0xff] }
  0x1d   :  { %v156_v36 = vpack.c.bf16 %v103_v35, %v102_v34  ;;  %v64_v34 = vld [vmem:[%s12722_s0 + $0x170] sm:$0xff]  ;;  %v65_v35 = vld [vmem:[%s12722_s0 + $0x178] sm:$0xff] }
  0x1e   :  { %v129_v37 = vmax.f32 %v65_v35, 0.0 }
  0x22   :  { %6245 = vmatmul.mubr.msk.bf16.gmra.mxu0 %vm202_vm0, %v149_v43  ;;  %6269 = vmatmul.mubr.msk.bf16.gmra.mxu1 %vm202_vm0, %v173_v44  ;;  %v43_v43 = vld [vmem:[%s12722_s0 + $0xc8] sm:$0xff]  ;;  %v106_v44 = vmax.f32 %v42_v42, 0.0 }
  0x23   :  { %371 = vmatprep.mubr.bf16.mxu0 %v6633_v1  ;;  %611 = vmatprep.mubr.bf16.mxu1 %v6633_v1  ;;  %v107_v45 = vmax.f32 %v43_v43, 0.0  ;;  %v653_v43 = vld [vmem:[%s12723_s3 + $0x8] sm:$0xff] }
  0x25   :  { %v158_v46 = vpack.c.bf16 %v107_v45, %v106_v44 }
  0x2a   :  { %6246 = vmatmul.mubr.msk.bf16.gmra.mxu0 %vm202_vm0, %v150_v53  ;;  %6270 = vmatmul.mubr.msk.bf16.gmra.mxu1 %vm202_vm0, %v174_v54  ;;  %v47_v53 = vld [vmem:[%s12722_s0 + $0xe8] sm:$0xff]  ;;  %v110_v54 = vmax.f32 %v46_v52, 0.0 }
  0x2b   :  { %381 = vmatprep.mubr.bf16.mxu0 %v6633_v1  ;;  %621 = vmatprep.mubr.bf16.mxu1 %v6633_v1  ;;  %v111_v55 = vmax.f32 %v47_v53, 0.0 }
  0x2d   :  { %v160_v56 = vpack.c.bf16 %v111_v55, %v110_v54  ;;  %v655_v54 = vld [vmem:[%s12723_s3 + $0x18] sm:$0xff] }
  0x2e   :  { %v751_v55 = vld [vmem:[%s12723_s3 + $0x318] sm:$0xff] }
  0x32   :  { %6247 = vmatmul.mubr.msk.bf16.gmra.mxu0 %vm202_vm0, %v151_v63  ;;  %6271 = vmatmul.mubr.msk.bf16.gmra.mxu1 %vm202_vm0, %v175_v0  ;;  %v51_v63 = vld [vmem:[%s12722_s0 + $0x108] sm:$0xff]  ;;  %v114_v0 = vmax.f32 %v50_v62, 0.0 }
  0x33   :  { %391 = vmatprep.mubr.bf16.mxu0 %v6633_v1  ;;  %631 = vmatprep.mubr.bf16.mxu1 %v6633_v1  ;;  %v115_v2 = vmax.f32 %v51_v63, 0.0 }
  0x35   :  { %v162_v3 = vpack.c.bf16 %v115_v2, %v114_v0  ;;  %v1165_v0 = vlaneseq }
  0x37   :  { %v7008_v14 = vshrl.u32 %v1165_v0, 7 }
  0x39   :  { %vm1167_vm2 = vcmp.lt.s32.totalorder %v7008_v14, 1  ;;  %vm2256_vm3 = vcmp.lt.s32.totalorder %v7008_v14, 7 }
  0x3a   :  { %6248 = vmatmul.mubr.msk.bf16.gmra.mxu0 %vm202_vm0, %v152_v10  ;;  %6272 = vmatmul.mubr.msk.bf16.gmra.mxu1 %vm202_vm0, %v176_v11  ;;  %v55_v10 = vld [vmem:[%s12722_s0 + $0x128] sm:$0xff]  ;;  %v118_v11 = vmax.f32 %v54_v9, 0.0 }
  0x3b   :  { %401 = vmatprep.mubr.bf16.mxu0 %v6633_v1  ;;  %641 = vmatprep.mubr.bf16.mxu1 %v6633_v1  ;;  %v119_v12 = vmax.f32 %v55_v10, 0.0  ;;  %v658_v10 = vld [vmem:[%s12723_s3 + $0x30] sm:$0xff] }
  0x3d   :  { %v164_v13 = vpack.c.bf16 %v119_v12, %v118_v11  ;;  %v754_v11 = vld [vmem:[%s12723_s3 + $0x330] sm:$0xff] }
  0x42   :  { %6249 = vmatmul.mubr.msk.bf16.gmra.mxu0 %vm202_vm0, %v153_v20  ;;  %6273 = vmatmul.mubr.msk.bf16.gmra.mxu1 %vm202_vm0, %v177_v21  ;;  %v59_v20 = vld [vmem:[%s12722_s0 + $0x148] sm:$0xff]  ;;  %v122_v21 = vmax.f32 %v58_v19, 0.0 }
  0x43   :  { %411 = vmatprep.mubr.bf16.mxu0 %v6633_v1  ;;  %v123_v22 = vmax.f32 %v59_v20, 0.0 }
  0x45   :  { %v166_v23 = vpack.c.bf16 %v123_v22, %v122_v21 }
  0x4a   :  { %6250 = vmatmul.mubr.msk.bf16.gmra.mxu0 %vm202_vm0, %v154_v26  ;;  %v124_v26 = vmax.f32 %v60_v24, 0.0  ;;  %v756_v24 = vld [vmem:[%s12723_s3 + $0x340] sm:$0xff] }
  0x4b   :  { %421 = vmatprep.mubr.bf16.mxu0 %v6633_v1 }
  0x4c   :  { %v167_v28 = vpack.c.bf16 %v125_v27, %v124_v26 }
  0x52   :  { %6251 = vmatmul.mubr.msk.bf16.gmra.mxu0 %vm202_vm0, %v155_v31  ;;  %v126_v31 = vmax.f32 %v62_v29, 0.0 }
  0x53   :  { %431 = vmatprep.mubr.bf16.mxu0 %v6633_v1 }
  0x54   :  { %v168_v33 = vpack.c.bf16 %v127_v32, %v126_v31  ;;  %v757_v31 = vld [vmem:[%s12723_s3 + $0x348] sm:$0xff] }
  0x5a   :  { %6252 = vmatmul.mubr.msk.bf16.gmra.mxu0 %vm202_vm0, %v156_v36  ;;  %v128_v36 = vmax.f32 %v64_v34, 0.0 }
  0x5b   :  { %441 = vmatprep.mubr.bf16.mxu0 %v6633_v1 }
  0x5c   :  { %v169_v38 = vpack.c.bf16 %v129_v37, %v128_v36  ;;  %v662_v37 = vld [vmem:[%s12723_s3 + $0x50] sm:$0xff] }
  0x62   :  { %6253 = vmatmul.mubr.msk.bf16.gmra.mxu0 %vm202_vm0, %v157_v41 }
  0x63   :  { %451 = vmatprep.mubr.bf16.mxu0 %v6633_v1 }
  0x6a   :  { %6254 = vmatmul.mubr.msk.bf16.gmra.mxu0 %vm202_vm0, %v158_v46 }
  0x6b   :  { %461 = vmatprep.mubr.bf16.mxu0 %v6633_v1 }
  0x72   :  { %6255 = vmatmul.mubr.msk.bf16.gmra.mxu0 %vm202_vm0, %v159_v51 }
  0x73   :  { %471 = vmatprep.mubr.bf16.mxu0 %v6633_v1 }
  0x7a   :  { %6256 = vmatmul.mubr.msk.bf16.gmra.mxu0 %vm202_vm0, %v160_v56 }
  0x7b   :  { %481 = vmatprep.mubr.bf16.mxu0 %v6633_v1 }
  0x82   :  { %6257 = vmatmul.mubr.msk.bf16.gmra.mxu0 %vm202_vm0, %v161_v61  ;;  %v752_v61 = vld [vmem:[%s12723_s3 + $0x320] sm:$0xff] }
  0x83   :  { %491 = vmatprep.mubr.bf16.mxu0 %v6633_v1 }
  0x8a   :  { %6258 = vmatmul.mubr.msk.bf16.gmra.mxu0 %vm202_vm0, %v162_v3 }
  0x8b   :  { %501 = vmatprep.mubr.bf16.mxu0 %v6633_v1 }
  0x92   :  { %6259 = vmatmul.mubr.msk.bf16.gmra.mxu0 %vm202_vm0, %v163_v8 }
  0x93   :  { %511 = vmatprep.mubr.bf16.mxu0 %v6633_v1 }
  0x9a   :  { %6260 = vmatmul.mubr.msk.bf16.gmra.mxu0 %vm202_vm0, %v164_v13 }
  0x9b   :  { %521 = vmatprep.mubr.bf16.mxu0 %v6633_v1 }
  0xa2   :  { %6261 = vmatmul.mubr.msk.bf16.gmra.mxu0 %vm202_vm0, %v165_v18  ;;  %v755_v18 = vld [vmem:[%s12723_s3 + $0x338] sm:$0xff] }
  0xa3   :  { %531 = vmatprep.mubr.bf16.mxu0 %v6633_v1 }
  0xaa   :  { %6262 = vmatmul.mubr.msk.bf16.gmra.mxu0 %vm202_vm0, %v166_v23  ;;  %v660_v23 = vld [vmem:[%s12723_s3 + $0x40] sm:$0xff] }
  0xab   :  { %541 = vmatprep.mubr.bf16.mxu0 %v6633_v1 }
  0xb2   :  { %6263 = vmatmul.mubr.msk.bf16.gmra.mxu0 %vm202_vm0, %v167_v28 }
  0xb3   :  { %551 = vmatprep.mubr.bf16.mxu0 %v6633_v1 }
  0xba   :  { %6264 = vmatmul.mubr.msk.bf16.gmra.mxu0 %vm202_vm0, %v168_v33 }
  0xbb   :  { %561 = vmatprep.mubr.bf16.mxu0 %v6633_v1  ;;  %v749_v1 = vld [vmem:[%s12723_s3 + $0x308] sm:$0xff] }
  0xc2   :  { %6265 = vmatmul.mubr.msk.bf16.gmra.mxu0 %vm202_vm0, %v169_v38  ;;  %v758_v38 = vld [vmem:[%s12723_s3 + $0x350] sm:$0xff] }
  0xca   :  { %v333_v41 = vpop.f32.mrf.mxu0  ;;  %v573_v42 = vpop.f32.mrf.mxu1 }
  0xcb   :  { %v6946_v44 = vmul.f32 %v652_v39, %v333_v41  ;;  %v6948_v45 = vmul.f32 %v748_v40, %v573_v42 }
  0xcc   :  { %v335_v46 = vpop.f32.mrf.mxu0  ;;  %v575_v47 = vpop.f32.mrf.mxu1 }
  0xcd   :  { %908 = vst [vmem:[#allocation2] sm:$0xff] %v6946_v44  ;;  %1005 = vst [vmem:[#allocation2 + $0x300] sm:$0xff] %v6948_v45  ;;  %v781_v50 = vmul.f32 %v653_v43, %v335_v46  ;;  %v877_v51 = vmul.f32 %v749_v1, %v575_v47  ;;  %1616 = vrot.lane.b32.xlu0 %v6946_v44, %s6634_s28  ;;  %v1101_v32 = vrot.slane %v6946_v44, 7  ;;  %v12726_v40 = vrot.slane %v6948_v45, 7  ;;  %v663_v47 = vld [vmem:[%s12723_s3 + $0x58] sm:$0xff] }
  0xce   :  { %v337_v52 = vpop.f32.mrf.mxu0  ;;  %v577_v53 = vpop.f32.mrf.mxu1 }
  0xcf   :  { %910 = vst.msk [vmem:[#allocation2 + $0x8] sm:$0xff] %vm909_vm1, %v781_v50  ;;  %1006 = vst.msk [vmem:[#allocation2 + $0x308] sm:$0xff] %vm909_vm1, %v877_v51  ;;  %v6968_v56 = vmul.f32 %v654_v48, %v337_v52  ;;  %v6970_v57 = vmul.f32 %v750_v49, %v577_v53  ;;  %v759_v48 = vld [vmem:[%s12723_s3 + $0x358] sm:$0xff]  ;;  %v664_v53 = vld [vmem:[%s12723_s3 + $0x60] sm:$0xff] }
  0xd0   :  { %v339_v58 = vpop.f32.mrf.mxu0  ;;  %v579_v59 = vpop.f32.mrf.mxu1 }
  0xd1   :  { %911 = vst [vmem:[#allocation2 + $0x10] sm:$0xff] %v6968_v56  ;;  %1007 = vst [vmem:[#allocation2 + $0x310] sm:$0xff] %v6970_v57  ;;  %v783_v62 = vmul.f32 %v655_v54, %v339_v58  ;;  %v879_v63 = vmul.f32 %v751_v55, %v579_v59  ;;  %1712 = vrot.lane.b32.xlu0 %v6948_v45, %s6634_s28  ;;  %1618 = vrot.lane.b32.xlu1 %v6968_v56, %s6634_s28  ;;  %v1102_v25 = vrot.slane %v6968_v56, 7  ;;  %v760_v54 = vld [vmem:[%s12723_s3 + $0x360] sm:$0xff] }
  0xd2   :  { %v343_v2 = vpop.f32.mrf.mxu0  ;;  %v583_v3 = vpop.f32.mrf.mxu1  ;;  %v1150_v41 = vrot.slane %v6970_v57, 7 }
  0xd3   :  { %912 = vst.msk [vmem:[#allocation2 + $0x18] sm:$0xff] %vm909_vm1, %v783_v62  ;;  %1008 = vst.msk [vmem:[#allocation2 + $0x318] sm:$0xff] %vm909_vm1, %v879_v63  ;;  %v6992_v6 = vmul.f32 %v656_v60, %v343_v2  ;;  %v6994_v7 = vmul.f32 %v752_v61, %v583_v3  ;;  %v1230_v39 = vsel %vm1167_vm2, %v1101_v32, %v1102_v25  ;;  %v665_v62 = vld [vmem:[%s12723_s3 + $0x68] sm:$0xff] }
  0xd4   :  { %v345_v8 = vpop.f32.mrf.mxu0  ;;  %v585_v9 = vpop.f32.mrf.mxu1  ;;  %v1182_v55 = vsel %vm1167_vm2, %v12726_v40, %v1150_v41  ;;  %v761_v63 = vld [vmem:[%s12723_s3 + $0x368] sm:$0xff] }
  0xd5   :  { %913 = vst [vmem:[#allocation2 + $0x20] sm:$0xff] %v6992_v6  ;;  %1009 = vst [vmem:[#allocation2 + $0x320] sm:$0xff] %v6994_v7  ;;  %v785_v12 = vmul.f32 %v657_v4, %v345_v8  ;;  %v881_v13 = vmul.f32 %v753_v5, %v585_v9  ;;  %2000 = vrot.lane.b32.xlu0 %v6946_v44, %s6635_s18  ;;  %1714 = vrot.lane.b32.xlu1 %v6970_v57, %s6634_s28  ;;  %v1103_v57 = vrot.slane %v6992_v6, 7  ;;  %v666_v5 = vld [vmem:[%s12723_s3 + $0x70] sm:$0xff] }
  0xd6   :  { %v347_v15 = vpop.f32.mrf.mxu0  ;;  %v587_v16 = vpop.f32.mrf.mxu1  ;;  %v762_v8 = vld [vmem:[%s12723_s3 + $0x370] sm:$0xff] }
  0xd7   :  { %914 = vst.msk [vmem:[#allocation2 + $0x28] sm:$0xff] %vm909_vm1, %v785_v12  ;;  %1010 = vst.msk [vmem:[#allocation2 + $0x328] sm:$0xff] %vm909_vm1, %v881_v13  ;;  %v7018_v19 = vmul.f32 %v658_v10, %v347_v15  ;;  %v7020_v20 = vmul.f32 %v754_v11, %v587_v16  ;;  %v1229_v9 = vsel %vm1167_vm2, %v1102_v25, %v1103_v57  ;;  %v1151_v10 = vrot.slane %v6994_v7, 7  ;;  %v763_v16 = vld [vmem:[%s12723_s3 + $0x378] sm:$0xff] }
  0xd8   :  { %v349_v21 = vpop.f32.mrf.mxu0  ;;  %v589_v22 = vpop.f32.mrf.mxu1 }
  0xd9   :  { %915 = vst [vmem:[#allocation2 + $0x30] sm:$0xff] %v7018_v19  ;;  %1011 = vst [vmem:[#allocation2 + $0x330] sm:$0xff] %v7020_v20  ;;  %v787_v26 = vmul.f32 %v659_v17, %v349_v21  ;;  %v883_v27 = vmul.f32 %v755_v18, %v589_v22  ;;  %2002 = vrot.lane.b32.xlu1 %v6968_v56, %s6635_s18  ;;  %1620 = vrot.lane.b32.xlu0 %v6992_v6, %s6634_s28  ;;  %v667_v56 = vld [vmem:[%s12723_s3 + $0x78] sm:$0xff] }
  0xda   :  { %v353_v28 = vpop.f32.mrf.mxu0  ;;  %v593_v29 = vpop.f32.mrf.mxu1  ;;  %v1181_v25 = vsel %vm1167_vm2, %v1150_v41, %v1151_v10  ;;  %v766_v41 = vld [vmem:[%s12723_s3 + $0x390] sm:$0xff] }
  0xdb   :  { %916 = vst.msk [vmem:[#allocation2 + $0x38] sm:$0xff] %vm909_vm1, %v787_v26  ;;  %1012 = vst.msk [vmem:[#allocation2 + $0x338] sm:$0xff] %vm909_vm1, %v883_v27  ;;  %v7045_v33 = vmul.f32 %v660_v23, %v353_v28  ;;  %v7047_v34 = vmul.f32 %v756_v24, %v593_v29  ;;  %v668_v23 = vld [vmem:[%s12723_s3 + $0x80] sm:$0xff] }
  0xdc   :  { %v355_v35 = vpop.f32.mrf.mxu0  ;;  %v595_v36 = vpop.f32.mrf.mxu1  ;;  %v764_v24 = vld [vmem:[%s12723_s3 + $0x380] sm:$0xff] }
  0xdd   :  { %917 = vst [vmem:[#allocation2 + $0x40] sm:$0xff] %v7045_v33  ;;  %1013 = vst [vmem:[#allocation2 + $0x340] sm:$0xff] %v7047_v34  ;;  %v789_v42 = vmul.f32 %v661_v30, %v355_v35  ;;  %v885_v43 = vmul.f32 %v757_v31, %v595_v36  ;;  %1302 = vrot.lane.b32.xlu1 %v1230_v39, %s6636_s9  ;;  %1716 = vrot.lane.b32.xlu0 %v6994_v7, %s6634_s28  ;;  %v669_v30 = vld [vmem:[%s12723_s3 + $0x88] sm:$0xff]  ;;  %v670_v39 = vld [vmem:[%s12723_s3 + $0x90] sm:$0xff] }
  0xde   :  { %v357_v1 = vpop.f32.mrf.mxu0  ;;  %v597_v46 = vpop.f32.mrf.mxu1  ;;  %v765_v31 = vld [vmem:[%s12723_s3 + $0x388] sm:$0xff]  ;;  %v675_v7 = vld [vmem:[%s12723_s3 + $0xb8] sm:$0xff] }
  0xdf   :  { %918 = vst.msk [vmem:[#allocation2 + $0x48] sm:$0xff] %vm909_vm1, %v789_v42  ;;  %1014 = vst.msk [vmem:[#allocation2 + $0x348] sm:$0xff] %vm909_vm1, %v885_v43  ;;  %v7076_v49 = vmul.f32 %v662_v37, %v357_v1  ;;  %v7078_v50 = vmul.f32 %v758_v38, %v597_v46  ;;  %v1104_v42 = vrot.slane %v7018_v19, 7 }
  0xe0   :  { %v359_v51 = vpop.f32.mrf.mxu0  ;;  %v599_v52 = vpop.f32.mrf.mxu1 }
  0xe1   :  { %919 = vst [vmem:[#allocation2 + $0x50] sm:$0xff] %v7076_v49  ;;  %1015 = vst [vmem:[#allocation2 + $0x350] sm:$0xff] %v7078_v50  ;;  %v791_v58 = vmul.f32 %v663_v47, %v359_v51  ;;  %v887_v59 = vmul.f32 %v759_v48, %v599_v52  ;;  %1398 = vrot.lane.b32.xlu1 %v1182_v55, %s6636_s9  ;;  %2004 = vrot.lane.b32.xlu0 %v6992_v6, %s6635_s18  ;;  %v671_v48 = vld [vmem:[%s12723_s3 + $0x98] sm:$0xff]  ;;  %v672_v55 = vld [vmem:[%s12723_s3 + $0xa0] sm:$0xff] }
  0xe2   :  { %v363_v60 = vpop.f32.mrf.mxu0  ;;  %v603_v61 = vpop.f32.mrf.mxu1  ;;  %v767_v51 = vld [vmem:[%s12723_s3 + $0x398] sm:$0xff]  ;;  %v673_v6 = vld [vmem:[%s12723_s3 + $0xa8] sm:$0xff] }
  0xe3   :  { %920 = vst.msk [vmem:[#allocation2 + $0x58] sm:$0xff] %vm909_vm1, %v791_v58  ;;  %1016 = vst.msk [vmem:[#allocation2 + $0x358] sm:$0xff] %vm909_vm1, %v887_v59  ;;  %v7104_v0 = vmul.f32 %v664_v53, %v363_v60  ;;  %v7106_v2 = vmul.f32 %v760_v54, %v603_v61  ;;  %v768_v58 = vld [vmem:[%s12723_s3 + $0x3a0] sm:$0xff]  ;;  %v1228_v59 = vsel %vm1167_vm2, %v1103_v57, %v1104_v42  ;;  %v1152_v60 = vrot.slane %v7020_v20, 7 }
  0xe4   :  { %v365_v3 = vpop.f32.mrf.mxu0  ;;  %v605_v4 = vpop.f32.mrf.mxu1 }
  0xe5   :  { %921 = vst [vmem:[#allocation2 + $0x60] sm:$0xff] %v7104_v0  ;;  %1017 = vst [vmem:[#allocation2 + $0x360] sm:$0xff] %v7106_v2  ;;  %v793_v11 = vmul.f32 %v665_v62, %v365_v3  ;;  %v889_v12 = vmul.f32 %v761_v63, %v605_v4  ;;  %1304 = vrot.lane.b32.xlu0 %v1229_v9, %s6636_s9  ;;  %1622 = vrot.lane.b32.xlu1 %v7018_v19, %s6634_s28  ;;  %v674_v9 = vld [vmem:[%s12723_s3 + $0xb0] sm:$0xff] }
  0xe6   :  { %v367_v13 = vpop.f32.mrf.mxu0  ;;  %v607_v15 = vpop.f32.mrf.mxu1 }
  0xe7   :  { %922 = vst.msk [vmem:[#allocation2 + $0x68] sm:$0xff] %vm909_vm1, %v793_v11  ;;  %1018 = vst.msk [vmem:[#allocation2 + $0x368] sm:$0xff] %vm909_vm1, %v889_v12  ;;  %v7134_v17 = vmul.f32 %v666_v5, %v367_v13  ;;  %v7136_v18 = vmul.f32 %v762_v8, %v607_v15  ;;  %v770_v11 = vld [vmem:[%s12723_s3 + $0x3b0] sm:$0xff]  ;;  %v1180_v12 = vsel %vm1167_vm2, %v1151_v10, %v1152_v60  ;;  %v1105_v13 = vrot.slane %v7045_v33, 7  ;;  %v771_v10 = vld [vmem:[%s12723_s3 + $0x3b8] sm:$0xff] }
  0xe8   :  { %v369_v21 = vpop.f32.mrf.mxu0  ;;  %v609_v22 = vpop.f32.mrf.mxu1 }
  0xe9   :  { %923 = vst [vmem:[#allocation2 + $0x70] sm:$0xff] %v7134_v17  ;;  %1019 = vst [vmem:[#allocation2 + $0x370] sm:$0xff] %v7136_v18  ;;  %v795_v26 = vmul.f32 %v667_v56, %v369_v21  ;;  %v891_v27 = vmul.f32 %v763_v16, %v609_v22  ;;  %1400 = vrot.lane.b32.xlu0 %v1181_v25, %s6636_s9  ;;  %1718 = vrot.lane.b32.xlu1 %v7020_v20, %s6634_s28  ;;  %v769_v20 = vld [vmem:[%s12723_s3 + $0x3a8] sm:$0xff] }
  0xea   :  { %v373_v28 = vpop.f32.mrf.mxu0  ;;  %v613_v29 = vpop.f32.mrf.mxu1 }
  0xeb   :  { %924 = vst.msk [vmem:[#allocation2 + $0x78] sm:$0xff] %vm909_vm1, %v795_v26  ;;  %1020 = vst.msk [vmem:[#allocation2 + $0x378] sm:$0xff] %vm909_vm1, %v891_v27  ;;  %v7161_v35 = vmul.f32 %v668_v23, %v373_v28  ;;  %v7163_v36 = vmul.f32 %v764_v24, %v613_v29  ;;  %v676_v26 = vld [vmem:[%s12723_s3 + $0xc0] sm:$0xff]  ;;  %v1227_v28 = vsel %vm1167_vm2, %v1104_v42, %v1105_v13  ;;  %v1153_v29 = vrot.slane %v7047_v34, 7 }
  0xec   :  { %v375_v37 = vpop.f32.mrf.mxu0  ;;  %v615_v38 = vpop.f32.mrf.mxu1  ;;  %v772_v27 = vld [vmem:[%s12723_s3 + $0x3c0] sm:$0xff] }
  0xed   :  { %925 = vst [vmem:[#allocation2 + $0x80] sm:$0xff] %v7161_v35  ;;  %1021 = vst [vmem:[#allocation2 + $0x380] sm:$0xff] %v7163_v36  ;;  %v797_v43 = vmul.f32 %v669_v30, %v375_v37  ;;  %v893_v1 = vmul.f32 %v765_v31, %v615_v38  ;;  %2006 = vrot.lane.b32.xlu1 %v7018_v19, %s6635_s18  ;;  %1624 = vrot.lane.b32.xlu0 %v7045_v33, %s6634_s28 }
  0xee   :  { %v377_v46 = vpop.f32.mrf.mxu0  ;;  %v617_v47 = vpop.f32.mrf.mxu1 }
  0xef   :  { %926 = vst.msk [vmem:[#allocation2 + $0x88] sm:$0xff] %vm909_vm1, %v797_v43  ;;  %1022 = vst.msk [vmem:[#allocation2 + $0x388] sm:$0xff] %vm909_vm1, %v893_v1  ;;  %v7186_v52 = vmul.f32 %v670_v39, %v377_v46  ;;  %v7188_v19 = vmul.f32 %v766_v41, %v617_v47  ;;  %v677_v39 = vld [vmem:[%s12723_s3 + $0xc8] sm:$0xff]  ;;  %v678_v47 = vld [vmem:[%s12723_s3 + $0xd0] sm:$0xff] }
  0xf0   :  { %v379_v53 = vpop.f32.mrf.mxu0  ;;  %v619_v54 = vpop.f32.mrf.mxu1  ;;  %v773_v41 = vld [vmem:[%s12723_s3 + $0x3c8] sm:$0xff] }
  0xf1   :  { %927 = vst [vmem:[#allocation2 + $0x90] sm:$0xff] %v7186_v52  ;;  %1023 = vst [vmem:[#allocation2 + $0x390] sm:$0xff] %v7188_v19  ;;  %v799_v61 = vmul.f32 %v671_v48, %v379_v53  ;;  %v895_v62 = vmul.f32 %v767_v51, %v619_v54  ;;  %1306 = vrot.lane.b32.xlu1 %v1228_v59, %s6636_s9  ;;  %1720 = vrot.lane.b32.xlu0 %v7047_v34, %s6634_s28  ;;  %v774_v48 = vld [vmem:[%s12723_s3 + $0x3d0] sm:$0xff]  ;;  %v679_v59 = vld [vmem:[%s12723_s3 + $0xd8] sm:$0xff] }
  0xf2   :  { %v383_v63 = vpop.f32.mrf.mxu0  ;;  %v623_v3 = vpop.f32.mrf.mxu1  ;;  %v1179_v51 = vsel %vm1167_vm2, %v1152_v60, %v1153_v29  ;;  %v775_v60 = vld [vmem:[%s12723_s3 + $0x3d8] sm:$0xff]  ;;  %v685_v34 = vld [vmem:[%s12723_s3 + $0x108] sm:$0xff] }
  0xf3   :  { %928 = vst.msk [vmem:[#allocation2 + $0x98] sm:$0xff] %vm909_vm1, %v799_v61  ;;  %1024 = vst.msk [vmem:[#allocation2 + $0x398] sm:$0xff] %vm909_vm1, %v895_v62  ;;  %v7214_v57 = vmul.f32 %v672_v55, %v383_v63  ;;  %v7216_v4 = vmul.f32 %v768_v58, %v623_v3 }
  0xf4   :  { %v385_v5 = vpop.f32.mrf.mxu0  ;;  %v625_v8 = vpop.f32.mrf.mxu1 }
  0xf5   :  { %929 = vst [vmem:[#allocation2 + $0xa0] sm:$0xff] %v7214_v57  ;;  %1025 = vst [vmem:[#allocation2 + $0x3a0] sm:$0xff] %v7216_v4  ;;  %v801_v15 = vmul.f32 %v673_v6, %v385_v5  ;;  %v897_v56 = vmul.f32 %v769_v20, %v625_v8  ;;  %1402 = vrot.lane.b32.xlu1 %v1180_v12, %s6636_s9  ;;  %2008 = vrot.lane.b32.xlu0 %v7045_v33, %s6635_s18  ;;  %v680_v6 = vld [vmem:[%s12723_s3 + $0xe0] sm:$0xff]  ;;  %v1106_v5 = vrot.slane %v7076_v49, 7  ;;  %v683_v33 = vld [vmem:[%s12723_s3 + $0xf8] sm:$0xff] }
  0xf6   :  { %v387_v16 = vpop.f32.mrf.mxu0  ;;  %v627_v21 = vpop.f32.mrf.mxu1  ;;  %v776_v20 = vld [vmem:[%s12723_s3 + $0x3e0] sm:$0xff] }
  0xf7   :  { %930 = vst.msk [vmem:[#allocation2 + $0xa8] sm:$0xff] %vm909_vm1, %v801_v15  ;;  %1026 = vst.msk [vmem:[#allocation2 + $0x3a8] sm:$0xff] %vm909_vm1, %v897_v56  ;;  %v7242_v22 = vmul.f32 %v674_v9, %v387_v16  ;;  %v7244_v23 = vmul.f32 %v770_v11, %v627_v21  ;;  %v681_v15 = vld [vmem:[%s12723_s3 + $0xe8] sm:$0xff] }
  0xf8   :  { %v389_v24 = vpop.f32.mrf.mxu0  ;;  %v629_v25 = vpop.f32.mrf.mxu1  ;;  %v777_v56 = vld [vmem:[%s12723_s3 + $0x3e8] sm:$0xff] }
  0xf9   :  { %931 = vst [vmem:[#allocation2 + $0xb0] sm:$0xff] %v7242_v22  ;;  %1027 = vst [vmem:[#allocation2 + $0x3b0] sm:$0xff] %v7244_v23  ;;  %v803_v30 = vmul.f32 %v675_v7, %v389_v24  ;;  %v899_v31 = vmul.f32 %v771_v10, %v629_v25  ;;  %1308 = vrot.lane.b32.xlu0 %v1227_v28, %s6636_s9  ;;  %1626 = vrot.lane.b32.xlu1 %v7076_v49, %s6634_s28  ;;  %v682_v10 = vld [vmem:[%s12723_s3 + $0xf0] sm:$0xff] }
  0xfa   :  { %v393_v37 = vpop.f32.mrf.mxu0  ;;  %v633_v38 = vpop.f32.mrf.mxu1  ;;  %v778_v24 = vld [vmem:[%s12723_s3 + $0x3f0] sm:$0xff]  ;;  %v1226_v25 = vsel %vm1167_vm2, %v1105_v13, %v1106_v5 }
  0xfb   :  { %932 = vst.msk [vmem:[#allocation2 + $0xb8] sm:$0xff] %vm909_vm1, %v803_v30  ;;  %1028 = vst.msk [vmem:[#allocation2 + $0x3b8] sm:$0xff] %vm909_vm1, %v899_v31  ;;  %v7270_v42 = vmul.f32 %v676_v26, %v393_v37  ;;  %v7272_v43 = vmul.f32 %v772_v27, %v633_v38  ;;  %v1154_v26 = vrot.slane %v7078_v50, 7 }
  0xfc   :  { %v395_v1 = vpop.f32.mrf.mxu0  ;;  %v635_v46 = vpop.f32.mrf.mxu1 }
  0xfd   :  { %933 = vst [vmem:[#allocation2 + $0xc0] sm:$0xff] %v7270_v42  ;;  %1029 = vst [vmem:[#allocation2 + $0x3c0] sm:$0xff] %v7272_v43  ;;  %v805_v53 = vmul.f32 %v677_v39, %v395_v1  ;;  %v901_v54 = vmul.f32 %v773_v41, %v635_v46  ;;  %1404 = vrot.lane.b32.xlu0 %v1179_v51, %s6636_s9  ;;  %1722 = vrot.lane.b32.xlu1 %v7078_v50, %s6634_s28  ;;  %v779_v50 = vld [vmem:[%s12723_s3 + $0x3f8] sm:$0xff]  ;;  %v684_v41 = vld [vmem:[%s12723_s3 + $0x100] sm:$0xff]  ;;  %v1107_v46 = vrot.slane %v7104_v0, 7 }
  0xfe   :  { %v397_v55 = vpop.f32.mrf.mxu0  ;;  %v637_v58 = vpop.f32.mrf.mxu1  ;;  %v1178_v1 = vsel %vm1167_vm2, %v1153_v29, %v1154_v26 }
  0xff   :  { %934 = vst.msk [vmem:[#allocation2 + $0xc8] sm:$0xff] %vm909_vm1, %v805_v53  ;;  %1030 = vst.msk [vmem:[#allocation2 + $0x3c8] sm:$0xff] %vm909_vm1, %v901_v54  ;;  %v7297_v61 = vmul.f32 %v678_v47, %v397_v55  ;;  %v7299_v62 = vmul.f32 %v774_v48, %v637_v58  ;;  %v686_v54 = vld [vmem:[%s12723_s3 + $0x110] sm:$0xff]  ;;  %v1225_v55 = vsel %vm1167_vm2, %v1106_v5, %v1107_v46 }
 0x100   :  { %v399_v63 = vpop.f32.mrf.mxu0  ;;  %v639_v3 = vpop.f32.mrf.mxu1 }
 0x101   :  { %935 = vst [vmem:[#allocation2 + $0xd0] sm:$0xff] %v7297_v61  ;;  %1031 = vst [vmem:[#allocation2 + $0x3d0] sm:$0xff] %v7299_v62  ;;  %v807_v8 = vmul.f32 %v679_v59, %v399_v63  ;;  %v903_v9 = vmul.f32 %v775_v60, %v639_v3  ;;  %2010 = vrot.lane.b32.xlu1 %v7076_v49, %s6635_s18  ;;  %1628 = vrot.lane.b32.xlu0 %v7104_v0, %s6634_s28  ;;  %v687_v60 = vld [vmem:[%s12723_s3 + $0x118] sm:$0xff] }
 0x102   :  { %v403_v11 = vpop.f32.mrf.mxu0  ;;  %v643_v12 = vpop.f32.mrf.mxu1 }
 0x103   :  { %936 = vst.msk [vmem:[#allocation2 + $0xd8] sm:$0xff] %vm909_vm1, %v807_v8  ;;  %1032 = vst.msk [vmem:[#allocation2 + $0x3d8] sm:$0xff] %vm909_vm1, %v903_v9  ;;  %v7322_v16 = vmul.f32 %v680_v6, %v403_v11  ;;  %v7324_v49 = vmul.f32 %v776_v20, %v643_v12  ;;  %v689_v8 = vld [vmem:[%s12723_s3 + $0x128] sm:$0xff]  ;;  %v690_v12 = vld [vmem:[%s12723_s3 + $0x130] sm:$0xff] }
 0x104   :  { %v405_v21 = vpop.f32.mrf.mxu0  ;;  %v645_v7 = vpop.f32.mrf.mxu1 }
 0x105   :  { %937 = vst [vmem:[#allocation2 + $0xe0] sm:$0xff] %v7322_v16  ;;  %1033 = vst [vmem:[#allocation2 + $0x3e0] sm:$0xff] %v7324_v49  ;;  %v809_v27 = vmul.f32 %v681_v15, %v405_v21  ;;  %v905_v28 = vmul.f32 %v777_v56, %v645_v7  ;;  %1310 = vrot.lane.b32.xlu1 %v1226_v25, %s6636_s9  ;;  %1724 = vrot.lane.b32.xlu0 %v7106_v2, %s6634_s28  ;;  %v1108_v15 = vrot.slane %v7134_v17, 7  ;;  %v691_v7 = vld [vmem:[%s12723_s3 + $0x138] sm:$0xff]  ;;  %v692_v25 = vld [vmem:[%s12723_s3 + $0x140] sm:$0xff] }
 0x106   :  { %v407_v30 = vpop.f32.mrf.mxu0  ;;  %v647_v31 = vpop.f32.mrf.mxu1 }
 0x107   :  { %938 = vst.msk [vmem:[#allocation2 + $0xe8] sm:$0xff] %vm909_vm1, %v809_v27  ;;  %1034 = vst.msk [vmem:[#allocation2 + $0x3e8] sm:$0xff] %vm909_vm1, %v905_v28  ;;  %v7350_v13 = vmul.f32 %v682_v10, %v407_v30  ;;  %v7352_v37 = vmul.f32 %v778_v24, %v647_v31  ;;  %v693_v30 = vld [vmem:[%s12723_s3 + $0x148] sm:$0xff] }
 0x108   :  { %v409_v38 = vpop.f32.mrf.mxu0  ;;  %v649_v39 = vpop.f32.mrf.mxu1 }
 0x109   :  { %939 = vst [vmem:[#allocation2 + $0xf0] sm:$0xff] %v7350_v13  ;;  %1035 = vst [vmem:[#allocation2 + $0x3f0] sm:$0xff] %v7352_v37  ;;  %v811_v47 = vmul.f32 %v683_v33, %v409_v38  ;;  %v907_v48 = vmul.f32 %v779_v50, %v649_v39  ;;  %1406 = vrot.lane.b32.xlu1 %v1178_v1, %s6636_s9  ;;  %2012 = vrot.lane.b32.xlu0 %v7104_v0, %s6635_s18  ;;  %v1155_v0 = vrot.slane %v7106_v2, 7  ;;  %v688_v2 = vld [vmem:[%s12723_s3 + $0x120] sm:$0xff]  ;;  %v695_v1 = vld [vmem:[%s12723_s3 + $0x158] sm:$0xff] }
 0x10a   :  { %v413_v51 = vpop.f32.mrf.mxu0  ;;  %v1109_v38 = vrot.slane %v7161_v35, 7 }
 0x10b   :  { %940 = vst.msk [vmem:[#allocation2 + $0xf8] sm:$0xff] %vm909_vm1, %v811_v47  ;;  %1036 = vst.msk [vmem:[#allocation2 + $0x3f8] sm:$0xff] %vm909_vm1, %v907_v48  ;;  %v7372_v29 = vmul.f32 %v684_v41, %v413_v51  ;;  %v1177_v6 = vsel %vm1167_vm2, %v1154_v26, %v1155_v0  ;;  %v1156_v26 = vrot.slane %v7136_v18, 7  ;;  %v696_v48 = vld [vmem:[%s12723_s3 + $0x160] sm:$0xff] }
 0x10c   :  { %v415_v53 = vpop.f32.mrf.mxu0  ;;  %v1223_v51 = vsel %vm1167_vm2, %v1108_v15, %v1109_v38 }
 0x10d   :  { %941 = vst [vmem:[#allocation2 + $0x100] sm:$0xff] %v7372_v29  ;;  %v813_v58 = vmul.f32 %v685_v34, %v415_v53  ;;  %1312 = vrot.lane.b32.xlu0 %v1225_v55, %s6636_s9  ;;  %1630 = vrot.lane.b32.xlu1 %v7134_v17, %s6634_s28  ;;  %v1176_v50 = vsel %vm1167_vm2, %v1155_v0, %v1156_v26  ;;  %v1157_v34 = vrot.slane %v7163_v36, 7 }
 0x10e   :  { %v417_v59 = vpop.f32.mrf.mxu0 }
 0x10f   :  { %942 = vst.msk [vmem:[#allocation2 + $0x108] sm:$0xff] %vm909_vm1, %v813_v58  ;;  %v7388_v63 = vmul.f32 %v686_v54, %v417_v59  ;;  %v697_v54 = vld [vmem:[%s12723_s3 + $0x168] sm:$0xff]  ;;  %v1175_v58 = vsel %vm1167_vm2, %v1156_v26, %v1157_v34 }
 0x110   :  { %v419_v3 = vpop.f32.mrf.mxu0 }
 0x111   :  { %943 = vst [vmem:[#allocation2 + $0x110] sm:$0xff] %v7388_v63  ;;  %v815_v20 = vmul.f32 %v687_v60, %v419_v3  ;;  %1408 = vrot.lane.b32.xlu0 %v1177_v6, %s6636_s9  ;;  %1726 = vrot.lane.b32.xlu1 %v7136_v18, %s6634_s28  ;;  %v694_v18 = vld [vmem:[%s12723_s3 + $0x150] sm:$0xff]  ;;  %v699_v3 = vld [vmem:[%s12723_s3 + $0x178] sm:$0xff] }
 0x112   :  { %v423_v5 = vpop.f32.mrf.mxu0 }
 0x113   :  { %944 = vst.msk [vmem:[#allocation2 + $0x118] sm:$0xff] %vm909_vm1, %v815_v20  ;;  %v7403_v9 = vmul.f32 %v688_v2, %v423_v5  ;;  %v700_v20 = vld [vmem:[%s12723_s3 + $0x180] sm:$0xff]  ;;  %v1110_v5 = vrot.slane %v7186_v52, 7 }
 0x114   :  { %v425_v11 = vpop.f32.mrf.mxu0 }
 0x115   :  { %945 = vst [vmem:[#allocation2 + $0x120] sm:$0xff] %v7403_v9  ;;  %v817_v56 = vmul.f32 %v689_v8, %v425_v11  ;;  %2014 = vrot.lane.b32.xlu1 %v7134_v17, %s6635_s18  ;;  %1632 = vrot.lane.b32.xlu0 %v7161_v35, %s6634_s28  ;;  %v1224_v17 = vsel %vm1167_vm2, %v1107_v46, %v1108_v15 }
 0x116   :  { %v427_v21 = vpop.f32.mrf.mxu0 }
 0x117   :  { %946 = vst.msk [vmem:[#allocation2 + $0x128] sm:$0xff] %vm909_vm1, %v817_v56  ;;  %v7418_v10 = vmul.f32 %v690_v12, %v427_v21  ;;  %v701_v12 = vld [vmem:[%s12723_s3 + $0x188] sm:$0xff]  ;;  %v702_v21 = vld [vmem:[%s12723_s3 + $0x190] sm:$0xff] }
 0x118   :  { %v429_v24 = vpop.f32.mrf.mxu0 }
 0x119   :  { %947 = vst [vmem:[#allocation2 + $0x130] sm:$0xff] %v7418_v10  ;;  %v819_v27 = vmul.f32 %v691_v7, %v429_v24  ;;  %1314 = vrot.lane.b32.xlu1 %v1224_v17, %s6636_s9  ;;  %1728 = vrot.lane.b32.xlu0 %v7163_v36, %s6634_s28  ;;  %v698_v36 = vld [vmem:[%s12723_s3 + $0x170] sm:$0xff]  ;;  %v1158_v7 = vrot.slane %v7188_v19, 7  ;;  %v703_v17 = vld [vmem:[%s12723_s3 + $0x198] sm:$0xff] }
 0x11a   :  { %v433_v28 = vpop.f32.mrf.mxu0 }
 0x11b   :  { %948 = vst.msk [vmem:[#allocation2 + $0x138] sm:$0xff] %vm909_vm1, %v819_v27  ;;  %v7434_v31 = vmul.f32 %v692_v25, %v433_v28  ;;  %v1174_v28 = vsel %vm1167_vm2, %v1157_v34, %v1158_v7 }
 0x11c   :  { %v435_v33 = vpop.f32.mrf.mxu0 }
 0x11d   :  { %949 = vst [vmem:[#allocation2 + $0x140] sm:$0xff] %v7434_v31  ;;  %v821_v39 = vmul.f32 %v693_v30, %v435_v33  ;;  %1410 = vrot.lane.b32.xlu1 %v1176_v50, %s6636_s9  ;;  %2016 = vrot.lane.b32.xlu0 %v7161_v35, %s6635_s18  ;;  %v1111_v30 = vrot.slane %v7214_v57, 7  ;;  %v705_v50 = vld [vmem:[%s12723_s3 + $0x1a8] sm:$0xff] }
 0x11e   :  { %v437_v41 = vpop.f32.mrf.mxu0 }
 0x11f   :  { %950 = vst.msk [vmem:[#allocation2 + $0x148] sm:$0xff] %vm909_vm1, %v821_v39  ;;  %v7450_v46 = vmul.f32 %v694_v18, %v437_v41  ;;  %v706_v41 = vld [vmem:[%s12723_s3 + $0x1b0] sm:$0xff] }
 0x120   :  { %v439_v47 = vpop.f32.mrf.mxu0 }
 0x121   :  { %951 = vst [vmem:[#allocation2 + $0x150] sm:$0xff] %v7450_v46  ;;  %v823_v35 = vmul.f32 %v695_v1, %v439_v47  ;;  %1316 = vrot.lane.b32.xlu0 %v1223_v51, %s6636_s9  ;;  %1634 = vrot.lane.b32.xlu1 %v7186_v52, %s6634_s28  ;;  %v1221_v1 = vsel %vm1167_vm2, %v1110_v5, %v1111_v30  ;;  %v1159_v47 = vrot.slane %v7216_v4, 7  ;;  %v707_v51 = vld [vmem:[%s12723_s3 + $0x1b8] sm:$0xff] }
 0x122   :  { %v443_v53 = vpop.f32.mrf.mxu0 }
 0x123   :  { %952 = vst.msk [vmem:[#allocation2 + $0x158] sm:$0xff] %vm909_vm1, %v823_v35  ;;  %v7466_v55 = vmul.f32 %v696_v48, %v443_v53  ;;  %v1173_v53 = vsel %vm1167_vm2, %v1158_v7, %v1159_v47 }
 0x124   :  { %v445_v0 = vpop.f32.mrf.mxu0 }
 0x125   :  { %953 = vst [vmem:[#allocation2 + $0x160] sm:$0xff] %v7466_v55  ;;  %v825_v59 = vmul.f32 %v697_v54, %v445_v0  ;;  %1412 = vrot.lane.b32.xlu0 %v1175_v58, %s6636_s9  ;;  %1730 = vrot.lane.b32.xlu1 %v7188_v19, %s6634_s28  ;;  %v704_v19 = vld [vmem:[%s12723_s3 + $0x1a0] sm:$0xff] }
 0x126   :  { %v447_v60 = vpop.f32.mrf.mxu0 }
 0x127   :  { %954 = vst.msk [vmem:[#allocation2 + $0x168] sm:$0xff] %vm909_vm1, %v825_v59  ;;  %v7481_v2 = vmul.f32 %v698_v36, %v447_v60  ;;  %v709_v36 = vld [vmem:[%s12723_s3 + $0x1c8] sm:$0xff]  ;;  %v710_v60 = vld [vmem:[%s12723_s3 + $0x1d0] sm:$0xff] }
 0x128   :  { %v449_v6 = vpop.f32.mrf.mxu0 }
 0x129   :  { %955 = vst [vmem:[#allocation2 + $0x170] sm:$0xff] %v7481_v2  ;;  %v827_v8 = vmul.f32 %v699_v3, %v449_v6  ;;  %2018 = vrot.lane.b32.xlu1 %v7186_v52, %s6635_s18  ;;  %1636 = vrot.lane.b32.xlu0 %v7214_v57, %s6634_s28  ;;  %v1222_v52 = vsel %vm1167_vm2, %v1109_v38, %v1110_v5  ;;  %v1112_v3 = vrot.slane %v7242_v22, 7  ;;  %v711_v5 = vld [vmem:[%s12723_s3 + $0x1d8] sm:$0xff] }
 0x12a   :  { %v453_v11 = vpop.f32.mrf.mxu0 }
 0x12b   :  { %956 = vst.msk [vmem:[#allocation2 + $0x178] sm:$0xff] %vm909_vm1, %v827_v8  ;;  %v7496_v15 = vmul.f32 %v700_v20, %v453_v11 }
 0x12c   :  { %v455_v56 = vpop.f32.mrf.mxu0 }
 0x12d   :  { %957 = vst [vmem:[#allocation2 + $0x180] sm:$0xff] %v7496_v15  ;;  %v829_v24 = vmul.f32 %v701_v12, %v455_v56  ;;  %1318 = vrot.lane.b32.xlu1 %v1222_v52, %s6636_s9  ;;  %1732 = vrot.lane.b32.xlu0 %v7216_v4, %s6634_s28  ;;  %v708_v4 = vld [vmem:[%s12723_s3 + $0x1c0] sm:$0xff] }
 0x12e   :  { %v457_v25 = vpop.f32.mrf.mxu0  ;;  %v712_v56 = vld [vmem:[%s12723_s3 + $0x1e0] sm:$0xff] }
 0x12f   :  { %958 = vst.msk [vmem:[#allocation2 + $0x188] sm:$0xff] %vm909_vm1, %v829_v24  ;;  %v7512_v26 = vmul.f32 %v702_v21, %v457_v25  ;;  %v1160_v21 = vrot.slane %v7244_v23, 7  ;;  %v713_v24 = vld [vmem:[%s12723_s3 + $0x1e8] sm:$0xff] }
 0x130   :  { %v459_v27 = vpop.f32.mrf.mxu0 }
 0x131   :  { %959 = vst [vmem:[#allocation2 + $0x190] sm:$0xff] %v7512_v26  ;;  %v831_v33 = vmul.f32 %v703_v17, %v459_v27  ;;  %1414 = vrot.lane.b32.xlu1 %v1174_v28, %s6636_s9  ;;  %2020 = vrot.lane.b32.xlu0 %v7214_v57, %s6635_s18  ;;  %v1172_v28 = vsel %vm1167_vm2, %v1159_v47, %v1160_v21 }
 0x132   :  { %v463_v18 = vpop.f32.mrf.mxu0 }
 0x133   :  { %960 = vst.msk [vmem:[#allocation2 + $0x198] sm:$0xff] %vm909_vm1, %v831_v33  ;;  %v7528_v38 = vmul.f32 %v704_v19, %v463_v18  ;;  %v714_v19 = vld [vmem:[%s12723_s3 + $0x1f0] sm:$0xff] }
 0x134   :  { %v465_v39 = vpop.f32.mrf.mxu0 }
 0x135   :  { %961 = vst [vmem:[#allocation2 + $0x1a0] sm:$0xff] %v7528_v38  ;;  %v833_v57 = vmul.f32 %v705_v50, %v465_v39  ;;  %1320 = vrot.lane.b32.xlu0 %v1221_v1, %s6636_s9  ;;  %1638 = vrot.lane.b32.xlu1 %v7242_v22, %s6634_s28  ;;  %v715_v50 = vld [vmem:[%s12723_s3 + $0x1f8] sm:$0xff] }
 0x136   :  { %v467_v48 = vpop.f32.mrf.mxu0 }
 0x137   :  { %962 = vst.msk [vmem:[#allocation2 + $0x1a8] sm:$0xff] %vm909_vm1, %v833_v57  ;;  %v7544_v34 = vmul.f32 %v706_v41, %v467_v48  ;;  %v716_v57 = vld [vmem:[%s12723_s3 + $0x200] sm:$0xff]  ;;  %v1161_v48 = vrot.slane %v7272_v43, 7 }
 0x138   :  { %v469_v35 = vpop.f32.mrf.mxu0 }
 0x139   :  { %963 = vst [vmem:[#allocation2 + $0x1b0] sm:$0xff] %v7544_v34  ;;  %v835_v54 = vmul.f32 %v707_v51, %v469_v35  ;;  %1416 = vrot.lane.b32.xlu0 %v1173_v53, %s6636_s9  ;;  %1734 = vrot.lane.b32.xlu1 %v7244_v23, %s6634_s28 }
 0x13a   :  { %v473_v0 = vpop.f32.mrf.mxu0 }
 0x13b   :  { %964 = vst.msk [vmem:[#allocation2 + $0x1b8] sm:$0xff] %vm909_vm1, %v835_v54  ;;  %v7559_v58 = vmul.f32 %v708_v4, %v473_v0  ;;  %v717_v4 = vld [vmem:[%s12723_s3 + $0x208] sm:$0xff] }
 0x13c   :  { %v475_v59 = vpop.f32.mrf.mxu0 }
 0x13d   :  { %965 = vst [vmem:[#allocation2 + $0x1c0] sm:$0xff] %v7559_v58  ;;  %v837_v6 = vmul.f32 %v709_v36, %v475_v59  ;;  %2022 = vrot.lane.b32.xlu1 %v7242_v22, %s6635_s18  ;;  %1640 = vrot.lane.b32.xlu0 %v7270_v42, %s6634_s28  ;;  %v1220_v22 = vsel %vm1167_vm2, %v1111_v30, %v1112_v3  ;;  %v1113_v30 = vrot.slane %v7270_v42, 7  ;;  %v718_v36 = vld [vmem:[%s12723_s3 + $0x210] sm:$0xff] }
 0x13e   :  { %v477_v20 = vpop.f32.mrf.mxu0  ;;  %v1171_v59 = vsel %vm1167_vm2, %v1160_v21, %v1161_v48  ;;  %v1114_v21 = vrot.slane %v7297_v61, 7 }
 0x13f   :  { %966 = vst.msk [vmem:[#allocation2 + $0x1c8] sm:$0xff] %vm909_vm1, %v837_v6  ;;  %v7574_v8 = vmul.f32 %v710_v60, %v477_v20  ;;  %v7576_v11 = vpop.permute.xlu0 %1616  ;;  %v719_v6 = vld [vmem:[%s12723_s3 + $0x218] sm:$0xff] }
 0x140   :  { %v479_v12 = vpop.f32.mrf.mxu0 }
 0x141   :  { %967 = vst [vmem:[#allocation2 + $0x1d0] sm:$0xff] %v7574_v8  ;;  %v839_v52 = vmul.f32 %v711_v5, %v479_v12  ;;  %1322 = vrot.lane.b32.xlu1 %v1220_v22, %s6636_s9  ;;  %1736 = vrot.lane.b32.xlu0 %v7272_v43, %s6634_s28  ;;  %v720_v22 = vld [vmem:[%s12723_s3 + $0x220] sm:$0xff] }
 0x142   :  { %v483_v7 = vpop.f32.mrf.mxu0 }
 0x143   :  { %968 = vst.msk [vmem:[#allocation2 + $0x1d8] sm:$0xff] %vm909_vm1, %v839_v52  ;;  %v7592_v25 = vmul.f32 %v712_v56, %v483_v7  ;;  %v7594_v17 = vpop.permute.xlu0 %1712  ;;  %v7596_v23 = vpop.permute.xlu1 %1618 }
 0x144   :  { %v485_v27 = vpop.f32.mrf.mxu0 }
 0x145   :  { %969 = vst [vmem:[#allocation2 + $0x1e0] sm:$0xff] %v7592_v25  ;;  %v841_v33 = vmul.f32 %v713_v24, %v485_v27  ;;  %1418 = vrot.lane.b32.xlu1 %v1172_v28, %s6636_s9  ;;  %2024 = vrot.lane.b32.xlu0 %v7270_v42, %s6635_s18  ;;  %v1219_v42 = vsel %vm1167_vm2, %v1112_v3, %v1113_v30  ;;  %v721_v24 = vld [vmem:[%s12723_s3 + $0x228] sm:$0xff] }
 0x146   :  { %v487_v18 = vpop.f32.mrf.mxu0 }
 0x147   :  { %970 = vst.msk [vmem:[#allocation2 + $0x1e8] sm:$0xff] %vm909_vm1, %v841_v33  ;;  %v7612_v39 = vmul.f32 %v714_v19, %v487_v18  ;;  %v7614_v41 = vpop.permute.xlu0 %2000  ;;  %v7616_v1 = vpop.permute.xlu1 %1714  ;;  %v1218_v18 = vsel %vm1167_vm2, %v1113_v30, %v1114_v21 }
 0x148   :  { %v489_v47 = vpop.f32.mrf.mxu0 }
 0x149   :  { %971 = vst [vmem:[#allocation2 + $0x1f0] sm:$0xff] %v7612_v39  ;;  %v843_v51 = vmul.f32 %v715_v50, %v489_v47  ;;  %1324 = vrot.lane.b32.xlu0 %v1219_v42, %s6636_s9  ;;  %1642 = vrot.lane.b32.xlu1 %v7297_v61, %s6634_s28  ;;  %v1162_v50 = vrot.slane %v7299_v62, 7  ;;  %v723_v42 = vld [vmem:[%s12723_s3 + $0x238] sm:$0xff] }
 0x14a   :  { %v493_v35 = vpop.f32.mrf.mxu0 }
 0x14b   :  { %972 = vst.msk [vmem:[#allocation2 + $0x1f8] sm:$0xff] %vm909_vm1, %v843_v51  ;;  %v7632_v53 = vmul.f32 %v716_v57, %v493_v35  ;;  %v7634_v54 = vpop.permute.xlu1 %2002  ;;  %v7636_v43 = vpop.permute.xlu0 %1620 }
 0x14c   :  { %v495_v0 = vpop.f32.mrf.mxu0 }
 0x14d   :  { %973 = vst [vmem:[#allocation2 + $0x200] sm:$0xff] %v7632_v53  ;;  %v845_v60 = vmul.f32 %v717_v4, %v495_v0  ;;  %1420 = vrot.lane.b32.xlu0 %v1171_v59, %s6636_s9  ;;  %1738 = vrot.lane.b32.xlu1 %v7299_v62, %s6634_s28  ;;  %v724_v4 = vld [vmem:[%s12723_s3 + $0x240] sm:$0xff]  ;;  %v1170_v0 = vsel %vm1167_vm2, %v1161_v48, %v1162_v50 }
 0x14e   :  { %v497_v3 = vpop.f32.mrf.mxu0 }
 0x14f   :  { %974 = vst.msk [vmem:[#allocation2 + $0x208] sm:$0xff] %vm909_vm1, %v845_v60  ;;  %v7651_v20 = vmul.f32 %v718_v36, %v497_v3  ;;  %v7653_v5 = vpop.permute.xlu1 %1302  ;;  %v7655_v12 = vpop.permute.xlu0 %1716  ;;  %v1163_v36 = vrot.slane %v7324_v49, 7  ;;  %v725_v3 = vld [vmem:[%s12723_s3 + $0x248] sm:$0xff] }
 0x150   :  { %12794 = vst [vmem:[#allocation3_spill] sm:$0xff] %v7653_v5  ;;  %v499_v56 = vpop.f32.mrf.mxu0 }
 0x151   :  { %975 = vst [vmem:[#allocation2 + $0x210] sm:$0xff] %v7651_v20  ;;  %v847_v52 = vmul.f32 %v719_v6, %v499_v56  ;;  %2026 = vrot.lane.b32.xlu1 %v7297_v61, %s6635_s18  ;;  %1644 = vrot.lane.b32.xlu0 %v7322_v16, %s6634_s28  ;;  %v722_v61 = vld [vmem:[%s12723_s3 + $0x230] sm:$0xff] }
 0x152   :  { %v503_v7 = vpop.f32.mrf.mxu0 }
 0x153   :  { %976 = vst.msk [vmem:[#allocation2 + $0x218] sm:$0xff] %vm909_vm1, %v847_v52  ;;  %v7670_v27 = vmul.f32 %v720_v22, %v503_v7  ;;  %v7672_v19 = vpop.permute.xlu1 %1398  ;;  %v7674_v28 = vpop.permute.xlu0 %2004  ;;  %v726_v22 = vld [vmem:[%s12723_s3 + $0x250] sm:$0xff]  ;;  %v1169_v52 = vsel %vm1167_vm2, %v1162_v50, %v1163_v36  ;;  %v1115_v7 = vrot.slane %v7322_v16, 7 }
 0x154   :  { %12795 = vst [vmem:[#allocation4_spill] sm:$0xff] %v7672_v19  ;;  %v505_v33 = vpop.f32.mrf.mxu0 }
 0x155   :  { %977 = vst [vmem:[#allocation2 + $0x220] sm:$0xff] %v7670_v27  ;;  %v849_v47 = vmul.f32 %v721_v24, %v505_v33  ;;  %1326 = vrot.lane.b32.xlu1 %v1218_v18, %s6636_s9  ;;  %1740 = vrot.lane.b32.xlu0 %v7324_v49, %s6634_s28 }
 0x156   :  { %v507_v57 = vpop.f32.mrf.mxu0 }
 0x157   :  { %978 = vst.msk [vmem:[#allocation2 + $0x228] sm:$0xff] %vm909_vm1, %v849_v47  ;;  %v7690_v51 = vmul.f32 %v722_v61, %v507_v57  ;;  %v7692_v30 = vpop.permute.xlu0 %1304  ;;  %v7694_v62 = vpop.permute.xlu1 %1622  ;;  %v727_v61 = vld [vmem:[%s12723_s3 + $0x258] sm:$0xff]  ;;  %v728_v57 = vld [vmem:[%s12723_s3 + $0x260] sm:$0xff] }
 0x158   :  { %12796 = vst [vmem:[#allocation5_spill] sm:$0xff] %v7692_v30  ;;  %v509_v35 = vpop.f32.mrf.mxu0 }
 0x159   :  { %979 = vst [vmem:[#allocation2 + $0x230] sm:$0xff] %v7690_v51  ;;  %v851_v59 = vmul.f32 %v723_v42, %v509_v35  ;;  %1422 = vrot.lane.b32.xlu1 %v1170_v0, %s6636_s9  ;;  %2028 = vrot.lane.b32.xlu0 %v7322_v16, %s6635_s18  ;;  %v1217_v42 = vsel %vm1167_vm2, %v1114_v21, %v1115_v7  ;;  %v729_v0 = vld [vmem:[%s12723_s3 + $0x268] sm:$0xff] }
 0x15a   :  { %v513_v60 = vpop.f32.mrf.mxu0 }
 0x15b   :  { %980 = vst.msk [vmem:[#allocation2 + $0x238] sm:$0xff] %vm909_vm1, %v851_v59  ;;  %v7710_v6 = vmul.f32 %v724_v4, %v513_v60  ;;  %v7712_v48 = vpop.permute.xlu0 %1400  ;;  %v7714_v49 = vpop.permute.xlu1 %1718  ;;  %v1164_v59 = vrot.slane %v7352_v37, 7 }
 0x15c   :  { %12797 = vst [vmem:[#allocation6_spill] sm:$0xff] %v7712_v48  ;;  %v515_v56 = vpop.f32.mrf.mxu0 }
 0x15d   :  { %981 = vst [vmem:[#allocation2 + $0x240] sm:$0xff] %v7710_v6  ;;  %v853_v24 = vmul.f32 %v725_v3, %v515_v56  ;;  %1296 = vrot.lane.b32.xlu0 %v1169_v52, %s6636_s9  ;;  %1646 = vrot.lane.b32.xlu1 %v7350_v13, %s6634_s28  ;;  %v1168_v52 = vsel %vm1167_vm2, %v1163_v36, %v1164_v59 }
 0x15e   :  { %v517_v33 = vpop.f32.mrf.mxu0 }
 0x15f   :  { %982 = vst.msk [vmem:[#allocation2 + $0x248] sm:$0xff] %vm909_vm1, %v853_v24  ;;  %v7730_v18 = vmul.f32 %v726_v22, %v517_v33  ;;  %v7732_v50 = vpop.permute.xlu1 %2006  ;;  %v7734_v16 = vpop.permute.xlu0 %1624  ;;  %v730_v22 = vld [vmem:[%s12723_s3 + $0x270] sm:$0xff]  ;;  %v731_v33 = vld [vmem:[%s12723_s3 + $0x278] sm:$0xff] }
 0x160   :  { %v519_v47 = vpop.f32.mrf.mxu0 }
 0x161   :  { %983 = vst [vmem:[#allocation2 + $0x250] sm:$0xff] %v7730_v18  ;;  %v855_v35 = vmul.f32 %v727_v61, %v519_v47  ;;  %1328 = vrot.lane.b32.xlu0 %v1217_v42, %s6636_s9  ;;  %1742 = vrot.lane.b32.xlu1 %v7352_v37, %s6634_s28  ;;  %v732_v42 = vld [vmem:[%s12723_s3 + $0x280] sm:$0xff] }
 0x162   :  { %v523_v4 = vpop.f32.mrf.mxu0 }
 0x163   :  { %984 = vst.msk [vmem:[#allocation2 + $0x258] sm:$0xff] %vm909_vm1, %v855_v35  ;;  %v7750_v60 = vmul.f32 %v728_v57, %v523_v4  ;;  %v7752_v21 = vpop.permute.xlu1 %1306  ;;  %v7754_v3 = vpop.permute.xlu0 %1720  ;;  %v1231_v35 = vsel %vm1167_vm2, %v1164_v59, %v1101_v32  ;;  %v1116_v4 = vrot.slane %v7350_v13, 7 }
 0x164   :  { %12798 = vst [vmem:[#allocation7_spill] sm:$0xff] %v7752_v21  ;;  %v525_v56 = vpop.f32.mrf.mxu0 }
 0x165   :  { %985 = vst [vmem:[#allocation2 + $0x260] sm:$0xff] %v7750_v60  ;;  %v857_v24 = vmul.f32 %v729_v0, %v525_v56  ;;  %1298 = vrot.lane.b32.xlu0 %v1168_v52, %s6636_s9  ;;  %2030 = vrot.lane.b32.xlu1 %v7350_v13, %s6635_s18  ;;  %v734_v52 = vld [vmem:[%s12723_s3 + $0x290] sm:$0xff] }
 0x166   :  { %v527_v37 = vpop.f32.mrf.mxu0 }
 0x167   :  { %986 = vst.msk [vmem:[#allocation2 + $0x268] sm:$0xff] %vm909_vm1, %v857_v24  ;;  %v7769_v61 = vmul.f32 %v730_v22, %v527_v37  ;;  %v7771_v47 = vpop.permute.xlu1 %1402  ;;  %v7773_v36 = vpop.permute.xlu0 %2008  ;;  %v733_v22 = vld [vmem:[%s12723_s3 + $0x288] sm:$0xff]  ;;  %v1216_v24 = vsel %vm1167_vm2, %v1115_v7, %v1116_v4  ;;  %v1117_v37 = vrot.slane %v7372_v29, 7 }
 0x168   :  { %12799 = vst [vmem:[#allocation8_spill] sm:$0xff] %v7771_v47  ;;  %v529_v57 = vpop.f32.mrf.mxu0  ;;  %v1119_v47 = vrot.slane %v7403_v9, 7 }
 0x169   :  { %987 = vst [vmem:[#allocation2 + $0x270] sm:$0xff] %v7769_v61  ;;  %v859_v0 = vmul.f32 %v731_v33, %v529_v57  ;;  %1300 = vrot.lane.b32.xlu1 %v1231_v35, %s6636_s9  ;;  %1648 = vrot.lane.b32.xlu0 %v7372_v29, %s6634_s28 }
 0x16a   :  { %v533_v56 = vpop.f32.mrf.mxu0 }
 0x16b   :  { %988 = vst.msk [vmem:[#allocation2 + $0x278] sm:$0xff] %vm909_vm1, %v859_v0  ;;  %v7791_v44 = vmul.f32 %v732_v42, %v533_v56  ;;  %v7793_v32 = vpop.permute.xlu0 %1308  ;;  %v7795_v13 = vpop.permute.xlu1 %1626  ;;  %v735_v42 = vld [vmem:[%s12723_s3 + $0x298] sm:$0xff] }
 0x16c   :  { %12800 = vst [vmem:[#allocation9_spill] sm:$0xff] %v7793_v32  ;;  %v535_v59 = vpop.f32.mrf.mxu0  ;;  %v1121_v32 = vrot.slane %v7434_v31, 7 }
 0x16d   :  { %989 = vst [vmem:[#allocation2 + $0x280] sm:$0xff] %v7791_v44  ;;  %v861_v33 = vmul.f32 %v733_v22, %v535_v59  ;;  %1330 = vrot.lane.b32.xlu1 %v1216_v24, %s6636_s9  ;;  %2032 = vrot.lane.b32.xlu0 %v7372_v29, %s6635_s18  ;;  %v736_v22 = vld [vmem:[%s12723_s3 + $0x2a0] sm:$0xff]  ;;  %v1215_v29 = vsel %vm1167_vm2, %v1116_v4, %v1117_v37  ;;  %v737_v24 = vld [vmem:[%s12723_s3 + $0x2a8] sm:$0xff] }
 0x16e   :  { %v537_v57 = vpop.f32.mrf.mxu0 }
 0x16f   :  { %990 = vst.msk [vmem:[#allocation2 + $0x288] sm:$0xff] %vm909_vm1, %v861_v33  ;;  %v7811_v35 = vmul.f32 %v734_v52, %v537_v57  ;;  %v7813_v7 = vpop.permute.xlu0 %1404  ;;  %v7815_v0 = vpop.permute.xlu1 %1722 }
 0x170   :  { %12801 = vst [vmem:[#allocation10_spill] sm:$0xff] %v7813_v7  ;;  %v539_v56 = vpop.f32.mrf.mxu0 }
 0x171   :  { %991 = vst [vmem:[#allocation2 + $0x290] sm:$0xff] %v7811_v35  ;;  %v863_v59 = vmul.f32 %v735_v42, %v539_v56  ;;  %1332 = vrot.lane.b32.xlu0 %v1215_v29, %s6636_s9  ;;  %1650 = vrot.lane.b32.xlu1 %v7388_v63, %s6634_s28  ;;  %v738_v42 = vld [vmem:[%s12723_s3 + $0x2b0] sm:$0xff]  ;;  %v1118_v56 = vrot.slane %v7388_v63, 7 }
 0x172   :  { %v543_v52 = vpop.f32.mrf.mxu0 }
 0x173   :  { %992 = vst.msk [vmem:[#allocation2 + $0x298] sm:$0xff] %vm909_vm1, %v863_v59  ;;  %v7830_v33 = vmul.f32 %v736_v22, %v543_v52  ;;  %v7832_v57 = vpop.permute.xlu1 %2010  ;;  %v7834_v4 = vpop.permute.xlu0 %1628  ;;  %v739_v59 = vld [vmem:[%s12723_s3 + $0x2b8] sm:$0xff] }
 0x174   :  { %v545_v40 = vpop.f32.mrf.mxu0 }
 0x175   :  { %993 = vst [vmem:[#allocation2 + $0x2a0] sm:$0xff] %v7830_v33  ;;  %v865_v29 = vmul.f32 %v737_v24, %v545_v40  ;;  %2034 = vrot.lane.b32.xlu1 %v7388_v63, %s6635_s18  ;;  %1652 = vrot.lane.b32.xlu0 %v7403_v9, %s6634_s28  ;;  %v740_v63 = vld [vmem:[%s12723_s3 + $0x2c0] sm:$0xff]  ;;  %v1214_v24 = vsel %vm1167_vm2, %v1117_v37, %v1118_v56 }
 0x176   :  { %v547_v22 = vpop.f32.mrf.mxu0 }
 0x177   :  { %994 = vst.msk [vmem:[#allocation2 + $0x2a8] sm:$0xff] %vm909_vm1, %v865_v29  ;;  %v7849_v52 = vmul.f32 %v738_v42, %v547_v22  ;;  %v7851_v7 = vpop.permute.xlu1 %1310  ;;  %v7853_v48 = vpop.permute.xlu0 %1724  ;;  %v741_v29 = vld [vmem:[%s12723_s3 + $0x2c8] sm:$0xff] }
 0x178   :  { %12802 = vst [vmem:[#allocation11_spill] sm:$0xff] %v7851_v7  ;;  %v549_v40 = vpop.f32.mrf.mxu0 }
 0x179   :  { %995 = vst [vmem:[#allocation2 + $0x2b0] sm:$0xff] %v7849_v52  ;;  %v867_v19 = vmul.f32 %v739_v59, %v549_v40  ;;  %1334 = vrot.lane.b32.xlu1 %v1214_v24, %s6636_s9  ;;  %2036 = vrot.lane.b32.xlu0 %v7403_v9, %s6635_s18  ;;  %v742_v59 = vld [vmem:[%s12723_s3 + $0x2d0] sm:$0xff]  ;;  %v1213_v9 = vsel %vm1167_vm2, %v1118_v56, %v1119_v47 }
 0x17a   :  { %v553_v42 = vpop.f32.mrf.mxu0 }
 0x17b   :  { %996 = vst.msk [vmem:[#allocation2 + $0x2b8] sm:$0xff] %vm909_vm1, %v867_v19  ;;  %v7869_v22 = vmul.f32 %v740_v63, %v553_v42  ;;  %v7871_v37 = vpop.permute.xlu1 %1406  ;;  %v7873_v21 = vpop.permute.xlu0 %2012  ;;  %v743_v63 = vld [vmem:[%s12723_s3 + $0x2d8] sm:$0xff] }
 0x17c   :  { %12803 = vst [vmem:[#allocation12_spill] sm:$0xff] %v7871_v37  ;;  %12804 = vst [vmem:[#allocation13_spill] sm:$0xff] %v7873_v21  ;;  %v555_v7 = vpop.f32.mrf.mxu0 }
 0x17d   :  { %997 = vst [vmem:[#allocation2 + $0x2c0] sm:$0xff] %v7869_v22  ;;  %v869_v40 = vmul.f32 %v741_v29, %v555_v7  ;;  %1336 = vrot.lane.b32.xlu0 %v1213_v9, %s6636_s9  ;;  %1654 = vrot.lane.b32.xlu1 %v7418_v10, %s6634_s28  ;;  %v744_v7 = vld [vmem:[%s12723_s3 + $0x2e0] sm:$0xff]  ;;  %v1120_v29 = vrot.slane %v7418_v10, 7 }
 0x17e   :  { %v557_v19 = vpop.f32.mrf.mxu0 }
 0x17f   :  { %998 = vst.msk [vmem:[#allocation2 + $0x2c8] sm:$0xff] %vm909_vm1, %v869_v40  ;;  %v7888_v24 = vmul.f32 %v742_v59, %v557_v19  ;;  %v7890_v42 = vpop.permute.xlu0 %1312  ;;  %v7892_v56 = vpop.permute.xlu1 %1630  ;;  %v745_v40 = vld [vmem:[%s12723_s3 + $0x2e8] sm:$0xff] }
 0x180   :  { %12805 = vst [vmem:[#allocation14_spill] sm:$0xff] %v7890_v42  ;;  %v559_v37 = vpop.f32.mrf.mxu0 }
 0x181   :  { %999 = vst [vmem:[#allocation2 + $0x2d0] sm:$0xff] %v7888_v24  ;;  %v871_v9 = vmul.f32 %v743_v63, %v559_v37  ;;  %2038 = vrot.lane.b32.xlu1 %v7418_v10, %s6635_s18  ;;  %1656 = vrot.lane.b32.xlu0 %v7434_v31, %s6634_s28  ;;  %v746_v10 = vld [vmem:[%s12723_s3 + $0x2f0] sm:$0xff]  ;;  %v1212_v63 = vsel %vm1167_vm2, %v1119_v47, %v1120_v29 }
 0x182   :  { %v563_v59 = vpop.f32.mrf.mxu0 }
 0x183   :  { %1000 = vst.msk [vmem:[#allocation2 + $0x2d8] sm:$0xff] %vm909_vm1, %v871_v9  ;;  %v7907_v19 = vmul.f32 %v744_v7, %v563_v59  ;;  %v7909_v42 = vpop.permute.xlu0 %1408  ;;  %v7911_v30 = vpop.permute.xlu1 %1726  ;;  %v747_v9 = vld [vmem:[%s12723_s3 + $0x2f8] sm:$0xff]  ;;  %s6637_s3 = smov 80  }
 0x184   :  { %12806 = vst [vmem:[#allocation15_spill] sm:$0xff] %v7909_v42  ;;  %v565_v37 = vpop.f32.mrf.mxu0 }
 0x185   :  { %1001 = vst [vmem:[#allocation2 + $0x2e0] sm:$0xff] %v7907_v19  ;;  %v873_v5 = vmul.f32 %v745_v40, %v565_v37  ;;  %1338 = vrot.lane.b32.xlu1 %v1212_v63, %s6636_s9  ;;  %2040 = vrot.lane.b32.xlu0 %v7434_v31, %s6635_s18  ;;  %v1211_v40 = vsel %vm1167_vm2, %v1120_v29, %v1121_v32 }
 0x186   :  { %v567_v7 = vpop.f32.mrf.mxu0 }
 0x187   :  { %1002 = vst.msk [vmem:[#allocation2 + $0x2e8] sm:$0xff] %vm909_vm1, %v873_v5  ;;  %v7927_v59 = vmul.f32 %v746_v10, %v567_v7  ;;  %v7929_v47 = vpop.permute.xlu1 %2014  ;;  %v7931_v42 = vpop.permute.xlu0 %1632  ;;  %v1122_v10 = vrot.slane %v7450_v46, 7  ;;  %v1123_v7 = vrot.slane %v7466_v55, 7 }
 0x188   :  { %v569_v21 = vpop.f32.mrf.mxu0 }
 0x189   :  { %1003 = vst [vmem:[#allocation2 + $0x2f0] sm:$0xff] %v7927_v59  ;;  %v875_v31 = vmul.f32 %v747_v9, %v569_v21  ;;  %1340 = vrot.lane.b32.xlu0 %v1211_v40, %s6636_s9  ;;  %1658 = vrot.lane.b32.xlu1 %v7450_v46, %s6634_s28  ;;  %v1210_v63 = vsel %vm1167_vm2, %v1121_v32, %v1122_v10 }
 0x18a   :  { %v1209_v40 = vsel %vm1167_vm2, %v1122_v10, %v1123_v7 }
 0x18b   :  { %1004 = vst.msk [vmem:[#allocation2 + $0x2f8] sm:$0xff] %vm909_vm1, %v875_v31  ;;  %v7940_v5 = vpop.permute.xlu1 %1314  ;;  %v7942_v37 = vpop.permute.xlu0 %1728 }
 0x18c   :  { %12807 = vst [vmem:[#allocation16_spill] sm:$0xff] %v7940_v5 }
 0x18d   :  { %2042 = vrot.lane.b32.xlu1 %v7450_v46, %s6635_s18  ;;  %1660 = vrot.lane.b32.xlu0 %v7466_v55, %s6634_s28 }
 0x18f   :  { %v7949_v21 = vpop.permute.xlu1 %1410  ;;  %v7951_v29 = vpop.permute.xlu0 %2016 }
 0x190   :  { %12808 = vst [vmem:[#allocation17_spill] sm:$0xff] %v7949_v21  ;;  %v1125_v21 = vrot.slane %v7496_v15, 7 }
 0x191   :  { %1342 = vrot.lane.b32.xlu1 %v1210_v63, %s6636_s9  ;;  %2044 = vrot.lane.b32.xlu0 %v7466_v55, %s6635_s18  ;;  %v1124_v63 = vrot.slane %v7481_v2, 7 }
 0x193   :  { %v7959_v9 = vpop.permute.xlu0 %1316  ;;  %v7961_v46 = vpop.permute.xlu1 %1634  ;;  %v1207_v5 = vsel %vm1167_vm2, %v1124_v63, %v1125_v21 }
 0x194   :  { %12809 = vst [vmem:[#allocation18_spill] sm:$0xff] %v7959_v9 }
 0x195   :  { %1344 = vrot.lane.b32.xlu0 %v1209_v40, %s6636_s9  ;;  %1662 = vrot.lane.b32.xlu1 %v7481_v2, %s6634_s28  ;;  %v1208_v40 = vsel %vm1167_vm2, %v1123_v7, %v1124_v63 }
 0x197   :  { %v7968_v32 = vpop.permute.xlu0 %1412  ;;  %v7970_v31 = vpop.permute.xlu1 %1730 }
 0x198   :  { %12810 = vst [vmem:[#allocation19_spill] sm:$0xff] %v7968_v32 }
 0x199   :  { %2046 = vrot.lane.b32.xlu1 %v7481_v2, %s6635_s18  ;;  %1664 = vrot.lane.b32.xlu0 %v7496_v15, %s6634_s28 }
 0x19b   :  { %v7977_v55 = vpop.permute.xlu1 %2018  ;;  %v7979_v10 = vpop.permute.xlu0 %1636 }
 0x19c   :  { %12811 = vst [vmem:[#allocation20_spill] sm:$0xff] %v7977_v55 }
 0x19d   :  { %1346 = vrot.lane.b32.xlu1 %v1208_v40, %s6636_s9  ;;  %2048 = vrot.lane.b32.xlu0 %v7496_v15, %s6635_s18  ;;  %v1126_v40 = vrot.slane %v7512_v26, 7 }
 0x19f   :  { %v7987_v32 = vpop.permute.xlu1 %1318  ;;  %v7989_v2 = vpop.permute.xlu0 %1732 }
 0x1a0   :  { %12812 = vst [vmem:[#allocation21_spill] sm:$0xff] %v7987_v32  ;;  %v1127_v32 = vrot.slane %v7528_v38, 7 }
 0x1a1   :  { %1348 = vrot.lane.b32.xlu0 %v1207_v5, %s6636_s9  ;;  %1666 = vrot.lane.b32.xlu1 %v7512_v26, %s6634_s28  ;;  %v1206_v5 = vsel %vm1167_vm2, %v1125_v21, %v1126_v40 }
 0x1a3   :  { %v7996_v7 = vpop.permute.xlu1 %1414  ;;  %v7998_v9 = vpop.permute.xlu0 %2020 }
 0x1a4   :  { %12813 = vst [vmem:[#allocation22_spill] sm:$0xff] %v7996_v7  ;;  %12814 = vst [vmem:[#allocation23_spill] sm:$0xff] %v7998_v9  ;;  %v1205_v9 = vsel %vm1167_vm2, %v1126_v40, %v1127_v32 }
 0x1a5   :  { %2050 = vrot.lane.b32.xlu1 %v7512_v26, %s6635_s18  ;;  %1668 = vrot.lane.b32.xlu0 %v7528_v38, %s6634_s28 }
 0x1a7   :  { %v8005_v15 = vpop.permute.xlu0 %1320  ;;  %v8007_v63 = vpop.permute.xlu1 %1638 }
 0x1a8   :  { %12815 = vst [vmem:[#allocation24_spill] sm:$0xff] %v8005_v15 }
 0x1a9   :  { %1350 = vrot.lane.b32.xlu1 %v1206_v5, %s6636_s9  ;;  %2052 = vrot.lane.b32.xlu0 %v7528_v38, %s6635_s18  ;;  %v1128_v5 = vrot.slane %v7544_v34, 7 }
 0x1ab   :  { %v8015_v7 = vpop.permute.xlu0 %1416  ;;  %v8017_v26 = vpop.permute.xlu1 %1734 }
 0x1ac   :  { %12816 = vst [vmem:[#allocation25_spill] sm:$0xff] %v8015_v7  ;;  %v1129_v7 = vrot.slane %v7559_v58, 7 }
 0x1ad   :  { %1352 = vrot.lane.b32.xlu0 %v1205_v9, %s6636_s9  ;;  %1670 = vrot.lane.b32.xlu1 %v7544_v34, %s6634_s28  ;;  %v1204_v9 = vsel %vm1167_vm2, %v1127_v32, %v1128_v5 }
 0x1ae   :  { %v1203_v55 = vsel %vm1167_vm2, %v1128_v5, %v1129_v7 }
 0x1af   :  { %v8024_v21 = vpop.permute.xlu1 %2022  ;;  %v8026_v15 = vpop.permute.xlu0 %1640 }
 0x1b0   :  { %12817 = vst [vmem:[#allocation26_spill] sm:$0xff] %v8024_v21 }
 0x1b1   :  { %2054 = vrot.lane.b32.xlu1 %v7544_v34, %s6635_s18  ;;  %1672 = vrot.lane.b32.xlu0 %v7559_v58, %s6634_s28 }
 0x1b3   :  { %v8033_v38 = vpop.permute.xlu1 %1322  ;;  %v8035_v40 = vpop.permute.xlu0 %1736 }
 0x1b4   :  { %12818 = vst [vmem:[#allocation27_spill] sm:$0xff] %v8033_v38 }
 0x1b5   :  { %1354 = vrot.lane.b32.xlu1 %v1204_v9, %s6636_s9  ;;  %2056 = vrot.lane.b32.xlu0 %v7559_v58, %s6635_s18  ;;  %v1130_v9 = vrot.slane %v7574_v8, 7 }
 0x1b7   :  { %v8043_v21 = vpop.permute.xlu1 %1418  ;;  %v8045_v34 = vpop.permute.xlu0 %2024 }
 0x1b8   :  { %12819 = vst [vmem:[#allocation28_spill] sm:$0xff] %v8043_v21 }
 0x1b9   :  { %1356 = vrot.lane.b32.xlu0 %v1203_v55, %s6636_s9  ;;  %1674 = vrot.lane.b32.xlu1 %v7574_v8, %s6634_s28  ;;  %v1202_v55 = vsel %vm1167_vm2, %v1129_v7, %v1130_v9  ;;  %v1131_v7 = vrot.slane %v7592_v25, 7 }
 0x1bb   :  { %v8052_v32 = vpop.permute.xlu0 %1324  ;;  %v8054_v38 = vpop.permute.xlu1 %1642 }
 0x1bc   :  { %12820 = vst [vmem:[#allocation29_spill] sm:$0xff] %v8052_v32 }
 0x1bd   :  { %1748 = vrot.lane.b32.xlu0 %v7576_v11, %s6636_s9  ;;  %2058 = vrot.lane.b32.xlu1 %v7574_v8, %s6635_s18 }
 0x1bf   :  { %v8061_v58 = vpop.permute.xlu0 %1420  ;;  %v8063_v5 = vpop.permute.xlu1 %1738 }
 0x1c0   :  { %12821 = vst [vmem:[#allocation30_spill] sm:$0xff] %v8061_v58 }
 0x1c1   :  { %1844 = vrot.lane.b32.xlu0 %v7594_v17, %s6636_s9  ;;  %1358 = vrot.lane.b32.xlu1 %v1202_v55, %s6636_s9 }
 0x1c3   :  { %v8070_v21 = vpop.permute.xlu1 %2026  ;;  %v8072_v32 = vpop.permute.xlu0 %1644 }
 0x1c5   :  { %1750 = vrot.lane.b32.xlu1 %v7596_v23, %s6636_s9  ;;  %1676 = vrot.lane.b32.xlu0 %v7592_v25, %s6634_s28  ;;  %v1201_v23 = vsel %vm1167_vm2, %v1130_v9, %v1131_v7 }
 0x1c7   :  { %v8078_v8 = vpop.permute.xlu1 %1326  ;;  %v8080_v11 = vpop.permute.xlu0 %1740 }
 0x1c8   :  { %12822 = vst [vmem:[#allocation31_spill] sm:$0xff] %v8078_v8 }
 0x1c9   :  { %1846 = vrot.lane.b32.xlu1 %v7616_v1, %s6636_s9  ;;  %2060 = vrot.lane.b32.xlu0 %v7592_v25, %s6635_s18  ;;  %v1132_v1 = vrot.slane %v7612_v39, 7 }
 0x1cb   :  { %v8087_v17 = vpop.permute.xlu1 %1422  ;;  %v8089_v55 = vpop.permute.xlu0 %2028 }
 0x1cc   :  { %12823 = vst [vmem:[#allocation32_spill] sm:$0xff] %v8087_v17 }
 0x1cd   :  { %1360 = vrot.lane.b32.xlu0 %v1201_v23, %s6636_s9  ;;  %1678 = vrot.lane.b32.xlu1 %v7612_v39, %s6634_s28  ;;  %v1200_v23 = vsel %vm1167_vm2, %v1131_v7, %v1132_v1  ;;  %v1133_v7 = vrot.slane %v7632_v53, 7 }
 0x1cf   :  { %v8096_v58 = vpop.permute.xlu0 %1296  ;;  %v8098_v8 = vpop.permute.xlu1 %1646 }
 0x1d0   :  { %12824 = vst [vmem:[#allocation33_spill] sm:$0xff] %v8096_v58 }
 0x1d1   :  { %1752 = vrot.lane.b32.xlu0 %v7636_v43, %s6636_s9  ;;  %2062 = vrot.lane.b32.xlu1 %v7612_v39, %s6635_s18 }
 0x1d3   :  { %v8105_v25 = vpop.permute.xlu0 %1328  ;;  %v8107_v9 = vpop.permute.xlu1 %1742 }
 0x1d4   :  { %12825 = vst [vmem:[#allocation34_spill] sm:$0xff] %v8105_v25 }
 0x1d5   :  { %1848 = vrot.lane.b32.xlu0 %v7655_v12, %s6636_s9  ;;  %1362 = vrot.lane.b32.xlu1 %v1200_v23, %s6636_s9 }
 0x1d7   :  { %v8114_v17 = vpop.permute.xlu0 %1298  ;;  %v8116_v58 = vpop.permute.xlu1 %2030 }
 0x1d8   :  { %12826 = vst [vmem:[#allocation35_spill] sm:$0xff] %v8114_v17 }
 0x1d9   :  { %1754 = vrot.lane.b32.xlu1 %v7694_v62, %s6636_s9  ;;  %1680 = vrot.lane.b32.xlu0 %v7632_v53, %s6634_s28  ;;  %v1199_v62 = vsel %vm1167_vm2, %v1132_v1, %v1133_v7 }
 0x1db   :  { %v8122_v39 = vpop.permute.xlu1 %1300  ;;  %v8124_v43 = vpop.permute.xlu0 %1648 }
 0x1dc   :  { %12827 = vst [vmem:[#allocation36_spill] sm:$0xff] %v8122_v39 }
 0x1dd   :  { %1850 = vrot.lane.b32.xlu1 %v7714_v49, %s6636_s9  ;;  %2064 = vrot.lane.b32.xlu0 %v7632_v53, %s6635_s18  ;;  %v1134_v49 = vrot.slane %v7651_v20, 7 }
 0x1df   :  { %v8131_v12 = vpop.permute.xlu1 %1330  ;;  %v8133_v23 = vpop.permute.xlu0 %2032 }
 0x1e0   :  { %12828 = vst [vmem:[#allocation37_spill] sm:$0xff] %v8131_v12 }
 0x1e1   :  { %1364 = vrot.lane.b32.xlu0 %v1199_v62, %s6636_s9  ;;  %1682 = vrot.lane.b32.xlu1 %v7651_v20, %s6634_s28  ;;  %v1198_v62 = vsel %vm1167_vm2, %v1133_v7, %v1134_v49  ;;  %v1135_v7 = vrot.slane %v7670_v27, 7 }
 0x1e3   :  { %v8140_v25 = vpop.permute.xlu0 %1332  ;;  %v8142_v17 = vpop.permute.xlu1 %1650 }
 0x1e4   :  { %12829 = vst [vmem:[#allocation38_spill] sm:$0xff] %v8140_v25 }
 0x1e5   :  { %1756 = vrot.lane.b32.xlu0 %v7734_v16, %s6636_s9  ;;  %2066 = vrot.lane.b32.xlu1 %v7651_v20, %s6635_s18 }
 0x1e7   :  { %v8149_v53 = vpop.permute.xlu1 %2034  ;;  %v8151_v1 = vpop.permute.xlu0 %1652 }
 0x1e9   :  { %1852 = vrot.lane.b32.xlu0 %v7754_v3, %s6636_s9  ;;  %1366 = vrot.lane.b32.xlu1 %v1198_v62, %s6636_s9 }
 0x1eb   :  { %v8158_v12 = vpop.permute.xlu1 %1334  ;;  %v8160_v25 = vpop.permute.xlu0 %2036 }
 0x1ec   :  { %12830 = vst [vmem:[#allocation39_spill] sm:$0xff] %v8158_v12 }
 0x1ed   :  { %1758 = vrot.lane.b32.xlu1 %v7795_v13, %s6636_s9  ;;  %1684 = vrot.lane.b32.xlu0 %v7670_v27, %s6634_s28  ;;  %v1197_v13 = vsel %vm1167_vm2, %v1134_v49, %v1135_v7 }
 0x1ef   :  { %v8166_v20 = vpop.permute.xlu0 %1336  ;;  %v8168_v16 = vpop.permute.xlu1 %1654 }
 0x1f0   :  { %12831 = vst [vmem:[#allocation40_spill] sm:$0xff] %v8166_v20 }
 0x1f1   :  { %1854 = vrot.lane.b32.xlu1 %v7815_v0, %s6636_s9  ;;  %2068 = vrot.lane.b32.xlu0 %v7670_v27, %s6635_s18  ;;  %v1136_v0 = vrot.slane %v7690_v51, 7 }
 0x1f3   :  { %v8175_v3 = vpop.permute.xlu1 %2038  ;;  %v8177_v62 = vpop.permute.xlu0 %1656 }
 0x1f5   :  { %1368 = vrot.lane.b32.xlu0 %v1197_v13, %s6636_s9  ;;  %1686 = vrot.lane.b32.xlu1 %v7690_v51, %s6634_s28  ;;  %v1196_v13 = vsel %vm1167_vm2, %v1135_v7, %v1136_v0  ;;  %v1137_v7 = vrot.slane %v7710_v6, 7 }
 0x1f7   :  { %v8184_v20 = vpop.permute.xlu1 %1338  ;;  %v8186_v12 = vpop.permute.xlu0 %2040 }
 0x1f8   :  { %12832 = vst [vmem:[#allocation41_spill] sm:$0xff] %v8184_v20 }
 0x1f9   :  { %1760 = vrot.lane.b32.xlu0 %v7834_v4, %s6636_s9  ;;  %2070 = vrot.lane.b32.xlu1 %v7690_v51, %s6635_s18 }
 0x1fb   :  { %v8193_v27 = vpop.permute.xlu0 %1340  ;;  %v8195_v49 = vpop.permute.xlu1 %1658 }
 0x1fc   :  { %12833 = vst [vmem:[#allocation42_spill] sm:$0xff] %v8193_v27 }
 0x1fd   :  { %1856 = vrot.lane.b32.xlu0 %v7853_v48, %s6636_s9  ;;  %1370 = vrot.lane.b32.xlu1 %v1196_v13, %s6636_s9 }
 0x1ff   :  { %v8202_v20 = vpop.permute.xlu1 %2042  ;;  %v8204_v39 = vpop.permute.xlu0 %1660 }
 0x201   :  { %1762 = vrot.lane.b32.xlu1 %v7892_v56, %s6636_s9  ;;  %1688 = vrot.lane.b32.xlu0 %v7710_v6, %s6634_s28  ;;  %v1195_v56 = vsel %vm1167_vm2, %v1136_v0, %v1137_v7 }
 0x203   :  { %v8210_v51 = vpop.permute.xlu1 %1342  ;;  %v8212_v4 = vpop.permute.xlu0 %2044 }
 0x204   :  { %12834 = vst [vmem:[#allocation43_spill] sm:$0xff] %v8210_v51 }
 0x205   :  { %1858 = vrot.lane.b32.xlu1 %v7911_v30, %s6636_s9  ;;  %2072 = vrot.lane.b32.xlu0 %v7710_v6, %s6635_s18  ;;  %v1138_v30 = vrot.slane %v7730_v18, 7 }
 0x207   :  { %v8219_v48 = vpop.permute.xlu0 %1344  ;;  %v8221_v13 = vpop.permute.xlu1 %1662 }
 0x208   :  { %12835 = vst [vmem:[#allocation44_spill] sm:$0xff] %v8219_v48 }
 0x209   :  { %1372 = vrot.lane.b32.xlu0 %v1195_v56, %s6636_s9  ;;  %1690 = vrot.lane.b32.xlu1 %v7730_v18, %s6634_s28  ;;  %v1194_v56 = vsel %vm1167_vm2, %v1137_v7, %v1138_v30  ;;  %v1139_v7 = vrot.slane %v7750_v60, 7 }
 0x20b   :  { %v8228_v51 = vpop.permute.xlu1 %2046  ;;  %v8230_v27 = vpop.permute.xlu0 %1664 }
 0x20c   :  { %12836 = vst [vmem:[#allocation45_spill] sm:$0xff] %v8228_v51 }
 0x20d   :  { %1764 = vrot.lane.b32.xlu0 %v7931_v42, %s6636_s9  ;;  %2074 = vrot.lane.b32.xlu1 %v7730_v18, %s6635_s18 }
 0x20f   :  { %v8237_v6 = vpop.permute.xlu1 %1346  ;;  %v8239_v0 = vpop.permute.xlu0 %2048 }
 0x210   :  { %12837 = vst [vmem:[#allocation46_spill] sm:$0xff] %v8237_v6 }
 0x211   :  { %1860 = vrot.lane.b32.xlu0 %v7942_v37, %s6636_s9  ;;  %1374 = vrot.lane.b32.xlu1 %v1194_v56, %s6636_s9 }
 0x213   :  { %v8246_v48 = vpop.permute.xlu0 %1348  ;;  %v8248_v51 = vpop.permute.xlu1 %1666 }
 0x214   :  { %12838 = vst [vmem:[#allocation47_spill] sm:$0xff] %v8246_v48 }
 0x215   :  { %1766 = vrot.lane.b32.xlu1 %v7961_v46, %s6636_s9  ;;  %1692 = vrot.lane.b32.xlu0 %v7750_v60, %s6634_s28  ;;  %v1193_v46 = vsel %vm1167_vm2, %v1138_v30, %v1139_v7 }
 0x217   :  { %v8254_v18 = vpop.permute.xlu1 %2050  ;;  %v8256_v42 = vpop.permute.xlu0 %1668 }
 0x219   :  { %1862 = vrot.lane.b32.xlu1 %v7970_v31, %s6636_s9  ;;  %2076 = vrot.lane.b32.xlu0 %v7750_v60, %s6635_s18  ;;  %v1140_v31 = vrot.slane %v7769_v61, 7 }
 0x21b   :  { %v8263_v37 = vpop.permute.xlu1 %1350  ;;  %v8265_v56 = vpop.permute.xlu0 %2052 }
 0x21c   :  { %12839 = vst [vmem:[#allocation48_spill] sm:$0xff] %v8263_v37 }
 0x21d   :  { %1376 = vrot.lane.b32.xlu0 %v1193_v46, %s6636_s9  ;;  %1694 = vrot.lane.b32.xlu1 %v7769_v61, %s6634_s28  ;;  %v1192_v46 = vsel %vm1167_vm2, %v1139_v7, %v1140_v31 }
 0x21f   :  { %v8272_v6 = vpop.permute.xlu0 %1352  ;;  %v8274_v48 = vpop.permute.xlu1 %1670 }
 0x220   :  { %12840 = vst [vmem:[#allocation49_spill] sm:$0xff] %v8272_v6 }
 0x221   :  { %1768 = vrot.lane.b32.xlu0 %v7979_v10, %s6636_s9  ;;  %2078 = vrot.lane.b32.xlu1 %v7769_v61, %s6635_s18  ;;  %v1141_v10 = vrot.slane %v7791_v44, 7 }
 0x223   :  { %v8281_v60 = vpop.permute.xlu1 %2054  ;;  %v8283_v30 = vpop.permute.xlu0 %1672 }
 0x225   :  { %1864 = vrot.lane.b32.xlu0 %v7989_v2, %s6636_s9  ;;  %1378 = vrot.lane.b32.xlu1 %v1192_v46, %s6636_s9  ;;  %v1191_v2 = vsel %vm1167_vm2, %v1140_v31, %v1141_v10 }
 0x227   :  { %v8290_v6 = vpop.permute.xlu1 %1354  ;;  %v8292_v37 = vpop.permute.xlu0 %2056 }
 0x228   :  { %12841 = vst [vmem:[#allocation50_spill] sm:$0xff] %v8290_v6 }
 0x229   :  { %1770 = vrot.lane.b32.xlu1 %v8007_v63, %s6636_s9  ;;  %1696 = vrot.lane.b32.xlu0 %v7791_v44, %s6634_s28  ;;  %v1142_v63 = vrot.slane %v7811_v35, 7 }
 0x22b   :  { %v8299_v61 = vpop.permute.xlu0 %1356  ;;  %v8301_v7 = vpop.permute.xlu1 %1674 }
 0x22c   :  { %12842 = vst [vmem:[#allocation51_spill] sm:$0xff] %v8299_v61 }
 0x22d   :  { %1866 = vrot.lane.b32.xlu1 %v8017_v26, %s6636_s9  ;;  %1380 = vrot.lane.b32.xlu0 %v1191_v2, %s6636_s9  ;;  %v1190_v26 = vsel %vm1167_vm2, %v1141_v10, %v1142_v63 }
 0x22f   :  { %v8308_v46 = vpop.permute.xlu0 %1748  ;;  %v8310_v6 = vpop.permute.xlu1 %2058 }
 0x230   :  { %12843 = vst [vmem:[#allocation52_spill] sm:$0xff] %v8308_v46 }
 0x231   :  { %1772 = vrot.lane.b32.xlu0 %v8026_v15, %s6636_s9  ;;  %1698 = vrot.lane.b32.xlu1 %v7811_v35, %s6634_s28  ;;  %v1143_v15 = vrot.slane %v7830_v33, 7 }
 0x233   :  { %v8317_v61 = vpop.permute.xlu0 %1844  ;;  %v8319_v31 = vpop.permute.xlu1 %1358 }
 0x234   :  { %12844 = vst [vmem:[#allocation53_spill] sm:$0xff] %v8317_v61  ;;  %12845 = vst [vmem:[#allocation54_spill] sm:$0xff] %v8319_v31 }
 0x235   :  { %1868 = vrot.lane.b32.xlu0 %v8035_v40, %s6636_s9  ;;  %1382 = vrot.lane.b32.xlu1 %v1190_v26, %s6636_s9  ;;  %v1189_v40 = vsel %vm1167_vm2, %v1142_v63, %v1143_v15 }
 0x237   :  { %v8326_v2 = vpop.permute.xlu1 %1750  ;;  %v8328_v46 = vpop.permute.xlu0 %1676 }
 0x238   :  { %12846 = vst [vmem:[#allocation55_spill] sm:$0xff] %v8326_v2 }
 0x239   :  { %1774 = vrot.lane.b32.xlu1 %v8054_v38, %s6636_s9  ;;  %1700 = vrot.lane.b32.xlu0 %v7830_v33, %s6634_s28  ;;  %v1144_v38 = vrot.slane %v7849_v52, 7 }
 0x23b   :  { %v8335_v61 = vpop.permute.xlu1 %1846  ;;  %v8337_v10 = vpop.permute.xlu0 %2060 }
 0x23c   :  { %12847 = vst [vmem:[#allocation56_spill] sm:$0xff] %v8335_v61 }
 0x23d   :  { %1870 = vrot.lane.b32.xlu1 %v8063_v5, %s6636_s9  ;;  %1384 = vrot.lane.b32.xlu0 %v1189_v40, %s6636_s9  ;;  %v1188_v5 = vsel %vm1167_vm2, %v1143_v15, %v1144_v38 }
 0x23f   :  { %v8344_v26 = vpop.permute.xlu0 %1360  ;;  %v8346_v31 = vpop.permute.xlu1 %1678 }
 0x240   :  { %12848 = vst [vmem:[#allocation57_spill] sm:$0xff] %v8344_v26 }
 0x241   :  { %1744 = vrot.lane.b32.xlu0 %v8080_v11, %s6636_s9  ;;  %1702 = vrot.lane.b32.xlu1 %v7849_v52, %s6634_s28  ;;  %v1145_v11 = vrot.slane %v7869_v22, 7 }
 0x243   :  { %v8353_v61 = vpop.permute.xlu0 %1752  ;;  %v8355_v63 = vpop.permute.xlu1 %2062 }
 0x244   :  { %12849 = vst [vmem:[#allocation58_spill] sm:$0xff] %v8353_v61 }
 0x245   :  { %1776 = vrot.lane.b32.xlu0 %v8072_v32, %s6636_s9  ;;  %1386 = vrot.lane.b32.xlu1 %v1188_v5, %s6636_s9  ;;  %v1187_v32 = vsel %vm1167_vm2, %v1144_v38, %v1145_v11 }
 0x247   :  { %v8362_v40 = vpop.permute.xlu0 %1848  ;;  %v8364_v26 = vpop.permute.xlu1 %1362 }
 0x248   :  { %12850 = vst [vmem:[#allocation59_spill] sm:$0xff] %v8362_v40  ;;  %12851 = vst [vmem:[#allocation60_spill] sm:$0xff] %v8364_v26 }
 0x249   :  { %1746 = vrot.lane.b32.xlu1 %v8107_v9, %s6636_s9  ;;  %1704 = vrot.lane.b32.xlu0 %v7869_v22, %s6634_s28  ;;  %v1146_v9 = vrot.slane %v7888_v24, 7 }
 0x24b   :  { %v8371_v61 = vpop.permute.xlu1 %1754  ;;  %v8373_v15 = vpop.permute.xlu0 %1680 }
 0x24c   :  { %12852 = vst [vmem:[#allocation61_spill] sm:$0xff] %v8371_v61 }
 0x24d   :  { %1778 = vrot.lane.b32.xlu1 %v8098_v8, %s6636_s9  ;;  %1388 = vrot.lane.b32.xlu0 %v1187_v32, %s6636_s9  ;;  %v1186_v8 = vsel %vm1167_vm2, %v1145_v11, %v1146_v9  ;;  %v1147_v32 = vrot.slane %v7907_v19, 7 }
 0x24f   :  { %v8380_v5 = vpop.permute.xlu1 %1850  ;;  %v8382_v40 = vpop.permute.xlu0 %2064  ;;  %v1185_v61 = vsel %vm1167_vm2, %v1146_v9, %v1147_v32 }
 0x250   :  { %12853 = vst [vmem:[#allocation62_spill] sm:$0xff] %v8380_v5 }
 0x251   :  { %1780 = vrot.lane.b32.xlu0 %v8124_v43, %s6636_s9  ;;  %1706 = vrot.lane.b32.xlu1 %v7888_v24, %s6634_s28 }
 0x253   :  { %v8389_v26 = vpop.permute.xlu0 %1364  ;;  %v8391_v38 = vpop.permute.xlu1 %1682 }
 0x254   :  { %12854 = vst [vmem:[#allocation63_spill] sm:$0xff] %v8389_v26 }
 0x255   :  { %1390 = vrot.lane.b32.xlu1 %v1186_v8, %s6636_s9  ;;  %1708 = vrot.lane.b32.xlu0 %v7907_v19, %s6634_s28  ;;  %v1148_v8 = vrot.slane %v7927_v59, 7 }
 0x257   :  { %v8399_v5 = vpop.permute.xlu0 %1756  ;;  %v8401_v43 = vpop.permute.xlu1 %2066 }
 0x258   :  { %12855 = vst [vmem:[#allocation64_spill] sm:$0xff] %v8399_v5 }
 0x259   :  { %1782 = vrot.lane.b32.xlu1 %v8142_v17, %s6636_s9  ;;  %1392 = vrot.lane.b32.xlu0 %v1185_v61, %s6636_s9  ;;  %v1184_v17 = vsel %vm1167_vm2, %v1147_v32, %v1148_v8  ;;  %v12859_v61 = vrot.slane %v6948_v45, 7 }
 0x25b   :  { %v8408_v11 = vpop.permute.xlu0 %1852  ;;  %v8410_v26 = vpop.permute.xlu1 %1366 }
 0x25c   :  { %12856 = vst [vmem:[#allocation65_spill] sm:$0xff] %v8408_v11  ;;  %12857 = vst [vmem:[#allocation66_spill] sm:$0xff] %v8410_v26  ;;  %v1183_v11 = vsel %vm1167_vm2, %v1148_v8, %v12859_v61 }
 0x25d   :  { %1784 = vrot.lane.b32.xlu0 %v8151_v1, %s6636_s9  ;;  %1710 = vrot.lane.b32.xlu1 %v7927_v59, %s6634_s28  ;;  %s6638_s28 = smov 48  }
 0x25f   :  { %v8417_v5 = vpop.permute.xlu1 %1758  ;;  %v8419_v9 = vpop.permute.xlu0 %1684 }
 0x260   :  { %12858 = vst [vmem:[#allocation67_spill] sm:$0xff] %v8417_v5 }
 0x261   :  { %1394 = vrot.lane.b32.xlu1 %v1184_v17, %s6636_s9  ;;  %1396 = vrot.lane.b32.xlu0 %v1183_v11, %s6636_s9  ;;  %v8499_v17 = vld [vmem:[#allocation2 + $0x310] sm:$0xff] }
 0x262   :  { %12872 = vst [vmem:[#allocation80_spill] sm:$0xff] %v8499_v17 }
 0x263   :  { %v8429_v1 = vpop.permute.xlu1 %1854  ;;  %v8431_v26 = vpop.permute.xlu0 %2068 }
 0x264   :  { %12860 = vst [vmem:[#allocation68_spill] sm:$0xff] %v8429_v1  ;;  %v8537_v1 = vld [vmem:[#allocation2 + $0x350] sm:$0xff] }
 0x265   :  { %1786 = vrot.lane.b32.xlu1 %v8168_v16, %s6636_s9  ;;  %1788 = vrot.lane.b32.xlu0 %v8177_v62, %s6636_s9  ;;  %12881 = vst [vmem:[#allocation89_spill] sm:$0xff] %v8537_v1 }
 0x267   :  { %v8437_v32 = vpop.permute.xlu0 %1368  ;;  %v8439_v45 = vpop.permute.xlu1 %1686 }
 0x268   :  { %12861 = vst [vmem:[#allocation69_spill] sm:$0xff] %v8437_v32  ;;  %v8576_v32 = vld [vmem:[#allocation2 + $0x380] sm:$0xff] }
 0x269   :  { %2082 = vrot.lane.b32.xlu1 %v7811_v35, %s6635_s18  ;;  %2080 = vrot.lane.b32.xlu0 %v7791_v44, %s6635_s18  ;;  %12892 = vst [vmem:[#allocation100_spill] sm:$0xff] %v8576_v32 }
 0x26b   :  { %v8445_v11 = vpop.permute.xlu0 %1760  ;;  %v8447_v8 = vpop.permute.xlu1 %2070 }
 0x26c   :  { %12862 = vst [vmem:[#allocation70_spill] sm:$0xff] %v8445_v11 }
 0x26d   :  { %1790 = vrot.lane.b32.xlu1 %v8195_v49, %s6636_s9  ;;  %1792 = vrot.lane.b32.xlu0 %v8204_v39, %s6636_s9 }
 0x26f   :  { %v8453_v16 = vpop.permute.xlu0 %1856  ;;  %v8455_v62 = vpop.permute.xlu1 %1370 }
 0x270   :  { %12863 = vst [vmem:[#allocation71_spill] sm:$0xff] %v8453_v16  ;;  %12864 = vst [vmem:[#allocation72_spill] sm:$0xff] %v8455_v62  ;;  %v8521_v16 = vld [vmem:[#allocation2 + $0x320] sm:$0xff] }
 0x271   :  { %2086 = vrot.lane.b32.xlu1 %v7849_v52, %s6635_s18  ;;  %2084 = vrot.lane.b32.xlu0 %v7830_v33, %s6635_s18  ;;  %12877 = vst [vmem:[#allocation85_spill] sm:$0xff] %v8521_v16 }
 0x273   :  { %v8461_v44 = vpop.permute.xlu1 %1762  ;;  %v1689_v35 = vpop.permute.xlu0 %1688 }
 0x274   :  { %12865 = vst [vmem:[#allocation73_spill] sm:$0xff] %v8461_v44 }
 0x275   :  { %1794 = vrot.lane.b32.xlu1 %v8221_v13, %s6636_s9  ;;  %1796 = vrot.lane.b32.xlu0 %v8230_v27, %s6636_s9 }
 0x277   :  { %v8467_v39 = vpop.permute.xlu1 %1858  ;;  %v8469_v49 = vpop.permute.xlu0 %2072 }
 0x278   :  { %12866 = vst [vmem:[#allocation74_spill] sm:$0xff] %v8467_v39 }
 0x279   :  { %2090 = vrot.lane.b32.xlu1 %v7888_v24, %s6635_s18  ;;  %2088 = vrot.lane.b32.xlu0 %v7869_v22, %s6635_s18 }
 0x27b   :  { %v8475_v33 = vpop.permute.xlu0 %1372  ;;  %v1691_v52 = vpop.permute.xlu1 %1690 }
 0x27c   :  { %12867 = vst [vmem:[#allocation75_spill] sm:$0xff] %v8475_v33  ;;  %v8559_v33 = vld [vmem:[#allocation2 + $0x360] sm:$0xff] }
 0x27d   :  { %1798 = vrot.lane.b32.xlu1 %v8248_v51, %s6636_s9  ;;  %1800 = vrot.lane.b32.xlu0 %v8256_v42, %s6636_s9  ;;  %12887 = vst [vmem:[#allocation95_spill] sm:$0xff] %v8559_v33 }
 0x27f   :  { %v8481_v27 = vpop.permute.xlu0 %1764  ;;  %v8483_v13 = vpop.permute.xlu1 %2074 }
 0x280   :  { %12868 = vst [vmem:[#allocation76_spill] sm:$0xff] %v8481_v27 }
 0x281   :  { %2094 = vrot.lane.b32.xlu1 %v7927_v59, %s6635_s18  ;;  %2092 = vrot.lane.b32.xlu0 %v7907_v19, %s6635_s18  ;;  %v8503_v59 = vld [vmem:[#allocation2 + $0x300] sm:$0xff] }
 0x282   :  { %12873 = vst [vmem:[#allocation81_spill] sm:$0xff] %v8503_v59 }
 0x283   :  { %v8489_v22 = vpop.permute.xlu0 %1860  ;;  %v8491_v24 = vpop.permute.xlu1 %1374 }
 0x284   :  { %12869 = vst [vmem:[#allocation77_spill] sm:$0xff] %v8489_v22  ;;  %12870 = vst [vmem:[#allocation78_spill] sm:$0xff] %v8491_v24  ;;  %v8517_v22 = vld [vmem:[#allocation2 + $0x330] sm:$0xff] }
 0x285   :  { %1802 = vrot.lane.b32.xlu1 %v8274_v48, %s6636_s9  ;;  %1804 = vrot.lane.b32.xlu0 %v8283_v30, %s6636_s9  ;;  %12876 = vst [vmem:[#allocation84_spill] sm:$0xff] %v8517_v22 }
 0x287   :  { %v8497_v51 = vpop.permute.xlu1 %1766  ;;  %v1693_v42 = vpop.permute.xlu0 %1692 }
 0x288   :  { %12871 = vst [vmem:[#allocation79_spill] sm:$0xff] %v8497_v51 }
 0x289   :  { %2098 = vrot.lane.b32.xlu1 %v8499_v17, %s6635_s18  ;;  %2096 = vrot.lane.b32.xlu0 %v8503_v59, %s6635_s18 }
 0x28b   :  { %v8507_v19 = vpop.permute.xlu1 %1862  ;;  %v8509_v61 = vpop.permute.xlu0 %2076 }
 0x28c   :  { %12874 = vst [vmem:[#allocation82_spill] sm:$0xff] %v8507_v19 }
 0x28d   :  { %1806 = vrot.lane.b32.xlu1 %v8301_v7, %s6636_s9  ;;  %1808 = vrot.lane.b32.xlu0 %v8328_v46, %s6636_s9 }
 0x28f   :  { %v8515_v48 = vpop.permute.xlu0 %1376  ;;  %v1695_v30 = vpop.permute.xlu1 %1694 }
 0x290   :  { %12875 = vst [vmem:[#allocation83_spill] sm:$0xff] %v8515_v48  ;;  %v8541_v48 = vld [vmem:[#allocation2 + $0x340] sm:$0xff] }
 0x291   :  { %2102 = vrot.lane.b32.xlu1 %v8517_v22, %s6635_s18  ;;  %2100 = vrot.lane.b32.xlu0 %v8521_v16, %s6635_s18  ;;  %12882 = vst [vmem:[#allocation90_spill] sm:$0xff] %v8541_v48 }
 0x293   :  { %v8525_v19 = vpop.permute.xlu0 %1768  ;;  %v8527_v39 = vpop.permute.xlu1 %2078 }
 0x294   :  { %12878 = vst [vmem:[#allocation86_spill] sm:$0xff] %v8525_v19 }
 0x295   :  { %1810 = vrot.lane.b32.xlu1 %v8346_v31, %s6636_s9  ;;  %1812 = vrot.lane.b32.xlu0 %v8373_v15, %s6636_s9 }
 0x297   :  { %v8533_v7 = vpop.permute.xlu0 %1864  ;;  %v8535_v46 = vpop.permute.xlu1 %1378 }
 0x298   :  { %12879 = vst [vmem:[#allocation87_spill] sm:$0xff] %v8533_v7  ;;  %12880 = vst [vmem:[#allocation88_spill] sm:$0xff] %v8535_v46  ;;  %v8555_v46 = vld [vmem:[#allocation2 + $0x370] sm:$0xff] }
 0x299   :  { %2106 = vrot.lane.b32.xlu1 %v8537_v1, %s6635_s18  ;;  %2104 = vrot.lane.b32.xlu0 %v8541_v48, %s6635_s18  ;;  %12886 = vst [vmem:[#allocation94_spill] sm:$0xff] %v8555_v46 }
 0x29b   :  { %v8545_v24 = vpop.permute.xlu1 %1770  ;;  %v1697_v31 = vpop.permute.xlu0 %1696 }
 0x29c   :  { %12883 = vst [vmem:[#allocation91_spill] sm:$0xff] %v8545_v24 }
 0x29d   :  { %1814 = vrot.lane.b32.xlu1 %v8391_v38, %s6636_s9  ;;  %1816 = vrot.lane.b32.xlu0 %v8419_v9, %s6636_s9 }
 0x29f   :  { %v8551_v15 = vpop.permute.xlu1 %1866  ;;  %v8553_v7 = vpop.permute.xlu0 %1380 }
 0x2a0   :  { %12884 = vst [vmem:[#allocation92_spill] sm:$0xff] %v8551_v15  ;;  %12885 = vst [vmem:[#allocation93_spill] sm:$0xff] %v8553_v7  ;;  %v8572_v7 = vld [vmem:[#allocation2 + $0x390] sm:$0xff] }
 0x2a1   :  { %2110 = vrot.lane.b32.xlu1 %v8555_v46, %s6635_s18  ;;  %2108 = vrot.lane.b32.xlu0 %v8559_v33, %s6635_s18  ;;  %12891 = vst [vmem:[#allocation99_spill] sm:$0xff] %v8572_v7 }
 0x2a3   :  { %v8563_v62 = vpop.permute.xlu0 %1772  ;;  %v1699_v38 = vpop.permute.xlu1 %1698 }
 0x2a4   :  { %12888 = vst [vmem:[#allocation96_spill] sm:$0xff] %v8563_v62 }
 0x2a5   :  { %1818 = vrot.lane.b32.xlu1 %v8439_v45, %s6636_s9  ;;  %1820 = vrot.lane.b32.xlu0 %v1689_v35, %s6636_s9 }
 0x2a7   :  { %v8568_v9 = vpop.permute.xlu0 %1868  ;;  %v8570_v15 = vpop.permute.xlu1 %1382 }
 0x2a8   :  { %12889 = vst [vmem:[#allocation97_spill] sm:$0xff] %v8568_v9  ;;  %12890 = vst [vmem:[#allocation98_spill] sm:$0xff] %v8570_v15  ;;  %v8588_v9 = vld [vmem:[#allocation2 + $0x3b0] sm:$0xff]  ;;  %v8592_v15 = vld [vmem:[#allocation2 + $0x3a0] sm:$0xff] }
 0x2a9   :  { %2114 = vrot.lane.b32.xlu1 %v8572_v7, %s6635_s18  ;;  %2112 = vrot.lane.b32.xlu0 %v8576_v32, %s6635_s18  ;;  %12896 = vst [vmem:[#allocation104_spill] sm:$0xff] %v8588_v9  ;;  %12897 = vst [vmem:[#allocation105_spill] sm:$0xff] %v8592_v15 }
 0x2ab   :  { %v8580_v24 = vpop.permute.xlu1 %1774  ;;  %v1701_v19 = vpop.permute.xlu0 %1700 }
 0x2ac   :  { %12893 = vst [vmem:[#allocation101_spill] sm:$0xff] %v8580_v24 }
 0x2ad   :  { %1822 = vrot.lane.b32.xlu1 %v1691_v52, %s6636_s9  ;;  %1824 = vrot.lane.b32.xlu0 %v1693_v42, %s6636_s9 }
 0x2af   :  { %v8584_v45 = vpop.permute.xlu1 %1870  ;;  %v8586_v35 = vpop.permute.xlu0 %1384 }
 0x2b0   :  { %12894 = vst [vmem:[#allocation102_spill] sm:$0xff] %v8584_v45  ;;  %12895 = vst [vmem:[#allocation103_spill] sm:$0xff] %v8586_v35  ;;  %v8604_v45 = vld [vmem:[#allocation2 + $0x3d0] sm:$0xff]  ;;  %v8608_v35 = vld [vmem:[#allocation2 + $0x3c0] sm:$0xff] }
 0x2b1   :  { %2118 = vrot.lane.b32.xlu1 %v8588_v9, %s6635_s18  ;;  %2116 = vrot.lane.b32.xlu0 %v8592_v15, %s6635_s18  ;;  %12901 = vst [vmem:[#allocation109_spill] sm:$0xff] %v8604_v45  ;;  %12902 = vst [vmem:[#allocation110_spill] sm:$0xff] %v8608_v35 }
 0x2b3   :  { %v8596_v24 = vpop.permute.xlu0 %1744  ;;  %v1703_v62 = vpop.permute.xlu1 %1702 }
 0x2b4   :  { %12898 = vst [vmem:[#allocation106_spill] sm:$0xff] %v8596_v24 }
 0x2b5   :  { %1826 = vrot.lane.b32.xlu1 %v1695_v30, %s6636_s9  ;;  %1828 = vrot.lane.b32.xlu0 %v1697_v31, %s6636_s9 }
 0x2b7   :  { %v8600_v52 = vpop.permute.xlu0 %1776  ;;  %v8602_v42 = vpop.permute.xlu1 %1386 }
 0x2b8   :  { %12899 = vst [vmem:[#allocation107_spill] sm:$0xff] %v8600_v52  ;;  %12900 = vst [vmem:[#allocation108_spill] sm:$0xff] %v8602_v42  ;;  %v8620_v42 = vld [vmem:[#allocation2 + $0x3f0] sm:$0xff]  ;;  %v8624_v52 = vld [vmem:[#allocation2 + $0x3e0] sm:$0xff] }
 0x2b9   :  { %2122 = vrot.lane.b32.xlu1 %v8604_v45, %s6635_s18  ;;  %2120 = vrot.lane.b32.xlu0 %v8608_v35, %s6635_s18  ;;  %12906 = vst [vmem:[#allocation114_spill] sm:$0xff] %v8620_v42  ;;  %12907 = vst [vmem:[#allocation115_spill] sm:$0xff] %v8624_v52 }
 0x2bb   :  { %v8612_v44 = vpop.permute.xlu1 %1746  ;;  %v1705_v51 = vpop.permute.xlu0 %1704 }
 0x2bc   :  { %12903 = vst [vmem:[#allocation111_spill] sm:$0xff] %v8612_v44 }
 0x2bd   :  { %1830 = vrot.lane.b32.xlu1 %v1699_v38, %s6636_s9  ;;  %1832 = vrot.lane.b32.xlu0 %v1701_v19, %s6636_s9 }
 0x2bf   :  { %v8616_v30 = vpop.permute.xlu1 %1778  ;;  %v8618_v31 = vpop.permute.xlu0 %1388 }
 0x2c0   :  { %12904 = vst [vmem:[#allocation112_spill] sm:$0xff] %v8616_v30  ;;  %12905 = vst [vmem:[#allocation113_spill] sm:$0xff] %v8618_v31 }
 0x2c1   :  { %2126 = vrot.lane.b32.xlu1 %v8620_v42, %s6635_s18  ;;  %2124 = vrot.lane.b32.xlu0 %v8624_v52, %s6635_s18  ;;  %s6639_s18 = smov 32  }
 0x2c3   :  { %v8628_v11 = vpop.permute.xlu0 %1780  ;;  %v8630_v27 = vpop.permute.xlu1 %1706 }
 0x2c4   :  { %12908 = vst [vmem:[#allocation116_spill] sm:$0xff] %v8628_v11 }
 0x2c5   :  { %1834 = vrot.lane.b32.xlu1 %v1703_v62, %s6636_s9  ;;  %1836 = vrot.lane.b32.xlu0 %v1705_v51, %s6636_s9 }
 0x2c7   :  { %v8634_v19 = vpop.permute.xlu1 %1390  ;;  %v8636_v38 = vpop.permute.xlu0 %1708 }
 0x2c8   :  { %12909 = vst [vmem:[#allocation117_spill] sm:$0xff] %v8634_v19 }
 0x2cb   :  { %v8638_v31 = vpop.permute.xlu1 %1782  ;;  %v8640_v30 = vpop.permute.xlu0 %1392 }
 0x2cc   :  { %12910 = vst [vmem:[#allocation118_spill] sm:$0xff] %v8638_v31  ;;  %12911 = vst [vmem:[#allocation119_spill] sm:$0xff] %v8640_v30 }
 0x2cf   :  { %v8642_v5 = vpop.permute.xlu0 %1784  ;;  %v8644_v44 = vpop.permute.xlu1 %1710 }
 0x2d0   :  { %12912 = vst [vmem:[#allocation120_spill] sm:$0xff] %v8642_v5 }
 0x2d3   :  { %v8646_v24 = vpop.permute.xlu1 %1394  ;;  %v8648_v11 = vpop.permute.xlu0 %1396 }
 0x2d4   :  { %12913 = vst [vmem:[#allocation121_spill] sm:$0xff] %v8646_v24  ;;  %12914 = vst [vmem:[#allocation122_spill] sm:$0xff] %v8648_v11 }
 0x2d7   :  { %v8650_v2 = vpop.permute.xlu1 %1786  ;;  %v8652_v62 = vpop.permute.xlu0 %1788 }
 0x2d8   :  { %12915 = vst [vmem:[#allocation123_spill] sm:$0xff] %v8650_v2  ;;  %12916 = vst [vmem:[#allocation124_spill] sm:$0xff] %v8652_v62 }
 0x2db   :  { %v8654_v51 = vpop.permute.xlu1 %2082  ;;  %v8656_v19 = vpop.permute.xlu0 %2080 }
 0x2df   :  { %v8658_v42 = vpop.permute.xlu1 %1790  ;;  %v8660_v31 = vpop.permute.xlu0 %1792 }
 0x2e0   :  { %12917 = vst [vmem:[#allocation125_spill] sm:$0xff] %v8658_v42  ;;  %12918 = vst [vmem:[#allocation126_spill] sm:$0xff] %v8660_v31 }
 0x2e3   :  { %v8662_v30 = vpop.permute.xlu1 %2086  ;;  %v8664_v5 = vpop.permute.xlu0 %2084 }
 0x2e7   :  { %v8666_v52 = vpop.permute.xlu1 %1794  ;;  %v8668_v24 = vpop.permute.xlu0 %1796 }
 0x2e8   :  { %12919 = vst [vmem:[#allocation127_spill] sm:$0xff] %v8666_v52  ;;  %12920 = vst [vmem:[#allocation128_spill] sm:$0xff] %v8668_v24 }
 0x2eb   :  { %v8670_v11 = vpop.permute.xlu1 %2090  ;;  %v8672_v2 = vpop.permute.xlu0 %2088 }
 0x2ef   :  { %v8674_v62 = vpop.permute.xlu1 %1798  ;;  %v8676_v45 = vpop.permute.xlu0 %1800 }
 0x2f0   :  { %12921 = vst [vmem:[#allocation129_spill] sm:$0xff] %v8674_v62  ;;  %12922 = vst [vmem:[#allocation130_spill] sm:$0xff] %v8676_v45 }
 0x2f3   :  { %v8678_v35 = vpop.permute.xlu1 %2094  ;;  %v8680_v42 = vpop.permute.xlu0 %2092 }
 0x2f7   :  { %v8682_v31 = vpop.permute.xlu1 %1802  ;;  %v8684_v9 = vpop.permute.xlu0 %1804 }
 0x2f8   :  { %12923 = vst [vmem:[#allocation131_spill] sm:$0xff] %v8682_v31  ;;  %12924 = vst [vmem:[#allocation132_spill] sm:$0xff] %v8684_v9 }
 0x2fb   :  { %v8686_v15 = vpop.permute.xlu1 %2098  ;;  %v8688_v52 = vpop.permute.xlu0 %2096 }
 0x2ff   :  { %v8690_v24 = vpop.permute.xlu1 %1806  ;;  %v8692_v7 = vpop.permute.xlu0 %1808 }
 0x300   :  { %12925 = vst [vmem:[#allocation133_spill] sm:$0xff] %v8690_v24  ;;  %12926 = vst [vmem:[#allocation134_spill] sm:$0xff] %v8692_v7 }
 0x303   :  { %v8694_v32 = vpop.permute.xlu1 %2102  ;;  %v8696_v62 = vpop.permute.xlu0 %2100 }
 0x307   :  { %v8698_v45 = vpop.permute.xlu1 %1810  ;;  %v8700_v46 = vpop.permute.xlu0 %1812 }
 0x308   :  { %12927 = vst [vmem:[#allocation135_spill] sm:$0xff] %v8698_v45  ;;  %12928 = vst [vmem:[#allocation136_spill] sm:$0xff] %v8700_v46 }
 0x30b   :  { %v8702_v33 = vpop.permute.xlu1 %2106  ;;  %v8704_v31 = vpop.permute.xlu0 %2104 }
 0x30f   :  { %v8706_v9 = vpop.permute.xlu1 %1814  ;;  %v8708_v1 = vpop.permute.xlu0 %1816 }
 0x310   :  { %12929 = vst [vmem:[#allocation137_spill] sm:$0xff] %v8706_v9  ;;  %12930 = vst [vmem:[#allocation138_spill] sm:$0xff] %v8708_v1 }
 0x313   :  { %v8710_v48 = vpop.permute.xlu1 %2110  ;;  %v8712_v24 = vpop.permute.xlu0 %2108 }
 0x314   :  { %12931 = vst [vmem:[#allocation139_spill] sm:$0xff] %v8710_v48  ;;  %12932 = vst [vmem:[#allocation140_spill] sm:$0xff] %v8712_v24 }
 0x317   :  { %v8714_v7 = vpop.permute.xlu1 %1818  ;;  %v8716_v22 = vpop.permute.xlu0 %1820 }
 0x318   :  { %12933 = vst [vmem:[#allocation141_spill] sm:$0xff] %v8714_v7  ;;  %12934 = vst [vmem:[#allocation142_spill] sm:$0xff] %v8716_v22 }
 0x31b   :  { %v8718_v16 = vpop.permute.xlu1 %2114  ;;  %v8720_v45 = vpop.permute.xlu0 %2112 }
 0x31c   :  { %12935 = vst [vmem:[#allocation143_spill] sm:$0xff] %v8718_v16  ;;  %12936 = vst [vmem:[#allocation144_spill] sm:$0xff] %v8720_v45 }
 0x31f   :  { %v8722_v46 = vpop.permute.xlu1 %1822  ;;  %v8724_v17 = vpop.permute.xlu0 %1824 }
 0x320   :  { %12937 = vst [vmem:[#allocation145_spill] sm:$0xff] %v8722_v46  ;;  %12938 = vst [vmem:[#allocation146_spill] sm:$0xff] %v8724_v17  ;;  %v2192_v17 = vrot.slane %v7614_v41, 1  ;;  %v2194_v41 = vrot.slane %v7674_v28, 1  ;;  %v2197_v28 = vrot.slane %v7832_v57, 1  ;;  %v2200_v57 = vrot.slane %v7951_v29, 1 }
 0x323   :  { %v8726_v59 = vpop.permute.xlu1 %2118  ;;  %v8728_v9 = vpop.permute.xlu0 %2116 }
 0x324   :  { %12939 = vst [vmem:[#allocation147_spill] sm:$0xff] %v8726_v59  ;;  %12940 = vst [vmem:[#allocation148_spill] sm:$0xff] %v8728_v9 }
 0x327   :  { %v8730_v1 = vpop.permute.xlu1 %1826  ;;  %v8732_v48 = vpop.permute.xlu0 %1828 }
 0x328   :  { %12941 = vst [vmem:[#allocation149_spill] sm:$0xff] %v8730_v1  ;;  %12942 = vst [vmem:[#allocation150_spill] sm:$0xff] %v8732_v48 }
 0x32b   :  { %v8734_v24 = vpop.permute.xlu1 %2122  ;;  %v8736_v7 = vpop.permute.xlu0 %2120 }
 0x32f   :  { %v8738_v22 = vpop.permute.xlu1 %1830  ;;  %v8740_v16 = vpop.permute.xlu0 %1832 }
 0x330   :  { %12943 = vst [vmem:[#allocation151_spill] sm:$0xff] %v8738_v22  ;;  %12944 = vst [vmem:[#allocation152_spill] sm:$0xff] %v8740_v16  ;;  %v2193_v16 = vrot.slane %v7634_v54, 1  ;;  %v2196_v54 = vrot.slane %v7773_v36, 1 }
 0x332   :  { %v2318_v1 = vsel %vm2256_vm3, %v2193_v16, %v2194_v41  ;;  %v2315_v36 = vsel %vm2256_vm3, %v2196_v54, %v2197_v28 }
 0x333   :  { %v2127_v45 = vpop.permute.xlu1 %2126  ;;  %v8742_v46 = vpop.permute.xlu0 %2124 }
 0x334   :  { %v2255_v59 = vrot.slane %v2127_v45, 1  ;;  %v2254_v9 = vrot.slane %v8742_v46, 1  ;;  %v2195_v45 = vrot.slane %v7732_v50, 1  ;;  %v12945_v50 = vld [vmem:[#allocation13_spill] sm:$0xff]  ;;  %v9046_v46 = vld [vmem:[#allocation2 + $0x20] sm:$0xff] }
 0x335   :  { %12971 = vst [vmem:[#allocation157_spill] sm:$0xff] %v9046_v46 }
 0x336   :  { %v2320_v48 = vsel %vm2256_vm3, %v2255_v59, %v2192_v17  ;;  %v2257_v22 = vsel %vm2256_vm3, %v2254_v9, %v2255_v59  ;;  %v2319_v59 = vsel %vm2256_vm3, %v2192_v17, %v2193_v16  ;;  %v2199_v16 = vrot.slane %v7929_v47, 1  ;;  %v12946_v17 = vld [vmem:[#allocation20_spill] sm:$0xff] }
 0x337   :  { %2387 = vrot.lane.b32.xlu1 %v2320_v48, %s6636_s9  ;;  %2385 = vrot.lane.b32.xlu0 %v2257_v22, %s6636_s9  ;;  %v2198_v22 = vrot.slane %v12945_v50, 1 }
 0x339   :  { %v2314_v48 = vsel %vm2256_vm3, %v2197_v28, %v2198_v22  ;;  %v2313_v47 = vsel %vm2256_vm3, %v2198_v22, %v2199_v16  ;;  %v2204_v28 = vrot.slane %v8045_v34, 1  ;;  %v2208_v34 = vrot.slane %v8133_v23, 1 }
 0x33b   :  { %1838 = vrot.lane.b32.xlu1 %v8630_v27, %s6636_s9  ;;  %1840 = vrot.lane.b32.xlu0 %v8636_v38, %s6636_s9  ;;  %v2317_v27 = vsel %vm2256_vm3, %v2194_v41, %v2195_v45  ;;  %v12947_v38 = vld [vmem:[#allocation23_spill] sm:$0xff] }
 0x33c   :  { %v2202_v41 = vrot.slane %v12947_v38, 1 }
 0x33f   :  { %2391 = vrot.lane.b32.xlu1 %v2318_v1, %s6636_s9  ;;  %2389 = vrot.lane.b32.xlu0 %v2319_v59, %s6636_s9  ;;  %v2316_v1 = vsel %vm2256_vm3, %v2195_v45, %v2196_v54  ;;  %v12948_v45 = vld [vmem:[#allocation26_spill] sm:$0xff]  ;;  %v2312_v54 = vsel %vm2256_vm3, %v2199_v16, %v2200_v57  ;;  %v2206_v16 = vrot.slane %v8089_v55, 1  ;;  %v2210_v55 = vrot.slane %v8160_v25, 1 }
 0x340   :  { %v2203_v59 = vrot.slane %v12948_v45, 1 }
 0x342   :  { %v2309_v22 = vsel %vm2256_vm3, %v2202_v41, %v2203_v59 }
 0x343   :  { %1842 = vrot.lane.b32.xlu1 %v8644_v44, %s6636_s9  ;;  %2393 = vrot.lane.b32.xlu0 %v2317_v27, %s6636_s9  ;;  %v2201_v44 = vrot.slane %v12946_v17, 1  ;;  %v2205_v27 = vrot.slane %v8070_v21, 1 }
 0x345   :  { %v2311_v29 = vsel %vm2256_vm3, %v2200_v57, %v2201_v44  ;;  %v2310_v50 = vsel %vm2256_vm3, %v2201_v44, %v2202_v41  ;;  %v2307_v21 = vsel %vm2256_vm3, %v2204_v28, %v2205_v27  ;;  %v2209_v57 = vrot.slane %v8149_v53, 1  ;;  %v12949_v41 = vld [vmem:[#allocation45_spill] sm:$0xff] }
 0x346   :  { %v2306_v17 = vsel %vm2256_vm3, %v2205_v27, %v2206_v16  ;;  %v2211_v44 = vrot.slane %v8175_v3, 1  ;;  %v2212_v53 = vrot.slane %v8186_v12, 1  ;;  %v2214_v3 = vrot.slane %v8212_v4, 1 }
 0x347   :  { %2395 = vrot.lane.b32.xlu1 %v2316_v1, %s6636_s9  ;;  %2397 = vrot.lane.b32.xlu0 %v2315_v36, %s6636_s9  ;;  %v2207_v1 = vrot.slane %v8116_v58, 1  ;;  %v2308_v36 = vsel %vm2256_vm3, %v2203_v59, %v2204_v28  ;;  %v2303_v23 = vsel %vm2256_vm3, %v2208_v34, %v2209_v57  ;;  %v2302_v38 = vsel %vm2256_vm3, %v2209_v57, %v2210_v55 }
 0x348   :  { %v2301_v25 = vsel %vm2256_vm3, %v2210_v55, %v2211_v44  ;;  %v2215_v45 = vrot.slane %v12949_v41, 1  ;;  %v2300_v59 = vsel %vm2256_vm3, %v2211_v44, %v2212_v53  ;;  %v2218_v28 = vrot.slane %v8265_v56, 1 }
 0x349   :  { %v2305_v58 = vsel %vm2256_vm3, %v2206_v16, %v2207_v1  ;;  %v2219_v27 = vrot.slane %v8281_v60, 1  ;;  %v2222_v60 = vrot.slane %v8337_v10, 1  ;;  %v2227_v57 = vrot.slane %v8447_v8, 1 }
 0x34a   :  { %v2297_v4 = vsel %vm2256_vm3, %v2214_v3, %v2215_v45  ;;  %v2230_v8 = vrot.slane %v8509_v61, 1  ;;  %v2231_v44 = vrot.slane %v8527_v39, 1  ;;  %v2235_v61 = vrot.slane %v8662_v30, 1 }
 0x34b   :  { %2399 = vrot.lane.b32.xlu1 %v2314_v48, %s6636_s9  ;;  %2401 = vrot.lane.b32.xlu0 %v2313_v47, %s6636_s9  ;;  %v2304_v48 = vsel %vm2256_vm3, %v2207_v1, %v2208_v34  ;;  %v2213_v47 = vrot.slane %v8202_v20, 1  ;;  %v2216_v20 = vrot.slane %v8239_v0, 1  ;;  %v2293_v56 = vsel %vm2256_vm3, %v2218_v28, %v2219_v27 }
 0x34c   :  { %v2223_v1 = vrot.slane %v8355_v63, 1  ;;  %v2226_v63 = vrot.slane %v8431_v26, 1  ;;  %v2281_v39 = vsel %vm2256_vm3, %v2230_v8, %v2231_v44  ;;  %v2239_v30 = vrot.slane %v8678_v35, 1 }
 0x34d   :  { %v2299_v12 = vsel %vm2256_vm3, %v2212_v53, %v2213_v47  ;;  %v2238_v41 = vrot.slane %v8680_v42, 1  ;;  %v2243_v42 = vrot.slane %v8694_v32, 1 }
 0x34e   :  { %v2289_v10 = vsel %vm2256_vm3, %v2222_v60, %v2223_v1  ;;  %v2285_v26 = vsel %vm2256_vm3, %v2226_v63, %v2227_v57 }
 0x34f   :  { %2403 = vrot.lane.b32.xlu1 %v2312_v54, %s6636_s9  ;;  %2405 = vrot.lane.b32.xlu0 %v2311_v29, %s6636_s9  ;;  %v2217_v54 = vrot.slane %v8254_v18, 1  ;;  %v2298_v29 = vsel %vm2256_vm3, %v2213_v47, %v2214_v3  ;;  %v2220_v18 = vrot.slane %v8292_v37, 1  ;;  %v2224_v37 = vrot.slane %v8382_v40, 1 }
 0x350   :  { %v2234_v47 = vrot.slane %v8664_v5, 1  ;;  %v2273_v35 = vsel %vm2256_vm3, %v2238_v41, %v2239_v30 }
 0x351   :  { %v2295_v0 = vsel %vm2256_vm3, %v2216_v20, %v2217_v54  ;;  %v2294_v16 = vsel %vm2256_vm3, %v2217_v54, %v2218_v28  ;;  %v8969_v28 = vpop.permute.xlu0 %1836 }
 0x352   :  { %v2277_v5 = vsel %vm2256_vm3, %v2234_v47, %v2235_v61  ;;  %12951 = vst [vmem:[#allocation20_spill] sm:$0xff] %v8969_v28  ;;  %v9210_v28 = vld [vmem:[#allocation2 + $0x1d0] sm:$0xff] }
 0x353   :  { %2407 = vrot.lane.b32.xlu1 %v2310_v50, %s6636_s9  ;;  %2409 = vrot.lane.b32.xlu0 %v2309_v22, %s6636_s9  ;;  %v2296_v50 = vsel %vm2256_vm3, %v2215_v45, %v2216_v20  ;;  %v2221_v22 = vrot.slane %v8310_v6, 1  ;;  %v2242_v20 = vrot.slane %v8696_v62, 1  ;;  %v8967_v62 = vpop.permute.xlu1 %1834 }
 0x354   :  { %12950 = vst [vmem:[#allocation13_spill] sm:$0xff] %v8967_v62 }
 0x355   :  { %v2291_v6 = vsel %vm2256_vm3, %v2220_v18, %v2221_v22  ;;  %v2290_v34 = vsel %vm2256_vm3, %v2221_v22, %v2222_v60  ;;  %v2269_v32 = vsel %vm2256_vm3, %v2242_v20, %v2243_v42 }
 0x357   :  { %2411 = vrot.lane.b32.xlu1 %v2308_v36, %s6636_s9  ;;  %2413 = vrot.lane.b32.xlu0 %v2307_v21, %s6636_s9  ;;  %v2292_v36 = vsel %vm2256_vm3, %v2219_v27, %v2220_v18  ;;  %v2225_v21 = vrot.slane %v8401_v43, 1  ;;  %v2228_v43 = vrot.slane %v8469_v49, 1  ;;  %v12952_v27 = vld [vmem:[#allocation139_spill] sm:$0xff] }
 0x359   :  { %v2287_v40 = vsel %vm2256_vm3, %v2224_v37, %v2225_v21  ;;  %v2286_v55 = vsel %vm2256_vm3, %v2225_v21, %v2226_v63 }
 0x35b   :  { %2415 = vrot.lane.b32.xlu1 %v2306_v17, %s6636_s9  ;;  %2417 = vrot.lane.b32.xlu0 %v2305_v58, %s6636_s9  ;;  %v2288_v17 = vsel %vm2256_vm3, %v2223_v1, %v2224_v37  ;;  %v2229_v58 = vrot.slane %v8483_v13, 1  ;;  %v2233_v13 = vrot.slane %v8654_v51, 1  ;;  %v2237_v51 = vrot.slane %v8670_v11, 1  ;;  %v12957_v1 = vld [vmem:[#allocation144_spill] sm:$0xff] }
 0x35c   :  { %v2241_v11 = vrot.slane %v8686_v15, 1 }
 0x35d   :  { %v2283_v49 = vsel %vm2256_vm3, %v2228_v43, %v2229_v58  ;;  %v2282_v53 = vsel %vm2256_vm3, %v2229_v58, %v2230_v8  ;;  %v2278_v3 = vsel %vm2256_vm3, %v2233_v13, %v2234_v47  ;;  %v2252_v8 = vrot.slane %v8736_v7, 1 }
 0x35f   :  { %2419 = vrot.lane.b32.xlu1 %v2304_v48, %s6636_s9  ;;  %2421 = vrot.lane.b32.xlu0 %v2303_v23, %s6636_s9  ;;  %v2284_v48 = vsel %vm2256_vm3, %v2227_v57, %v2228_v43  ;;  %v2232_v23 = vrot.slane %v8656_v19, 1  ;;  %v12961_v57 = vld [vmem:[#allocation148_spill] sm:$0xff] }
 0x361   :  { %v2279_v19 = vsel %vm2256_vm3, %v2232_v23, %v2233_v13 }
 0x363   :  { %2423 = vrot.lane.b32.xlu1 %v2302_v38, %s6636_s9  ;;  %2425 = vrot.lane.b32.xlu0 %v2301_v25, %s6636_s9  ;;  %v2280_v38 = vsel %vm2256_vm3, %v2231_v44, %v2232_v23  ;;  %v2236_v25 = vrot.slane %v8672_v2, 1 }
 0x365   :  { %v2276_v45 = vsel %vm2256_vm3, %v2235_v61, %v2236_v25  ;;  %v2275_v2 = vsel %vm2256_vm3, %v2236_v25, %v2237_v51  ;;  %v9034_v61 = vld [vmem:[#allocation2] sm:$0xff]  ;;  %v9054_v25 = vld [vmem:[#allocation2 + $0x30] sm:$0xff] }
 0x366   :  { %12968 = vst [vmem:[#allocation154_spill] sm:$0xff] %v9034_v61 }
 0x367   :  { %2427 = vrot.lane.b32.xlu1 %v2300_v59, %s6636_s9  ;;  %2429 = vrot.lane.b32.xlu0 %v2299_v12, %s6636_s9  ;;  %v2240_v59 = vrot.slane %v8688_v52, 1  ;;  %v2274_v12 = vsel %vm2256_vm3, %v2237_v51, %v2238_v41  ;;  %v2245_v52 = vrot.slane %v8702_v33, 1  ;;  %v9066_v41 = vld [vmem:[#allocation2 + $0x50] sm:$0xff] }
 0x369   :  { %v2272_v54 = vsel %vm2256_vm3, %v2239_v30, %v2240_v59  ;;  %v2271_v15 = vsel %vm2256_vm3, %v2240_v59, %v2241_v11  ;;  %v9078_v59 = vld [vmem:[#allocation2 + $0x70] sm:$0xff] }
 0x36b   :  { %2431 = vrot.lane.b32.xlu1 %v2298_v29, %s6636_s9  ;;  %2433 = vrot.lane.b32.xlu0 %v2297_v4, %s6636_s9  ;;  %v2244_v29 = vrot.slane %v8704_v31, 1  ;;  %v2270_v4 = vsel %vm2256_vm3, %v2241_v11, %v2242_v20  ;;  %v9090_v20 = vld [vmem:[#allocation2 + $0x90] sm:$0xff] }
 0x36d   :  { %v2268_v31 = vsel %vm2256_vm3, %v2243_v42, %v2244_v29  ;;  %v2267_v18 = vsel %vm2256_vm3, %v2244_v29, %v2245_v52  ;;  %v9102_v29 = vld [vmem:[#allocation2 + $0xb0] sm:$0xff] }
 0x36f   :  { %2435 = vrot.lane.b32.xlu1 %v2296_v50, %s6636_s9  ;;  %2437 = vrot.lane.b32.xlu0 %v2295_v0, %s6636_s9  ;;  %v2247_v50 = vrot.slane %v12952_v27, 1  ;;  %v12953_v0 = vld [vmem:[#allocation140_spill] sm:$0xff] }
 0x370   :  { %v2246_v33 = vrot.slane %v12953_v0, 1  ;;  %v9118_v0 = vld [vmem:[#allocation2 + $0xe0] sm:$0xff] }
 0x371   :  { %12989 = vst [vmem:[#allocation175_spill] sm:$0xff] %v9118_v0 }
 0x372   :  { %v2265_v37 = vsel %vm2256_vm3, %v2246_v33, %v2247_v50 }
 0x373   :  { %2439 = vrot.lane.b32.xlu1 %v2294_v16, %s6636_s9  ;;  %2441 = vrot.lane.b32.xlu0 %v2293_v56, %s6636_s9  ;;  %v12956_v56 = vld [vmem:[#allocation143_spill] sm:$0xff] }
 0x374   :  { %v2249_v60 = vrot.slane %v12956_v56, 1  ;;  %v9130_v56 = vld [vmem:[#allocation2 + $0x100] sm:$0xff] }
 0x375   :  { %12992 = vst [vmem:[#allocation178_spill] sm:$0xff] %v9130_v56 }
 0x377   :  { %2443 = vrot.lane.b32.xlu1 %v2292_v36, %s6636_s9  ;;  %2445 = vrot.lane.b32.xlu0 %v2291_v6, %s6636_s9  ;;  %v2248_v36 = vrot.slane %v12957_v1, 1  ;;  %v2266_v6 = vsel %vm2256_vm3, %v2245_v52, %v2246_v33 }
 0x379   :  { %v2263_v43 = vsel %vm2256_vm3, %v2248_v36, %v2249_v60 }
 0x37b   :  { %2447 = vrot.lane.b32.xlu1 %v2290_v34, %s6636_s9  ;;  %2449 = vrot.lane.b32.xlu0 %v2289_v10, %s6636_s9  ;;  %v12960_v10 = vld [vmem:[#allocation147_spill] sm:$0xff] }
 0x37c   :  { %v2251_v63 = vrot.slane %v12960_v10, 1 }
 0x37e   :  { %v2260_v23 = vsel %vm2256_vm3, %v2251_v63, %v2252_v8 }
 0x37f   :  { %2451 = vrot.lane.b32.xlu1 %v2288_v17, %s6636_s9  ;;  %2453 = vrot.lane.b32.xlu0 %v2287_v40, %s6636_s9  ;;  %v2250_v17 = vrot.slane %v12961_v57, 1  ;;  %v2264_v40 = vsel %vm2256_vm3, %v2247_v50, %v2248_v36  ;;  %v9114_v50 = vld [vmem:[#allocation2 + $0xd0] sm:$0xff]  ;;  %v9154_v57 = vld [vmem:[#allocation2 + $0x140] sm:$0xff] }
 0x380   :  { %v9138_v36 = vld [vmem:[#allocation2 + $0x110] sm:$0xff]  ;;  %12998 = vst [vmem:[#allocation184_spill] sm:$0xff] %v9154_v57 }
 0x381   :  { %v2262_v44 = vsel %vm2256_vm3, %v2249_v60, %v2250_v17 }
 0x383   :  { %2455 = vrot.lane.b32.xlu1 %v2286_v55, %s6636_s9  ;;  %2457 = vrot.lane.b32.xlu0 %v2285_v26, %s6636_s9  ;;  %v2253_v26 = vrot.slane %v8734_v24, 1 }
 0x385   :  { %v2259_v24 = vsel %vm2256_vm3, %v2252_v8, %v2253_v26 }
 0x387   :  { %2459 = vrot.lane.b32.xlu1 %v2284_v48, %s6636_s9  ;;  %2461 = vrot.lane.b32.xlu0 %v2283_v49, %s6636_s9  ;;  %v2261_v48 = vsel %vm2256_vm3, %v2250_v17, %v2251_v63  ;;  %v9150_v63 = vld [vmem:[#allocation2 + $0x130] sm:$0xff] }
 0x38b   :  { %2463 = vrot.lane.b32.xlu1 %v2282_v53, %s6636_s9  ;;  %2465 = vrot.lane.b32.xlu0 %v2281_v39, %s6636_s9  ;;  %v2258_v39 = vsel %vm2256_vm3, %v2253_v26, %v2254_v9  ;;  %v9166_v26 = vld [vmem:[#allocation2 + $0x160] sm:$0xff] }
 0x38c   :  { %13001 = vst [vmem:[#allocation187_spill] sm:$0xff] %v9166_v26 }
 0x38f   :  { %2467 = vrot.lane.b32.xlu1 %v2280_v38, %s6636_s9  ;;  %2469 = vrot.lane.b32.xlu0 %v2279_v19, %s6636_s9  ;;  %v9042_v19 = vld [vmem:[#allocation2 + $0x10] sm:$0xff] }
 0x393   :  { %2471 = vrot.lane.b32.xlu1 %v2278_v3, %s6636_s9  ;;  %2473 = vrot.lane.b32.xlu0 %v2277_v5, %s6636_s9  ;;  %v9058_v3 = vld [vmem:[#allocation2 + $0x40] sm:$0xff] }
 0x394   :  { %12974 = vst [vmem:[#allocation160_spill] sm:$0xff] %v9058_v3 }
 0x397   :  { %2475 = vrot.lane.b32.xlu1 %v2276_v45, %s6636_s9  ;;  %2477 = vrot.lane.b32.xlu0 %v2275_v2, %s6636_s9  ;;  %v9070_v45 = vld [vmem:[#allocation2 + $0x60] sm:$0xff] }
 0x398   :  { %12977 = vst [vmem:[#allocation163_spill] sm:$0xff] %v9070_v45 }
 0x39b   :  { %2479 = vrot.lane.b32.xlu1 %v2274_v12, %s6636_s9  ;;  %2481 = vrot.lane.b32.xlu0 %v2273_v35, %s6636_s9  ;;  %v9082_v12 = vld [vmem:[#allocation2 + $0x80] sm:$0xff] }
 0x39c   :  { %12980 = vst [vmem:[#allocation166_spill] sm:$0xff] %v9082_v12 }
 0x39f   :  { %2483 = vrot.lane.b32.xlu1 %v2272_v54, %s6636_s9  ;;  %2485 = vrot.lane.b32.xlu0 %v2271_v15, %s6636_s9  ;;  %v9094_v54 = vld [vmem:[#allocation2 + $0xa0] sm:$0xff] }
 0x3a0   :  { %12983 = vst [vmem:[#allocation169_spill] sm:$0xff] %v9094_v54 }
 0x3a3   :  { %2487 = vrot.lane.b32.xlu1 %v2270_v4, %s6636_s9  ;;  %2489 = vrot.lane.b32.xlu0 %v2269_v32, %s6636_s9  ;;  %v9106_v4 = vld [vmem:[#allocation2 + $0xc0] sm:$0xff] }
 0x3a4   :  { %12986 = vst [vmem:[#allocation172_spill] sm:$0xff] %v9106_v4 }
 0x3a7   :  { %2491 = vrot.lane.b32.xlu1 %v2268_v31, %s6636_s9  ;;  %2493 = vrot.lane.b32.xlu0 %v2267_v18, %s6636_s9  ;;  %v9126_v18 = vld [vmem:[#allocation2 + $0xf0] sm:$0xff] }
 0x3a9   :  { %v8979_v22 = vpop.permute.xlu1 %2387  ;;  %v8981_v16 = vpop.permute.xlu0 %2385 }
 0x3aa   :  { %12954 = vst [vmem:[#allocation23_spill] sm:$0xff] %v8979_v22  ;;  %12955 = vst [vmem:[#allocation26_spill] sm:$0xff] %v8981_v16 }
 0x3ab   :  { %2495 = vrot.lane.b32.xlu1 %v2266_v6, %s6636_s9  ;;  %2497 = vrot.lane.b32.xlu0 %v2265_v37, %s6636_s9  ;;  %v9142_v6 = vld [vmem:[#allocation2 + $0x120] sm:$0xff] }
 0x3ac   :  { %12995 = vst [vmem:[#allocation181_spill] sm:$0xff] %v9142_v6 }
 0x3ad   :  { %v8991_v21 = vpop.permute.xlu1 %1838  ;;  %v8993_v34 = vpop.permute.xlu0 %1840 }
 0x3ae   :  { %12958 = vst [vmem:[#allocation45_spill] sm:$0xff] %v8991_v21  ;;  %12959 = vst [vmem:[#allocation139_spill] sm:$0xff] %v8993_v34  ;;  %v9186_v34 = vld [vmem:[#allocation2 + $0x190] sm:$0xff] }
 0x3af   :  { %2499 = vrot.lane.b32.xlu1 %v2264_v40, %s6636_s9  ;;  %2501 = vrot.lane.b32.xlu0 %v2263_v43, %s6636_s9  ;;  %v9162_v43 = vld [vmem:[#allocation2 + $0x150] sm:$0xff] }
 0x3b1   :  { %v9003_v58 = vpop.permute.xlu1 %2391  ;;  %v9005_v55 = vpop.permute.xlu0 %2389 }
 0x3b2   :  { %12962 = vst [vmem:[#allocation140_spill] sm:$0xff] %v9003_v58  ;;  %12963 = vst [vmem:[#allocation143_spill] sm:$0xff] %v9005_v55 }
 0x3b3   :  { %2503 = vrot.lane.b32.xlu1 %v2262_v44, %s6636_s9  ;;  %2505 = vrot.lane.b32.xlu0 %v2261_v48, %s6636_s9  ;;  %v9174_v48 = vld [vmem:[#allocation2 + $0x170] sm:$0xff] }
 0x3b5   :  { %v9015_v49 = vpop.permute.xlu1 %1842  ;;  %v9017_v13 = vpop.permute.xlu0 %2393 }
 0x3b6   :  { %12964 = vst [vmem:[#allocation144_spill] sm:$0xff] %v9015_v49  ;;  %12965 = vst [vmem:[#allocation147_spill] sm:$0xff] %v9017_v13  ;;  %v9190_v49 = vld [vmem:[#allocation2 + $0x1a0] sm:$0xff] }
 0x3b7   :  { %2507 = vrot.lane.b32.xlu1 %v2260_v23, %s6636_s9  ;;  %2509 = vrot.lane.b32.xlu0 %v2259_v24, %s6636_s9  ;;  %v9178_v23 = vld [vmem:[#allocation2 + $0x180] sm:$0xff]  ;;  %13007 = vst [vmem:[#allocation193_spill] sm:$0xff] %v9190_v49 }
 0x3b8   :  { %13004 = vst [vmem:[#allocation190_spill] sm:$0xff] %v9178_v23 }
 0x3b9   :  { %v9025_v7 = vpop.permute.xlu1 %2395  ;;  %v9027_v53 = vpop.permute.xlu0 %2397 }
 0x3ba   :  { %12966 = vst [vmem:[#allocation148_spill] sm:$0xff] %v9025_v7  ;;  %12967 = vst [vmem:[#allocation153_spill] sm:$0xff] %v9027_v53  ;;  %v13050_v7 = vld [vmem:[#allocation84_spill] sm:$0xff] }
 0x3bb   :  { %2511 = vrot.lane.b32.xlu1 %v2258_v39, %s6636_s9  ;;  %2641 = vrot.lane.b32.xlu0 %v9034_v61, %s6637_s3  ;;  %v13063_v53 = vld [vmem:[#allocation104_spill] sm:$0xff] }
 0x3bd   :  { %v9038_v47 = vpop.permute.xlu1 %2399  ;;  %v9040_v38 = vpop.permute.xlu0 %2401 }
 0x3be   :  { %12969 = vst [vmem:[#allocation155_spill] sm:$0xff] %v9038_v47  ;;  %12970 = vst [vmem:[#allocation156_spill] sm:$0xff] %v9040_v38  ;;  %v13046_v38 = vld [vmem:[#allocation80_spill] sm:$0xff]  ;;  %v13051_v47 = vld [vmem:[#allocation90_spill] sm:$0xff] }
 0x3bf   :  { %2643 = vrot.lane.b32.xlu1 %v9042_v19, %s6637_s3  ;;  %2645 = vrot.lane.b32.xlu0 %v9046_v46, %s6637_s3 }
 0x3c1   :  { %v9050_v9 = vpop.permute.xlu1 %2403  ;;  %v9052_v51 = vpop.permute.xlu0 %2405 }
 0x3c2   :  { %12972 = vst [vmem:[#allocation158_spill] sm:$0xff] %v9050_v9  ;;  %12973 = vst [vmem:[#allocation159_spill] sm:$0xff] %v9052_v51  ;;  %v9318_v9 = vld [vmem:[#allocation2 + $0x2f0] sm:$0xff] }
 0x3c3   :  { %2647 = vrot.lane.b32.xlu1 %v9054_v25, %s6637_s3  ;;  %2649 = vrot.lane.b32.xlu0 %v9058_v3, %s6637_s3  ;;  %13042 = vst [vmem:[#allocation228_spill] sm:$0xff] %v9318_v9  ;;  %v13047_v51 = vld [vmem:[#allocation85_spill] sm:$0xff] }
 0x3c5   :  { %v9062_v5 = vpop.permute.xlu1 %2407  ;;  %v9064_v30 = vpop.permute.xlu0 %2409 }
 0x3c6   :  { %12975 = vst [vmem:[#allocation161_spill] sm:$0xff] %v9062_v5  ;;  %12976 = vst [vmem:[#allocation162_spill] sm:$0xff] %v9064_v30  ;;  %v9306_v30 = vld [vmem:[#allocation2 + $0x2d0] sm:$0xff] }
 0x3c7   :  { %2651 = vrot.lane.b32.xlu1 %v9066_v41, %s6637_s3  ;;  %2653 = vrot.lane.b32.xlu0 %v9070_v45, %s6637_s3  ;;  %13038 = vst [vmem:[#allocation224_spill] sm:$0xff] %v9306_v30 }
 0x3c9   :  { %v9074_v2 = vpop.permute.xlu1 %2411  ;;  %v9076_v11 = vpop.permute.xlu0 %2413 }
 0x3ca   :  { %12978 = vst [vmem:[#allocation164_spill] sm:$0xff] %v9074_v2  ;;  %12979 = vst [vmem:[#allocation165_spill] sm:$0xff] %v9076_v11  ;;  %v9294_v2 = vld [vmem:[#allocation2 + $0x2b0] sm:$0xff] }
 0x3cb   :  { %2655 = vrot.lane.b32.xlu1 %v9078_v59, %s6637_s3  ;;  %2657 = vrot.lane.b32.xlu0 %v9082_v12, %s6637_s3  ;;  %13034 = vst [vmem:[#allocation220_spill] sm:$0xff] %v9294_v2 }
 0x3cd   :  { %v9086_v35 = vpop.permute.xlu1 %2415  ;;  %v9088_v42 = vpop.permute.xlu0 %2417 }
 0x3ce   :  { %12981 = vst [vmem:[#allocation167_spill] sm:$0xff] %v9086_v35  ;;  %12982 = vst [vmem:[#allocation168_spill] sm:$0xff] %v9088_v42  ;;  %v9282_v42 = vld [vmem:[#allocation2 + $0x290] sm:$0xff] }
 0x3cf   :  { %2659 = vrot.lane.b32.xlu1 %v9090_v20, %s6637_s3  ;;  %2661 = vrot.lane.b32.xlu0 %v9094_v54, %s6637_s3 }
 0x3d1   :  { %v9098_v15 = vpop.permute.xlu1 %2419  ;;  %v9100_v52 = vpop.permute.xlu0 %2421 }
 0x3d2   :  { %12984 = vst [vmem:[#allocation170_spill] sm:$0xff] %v9098_v15  ;;  %12985 = vst [vmem:[#allocation171_spill] sm:$0xff] %v9100_v52  ;;  %v9270_v15 = vld [vmem:[#allocation2 + $0x270] sm:$0xff] }
 0x3d3   :  { %2663 = vrot.lane.b32.xlu1 %v9102_v29, %s6637_s3  ;;  %2665 = vrot.lane.b32.xlu0 %v9106_v4, %s6637_s3 }
 0x3d5   :  { %v9110_v32 = vpop.permute.xlu1 %2423  ;;  %v9112_v27 = vpop.permute.xlu0 %2425 }
 0x3d6   :  { %12987 = vst [vmem:[#allocation173_spill] sm:$0xff] %v9110_v32  ;;  %12988 = vst [vmem:[#allocation174_spill] sm:$0xff] %v9112_v27  ;;  %v9258_v27 = vld [vmem:[#allocation2 + $0x250] sm:$0xff] }
 0x3d7   :  { %2667 = vrot.lane.b32.xlu1 %v9114_v50, %s6637_s3  ;;  %2669 = vrot.lane.b32.xlu0 %v9118_v0, %s6637_s3 }
 0x3d9   :  { %v9122_v33 = vpop.permute.xlu1 %2427  ;;  %v9124_v31 = vpop.permute.xlu0 %2429 }
 0x3da   :  { %12990 = vst [vmem:[#allocation176_spill] sm:$0xff] %v9122_v33  ;;  %12991 = vst [vmem:[#allocation177_spill] sm:$0xff] %v9124_v31  ;;  %v9246_v33 = vld [vmem:[#allocation2 + $0x230] sm:$0xff] }
 0x3db   :  { %2671 = vrot.lane.b32.xlu1 %v9126_v18, %s6637_s3  ;;  %2673 = vrot.lane.b32.xlu0 %v9130_v56, %s6637_s3 }
 0x3dd   :  { %v9134_v60 = vpop.permute.xlu1 %2431  ;;  %v9136_v1 = vpop.permute.xlu0 %2433 }
 0x3de   :  { %12993 = vst [vmem:[#allocation179_spill] sm:$0xff] %v9134_v60  ;;  %12994 = vst [vmem:[#allocation180_spill] sm:$0xff] %v9136_v1  ;;  %v9234_v1 = vld [vmem:[#allocation2 + $0x210] sm:$0xff] }
 0x3df   :  { %2675 = vrot.lane.b32.xlu1 %v9138_v36, %s6637_s3  ;;  %2677 = vrot.lane.b32.xlu0 %v9142_v6, %s6637_s3 }
 0x3e1   :  { %v9146_v37 = vpop.permute.xlu1 %2435  ;;  %v9148_v10 = vpop.permute.xlu0 %2437 }
 0x3e2   :  { %12996 = vst [vmem:[#allocation182_spill] sm:$0xff] %v9146_v37  ;;  %12997 = vst [vmem:[#allocation183_spill] sm:$0xff] %v9148_v10  ;;  %v9222_v37 = vld [vmem:[#allocation2 + $0x1f0] sm:$0xff] }
 0x3e3   :  { %2679 = vrot.lane.b32.xlu1 %v9150_v63, %s6637_s3  ;;  %2681 = vrot.lane.b32.xlu0 %v9154_v57, %s6637_s3 }
 0x3e5   :  { %v9158_v17 = vpop.permute.xlu1 %2439  ;;  %v9160_v40 = vpop.permute.xlu0 %2441 }
 0x3e6   :  { %12999 = vst [vmem:[#allocation185_spill] sm:$0xff] %v9158_v17  ;;  %13000 = vst [vmem:[#allocation186_spill] sm:$0xff] %v9160_v40  ;;  %v9198_v40 = vld [vmem:[#allocation2 + $0x1b0] sm:$0xff] }
 0x3e7   :  { %2683 = vrot.lane.b32.xlu1 %v9162_v43, %s6637_s3  ;;  %2685 = vrot.lane.b32.xlu0 %v9166_v26, %s6637_s3 }
 0x3e9   :  { %v9170_v8 = vpop.permute.xlu1 %2443  ;;  %v9172_v44 = vpop.permute.xlu0 %2445 }
 0x3ea   :  { %13002 = vst [vmem:[#allocation188_spill] sm:$0xff] %v9170_v8  ;;  %13003 = vst [vmem:[#allocation189_spill] sm:$0xff] %v9172_v44 }
 0x3eb   :  { %2687 = vrot.lane.b32.xlu1 %v9174_v48, %s6637_s3  ;;  %2689 = vrot.lane.b32.xlu0 %v9178_v23, %s6637_s3 }
 0x3ed   :  { %v9182_v24 = vpop.permute.xlu1 %2447  ;;  %v9184_v39 = vpop.permute.xlu0 %2449 }
 0x3ee   :  { %13005 = vst [vmem:[#allocation191_spill] sm:$0xff] %v9182_v24  ;;  %13006 = vst [vmem:[#allocation192_spill] sm:$0xff] %v9184_v39  ;;  %v9202_v39 = vld [vmem:[#allocation2 + $0x1c0] sm:$0xff] }
 0x3ef   :  { %2691 = vrot.lane.b32.xlu1 %v9186_v34, %s6637_s3  ;;  %2693 = vrot.lane.b32.xlu0 %v9190_v49, %s6637_s3  ;;  %13010 = vst [vmem:[#allocation196_spill] sm:$0xff] %v9202_v39 }
 0x3f1   :  { %v9194_v44 = vpop.permute.xlu1 %2451  ;;  %v9196_v8 = vpop.permute.xlu0 %2453 }
 0x3f2   :  { %13008 = vst [vmem:[#allocation194_spill] sm:$0xff] %v9194_v44  ;;  %13009 = vst [vmem:[#allocation195_spill] sm:$0xff] %v9196_v8  ;;  %v9214_v8 = vld [vmem:[#allocation2 + $0x1e0] sm:$0xff] }
 0x3f3   :  { %2695 = vrot.lane.b32.xlu1 %v9198_v40, %s6637_s3  ;;  %2697 = vrot.lane.b32.xlu0 %v9202_v39, %s6637_s3  ;;  %13013 = vst [vmem:[#allocation199_spill] sm:$0xff] %v9214_v8 }
 0x3f5   :  { %v9206_v24 = vpop.permute.xlu1 %2455  ;;  %v9208_v21 = vpop.permute.xlu0 %2457 }
 0x3f6   :  { %13011 = vst [vmem:[#allocation197_spill] sm:$0xff] %v9206_v24  ;;  %13012 = vst [vmem:[#allocation198_spill] sm:$0xff] %v9208_v21  ;;  %v9226_v21 = vld [vmem:[#allocation2 + $0x200] sm:$0xff] }
 0x3f7   :  { %2699 = vrot.lane.b32.xlu1 %v9210_v28, %s6637_s3  ;;  %2701 = vrot.lane.b32.xlu0 %v9214_v8, %s6637_s3  ;;  %13016 = vst [vmem:[#allocation202_spill] sm:$0xff] %v9226_v21 }
 0x3f9   :  { %v9218_v44 = vpop.permute.xlu1 %2459  ;;  %v9220_v62 = vpop.permute.xlu0 %2461 }
 0x3fa   :  { %13014 = vst [vmem:[#allocation200_spill] sm:$0xff] %v9218_v44  ;;  %13015 = vst [vmem:[#allocation201_spill] sm:$0xff] %v9220_v62  ;;  %v9238_v62 = vld [vmem:[#allocation2 + $0x220] sm:$0xff] }
 0x3fb   :  { %2703 = vrot.lane.b32.xlu1 %v9222_v37, %s6637_s3  ;;  %2705 = vrot.lane.b32.xlu0 %v9226_v21, %s6637_s3  ;;  %13019 = vst [vmem:[#allocation205_spill] sm:$0xff] %v9238_v62 }
 0x3fd   :  { %v9230_v24 = vpop.permute.xlu1 %2463  ;;  %v9232_v17 = vpop.permute.xlu0 %2465 }
 0x3fe   :  { %13017 = vst [vmem:[#allocation203_spill] sm:$0xff] %v9230_v24  ;;  %13018 = vst [vmem:[#allocation204_spill] sm:$0xff] %v9232_v17  ;;  %v9250_v17 = vld [vmem:[#allocation2 + $0x240] sm:$0xff] }
 0x3ff   :  { %2707 = vrot.lane.b32.xlu1 %v9234_v1, %s6637_s3  ;;  %2709 = vrot.lane.b32.xlu0 %v9238_v62, %s6637_s3  ;;  %13022 = vst [vmem:[#allocation208_spill] sm:$0xff] %v9250_v17 }
 0x401   :  { %v9242_v44 = vpop.permute.xlu1 %2467  ;;  %v9244_v10 = vpop.permute.xlu0 %2469 }
 0x402   :  { %13020 = vst [vmem:[#allocation206_spill] sm:$0xff] %v9242_v44  ;;  %13021 = vst [vmem:[#allocation207_spill] sm:$0xff] %v9244_v10  ;;  %v9262_v10 = vld [vmem:[#allocation2 + $0x260] sm:$0xff] }
 0x403   :  { %2711 = vrot.lane.b32.xlu1 %v9246_v33, %s6637_s3  ;;  %2713 = vrot.lane.b32.xlu0 %v9250_v17, %s6637_s3  ;;  %13025 = vst [vmem:[#allocation211_spill] sm:$0xff] %v9262_v10 }
 0x405   :  { %v9254_v24 = vpop.permute.xlu1 %2471  ;;  %v9256_v60 = vpop.permute.xlu0 %2473 }
 0x406   :  { %13023 = vst [vmem:[#allocation209_spill] sm:$0xff] %v9254_v24  ;;  %13024 = vst [vmem:[#allocation210_spill] sm:$0xff] %v9256_v60  ;;  %v9274_v60 = vld [vmem:[#allocation2 + $0x280] sm:$0xff] }
 0x407   :  { %2715 = vrot.lane.b32.xlu1 %v9258_v27, %s6637_s3  ;;  %2717 = vrot.lane.b32.xlu0 %v9262_v10, %s6637_s3  ;;  %13028 = vst [vmem:[#allocation214_spill] sm:$0xff] %v9274_v60 }
 0x409   :  { %v9266_v44 = vpop.permute.xlu1 %2475  ;;  %v9268_v31 = vpop.permute.xlu0 %2477 }
 0x40a   :  { %13026 = vst [vmem:[#allocation212_spill] sm:$0xff] %v9266_v44  ;;  %13027 = vst [vmem:[#allocation213_spill] sm:$0xff] %v9268_v31  ;;  %v9286_v31 = vld [vmem:[#allocation2 + $0x2a0] sm:$0xff] }
 0x40b   :  { %2719 = vrot.lane.b32.xlu1 %v9270_v15, %s6637_s3  ;;  %2721 = vrot.lane.b32.xlu0 %v9274_v60, %s6637_s3  ;;  %13031 = vst [vmem:[#allocation217_spill] sm:$0xff] %v9286_v31 }
 0x40d   :  { %v9278_v24 = vpop.permute.xlu1 %2479  ;;  %v9280_v32 = vpop.permute.xlu0 %2481 }
 0x40e   :  { %13029 = vst [vmem:[#allocation215_spill] sm:$0xff] %v9278_v24  ;;  %13030 = vst [vmem:[#allocation216_spill] sm:$0xff] %v9280_v32  ;;  %v9298_v32 = vld [vmem:[#allocation2 + $0x2c0] sm:$0xff] }
 0x40f   :  { %2723 = vrot.lane.b32.xlu1 %v9282_v42, %s6637_s3  ;;  %2725 = vrot.lane.b32.xlu0 %v9286_v31, %s6637_s3  ;;  %13035 = vst [vmem:[#allocation221_spill] sm:$0xff] %v9298_v32 }
 0x411   :  { %v9290_v44 = vpop.permute.xlu1 %2483  ;;  %v9292_v52 = vpop.permute.xlu0 %2485 }
 0x412   :  { %13032 = vst [vmem:[#allocation218_spill] sm:$0xff] %v9290_v44  ;;  %13033 = vst [vmem:[#allocation219_spill] sm:$0xff] %v9292_v52  ;;  %v9310_v52 = vld [vmem:[#allocation2 + $0x2e0] sm:$0xff] }
 0x413   :  { %2727 = vrot.lane.b32.xlu1 %v9294_v2, %s6637_s3  ;;  %2729 = vrot.lane.b32.xlu0 %v9298_v32, %s6637_s3  ;;  %13039 = vst [vmem:[#allocation225_spill] sm:$0xff] %v9310_v52 }
 0x415   :  { %v9302_v24 = vpop.permute.xlu1 %2487  ;;  %v9304_v35 = vpop.permute.xlu0 %2489 }
 0x416   :  { %13036 = vst [vmem:[#allocation222_spill] sm:$0xff] %v9302_v24  ;;  %13037 = vst [vmem:[#allocation223_spill] sm:$0xff] %v9304_v35  ;;  %v13043_v35 = vld [vmem:[#allocation81_spill] sm:$0xff] }
 0x417   :  { %2731 = vrot.lane.b32.xlu1 %v9306_v30, %s6637_s3  ;;  %2733 = vrot.lane.b32.xlu0 %v9310_v52, %s6637_s3  ;;  %v13067_v52 = vld [vmem:[#allocation114_spill] sm:$0xff] }
 0x419   :  { %v9314_v44 = vpop.permute.xlu1 %2491  ;;  %v9316_v11 = vpop.permute.xlu0 %2493 }
 0x41a   :  { %13040 = vst [vmem:[#allocation226_spill] sm:$0xff] %v9314_v44  ;;  %13041 = vst [vmem:[#allocation227_spill] sm:$0xff] %v9316_v11 }
 0x41b   :  { %2735 = vrot.lane.b32.xlu1 %v9318_v9, %s6637_s3  ;;  %2737 = vrot.lane.b32.xlu0 %v13043_v35, %s6637_s3 }
 0x41d   :  { %v9324_v24 = vpop.permute.xlu1 %2495  ;;  %v9326_v5 = vpop.permute.xlu0 %2497 }
 0x41e   :  { %13044 = vst [vmem:[#allocation81_spill] sm:$0xff] %v9324_v24  ;;  %13045 = vst [vmem:[#allocation229_spill] sm:$0xff] %v9326_v5  ;;  %v13054_v5 = vld [vmem:[#allocation89_spill] sm:$0xff] }
 0x41f   :  { %2739 = vrot.lane.b32.xlu1 %v13046_v38, %s6637_s3  ;;  %2741 = vrot.lane.b32.xlu0 %v13047_v51, %s6637_s3  ;;  %v13055_v38 = vld [vmem:[#allocation95_spill] sm:$0xff] }
 0x421   :  { %v9332_v44 = vpop.permute.xlu1 %2499  ;;  %v9334_v11 = vpop.permute.xlu0 %2501 }
 0x422   :  { %13048 = vst [vmem:[#allocation80_spill] sm:$0xff] %v9332_v44  ;;  %13049 = vst [vmem:[#allocation85_spill] sm:$0xff] %v9334_v11  ;;  %v13058_v11 = vld [vmem:[#allocation94_spill] sm:$0xff] }
 0x423   :  { %2743 = vrot.lane.b32.xlu1 %v13050_v7, %s6637_s3  ;;  %2745 = vrot.lane.b32.xlu0 %v13051_v47, %s6637_s3  ;;  %v13059_v7 = vld [vmem:[#allocation100_spill] sm:$0xff] }
 0x425   :  { %v9340_v35 = vpop.permute.xlu1 %2503  ;;  %v9342_v24 = vpop.permute.xlu0 %2505 }
 0x426   :  { %13052 = vst [vmem:[#allocation84_spill] sm:$0xff] %v9340_v35  ;;  %13053 = vst [vmem:[#allocation90_spill] sm:$0xff] %v9342_v24  ;;  %v13061_v24 = vld [vmem:[#allocation99_spill] sm:$0xff] }
 0x427   :  { %2747 = vrot.lane.b32.xlu1 %v13054_v5, %s6637_s3  ;;  %2749 = vrot.lane.b32.xlu0 %v13055_v38, %s6637_s3  ;;  %v13062_v5 = vld [vmem:[#allocation105_spill] sm:$0xff] }
 0x429   :  { %v9348_v51 = vpop.permute.xlu1 %2507  ;;  %v9350_v44 = vpop.permute.xlu0 %2509 }
 0x42a   :  { %13056 = vst [vmem:[#allocation89_spill] sm:$0xff] %v9348_v51  ;;  %13057 = vst [vmem:[#allocation95_spill] sm:$0xff] %v9350_v44 }
 0x42b   :  { %2751 = vrot.lane.b32.xlu1 %v13058_v11, %s6637_s3  ;;  %2753 = vrot.lane.b32.xlu0 %v13059_v7, %s6637_s3  ;;  %v13064_v11 = vld [vmem:[#allocation110_spill] sm:$0xff] }
 0x42d   :  { %v9356_v47 = vpop.permute.xlu1 %2511  ;;  %v9358_v35 = vpop.permute.xlu0 %2641 }
 0x42e   :  { %13060 = vst [vmem:[#allocation94_spill] sm:$0xff] %v9356_v47 }
 0x42f   :  { %2755 = vrot.lane.b32.xlu1 %v13061_v24, %s6637_s3  ;;  %2757 = vrot.lane.b32.xlu0 %v13062_v5, %s6637_s3  ;;  %v13065_v5 = vld [vmem:[#allocation109_spill] sm:$0xff] }
 0x431   :  { %v2644_v38 = vpop.permute.xlu1 %2643  ;;  %v2646_v51 = vpop.permute.xlu0 %2645 }
 0x432   :  { %v2834_v13 = vrot.slane %v2644_v38, 7  ;;  %v2835_v44 = vrot.slane %v2646_v51, 7  ;;  %v13066_v38 = vld [vmem:[#allocation115_spill] sm:$0xff] }
 0x433   :  { %2759 = vrot.lane.b32.xlu1 %v13063_v53, %s6637_s3  ;;  %2761 = vrot.lane.b32.xlu0 %v13064_v11, %s6637_s3 }
 0x434   :  { %v9370_v7 = vsel %vm1167_vm2, %v2834_v13, %v2835_v44 }
 0x435   :  { %v2648_v47 = vpop.permute.xlu1 %2647  ;;  %v2650_v22 = vpop.permute.xlu0 %2649 }
 0x436   :  { %v2836_v24 = vrot.slane %v2648_v47, 7  ;;  %v2837_v58 = vrot.slane %v2650_v22, 7  ;;  %v12750_v47 = vrot.slane %v9358_v35, 7 }
 0x437   :  { %2763 = vrot.lane.b32.xlu1 %v13065_v5, %s6637_s3  ;;  %2765 = vrot.lane.b32.xlu0 %v13066_v38, %s6637_s3 }
 0x438   :  { %v9378_v53 = vsel %vm1167_vm2, %v2836_v24, %v2837_v58  ;;  %v2959_v60 = vsel %vm1167_vm2, %v12750_v47, %v2834_v13  ;;  %v2957_v62 = vsel %vm1167_vm2, %v2835_v44, %v2836_v24 }
 0x439   :  { %v2652_v51 = vpop.permute.xlu1 %2651  ;;  %v2654_v11 = vpop.permute.xlu0 %2653 }
 0x43a   :  { %v2838_v16 = vrot.slane %v2652_v51, 7  ;;  %v2839_v55 = vrot.slane %v2654_v11, 7 }
 0x43b   :  { %2767 = vrot.lane.b32.xlu1 %v13067_v52, %s6637_s3 }
 0x43c   :  { %v9385_v22 = vsel %vm1167_vm2, %v2838_v16, %v2839_v55  ;;  %v2955_v21 = vsel %vm1167_vm2, %v2837_v58, %v2838_v16 }
 0x43d   :  { %v2656_v5 = vpop.permute.xlu1 %2655  ;;  %v2658_v32 = vpop.permute.xlu0 %2657 }
 0x43e   :  { %v2840_v38 = vrot.slane %v2656_v5, 7  ;;  %v2841_v31 = vrot.slane %v2658_v32, 7 }
 0x43f   :  { %3027 = vrot.lane.b32.xlu1 %v2959_v60, %s6636_s9 }
 0x440   :  { %v9394_v52 = vsel %vm1167_vm2, %v2840_v38, %v2841_v31  ;;  %v2953_v8 = vsel %vm1167_vm2, %v2839_v55, %v2840_v38 }
 0x441   :  { %v2660_v51 = vpop.permute.xlu1 %2659  ;;  %v2662_v11 = vpop.permute.xlu0 %2661 }
 0x442   :  { %v2842_v10 = vrot.slane %v2660_v51, 7  ;;  %v2843_v17 = vrot.slane %v2662_v11, 7 }
 0x443   :  { %3031 = vrot.lane.b32.xlu1 %v2957_v62, %s6636_s9 }
 0x444   :  { %v9401_v32 = vsel %vm1167_vm2, %v2842_v10, %v2843_v17  ;;  %v2951_v39 = vsel %vm1167_vm2, %v2841_v31, %v2842_v10 }
 0x445   :  { %v2664_v13 = vpop.permute.xlu1 %2663  ;;  %v2666_v5 = vpop.permute.xlu0 %2665 }
 0x446   :  { %v2844_v60 = vrot.slane %v2664_v13, 7  ;;  %v2845_v47 = vrot.slane %v2666_v5, 7 }
 0x447   :  { %3035 = vrot.lane.b32.xlu1 %v2955_v21, %s6636_s9 }
 0x448   :  { %v9408_v51 = vsel %vm1167_vm2, %v2844_v60, %v2845_v47  ;;  %v2949_v49 = vsel %vm1167_vm2, %v2843_v17, %v2844_v60 }
 0x449   :  { %v2668_v44 = vpop.permute.xlu1 %2667  ;;  %v2670_v24 = vpop.permute.xlu0 %2669 }
 0x44a   :  { %v2846_v62 = vrot.slane %v2668_v44, 7  ;;  %v2847_v11 = vrot.slane %v2670_v24, 7 }
 0x44b   :  { %3039 = vrot.lane.b32.xlu1 %v2953_v8, %s6636_s9 }
 0x44c   :  { %v9415_v13 = vsel %vm1167_vm2, %v2846_v62, %v2847_v11  ;;  %v2947_v23 = vsel %vm1167_vm2, %v2845_v47, %v2846_v62 }
 0x44d   :  { %v2672_v16 = vpop.permute.xlu1 %2671  ;;  %v2674_v58 = vpop.permute.xlu0 %2673 }
 0x44e   :  { %v2848_v21 = vrot.slane %v2672_v16, 7  ;;  %v2849_v5 = vrot.slane %v2674_v58, 7 }
 0x44f   :  { %3043 = vrot.lane.b32.xlu1 %v2951_v39, %s6636_s9 }
 0x450   :  { %v9422_v44 = vsel %vm1167_vm2, %v2848_v21, %v2849_v5  ;;  %v2945_v26 = vsel %vm1167_vm2, %v2847_v11, %v2848_v21 }
 0x451   :  { %v2676_v55 = vpop.permute.xlu1 %2675  ;;  %v2678_v38 = vpop.permute.xlu0 %2677 }
 0x452   :  { %v2850_v8 = vrot.slane %v2676_v55, 7  ;;  %v2851_v24 = vrot.slane %v2678_v38, 7 }
 0x453   :  { %3047 = vrot.lane.b32.xlu1 %v2949_v49, %s6636_s9 }
 0x454   :  { %v9429_v16 = vsel %vm1167_vm2, %v2850_v8, %v2851_v24  ;;  %v2943_v57 = vsel %vm1167_vm2, %v2849_v5, %v2850_v8 }
 0x455   :  { %v2680_v31 = vpop.permute.xlu1 %2679  ;;  %v2682_v10 = vpop.permute.xlu0 %2681 }
 0x456   :  { %v2852_v39 = vrot.slane %v2680_v31, 7  ;;  %v2853_v58 = vrot.slane %v2682_v10, 7 }
 0x457   :  { %3051 = vrot.lane.b32.xlu1 %v2947_v23, %s6636_s9 }
 0x458   :  { %v9436_v55 = vsel %vm1167_vm2, %v2852_v39, %v2853_v58  ;;  %v2941_v6 = vsel %vm1167_vm2, %v2851_v24, %v2852_v39 }
 0x459   :  { %v2684_v17 = vpop.permute.xlu1 %2683  ;;  %v2686_v60 = vpop.permute.xlu0 %2685 }
 0x45a   :  { %v2854_v49 = vrot.slane %v2684_v17, 7  ;;  %v2855_v38 = vrot.slane %v2686_v60, 7 }
 0x45b   :  { %3055 = vrot.lane.b32.xlu1 %v2945_v26, %s6636_s9 }
 0x45c   :  { %v9443_v31 = vsel %vm1167_vm2, %v2854_v49, %v2855_v38  ;;  %v2939_v56 = vsel %vm1167_vm2, %v2853_v58, %v2854_v49 }
 0x45d   :  { %v2688_v47 = vpop.permute.xlu1 %2687  ;;  %v2690_v62 = vpop.permute.xlu0 %2689 }
 0x45e   :  { %v2856_v23 = vrot.slane %v2688_v47, 7  ;;  %v2857_v10 = vrot.slane %v2690_v62, 7 }
 0x45f   :  { %3059 = vrot.lane.b32.xlu1 %v2943_v57, %s6636_s9 }
 0x460   :  { %v9450_v17 = vsel %vm1167_vm2, %v2856_v23, %v2857_v10  ;;  %v2937_v0 = vsel %vm1167_vm2, %v2855_v38, %v2856_v23 }
 0x461   :  { %v2692_v11 = vpop.permute.xlu1 %2691  ;;  %v2694_v21 = vpop.permute.xlu0 %2693 }
 0x462   :  { %v2858_v26 = vrot.slane %v2692_v11, 7  ;;  %v2859_v60 = vrot.slane %v2694_v21, 7 }
 0x463   :  { %3063 = vrot.lane.b32.xlu1 %v2941_v6, %s6636_s9 }
 0x464   :  { %v9457_v47 = vsel %vm1167_vm2, %v2858_v26, %v2859_v60  ;;  %v2935_v4 = vsel %vm1167_vm2, %v2857_v10, %v2858_v26 }
 0x465   :  { %v2696_v5 = vpop.permute.xlu1 %2695  ;;  %v2698_v8 = vpop.permute.xlu0 %2697 }
 0x466   :  { %v2860_v57 = vrot.slane %v2696_v5, 7  ;;  %v2861_v62 = vrot.slane %v2698_v8, 7 }
 0x467   :  { %3067 = vrot.lane.b32.xlu1 %v2939_v56, %s6636_s9 }
 0x468   :  { %v9464_v11 = vsel %vm1167_vm2, %v2860_v57, %v2861_v62  ;;  %v2933_v54 = vsel %vm1167_vm2, %v2859_v60, %v2860_v57 }
 0x469   :  { %v2700_v24 = vpop.permute.xlu1 %2699  ;;  %v2702_v39 = vpop.permute.xlu0 %2701 }
 0x46a   :  { %v2862_v6 = vrot.slane %v2700_v24, 7  ;;  %v2863_v21 = vrot.slane %v2702_v39, 7 }
 0x46b   :  { %3071 = vrot.lane.b32.xlu1 %v2937_v0, %s6636_s9 }
 0x46c   :  { %v9471_v5 = vsel %vm1167_vm2, %v2862_v6, %v2863_v21  ;;  %v2931_v12 = vsel %vm1167_vm2, %v2861_v62, %v2862_v6 }
 0x46d   :  { %v2704_v58 = vpop.permute.xlu1 %2703  ;;  %v2706_v49 = vpop.permute.xlu0 %2705 }
 0x46e   :  { %v2864_v56 = vrot.slane %v2704_v58, 7  ;;  %v2865_v8 = vrot.slane %v2706_v49, 7 }
 0x46f   :  { %3075 = vrot.lane.b32.xlu1 %v2935_v4, %s6636_s9 }
 0x470   :  { %v9478_v24 = vsel %vm1167_vm2, %v2864_v56, %v2865_v8  ;;  %v2929_v45 = vsel %vm1167_vm2, %v2863_v21, %v2864_v56 }
 0x471   :  { %v2708_v38 = vpop.permute.xlu1 %2707  ;;  %v2710_v23 = vpop.permute.xlu0 %2709 }
 0x472   :  { %v2866_v0 = vrot.slane %v2708_v38, 7  ;;  %v2867_v39 = vrot.slane %v2710_v23, 7 }
 0x473   :  { %3079 = vrot.lane.b32.xlu1 %v2933_v54, %s6636_s9 }
 0x474   :  { %v9485_v58 = vsel %vm1167_vm2, %v2866_v0, %v2867_v39  ;;  %v2927_v3 = vsel %vm1167_vm2, %v2865_v8, %v2866_v0 }
 0x475   :  { %v2712_v10 = vpop.permute.xlu1 %2711  ;;  %v2714_v26 = vpop.permute.xlu0 %2713 }
 0x476   :  { %v2868_v4 = vrot.slane %v2712_v10, 7  ;;  %v2869_v49 = vrot.slane %v2714_v26, 7 }
 0x477   :  { %3083 = vrot.lane.b32.xlu1 %v2931_v12, %s6636_s9 }
 0x478   :  { %v9492_v38 = vsel %vm1167_vm2, %v2868_v4, %v2869_v49  ;;  %v2925_v46 = vsel %vm1167_vm2, %v2867_v39, %v2868_v4 }
 0x479   :  { %v2716_v60 = vpop.permute.xlu1 %2715  ;;  %v2718_v57 = vpop.permute.xlu0 %2717 }
 0x47a   :  { %v2870_v54 = vrot.slane %v2716_v60, 7  ;;  %v2871_v23 = vrot.slane %v2718_v57, 7 }
 0x47b   :  { %3087 = vrot.lane.b32.xlu1 %v2929_v45, %s6636_s9 }
 0x47c   :  { %v9499_v10 = vsel %vm1167_vm2, %v2870_v54, %v2871_v23  ;;  %v2923_v61 = vsel %vm1167_vm2, %v2869_v49, %v2870_v54 }
 0x47d   :  { %v2720_v62 = vpop.permute.xlu1 %2719  ;;  %v2722_v6 = vpop.permute.xlu0 %2721 }
 0x47e   :  { %v2872_v12 = vrot.slane %v2720_v62, 7  ;;  %v2873_v26 = vrot.slane %v2722_v6, 7 }
 0x47f   :  { %3091 = vrot.lane.b32.xlu1 %v2927_v3, %s6636_s9 }
 0x480   :  { %v9506_v60 = vsel %vm1167_vm2, %v2872_v12, %v2873_v26  ;;  %v2921_v9 = vsel %vm1167_vm2, %v2871_v23, %v2872_v12 }
 0x481   :  { %v2724_v21 = vpop.permute.xlu1 %2723  ;;  %v2726_v56 = vpop.permute.xlu0 %2725 }
 0x482   :  { %v2874_v45 = vrot.slane %v2724_v21, 7  ;;  %v2875_v57 = vrot.slane %v2726_v56, 7 }
 0x483   :  { %3095 = vrot.lane.b32.xlu1 %v2925_v46, %s6636_s9 }
 0x484   :  { %v9513_v62 = vsel %vm1167_vm2, %v2874_v45, %v2875_v57  ;;  %v2919_v30 = vsel %vm1167_vm2, %v2873_v26, %v2874_v45 }
 0x485   :  { %v2728_v8 = vpop.permute.xlu1 %2727  ;;  %v2730_v0 = vpop.permute.xlu0 %2729 }
 0x486   :  { %v2876_v3 = vrot.slane %v2728_v8, 7  ;;  %v2877_v6 = vrot.slane %v2730_v0, 7 }
 0x487   :  { %3099 = vrot.lane.b32.xlu1 %v2923_v61, %s6636_s9 }
 0x488   :  { %v9520_v21 = vsel %vm1167_vm2, %v2876_v3, %v2877_v6  ;;  %v2917_v2 = vsel %vm1167_vm2, %v2875_v57, %v2876_v3 }
 0x489   :  { %v2732_v39 = vpop.permute.xlu1 %2731  ;;  %v2734_v4 = vpop.permute.xlu0 %2733 }
 0x48a   :  { %v2878_v46 = vrot.slane %v2732_v39, 7  ;;  %v2879_v56 = vrot.slane %v2734_v4, 7 }
 0x48b   :  { %3103 = vrot.lane.b32.xlu1 %v2921_v9, %s6636_s9 }
 0x48c   :  { %v9527_v8 = vsel %vm1167_vm2, %v2878_v46, %v2879_v56 }
 0x48d   :  { %v2736_v49 = vpop.permute.xlu1 %2735  ;;  %v2738_v54 = vpop.permute.xlu0 %2737 }
 0x48e   :  { %v2880_v61 = vrot.slane %v2736_v49, 7  ;;  %v2881_v0 = vrot.slane %v2738_v54, 7 }
 0x48f   :  { %3107 = vrot.lane.b32.xlu1 %v2919_v30, %s6636_s9 }
 0x490   :  { %v9534_v39 = vsel %vm1167_vm2, %v2880_v61, %v2881_v0 }
 0x491   :  { %13068 = vst [vmem:[#allocation100_spill] sm:$0xff] %v9534_v39  ;;  %v2740_v23 = vpop.permute.xlu1 %2739  ;;  %v2742_v12 = vpop.permute.xlu0 %2741  ;;  %v2915_v39 = vsel %vm1167_vm2, %v2877_v6, %v2878_v46 }
 0x492   :  { %v2882_v9 = vrot.slane %v2740_v23, 7  ;;  %v2883_v4 = vrot.slane %v2742_v12, 7 }
 0x493   :  { %3111 = vrot.lane.b32.xlu1 %v2917_v2, %s6636_s9 }
 0x494   :  { %v9541_v49 = vsel %vm1167_vm2, %v2882_v9, %v2883_v4 }
 0x495   :  { %13069 = vst [vmem:[#allocation99_spill] sm:$0xff] %v9541_v49  ;;  %v2744_v26 = vpop.permute.xlu1 %2743  ;;  %v2746_v45 = vpop.permute.xlu0 %2745  ;;  %v2913_v49 = vsel %vm1167_vm2, %v2879_v56, %v2880_v61 }
 0x496   :  { %v2884_v30 = vrot.slane %v2744_v26, 7  ;;  %v2885_v54 = vrot.slane %v2746_v45, 7 }
 0x497   :  { %3115 = vrot.lane.b32.xlu1 %v2915_v39, %s6636_s9 }
 0x498   :  { %v9548_v23 = vsel %vm1167_vm2, %v2884_v30, %v2885_v54 }
 0x499   :  { %13070 = vst [vmem:[#allocation105_spill] sm:$0xff] %v9548_v23  ;;  %v2748_v57 = vpop.permute.xlu1 %2747  ;;  %v2750_v3 = vpop.permute.xlu0 %2749  ;;  %v2911_v23 = vsel %vm1167_vm2, %v2881_v0, %v2882_v9 }
 0x49a   :  { %v2886_v2 = vrot.slane %v2748_v57, 7  ;;  %v2887_v12 = vrot.slane %v2750_v3, 7 }
 0x49b   :  { %3119 = vrot.lane.b32.xlu1 %v2913_v49, %s6636_s9 }
 0x49c   :  { %v9555_v26 = vsel %vm1167_vm2, %v2886_v2, %v2887_v12 }
 0x49d   :  { %13071 = vst [vmem:[#allocation104_spill] sm:$0xff] %v9555_v26  ;;  %v2752_v6 = vpop.permute.xlu1 %2751  ;;  %v2754_v46 = vpop.permute.xlu0 %2753  ;;  %v2909_v26 = vsel %vm1167_vm2, %v2883_v4, %v2884_v30 }
 0x49e   :  { %v2888_v39 = vrot.slane %v2752_v6, 7  ;;  %v2889_v45 = vrot.slane %v2754_v46, 7 }
 0x49f   :  { %3123 = vrot.lane.b32.xlu1 %v2911_v23, %s6636_s9 }
 0x4a0   :  { %v9562_v57 = vsel %vm1167_vm2, %v2888_v39, %v2889_v45 }
 0x4a1   :  { %13072 = vst [vmem:[#allocation110_spill] sm:$0xff] %v9562_v57  ;;  %v2756_v56 = vpop.permute.xlu1 %2755  ;;  %v2758_v61 = vpop.permute.xlu0 %2757  ;;  %v2907_v57 = vsel %vm1167_vm2, %v2885_v54, %v2886_v2 }
 0x4a2   :  { %v2890_v49 = vrot.slane %v2756_v56, 7  ;;  %v2891_v3 = vrot.slane %v2758_v61, 7 }
 0x4a3   :  { %3127 = vrot.lane.b32.xlu1 %v2909_v26, %s6636_s9 }
 0x4a4   :  { %v9569_v6 = vsel %vm1167_vm2, %v2890_v49, %v2891_v3 }
 0x4a5   :  { %13073 = vst [vmem:[#allocation109_spill] sm:$0xff] %v9569_v6  ;;  %v2760_v0 = vpop.permute.xlu1 %2759  ;;  %v2762_v9 = vpop.permute.xlu0 %2761  ;;  %v2905_v6 = vsel %vm1167_vm2, %v2887_v12, %v2888_v39 }
 0x4a6   :  { %v2892_v23 = vrot.slane %v2760_v0, 7  ;;  %v2893_v46 = vrot.slane %v2762_v9, 7  ;;  %v13074_v9 = vrot.slane %v9358_v35, 7 }
 0x4a7   :  { %3131 = vrot.lane.b32.xlu1 %v2907_v57, %s6636_s9  ;;  %v2903_v57 = vsel %vm1167_vm2, %v2889_v45, %v2890_v49 }
 0x4a8   :  { %v9576_v56 = vsel %vm1167_vm2, %v2892_v23, %v2893_v46  ;;  %v2901_v39 = vsel %vm1167_vm2, %v2891_v3, %v2892_v23  ;;  %v9802_v23 = vld [vmem:[#allocation2 + $0x3d0] sm:$0xff] }
 0x4a9   :  { %v2764_v4 = vpop.permute.xlu1 %2763  ;;  %v2766_v30 = vpop.permute.xlu0 %2765 }
 0x4aa   :  { %v2894_v26 = vrot.slane %v2764_v4, 7  ;;  %v2895_v61 = vrot.slane %v2766_v30, 7 }
 0x4ab   :  { %3135 = vrot.lane.b32.xlu1 %v2905_v6, %s6636_s9 }
 0x4ac   :  { %v9583_v0 = vsel %vm1167_vm2, %v2894_v26, %v2895_v61  ;;  %v2899_v35 = vsel %vm1167_vm2, %v2893_v46, %v2894_v26  ;;  %v9812_v26 = vld [vmem:[#allocation2 + $0x3f0] sm:$0xff] }
 0x4ad   :  { %v2768_v54 = vpop.permute.xlu1 %2767 }
 0x4ae   :  { %v2896_v2 = vrot.slane %v2768_v54, 7 }
 0x4af   :  { %3139 = vrot.lane.b32.xlu1 %v2903_v57, %s6636_s9  ;;  %v13124_v57 = vld [vmem:[#allocation166_spill] sm:$0xff] }
 0x4b0   :  { %v2960_v4 = vsel %vm1167_vm2, %v2896_v2, %v13074_v9  ;;  %v2897_v3 = vsel %vm1167_vm2, %v2895_v61, %v2896_v2 }
 0x4b1   :  { %3025 = vrot.lane.b32.xlu0 %v2960_v4, %s6636_s9  ;;  %v9593_v12 = vpop.permute.xlu1 %3027  ;;  %v13126_v4 = vld [vmem:[#allocation169_spill] sm:$0xff] }
 0x4b2   :  { %13075 = vst [vmem:[#allocation115_spill] sm:$0xff] %v9593_v12  ;;  %v10479_v12 = vld [vmem:[#allocation2 + $0x260] sm:$0xff] }
 0x4b3   :  { %3143 = vrot.lane.b32.xlu1 %v2901_v39, %s6636_s9 }
 0x4b5   :  { %3029 = vrot.lane.b32.xlu0 %v9370_v7, %s6636_s9  ;;  %v9600_v45 = vpop.permute.xlu1 %3031 }
 0x4b6   :  { %13076 = vst [vmem:[#allocation114_spill] sm:$0xff] %v9600_v45 }
 0x4b7   :  { %3147 = vrot.lane.b32.xlu1 %v2899_v35, %s6636_s9 }
 0x4b9   :  { %3033 = vrot.lane.b32.xlu0 %v9378_v53, %s6636_s9  ;;  %v9607_v49 = vpop.permute.xlu1 %3035 }
 0x4ba   :  { %13077 = vst [vmem:[#allocation230_spill] sm:$0xff] %v9607_v49  ;;  %v10431_v49 = vld [vmem:[#allocation2 + $0x1e0] sm:$0xff] }
 0x4bb   :  { %3151 = vrot.lane.b32.xlu1 %v2897_v3, %s6636_s9  ;;  %v13129_v3 = vld [vmem:[#allocation172_spill] sm:$0xff] }
 0x4bd   :  { %3037 = vrot.lane.b32.xlu0 %v9385_v22, %s6636_s9  ;;  %v9614_v7 = vpop.permute.xlu1 %3039 }
 0x4be   :  { %13078 = vst [vmem:[#allocation231_spill] sm:$0xff] %v9614_v7 }
 0x4bf   :  { %3283 = vrot.lane.b32.xlu1 %v9042_v19, %s6638_s28 }
 0x4c1   :  { %3041 = vrot.lane.b32.xlu0 %v9394_v52, %s6636_s9  ;;  %v9620_v53 = vpop.permute.xlu1 %3043  ;;  %v13103_v52 = vld [vmem:[#allocation104_spill] sm:$0xff] }
 0x4c2   :  { %13079 = vst [vmem:[#allocation232_spill] sm:$0xff] %v9620_v53  ;;  %v10383_v53 = vld [vmem:[#allocation2 + $0x160] sm:$0xff] }
 0x4c3   :  { %3287 = vrot.lane.b32.xlu1 %v9054_v25, %s6638_s28 }
 0x4c5   :  { %3045 = vrot.lane.b32.xlu0 %v9401_v32, %s6636_s9  ;;  %v9626_v6 = vpop.permute.xlu1 %3047  ;;  %v9748_v32 = vld [vmem:[#allocation2 + $0x310] sm:$0xff] }
 0x4c6   :  { %13080 = vst [vmem:[#allocation233_spill] sm:$0xff] %v9626_v6 }
 0x4c7   :  { %3291 = vrot.lane.b32.xlu1 %v9066_v41, %s6638_s28 }
 0x4c9   :  { %3049 = vrot.lane.b32.xlu0 %v9408_v51, %s6636_s9  ;;  %v9632_v19 = vpop.permute.xlu1 %3051  ;;  %v13104_v51 = vld [vmem:[#allocation110_spill] sm:$0xff] }
 0x4ca   :  { %13081 = vst [vmem:[#allocation234_spill] sm:$0xff] %v9632_v19  ;;  %v10335_v19 = vld [vmem:[#allocation2 + $0xe0] sm:$0xff] }
 0x4cb   :  { %3295 = vrot.lane.b32.xlu1 %v9078_v59, %s6638_s28 }
 0x4cd   :  { %3053 = vrot.lane.b32.xlu0 %v9415_v13, %s6636_s9  ;;  %v9638_v25 = vpop.permute.xlu1 %3055 }
 0x4ce   :  { %13082 = vst [vmem:[#allocation235_spill] sm:$0xff] %v9638_v25 }
 0x4cf   :  { %3299 = vrot.lane.b32.xlu1 %v9090_v20, %s6638_s28 }
 0x4d1   :  { %3057 = vrot.lane.b32.xlu0 %v9422_v44, %s6636_s9  ;;  %v9644_v41 = vpop.permute.xlu1 %3059  ;;  %v9756_v44 = vld [vmem:[#allocation2 + $0x330] sm:$0xff] }
 0x4d2   :  { %13083 = vst [vmem:[#allocation236_spill] sm:$0xff] %v9644_v41 }
 0x4d3   :  { %3303 = vrot.lane.b32.xlu1 %v9102_v29, %s6638_s28 }
 0x4d5   :  { %3061 = vrot.lane.b32.xlu0 %v9429_v16, %s6636_s9  ;;  %v9650_v59 = vpop.permute.xlu1 %3063 }
 0x4d6   :  { %13084 = vst [vmem:[#allocation237_spill] sm:$0xff] %v9650_v59  ;;  %v10311_v59 = vld [vmem:[#allocation2 + $0xa0] sm:$0xff] }
 0x4d7   :  { %3307 = vrot.lane.b32.xlu1 %v9114_v50, %s6638_s28 }
 0x4d9   :  { %3065 = vrot.lane.b32.xlu0 %v9436_v55, %s6636_s9  ;;  %v9656_v20 = vpop.permute.xlu1 %3067  ;;  %v13107_v55 = vld [vmem:[#allocation109_spill] sm:$0xff] }
 0x4da   :  { %13085 = vst [vmem:[#allocation238_spill] sm:$0xff] %v9656_v20 }
 0x4db   :  { %3311 = vrot.lane.b32.xlu1 %v9126_v18, %s6638_s28 }
 0x4dd   :  { %3069 = vrot.lane.b32.xlu0 %v9443_v31, %s6636_s9  ;;  %v9664_v29 = vpop.permute.xlu1 %3071  ;;  %v9764_v31 = vld [vmem:[#allocation2 + $0x350] sm:$0xff] }
 0x4de   :  { %13086 = vst [vmem:[#allocation239_spill] sm:$0xff] %v9664_v29 }
 0x4df   :  { %3315 = vrot.lane.b32.xlu1 %v9138_v36, %s6638_s28 }
 0x4e1   :  { %3073 = vrot.lane.b32.xlu0 %v9450_v17, %s6636_s9  ;;  %v9672_v50 = vpop.permute.xlu1 %3075 }
 0x4e2   :  { %13087 = vst [vmem:[#allocation240_spill] sm:$0xff] %v9672_v50 }
 0x4e3   :  { %3319 = vrot.lane.b32.xlu1 %v9150_v63, %s6638_s28 }
 0x4e5   :  { %3077 = vrot.lane.b32.xlu0 %v9457_v47, %s6636_s9  ;;  %v9680_v18 = vpop.permute.xlu1 %3079 }
 0x4e6   :  { %13088 = vst [vmem:[#allocation241_spill] sm:$0xff] %v9680_v18 }
 0x4e7   :  { %3323 = vrot.lane.b32.xlu1 %v9162_v43, %s6638_s28 }
 0x4e9   :  { %3081 = vrot.lane.b32.xlu0 %v9464_v11, %s6636_s9  ;;  %v9688_v36 = vpop.permute.xlu1 %3083  ;;  %v9774_v11 = vld [vmem:[#allocation2 + $0x370] sm:$0xff] }
 0x4ea   :  { %13089 = vst [vmem:[#allocation242_spill] sm:$0xff] %v9688_v36 }
 0x4eb   :  { %3327 = vrot.lane.b32.xlu1 %v9174_v48, %s6638_s28  ;;  %v13100_v48 = vld [vmem:[#allocation105_spill] sm:$0xff] }
 0x4ed   :  { %3085 = vrot.lane.b32.xlu0 %v9471_v5, %s6636_s9  ;;  %v9696_v63 = vpop.permute.xlu1 %3087 }
 0x4ee   :  { %13090 = vst [vmem:[#allocation243_spill] sm:$0xff] %v9696_v63 }
 0x4ef   :  { %3331 = vrot.lane.b32.xlu1 %v9186_v34, %s6638_s28 }
 0x4f1   :  { %3089 = vrot.lane.b32.xlu0 %v9478_v24, %s6636_s9  ;;  %v9704_v34 = vpop.permute.xlu1 %3091 }
 0x4f2   :  { %13091 = vst [vmem:[#allocation244_spill] sm:$0xff] %v9704_v34 }
 0x4f3   :  { %3335 = vrot.lane.b32.xlu1 %v9198_v40, %s6638_s28  ;;  %v13097_v40 = vld [vmem:[#allocation99_spill] sm:$0xff] }
 0x4f5   :  { %3093 = vrot.lane.b32.xlu0 %v9485_v58, %s6636_s9  ;;  %v9784_v58 = vld [vmem:[#allocation2 + $0x390] sm:$0xff] }
 0x4f7   :  { %3339 = vrot.lane.b32.xlu1 %v9210_v28, %s6638_s28  ;;  %v9712_v28 = vpop.permute.xlu1 %3095 }
 0x4f8   :  { %13092 = vst [vmem:[#allocation245_spill] sm:$0xff] %v9712_v28 }
 0x4f9   :  { %3097 = vrot.lane.b32.xlu0 %v9492_v38, %s6636_s9 }
 0x4fb   :  { %3343 = vrot.lane.b32.xlu1 %v9222_v37, %s6638_s28  ;;  %v9720_v37 = vpop.permute.xlu1 %3099 }
 0x4fc   :  { %13093 = vst [vmem:[#allocation246_spill] sm:$0xff] %v9720_v37 }
 0x4fd   :  { %3101 = vrot.lane.b32.xlu0 %v9499_v10, %s6636_s9  ;;  %v13113_v10 = vld [vmem:[#allocation154_spill] sm:$0xff] }
 0x4ff   :  { %3347 = vrot.lane.b32.xlu1 %v9234_v1, %s6638_s28  ;;  %v13095_v1 = vld [vmem:[#allocation100_spill] sm:$0xff] }
 0x501   :  { %3105 = vrot.lane.b32.xlu0 %v9506_v60, %s6636_s9  ;;  %v9792_v60 = vld [vmem:[#allocation2 + $0x3b0] sm:$0xff] }
 0x503   :  { %3351 = vrot.lane.b32.xlu1 %v9246_v33, %s6638_s28  ;;  %v9728_v33 = vpop.permute.xlu1 %3103 }
 0x504   :  { %13094 = vst [vmem:[#allocation247_spill] sm:$0xff] %v9728_v33  ;;  %v9966_v33 = vld [vmem:[#allocation2 + $0x3a0] sm:$0xff] }
 0x505   :  { %3109 = vrot.lane.b32.xlu0 %v9513_v62, %s6636_s9 }
 0x507   :  { %3355 = vrot.lane.b32.xlu1 %v9258_v27, %s6638_s28  ;;  %v13096_v27 = vld [vmem:[#allocation220_spill] sm:$0xff]  ;;  %v9736_v43 = vpop.permute.xlu1 %3107 }
 0x508   :  { %13098 = vst [vmem:[#allocation100_spill] sm:$0xff] %v9736_v43  ;;  %v9960_v43 = vld [vmem:[#allocation2 + $0x380] sm:$0xff] }
 0x509   :  { %3113 = vrot.lane.b32.xlu0 %v9520_v21, %s6636_s9 }
 0x50b   :  { %3359 = vrot.lane.b32.xlu1 %v9270_v15, %s6638_s28  ;;  %v13099_v15 = vld [vmem:[#allocation224_spill] sm:$0xff]  ;;  %v9744_v22 = vpop.permute.xlu1 %3111 }
 0x50c   :  { %13102 = vst [vmem:[#allocation220_spill] sm:$0xff] %v9744_v22 }
 0x50d   :  { %3117 = vrot.lane.b32.xlu0 %v9527_v8, %s6636_s9  ;;  %v13116_v8 = vld [vmem:[#allocation157_spill] sm:$0xff] }
 0x50f   :  { %3363 = vrot.lane.b32.xlu1 %v9282_v42, %s6638_s28  ;;  %v13101_v42 = vld [vmem:[#allocation228_spill] sm:$0xff]  ;;  %v9754_v13 = vpop.permute.xlu1 %3115 }
 0x510   :  { %13105 = vst [vmem:[#allocation99_spill] sm:$0xff] %v9754_v13  ;;  %v9952_v13 = vld [vmem:[#allocation2 + $0x360] sm:$0xff] }
 0x511   :  { %3121 = vrot.lane.b32.xlu0 %v13095_v1, %s6636_s9 }
 0x513   :  { %3367 = vrot.lane.b32.xlu1 %v13096_v27, %s6638_s28  ;;  %v9770_v47 = vpop.permute.xlu1 %3119 }
 0x514   :  { %13109 = vst [vmem:[#allocation228_spill] sm:$0xff] %v9770_v47 }
 0x515   :  { %3125 = vrot.lane.b32.xlu0 %v13097_v40, %s6636_s9  ;;  %v13132_v40 = vld [vmem:[#allocation175_spill] sm:$0xff] }
 0x517   :  { %3371 = vrot.lane.b32.xlu1 %v13099_v15, %s6638_s28  ;;  %v9782_v24 = vpop.permute.xlu1 %3123 }
 0x518   :  { %13111 = vst [vmem:[#allocation110_spill] sm:$0xff] %v9782_v24  ;;  %v13156_v24 = vld [vmem:[#allocation208_spill] sm:$0xff] }
 0x519   :  { %3129 = vrot.lane.b32.xlu0 %v13100_v48, %s6636_s9  ;;  %v13134_v48 = vld [vmem:[#allocation178_spill] sm:$0xff] }
 0x51b   :  { %3375 = vrot.lane.b32.xlu1 %v13101_v42, %s6638_s28  ;;  %v9798_v21 = vpop.permute.xlu1 %3127 }
 0x51c   :  { %13115 = vst [vmem:[#allocation248_spill] sm:$0xff] %v9798_v21 }
 0x51d   :  { %3133 = vrot.lane.b32.xlu0 %v13103_v52, %s6636_s9 }
 0x51f   :  { %3379 = vrot.lane.b32.xlu1 %v9748_v32, %s6638_s28  ;;  %v9810_v30 = vpop.permute.xlu1 %3131 }
 0x521   :  { %3137 = vrot.lane.b32.xlu0 %v13104_v51, %s6636_s9  ;;  %v13137_v51 = vld [vmem:[#allocation181_spill] sm:$0xff] }
 0x523   :  { %3383 = vrot.lane.b32.xlu1 %v9756_v44, %s6638_s28  ;;  %v9760_v16 = vpop.permute.xlu0 %3025  ;;  %v9822_v2 = vpop.permute.xlu1 %3135 }
 0x524   :  { %13106 = vst [vmem:[#allocation224_spill] sm:$0xff] %v9760_v16  ;;  %13123 = vst [vmem:[#allocation250_spill] sm:$0xff] %v9822_v2  ;;  %v13152_v2 = vld [vmem:[#allocation202_spill] sm:$0xff]  ;;  %v10491_v16 = vld [vmem:[#allocation2 + $0x280] sm:$0xff] }
 0x525   :  { %3141 = vrot.lane.b32.xlu0 %v13107_v55, %s6636_s9  ;;  %13224 = vst [vmem:[#allocation310_spill] sm:$0xff] %v10491_v16 }
 0x527   :  { %3387 = vrot.lane.b32.xlu1 %v9764_v31, %s6638_s28  ;;  %v9768_v17 = vpop.permute.xlu0 %3029  ;;  %v9830_v39 = vpop.permute.xlu1 %3139 }
 0x528   :  { %13108 = vst [vmem:[#allocation105_spill] sm:$0xff] %v9768_v17  ;;  %13127 = vst [vmem:[#allocation169_spill] sm:$0xff] %v9830_v39  ;;  %v10503_v17 = vld [vmem:[#allocation2 + $0x2a0] sm:$0xff] }
 0x529   :  { %3145 = vrot.lane.b32.xlu0 %v9576_v56, %s6636_s9  ;;  %v13118_v56 = vld [vmem:[#allocation160_spill] sm:$0xff]  ;;  %13227 = vst [vmem:[#allocation313_spill] sm:$0xff] %v10503_v17 }
 0x52a   :  { %13119 = vst [vmem:[#allocation160_spill] sm:$0xff] %v9810_v30  ;;  %v13154_v30 = vld [vmem:[#allocation205_spill] sm:$0xff] }
 0x52b   :  { %3391 = vrot.lane.b32.xlu1 %v9774_v11, %s6638_s28  ;;  %v9778_v5 = vpop.permute.xlu0 %3033  ;;  %v9838_v27 = vpop.permute.xlu1 %3143 }
 0x52c   :  { %13110 = vst [vmem:[#allocation104_spill] sm:$0xff] %v9778_v5  ;;  %13131 = vst [vmem:[#allocation252_spill] sm:$0xff] %v9838_v27  ;;  %v13150_v27 = vld [vmem:[#allocation199_spill] sm:$0xff] }
 0x52d   :  { %3149 = vrot.lane.b32.xlu0 %v9583_v0, %s6636_s9  ;;  %v13121_v0 = vld [vmem:[#allocation163_spill] sm:$0xff] }
 0x52e   :  { %v10443_v5 = vld [vmem:[#allocation2 + $0x200] sm:$0xff] }
 0x52f   :  { %3395 = vrot.lane.b32.xlu1 %v9784_v58, %s6638_s28  ;;  %v9788_v38 = vpop.permute.xlu0 %3037  ;;  %v9846_v42 = vpop.permute.xlu1 %3147 }
 0x530   :  { %13112 = vst [vmem:[#allocation109_spill] sm:$0xff] %v9788_v38  ;;  %13135 = vst [vmem:[#allocation178_spill] sm:$0xff] %v9846_v42  ;;  %v10455_v38 = vld [vmem:[#allocation2 + $0x220] sm:$0xff] }
 0x531   :  { %3281 = vrot.lane.b32.xlu0 %v13113_v10, %s6638_s28 }
 0x533   :  { %3399 = vrot.lane.b32.xlu1 %v9792_v60, %s6638_s28  ;;  %v9796_v62 = vpop.permute.xlu0 %3041  ;;  %v9854_v10 = vpop.permute.xlu1 %3151 }
 0x534   :  { %13114 = vst [vmem:[#allocation154_spill] sm:$0xff] %v9796_v62  ;;  %13139 = vst [vmem:[#allocation254_spill] sm:$0xff] %v9854_v10  ;;  %v13148_v10 = vld [vmem:[#allocation196_spill] sm:$0xff]  ;;  %v10395_v62 = vld [vmem:[#allocation2 + $0x180] sm:$0xff] }
 0x535   :  { %3285 = vrot.lane.b32.xlu0 %v13116_v8, %s6638_s28  ;;  %v13140_v8 = vld [vmem:[#allocation184_spill] sm:$0xff] }
 0x537   :  { %3403 = vrot.lane.b32.xlu1 %v9802_v23, %s6638_s28  ;;  %v9806_v46 = vpop.permute.xlu0 %3045 }
 0x538   :  { %13117 = vst [vmem:[#allocation157_spill] sm:$0xff] %v9806_v46  ;;  %v10407_v46 = vld [vmem:[#allocation2 + $0x1a0] sm:$0xff] }
 0x539   :  { %3289 = vrot.lane.b32.xlu0 %v13118_v56, %s6638_s28 }
 0x53b   :  { %3407 = vrot.lane.b32.xlu1 %v9812_v26, %s6638_s28  ;;  %v9816_v61 = vpop.permute.xlu0 %3049 }
 0x53c   :  { %13120 = vst [vmem:[#allocation249_spill] sm:$0xff] %v9816_v61  ;;  %v10347_v61 = vld [vmem:[#allocation2 + $0x100] sm:$0xff] }
 0x53d   :  { %3293 = vrot.lane.b32.xlu0 %v13121_v0, %s6638_s28  ;;  %v13142_v0 = vld [vmem:[#allocation187_spill] sm:$0xff] }
 0x53f   :  { %v9820_v54 = vpop.permute.xlu0 %3053 }
 0x540   :  { %13122 = vst [vmem:[#allocation163_spill] sm:$0xff] %v9820_v54  ;;  %v10359_v54 = vld [vmem:[#allocation2 + $0x120] sm:$0xff] }
 0x541   :  { %3297 = vrot.lane.b32.xlu0 %v13124_v57, %s6638_s28  ;;  %v9862_v57 = vpop.permute.xlu1 %3283 }
 0x542   :  { %v3474_v28 = vrot.slane %v9862_v57, 1  ;;  %v9984_v57 = vld [vmem:[#allocation2 + $0x3e0] sm:$0xff] }
 0x543   :  { %v9826_v9 = vpop.permute.xlu0 %3057 }
 0x544   :  { %13125 = vst [vmem:[#allocation166_spill] sm:$0xff] %v9826_v9 }
 0x545   :  { %3301 = vrot.lane.b32.xlu0 %v13126_v4, %s6638_s28 }
 0x547   :  { %v9832_v35 = vpop.permute.xlu0 %3061 }
 0x548   :  { %13128 = vst [vmem:[#allocation251_spill] sm:$0xff] %v9832_v35 }
 0x549   :  { %3305 = vrot.lane.b32.xlu0 %v13129_v3, %s6638_s28  ;;  %v13144_v3 = vld [vmem:[#allocation190_spill] sm:$0xff] }
 0x54b   :  { %v9836_v1 = vpop.permute.xlu0 %3065 }
 0x54c   :  { %13130 = vst [vmem:[#allocation172_spill] sm:$0xff] %v9836_v1 }
 0x54d   :  { %3309 = vrot.lane.b32.xlu0 %v13132_v40, %s6638_s28 }
 0x54f   :  { %v9842_v15 = vpop.permute.xlu0 %3069 }
 0x550   :  { %13133 = vst [vmem:[#allocation175_spill] sm:$0xff] %v9842_v15 }
 0x551   :  { %3313 = vrot.lane.b32.xlu0 %v13134_v48, %s6638_s28  ;;  %v9870_v48 = vpop.permute.xlu1 %3287 }
 0x552   :  { %v3476_v36 = vrot.slane %v9870_v48, 1 }
 0x553   :  { %v9848_v52 = vpop.permute.xlu0 %3073 }
 0x554   :  { %13136 = vst [vmem:[#allocation253_spill] sm:$0xff] %v9848_v52 }
 0x555   :  { %3317 = vrot.lane.b32.xlu0 %v13137_v51, %s6638_s28  ;;  %v13146_v51 = vld [vmem:[#allocation193_spill] sm:$0xff] }
 0x557   :  { %v9852_v55 = vpop.permute.xlu0 %3077 }
 0x558   :  { %13138 = vst [vmem:[#allocation181_spill] sm:$0xff] %v9852_v55 }
 0x559   :  { %3321 = vrot.lane.b32.xlu0 %v13140_v8, %s6638_s28 }
 0x55b   :  { %v9858_v56 = vpop.permute.xlu0 %3081 }
 0x55c   :  { %13141 = vst [vmem:[#allocation184_spill] sm:$0xff] %v9858_v56  ;;  %v9938_v56 = vld [vmem:[#allocation2 + $0x320] sm:$0xff] }
 0x55d   :  { %3325 = vrot.lane.b32.xlu0 %v13142_v0, %s6638_s28  ;;  %v9878_v0 = vpop.permute.xlu1 %3291 }
 0x55f   :  { %v9864_v4 = vpop.permute.xlu0 %3085 }
 0x560   :  { %13143 = vst [vmem:[#allocation187_spill] sm:$0xff] %v9864_v4  ;;  %v9973_v4 = vld [vmem:[#allocation2 + $0x3c0] sm:$0xff] }
 0x561   :  { %3329 = vrot.lane.b32.xlu0 %v13144_v3, %s6638_s28  ;;  %v9886_v39 = vpop.permute.xlu1 %3295 }
 0x563   :  { %v9868_v40 = vpop.permute.xlu0 %3089 }
 0x564   :  { %13145 = vst [vmem:[#allocation190_spill] sm:$0xff] %v9868_v40  ;;  %v13164_v40 = vld [vmem:[#allocation221_spill] sm:$0xff] }
 0x565   :  { %3333 = vrot.lane.b32.xlu0 %v13146_v51, %s6638_s28 }
 0x567   :  { %v9874_v8 = vpop.permute.xlu0 %3093 }
 0x568   :  { %13147 = vst [vmem:[#allocation193_spill] sm:$0xff] %v9874_v8 }
 0x569   :  { %3337 = vrot.lane.b32.xlu0 %v13148_v10, %s6638_s28  ;;  %v9894_v10 = vpop.permute.xlu1 %3299 }
 0x56b   :  { %v9880_v42 = vpop.permute.xlu0 %3097 }
 0x56c   :  { %13149 = vst [vmem:[#allocation196_spill] sm:$0xff] %v9880_v42  ;;  %v13158_v42 = vld [vmem:[#allocation211_spill] sm:$0xff] }
 0x56d   :  { %3341 = vrot.lane.b32.xlu0 %v13150_v27, %s6638_s28 }
 0x56f   :  { %v9884_v3 = vpop.permute.xlu0 %3101 }
 0x570   :  { %13151 = vst [vmem:[#allocation199_spill] sm:$0xff] %v9884_v3  ;;  %v9902_v3 = vpop.permute.xlu1 %3303 }
 0x571   :  { %3345 = vrot.lane.b32.xlu0 %v13152_v2, %s6638_s28 }
 0x573   :  { %v9890_v51 = vpop.permute.xlu0 %3105 }
 0x574   :  { %13153 = vst [vmem:[#allocation202_spill] sm:$0xff] %v9890_v51  ;;  %v13160_v51 = vld [vmem:[#allocation214_spill] sm:$0xff] }
 0x575   :  { %3349 = vrot.lane.b32.xlu0 %v13154_v30, %s6638_s28  ;;  %v9910_v30 = vpop.permute.xlu1 %3307 }
 0x577   :  { %v9896_v21 = vpop.permute.xlu0 %3109 }
 0x578   :  { %13155 = vst [vmem:[#allocation205_spill] sm:$0xff] %v9896_v21  ;;  %v13162_v21 = vld [vmem:[#allocation217_spill] sm:$0xff] }
 0x579   :  { %3353 = vrot.lane.b32.xlu0 %v13156_v24, %s6638_s28 }
 0x57b   :  { %v9900_v27 = vpop.permute.xlu0 %3113 }
 0x57c   :  { %13157 = vst [vmem:[#allocation208_spill] sm:$0xff] %v9900_v27  ;;  %v9918_v27 = vpop.permute.xlu1 %3311 }
 0x57d   :  { %3357 = vrot.lane.b32.xlu0 %v13158_v42, %s6638_s28 }
 0x57f   :  { %v9906_v2 = vpop.permute.xlu0 %3117 }
 0x580   :  { %13159 = vst [vmem:[#allocation211_spill] sm:$0xff] %v9906_v2  ;;  %v13166_v2 = vld [vmem:[#allocation225_spill] sm:$0xff] }
 0x581   :  { %3361 = vrot.lane.b32.xlu0 %v13160_v51, %s6638_s28  ;;  %v9926_v51 = vpop.permute.xlu1 %3315 }
 0x583   :  { %v9912_v8 = vpop.permute.xlu0 %3121 }
 0x584   :  { %13161 = vst [vmem:[#allocation214_spill] sm:$0xff] %v9912_v8  ;;  %v9930_v8 = vld [vmem:[#allocation2 + $0x300] sm:$0xff] }
 0x585   :  { %3365 = vrot.lane.b32.xlu0 %v13162_v21, %s6638_s28 }
 0x587   :  { %v9916_v24 = vpop.permute.xlu0 %3125 }
 0x588   :  { %13163 = vst [vmem:[#allocation217_spill] sm:$0xff] %v9916_v24  ;;  %v9936_v24 = vpop.permute.xlu1 %3319 }
 0x589   :  { %3369 = vrot.lane.b32.xlu0 %v13164_v40, %s6638_s28 }
 0x58b   :  { %v9922_v42 = vpop.permute.xlu0 %3129 }
 0x58c   :  { %13165 = vst [vmem:[#allocation221_spill] sm:$0xff] %v9922_v42 }
 0x58d   :  { %3373 = vrot.lane.b32.xlu0 %v13166_v2, %s6638_s28  ;;  %v9944_v2 = vld [vmem:[#allocation2 + $0x340] sm:$0xff] }
 0x58f   :  { %v9928_v47 = vpop.permute.xlu0 %3133 }
 0x590   :  { %13167 = vst [vmem:[#allocation225_spill] sm:$0xff] %v9928_v47  ;;  %v9948_v47 = vpop.permute.xlu1 %3323 }
 0x591   :  { %3377 = vrot.lane.b32.xlu0 %v9930_v8, %s6638_s28 }
 0x593   :  { %v9934_v21 = vpop.permute.xlu0 %3137 }
 0x594   :  { %13168 = vst [vmem:[#allocation255_spill] sm:$0xff] %v9934_v21  ;;  %v9958_v22 = vpop.permute.xlu1 %3327 }
 0x595   :  { %3381 = vrot.lane.b32.xlu0 %v9938_v56, %s6638_s28 }
 0x597   :  { %v9942_v40 = vpop.permute.xlu0 %3141 }
 0x598   :  { %13169 = vst [vmem:[#allocation256_spill] sm:$0xff] %v9942_v40 }
 0x599   :  { %3385 = vrot.lane.b32.xlu0 %v9944_v2, %s6638_s28 }
 0x59b   :  { %v9950_v42 = vpop.permute.xlu0 %3145 }
 0x59c   :  { %13170 = vst [vmem:[#allocation257_spill] sm:$0xff] %v9950_v42  ;;  %v9970_v42 = vpop.permute.xlu1 %3331 }
 0x59d   :  { %3389 = vrot.lane.b32.xlu0 %v9952_v13, %s6638_s28 }
 0x59f   :  { %v9956_v21 = vpop.permute.xlu0 %3149 }
 0x5a0   :  { %13171 = vst [vmem:[#allocation258_spill] sm:$0xff] %v9956_v21  ;;  %v9982_v18 = vpop.permute.xlu1 %3335 }
 0x5a1   :  { %3393 = vrot.lane.b32.xlu0 %v9960_v43, %s6638_s28 }
 0x5a3   :  { %v9964_v40 = vpop.permute.xlu0 %3281 }
 0x5a4   :  { %v12771_v50 = vrot.slane %v9964_v40, 1  ;;  %v9999_v1 = vpop.permute.xlu1 %3339 }
 0x5a5   :  { %3397 = vrot.lane.b32.xlu0 %v9966_v33, %s6638_s28 }
 0x5a7   :  { %v3286_v37 = vpop.permute.xlu0 %3285 }
 0x5a8   :  { %v3475_v21 = vrot.slane %v3286_v37, 1  ;;  %v10012_v41 = vpop.permute.xlu1 %3343 }
 0x5a9   :  { %3401 = vrot.lane.b32.xlu0 %v9973_v4, %s6638_s28 }
 0x5aa   :  { %v3598_v34 = vsel %vm2256_vm3, %v3474_v28, %v3475_v21 }
 0x5ab   :  { %3667 = vrot.lane.b32.xlu1 %v3598_v34, %s6636_s9  ;;  %v3290_v63 = vpop.permute.xlu0 %3289  ;;  %v3478_v34 = vrot.slane %v9878_v0, 1 }
 0x5ac   :  { %v3477_v52 = vrot.slane %v3290_v63, 1  ;;  %v3599_v63 = vsel %vm2256_vm3, %v12771_v50, %v3474_v28 }
 0x5ad   :  { %3405 = vrot.lane.b32.xlu0 %v9984_v57, %s6638_s28 }
 0x5ae   :  { %v3596_v37 = vsel %vm2256_vm3, %v3476_v36, %v3477_v52 }
 0x5af   :  { %3671 = vrot.lane.b32.xlu1 %v3596_v37, %s6636_s9  ;;  %v3294_v55 = vpop.permute.xlu0 %3293  ;;  %v3480_v37 = vrot.slane %v9886_v39, 1  ;;  %v3484_v39 = vrot.slane %v9902_v3, 1 }
 0x5b0   :  { %v3479_v20 = vrot.slane %v3294_v55, 1  ;;  %v3597_v55 = vsel %vm2256_vm3, %v3475_v21, %v3476_v36 }
 0x5b1   :  { %3665 = vrot.lane.b32.xlu0 %v3599_v63, %s6636_s9  ;;  %v3482_v63 = vrot.slane %v9894_v10, 1 }
 0x5b2   :  { %v3594_v48 = vsel %vm2256_vm3, %v3478_v34, %v3479_v20  ;;  %v3593_v10 = vsel %vm2256_vm3, %v3479_v20, %v3480_v37 }
 0x5b3   :  { %3675 = vrot.lane.b32.xlu1 %v3594_v48, %s6636_s9  ;;  %v3298_v29 = vpop.permute.xlu0 %3297  ;;  %v3595_v48 = vsel %vm2256_vm3, %v3477_v52, %v3478_v34  ;;  %v10024_v34 = vpop.permute.xlu1 %3347 }
 0x5b4   :  { %v3481_v15 = vrot.slane %v3298_v29, 1 }
 0x5b5   :  { %3669 = vrot.lane.b32.xlu0 %v3597_v55, %s6636_s9 }
 0x5b6   :  { %v3592_v28 = vsel %vm2256_vm3, %v3480_v37, %v3481_v15  ;;  %v3591_v3 = vsel %vm2256_vm3, %v3481_v15, %v3482_v63 }
 0x5b7   :  { %3679 = vrot.lane.b32.xlu1 %v3592_v28, %s6636_s9  ;;  %v3302_v0 = vpop.permute.xlu0 %3301  ;;  %v3486_v28 = vrot.slane %v9910_v30, 1 }
 0x5b8   :  { %v3483_v50 = vrot.slane %v3302_v0, 1 }
 0x5b9   :  { %3673 = vrot.lane.b32.xlu0 %v3595_v48, %s6636_s9  ;;  %v3488_v48 = vrot.slane %v9918_v27, 1 }
 0x5ba   :  { %v3590_v29 = vsel %vm2256_vm3, %v3482_v63, %v3483_v50  ;;  %v3490_v63 = vrot.slane %v9926_v51, 1 }
 0x5bb   :  { %3683 = vrot.lane.b32.xlu1 %v3590_v29, %s6636_s9  ;;  %v3306_v36 = vpop.permute.xlu0 %3305 }
 0x5bc   :  { %v3485_v21 = vrot.slane %v3306_v36, 1  ;;  %v3589_v36 = vsel %vm2256_vm3, %v3483_v50, %v3484_v39 }
 0x5bd   :  { %3677 = vrot.lane.b32.xlu0 %v3593_v10, %s6636_s9  ;;  %v10037_v10 = vpop.permute.xlu1 %3351 }
 0x5be   :  { %v3588_v52 = vsel %vm2256_vm3, %v3484_v39, %v3485_v21  ;;  %v3587_v27 = vsel %vm2256_vm3, %v3485_v21, %v3486_v28 }
 0x5bf   :  { %3687 = vrot.lane.b32.xlu1 %v3588_v52, %s6636_s9  ;;  %v3310_v55 = vpop.permute.xlu0 %3309 }
 0x5c0   :  { %v3487_v0 = vrot.slane %v3310_v55, 1 }
 0x5c1   :  { %3681 = vrot.lane.b32.xlu0 %v3591_v3, %s6636_s9  ;;  %v10049_v39 = vpop.permute.xlu1 %3355  ;;  %v3492_v3 = vrot.slane %v9936_v24, 1 }
 0x5c2   :  { %v3586_v20 = vsel %vm2256_vm3, %v3486_v28, %v3487_v0  ;;  %v3585_v51 = vsel %vm2256_vm3, %v3487_v0, %v3488_v48 }
 0x5c3   :  { %3691 = vrot.lane.b32.xlu1 %v3586_v20, %s6636_s9  ;;  %v3314_v37 = vpop.permute.xlu0 %3313 }
 0x5c4   :  { %v3489_v29 = vrot.slane %v3314_v37, 1  ;;  %v3494_v37 = vrot.slane %v9948_v47, 1 }
 0x5c5   :  { %3685 = vrot.lane.b32.xlu0 %v3589_v36, %s6636_s9 }
 0x5c6   :  { %v3584_v15 = vsel %vm2256_vm3, %v3488_v48, %v3489_v29  ;;  %v3496_v48 = vrot.slane %v9958_v22, 1 }
 0x5c7   :  { %3695 = vrot.lane.b32.xlu1 %v3584_v15, %s6636_s9  ;;  %v3318_v30 = vpop.permute.xlu0 %3317  ;;  %v3583_v15 = vsel %vm2256_vm3, %v3489_v29, %v3490_v63 }
 0x5c8   :  { %v3491_v52 = vrot.slane %v3318_v30, 1  ;;  %v10062_v30 = vpop.permute.xlu1 %3359 }
 0x5c9   :  { %3689 = vrot.lane.b32.xlu0 %v3587_v27, %s6636_s9 }
 0x5ca   :  { %v3582_v50 = vsel %vm2256_vm3, %v3490_v63, %v3491_v52  ;;  %v3581_v47 = vsel %vm2256_vm3, %v3491_v52, %v3492_v3 }
 0x5cb   :  { %3699 = vrot.lane.b32.xlu1 %v3582_v50, %s6636_s9  ;;  %v3322_v55 = vpop.permute.xlu0 %3321 }
 0x5cc   :  { %v3493_v20 = vrot.slane %v3322_v55, 1  ;;  %v10074_v63 = vpop.permute.xlu1 %3363  ;;  %v3498_v55 = vrot.slane %v9970_v42, 1 }
 0x5cd   :  { %3693 = vrot.lane.b32.xlu0 %v3585_v51, %s6636_s9 }
 0x5ce   :  { %v3580_v21 = vsel %vm2256_vm3, %v3492_v3, %v3493_v20  ;;  %v3579_v22 = vsel %vm2256_vm3, %v3493_v20, %v3494_v37 }
 0x5cf   :  { %3703 = vrot.lane.b32.xlu1 %v3580_v21, %s6636_s9  ;;  %v3326_v28 = vpop.permute.xlu0 %3325  ;;  %v3500_v21 = vrot.slane %v9982_v18, 1 }
 0x5d0   :  { %v3495_v36 = vrot.slane %v3326_v28, 1 }
 0x5d1   :  { %3697 = vrot.lane.b32.xlu0 %v3583_v15, %s6636_s9 }
 0x5d2   :  { %v3578_v24 = vsel %vm2256_vm3, %v3494_v37, %v3495_v36  ;;  %v3577_v15 = vsel %vm2256_vm3, %v3495_v36, %v3496_v48  ;;  %v3502_v37 = vrot.slane %v9999_v1, 1 }
 0x5d3   :  { %3707 = vrot.lane.b32.xlu1 %v3578_v24, %s6636_s9  ;;  %v3330_v0 = vpop.permute.xlu0 %3329  ;;  %v10087_v24 = vpop.permute.xlu1 %3367 }
 0x5d4   :  { %v3497_v27 = vrot.slane %v3330_v0, 1 }
 0x5d5   :  { %3701 = vrot.lane.b32.xlu0 %v3581_v47, %s6636_s9 }
 0x5d6   :  { %v3576_v29 = vsel %vm2256_vm3, %v3496_v48, %v3497_v27  ;;  %v3575_v18 = vsel %vm2256_vm3, %v3497_v27, %v3498_v55 }
 0x5d7   :  { %3711 = vrot.lane.b32.xlu1 %v3576_v29, %s6636_s9  ;;  %v3334_v50 = vpop.permute.xlu0 %3333  ;;  %v10099_v48 = vpop.permute.xlu1 %3371  ;;  %v3504_v29 = vrot.slane %v10012_v41, 1 }
 0x5d8   :  { %v3499_v51 = vrot.slane %v3334_v50, 1 }
 0x5d9   :  { %3705 = vrot.lane.b32.xlu0 %v3579_v22, %s6636_s9  ;;  %v3506_v22 = vrot.slane %v10024_v34, 1 }
 0x5da   :  { %v3574_v52 = vsel %vm2256_vm3, %v3498_v55, %v3499_v51  ;;  %v3573_v1 = vsel %vm2256_vm3, %v3499_v51, %v3500_v21 }
 0x5db   :  { %3715 = vrot.lane.b32.xlu1 %v3574_v52, %s6636_s9  ;;  %v3338_v3 = vpop.permute.xlu0 %3337 }
 0x5dc   :  { %v3501_v28 = vrot.slane %v3338_v3, 1 }
 0x5dd   :  { %3709 = vrot.lane.b32.xlu0 %v3577_v15, %s6636_s9  ;;  %v10112_v15 = vpop.permute.xlu1 %3375 }
 0x5de   :  { %v3572_v42 = vsel %vm2256_vm3, %v3500_v21, %v3501_v28  ;;  %v3571_v3 = vsel %vm2256_vm3, %v3501_v28, %v3502_v37  ;;  %v3508_v21 = vrot.slane %v10037_v10, 1 }
 0x5df   :  { %3719 = vrot.lane.b32.xlu1 %v3572_v42, %s6636_s9  ;;  %v3342_v20 = vpop.permute.xlu0 %3341 }
 0x5e0   :  { %v3503_v0 = vrot.slane %v3342_v20, 1 }
 0x5e1   :  { %3713 = vrot.lane.b32.xlu0 %v3575_v18, %s6636_s9  ;;  %v10124_v20 = vpop.permute.xlu1 %3379  ;;  %v3510_v18 = vrot.slane %v10049_v39, 1 }
 0x5e2   :  { %v3570_v36 = vsel %vm2256_vm3, %v3502_v37, %v3503_v0  ;;  %v3569_v34 = vsel %vm2256_vm3, %v3503_v0, %v3504_v29 }
 0x5e3   :  { %3723 = vrot.lane.b32.xlu1 %v3570_v36, %s6636_s9  ;;  %v3346_v47 = vpop.permute.xlu0 %3345 }
 0x5e4   :  { %v3505_v50 = vrot.slane %v3346_v47, 1 }
 0x5e5   :  { %3717 = vrot.lane.b32.xlu0 %v3573_v1, %s6636_s9 }
 0x5e6   :  { %v3568_v27 = vsel %vm2256_vm3, %v3504_v29, %v3505_v50  ;;  %v3567_v10 = vsel %vm2256_vm3, %v3505_v50, %v3506_v22  ;;  %v3512_v29 = vrot.slane %v10062_v30, 1 }
 0x5e7   :  { %3727 = vrot.lane.b32.xlu1 %v3568_v27, %s6636_s9  ;;  %v3350_v55 = vpop.permute.xlu0 %3349 }
 0x5e8   :  { %v3507_v52 = vrot.slane %v3350_v55, 1  ;;  %v10137_v55 = vpop.permute.xlu1 %3383 }
 0x5e9   :  { %3721 = vrot.lane.b32.xlu0 %v3571_v3, %s6636_s9 }
 0x5ea   :  { %v3566_v41 = vsel %vm2256_vm3, %v3506_v22, %v3507_v52  ;;  %v3565_v27 = vsel %vm2256_vm3, %v3507_v52, %v3508_v21  ;;  %v3514_v22 = vrot.slane %v10074_v63, 1 }
 0x5eb   :  { %3731 = vrot.lane.b32.xlu1 %v3566_v41, %s6636_s9  ;;  %v3354_v51 = vpop.permute.xlu0 %3353 }
 0x5ec   :  { %v3509_v42 = vrot.slane %v3354_v51, 1  ;;  %v3388_v41 = vpop.permute.xlu1 %3387 }
 0x5ed   :  { %3725 = vrot.lane.b32.xlu0 %v3569_v34, %s6636_s9 }
 0x5ee   :  { %v3564_v28 = vsel %vm2256_vm3, %v3508_v21, %v3509_v42  ;;  %v3563_v30 = vsel %vm2256_vm3, %v3509_v42, %v3510_v18  ;;  %v3516_v21 = vrot.slane %v10087_v24, 1 }
 0x5ef   :  { %3735 = vrot.lane.b32.xlu1 %v3564_v28, %s6636_s9  ;;  %v3358_v37 = vpop.permute.xlu0 %3357 }
 0x5f0   :  { %v3511_v36 = vrot.slane %v3358_v37, 1  ;;  %v3518_v37 = vrot.slane %v10099_v48, 1 }
 0x5f1   :  { %3729 = vrot.lane.b32.xlu0 %v3567_v10, %s6636_s9 }
 0x5f2   :  { %v3562_v0 = vsel %vm2256_vm3, %v3510_v18, %v3511_v36  ;;  %v3561_v28 = vsel %vm2256_vm3, %v3511_v36, %v3512_v29 }
 0x5f3   :  { %3739 = vrot.lane.b32.xlu1 %v3562_v0, %s6636_s9  ;;  %v3362_v47 = vpop.permute.xlu0 %3361  ;;  %v3392_v0 = vpop.permute.xlu1 %3391 }
 0x5f4   :  { %v3513_v1 = vrot.slane %v3362_v47, 1  ;;  %v3520_v47 = vrot.slane %v10112_v15, 1 }
 0x5f5   :  { %3733 = vrot.lane.b32.xlu0 %v3565_v27, %s6636_s9 }
 0x5f6   :  { %v3560_v39 = vsel %vm2256_vm3, %v3512_v29, %v3513_v1  ;;  %v3559_v10 = vsel %vm2256_vm3, %v3513_v1, %v3514_v22 }
 0x5f7   :  { %3743 = vrot.lane.b32.xlu1 %v3560_v39, %s6636_s9  ;;  %v3366_v50 = vpop.permute.xlu0 %3365  ;;  %v3396_v1 = vpop.permute.xlu1 %3395 }
 0x5f8   :  { %v3515_v3 = vrot.slane %v3366_v50, 1  ;;  %v3522_v50 = vrot.slane %v10124_v20, 1 }
 0x5f9   :  { %3737 = vrot.lane.b32.xlu0 %v3563_v30, %s6636_s9 }
 0x5fa   :  { %v3558_v52 = vsel %vm2256_vm3, %v3514_v22, %v3515_v3  ;;  %v3557_v27 = vsel %vm2256_vm3, %v3515_v3, %v3516_v21 }
 0x5fb   :  { %3747 = vrot.lane.b32.xlu1 %v3558_v52, %s6636_s9  ;;  %v3370_v51 = vpop.permute.xlu0 %3369  ;;  %v3524_v52 = vrot.slane %v10137_v55, 1 }
 0x5fc   :  { %v3517_v34 = vrot.slane %v3370_v51, 1 }
 0x5fd   :  { %3741 = vrot.lane.b32.xlu0 %v3561_v28, %s6636_s9  ;;  %v3400_v28 = vpop.permute.xlu1 %3399 }
 0x5fe   :  { %v3556_v63 = vsel %vm2256_vm3, %v3516_v21, %v3517_v34  ;;  %v3555_v30 = vsel %vm2256_vm3, %v3517_v34, %v3518_v37 }
 0x5ff   :  { %3751 = vrot.lane.b32.xlu1 %v3556_v63, %s6636_s9  ;;  %v3374_v42 = vpop.permute.xlu0 %3373  ;;  %v3526_v63 = vrot.slane %v3388_v41, 1 }
 0x600   :  { %v3519_v18 = vrot.slane %v3374_v42, 1 }
 0x601   :  { %3745 = vrot.lane.b32.xlu0 %v3559_v10, %s6636_s9 }
 0x602   :  { %v3554_v24 = vsel %vm2256_vm3, %v3518_v37, %v3519_v18  ;;  %v3553_v21 = vsel %vm2256_vm3, %v3519_v18, %v3520_v47  ;;  %v3404_v18 = vpop.permute.xlu1 %3403 }
 0x603   :  { %3755 = vrot.lane.b32.xlu1 %v3554_v24, %s6636_s9  ;;  %v3378_v36 = vpop.permute.xlu0 %3377  ;;  %v3528_v24 = vrot.slane %v3392_v0, 1 }
 0x604   :  { %v3521_v29 = vrot.slane %v3378_v36, 1 }
 0x605   :  { %3749 = vrot.lane.b32.xlu0 %v3557_v27, %s6636_s9  ;;  %v3530_v27 = vrot.slane %v3396_v1, 1 }
 0x606   :  { %v3552_v48 = vsel %vm2256_vm3, %v3520_v47, %v3521_v29  ;;  %v3551_v37 = vsel %vm2256_vm3, %v3521_v29, %v3522_v50 }
 0x607   :  { %3759 = vrot.lane.b32.xlu1 %v3552_v48, %s6636_s9  ;;  %v3382_v39 = vpop.permute.xlu0 %3381 }
 0x608   :  { %v3523_v22 = vrot.slane %v3382_v39, 1 }
 0x609   :  { %3753 = vrot.lane.b32.xlu0 %v3555_v30, %s6636_s9  ;;  %v3532_v30 = vrot.slane %v3400_v28, 1 }
 0x60a   :  { %v3550_v15 = vsel %vm2256_vm3, %v3522_v50, %v3523_v22  ;;  %v3549_v47 = vsel %vm2256_vm3, %v3523_v22, %v3524_v52  ;;  %v3408_v50 = vpop.permute.xlu1 %3407 }
 0x60b   :  { %3763 = vrot.lane.b32.xlu1 %v3550_v15, %s6636_s9  ;;  %v3386_v3 = vpop.permute.xlu0 %3385 }
 0x60c   :  { %v3525_v51 = vrot.slane %v3386_v3, 1 }
 0x60d   :  { %3757 = vrot.lane.b32.xlu0 %v3553_v21, %s6636_s9  ;;  %v3534_v21 = vrot.slane %v3404_v18, 1 }
 0x60e   :  { %v3548_v20 = vsel %vm2256_vm3, %v3524_v52, %v3525_v51  ;;  %v3547_v39 = vsel %vm2256_vm3, %v3525_v51, %v3526_v63 }
 0x60f   :  { %3767 = vrot.lane.b32.xlu1 %v3548_v20, %s6636_s9  ;;  %v3390_v34 = vpop.permute.xlu0 %3389 }
 0x610   :  { %v3527_v42 = vrot.slane %v3390_v34, 1 }
 0x611   :  { %3761 = vrot.lane.b32.xlu0 %v3551_v37, %s6636_s9 }
 0x612   :  { %v3546_v55 = vsel %vm2256_vm3, %v3526_v63, %v3527_v42  ;;  %v3545_v3 = vsel %vm2256_vm3, %v3527_v42, %v3528_v24  ;;  %v3536_v63 = vrot.slane %v3408_v50, 1 }
 0x613   :  { %3771 = vrot.lane.b32.xlu1 %v3546_v55, %s6636_s9  ;;  %v3394_v10 = vpop.permute.xlu0 %3393 }
 0x614   :  { %v3529_v36 = vrot.slane %v3394_v10, 1  ;;  %v13176_v10 = vrot.slane %v9964_v40, 1 }
 0x615   :  { %3765 = vrot.lane.b32.xlu0 %v3549_v47, %s6636_s9 }
 0x616   :  { %v3544_v41 = vsel %vm2256_vm3, %v3528_v24, %v3529_v36  ;;  %v3543_v34 = vsel %vm2256_vm3, %v3529_v36, %v3530_v27  ;;  %v3600_v24 = vsel %vm2256_vm3, %v3536_v63, %v13176_v10  ;;  %v10287_v10 = vld [vmem:[#allocation2 + $0x60] sm:$0xff] }
 0x617   :  { %3775 = vrot.lane.b32.xlu1 %v3544_v41, %s6636_s9  ;;  %v3398_v29 = vpop.permute.xlu0 %3397 }
 0x618   :  { %v3531_v48 = vrot.slane %v3398_v29, 1  ;;  %v6505_v29 = vld [vmem:[#allocation2 + $0x10] sm:$0xff] }
 0x619   :  { %3769 = vrot.lane.b32.xlu0 %v3547_v39, %s6636_s9  ;;  %v10246_v39 = vld [vmem:[#allocation2 + $0x30] sm:$0xff] }
 0x61a   :  { %v3542_v0 = vsel %vm2256_vm3, %v3530_v27, %v3531_v48  ;;  %v3541_v55 = vsel %vm2256_vm3, %v3531_v48, %v3532_v30 }
 0x61b   :  { %3779 = vrot.lane.b32.xlu1 %v3542_v0, %s6636_s9  ;;  %v3402_v22 = vpop.permute.xlu0 %3401 }
 0x61c   :  { %v3533_v15 = vrot.slane %v3402_v22, 1  ;;  %v6507_v22 = vld [vmem:[#allocation2] sm:$0xff] }
 0x61d   :  { %v10205_v52 = vpop.permute.xlu1 %3667  ;;  %3773 = vrot.lane.b32.xlu0 %v3545_v3, %s6636_s9 }
 0x61e   :  { %13172 = vst [vmem:[#allocation259_spill] sm:$0xff] %v10205_v52  ;;  %v3540_v1 = vsel %vm2256_vm3, %v3532_v30, %v3533_v15  ;;  %v3539_v47 = vsel %vm2256_vm3, %v3533_v15, %v3534_v21  ;;  %v10255_v30 = vld [vmem:[#allocation2 + $0x50] sm:$0xff] }
 0x61f   :  { %3783 = vrot.lane.b32.xlu1 %v3540_v1, %s6636_s9  ;;  %v3406_v51 = vpop.permute.xlu0 %3405  ;;  %v10263_v1 = vld [vmem:[#allocation2 + $0x20] sm:$0xff] }
 0x620   :  { %v3535_v20 = vrot.slane %v3406_v51, 1  ;;  %v10267_v51 = vld [vmem:[#allocation2 + $0x70] sm:$0xff] }
 0x621   :  { %v10213_v28 = vpop.permute.xlu1 %3671  ;;  %3777 = vrot.lane.b32.xlu0 %v3543_v34, %s6636_s9  ;;  %v10275_v34 = vld [vmem:[#allocation2 + $0x40] sm:$0xff] }
 0x622   :  { %13173 = vst [vmem:[#allocation260_spill] sm:$0xff] %v10213_v28  ;;  %v3538_v42 = vsel %vm2256_vm3, %v3534_v21, %v3535_v20  ;;  %v3537_v40 = vsel %vm2256_vm3, %v3535_v20, %v3536_v63  ;;  %v10279_v63 = vld [vmem:[#allocation2 + $0x90] sm:$0xff] }
 0x623   :  { %3787 = vrot.lane.b32.xlu1 %v3538_v42, %s6636_s9  ;;  %v10219_v37 = vpop.permute.xlu0 %3665 }
 0x624   :  { %13174 = vst [vmem:[#allocation261_spill] sm:$0xff] %v10219_v37  ;;  %v10467_v37 = vld [vmem:[#allocation2 + $0x240] sm:$0xff] }
 0x625   :  { %v10223_v18 = vpop.permute.xlu1 %3675  ;;  %3781 = vrot.lane.b32.xlu0 %v3541_v55, %s6636_s9 }
 0x626   :  { %13175 = vst [vmem:[#allocation262_spill] sm:$0xff] %v10223_v18 }
 0x627   :  { %3791 = vrot.lane.b32.xlu1 %v3600_v24, %s6636_s9  ;;  %v10231_v36 = vpop.permute.xlu0 %3669  ;;  %v10291_v24 = vld [vmem:[#allocation2 + $0xb0] sm:$0xff] }
 0x628   :  { %13177 = vst [vmem:[#allocation263_spill] sm:$0xff] %v10231_v36 }
 0x629   :  { %v10235_v41 = vpop.permute.xlu1 %3679  ;;  %3785 = vrot.lane.b32.xlu0 %v3539_v47, %s6636_s9 }
 0x62a   :  { %13178 = vst [vmem:[#allocation264_spill] sm:$0xff] %v10235_v41 }
 0x62b   :  { %3923 = vrot.lane.b32.xlu1 %v6505_v29, %s6639_s18  ;;  %v10239_v27 = vpop.permute.xlu0 %3673 }
 0x62c   :  { %13179 = vst [vmem:[#allocation265_spill] sm:$0xff] %v10239_v27  ;;  %v10419_v27 = vld [vmem:[#allocation2 + $0x1c0] sm:$0xff] }
 0x62d   :  { %v10243_v48 = vpop.permute.xlu1 %3683  ;;  %3789 = vrot.lane.b32.xlu0 %v3537_v40, %s6636_s9  ;;  %v10299_v40 = vld [vmem:[#allocation2 + $0x80] sm:$0xff] }
 0x62e   :  { %13180 = vst [vmem:[#allocation266_spill] sm:$0xff] %v10243_v48 }
 0x62f   :  { %3927 = vrot.lane.b32.xlu1 %v10246_v39, %s6639_s18  ;;  %v10250_v50 = vpop.permute.xlu0 %3677 }
 0x630   :  { %13181 = vst [vmem:[#allocation267_spill] sm:$0xff] %v10250_v50 }
 0x631   :  { %v10252_v0 = vpop.permute.xlu1 %3687  ;;  %3921 = vrot.lane.b32.xlu0 %v6507_v22, %s6639_s18  ;;  %v10303_v22 = vld [vmem:[#allocation2 + $0xd0] sm:$0xff] }
 0x632   :  { %13182 = vst [vmem:[#allocation268_spill] sm:$0xff] %v10252_v0 }
 0x633   :  { %3931 = vrot.lane.b32.xlu1 %v10255_v30, %s6639_s18  ;;  %v10259_v15 = vpop.permute.xlu0 %3681 }
 0x634   :  { %13183 = vst [vmem:[#allocation269_spill] sm:$0xff] %v10259_v15  ;;  %v10371_v15 = vld [vmem:[#allocation2 + $0x140] sm:$0xff] }
 0x635   :  { %v10261_v3 = vpop.permute.xlu1 %3691  ;;  %3925 = vrot.lane.b32.xlu0 %v10263_v1, %s6639_s18 }
 0x636   :  { %13184 = vst [vmem:[#allocation270_spill] sm:$0xff] %v10261_v3 }
 0x637   :  { %3935 = vrot.lane.b32.xlu1 %v10267_v51, %s6639_s18  ;;  %v10271_v21 = vpop.permute.xlu0 %3685 }
 0x638   :  { %13185 = vst [vmem:[#allocation271_spill] sm:$0xff] %v10271_v21 }
 0x639   :  { %v10273_v20 = vpop.permute.xlu1 %3695  ;;  %3929 = vrot.lane.b32.xlu0 %v10275_v34, %s6639_s18 }
 0x63a   :  { %13186 = vst [vmem:[#allocation272_spill] sm:$0xff] %v10273_v20 }
 0x63b   :  { %3939 = vrot.lane.b32.xlu1 %v10279_v63, %s6639_s18  ;;  %v10283_v42 = vpop.permute.xlu0 %3689 }
 0x63c   :  { %13187 = vst [vmem:[#allocation273_spill] sm:$0xff] %v10283_v42  ;;  %v10323_v42 = vld [vmem:[#allocation2 + $0xc0] sm:$0xff] }
 0x63d   :  { %v10285_v55 = vpop.permute.xlu1 %3699  ;;  %3933 = vrot.lane.b32.xlu0 %v10287_v10, %s6639_s18 }
 0x63e   :  { %13188 = vst [vmem:[#allocation274_spill] sm:$0xff] %v10285_v55 }
 0x63f   :  { %3943 = vrot.lane.b32.xlu1 %v10291_v24, %s6639_s18  ;;  %v10295_v47 = vpop.permute.xlu0 %3693 }
 0x640   :  { %13189 = vst [vmem:[#allocation275_spill] sm:$0xff] %v10295_v47 }
 0x641   :  { %v10297_v29 = vpop.permute.xlu1 %3703  ;;  %3937 = vrot.lane.b32.xlu0 %v10299_v40, %s6639_s18 }
 0x642   :  { %13190 = vst [vmem:[#allocation276_spill] sm:$0xff] %v10297_v29  ;;  %v10315_v29 = vld [vmem:[#allocation2 + $0xf0] sm:$0xff] }
 0x643   :  { %3947 = vrot.lane.b32.xlu1 %v10303_v22, %s6639_s18  ;;  %v10307_v55 = vpop.permute.xlu0 %3697 }
 0x644   :  { %13191 = vst [vmem:[#allocation277_spill] sm:$0xff] %v10307_v55 }
 0x645   :  { %v10309_v9 = vpop.permute.xlu1 %3707  ;;  %3941 = vrot.lane.b32.xlu0 %v10311_v59, %s6639_s18 }
 0x646   :  { %13192 = vst [vmem:[#allocation278_spill] sm:$0xff] %v10309_v9  ;;  %v10327_v9 = vld [vmem:[#allocation2 + $0x110] sm:$0xff] }
 0x647   :  { %3951 = vrot.lane.b32.xlu1 %v10315_v29, %s6639_s18  ;;  %v10319_v35 = vpop.permute.xlu0 %3701 }
 0x648   :  { %13193 = vst [vmem:[#allocation279_spill] sm:$0xff] %v10319_v35 }
 0x649   :  { %v10321_v3 = vpop.permute.xlu1 %3711  ;;  %3945 = vrot.lane.b32.xlu0 %v10323_v42, %s6639_s18 }
 0x64a   :  { %13194 = vst [vmem:[#allocation280_spill] sm:$0xff] %v10321_v3  ;;  %v10339_v3 = vld [vmem:[#allocation2 + $0x130] sm:$0xff] }
 0x64b   :  { %3955 = vrot.lane.b32.xlu1 %v10327_v9, %s6639_s18  ;;  %v10331_v55 = vpop.permute.xlu0 %3705 }
 0x64c   :  { %13195 = vst [vmem:[#allocation281_spill] sm:$0xff] %v10331_v55 }
 0x64d   :  { %v10333_v20 = vpop.permute.xlu1 %3715  ;;  %3949 = vrot.lane.b32.xlu0 %v10335_v19, %s6639_s18 }
 0x64e   :  { %13196 = vst [vmem:[#allocation282_spill] sm:$0xff] %v10333_v20  ;;  %v10351_v20 = vld [vmem:[#allocation2 + $0x150] sm:$0xff] }
 0x64f   :  { %3959 = vrot.lane.b32.xlu1 %v10339_v3, %s6639_s18  ;;  %v10343_v35 = vpop.permute.xlu0 %3709 }
 0x650   :  { %13197 = vst [vmem:[#allocation283_spill] sm:$0xff] %v10343_v35 }
 0x651   :  { %v10345_v47 = vpop.permute.xlu1 %3719  ;;  %3953 = vrot.lane.b32.xlu0 %v10347_v61, %s6639_s18 }
 0x652   :  { %13198 = vst [vmem:[#allocation284_spill] sm:$0xff] %v10345_v47  ;;  %v10363_v47 = vld [vmem:[#allocation2 + $0x170] sm:$0xff] }
 0x653   :  { %3963 = vrot.lane.b32.xlu1 %v10351_v20, %s6639_s18  ;;  %v10355_v55 = vpop.permute.xlu0 %3713 }
 0x654   :  { %13199 = vst [vmem:[#allocation285_spill] sm:$0xff] %v10355_v55 }
 0x655   :  { %v10357_v25 = vpop.permute.xlu1 %3723  ;;  %3957 = vrot.lane.b32.xlu0 %v10359_v54, %s6639_s18 }
 0x656   :  { %13200 = vst [vmem:[#allocation286_spill] sm:$0xff] %v10357_v25  ;;  %v10375_v25 = vld [vmem:[#allocation2 + $0x190] sm:$0xff] }
 0x657   :  { %3967 = vrot.lane.b32.xlu1 %v10363_v47, %s6639_s18  ;;  %v10367_v35 = vpop.permute.xlu0 %3717 }
 0x658   :  { %13201 = vst [vmem:[#allocation287_spill] sm:$0xff] %v10367_v35 }
 0x659   :  { %v10369_v48 = vpop.permute.xlu1 %3727  ;;  %3961 = vrot.lane.b32.xlu0 %v10371_v15, %s6639_s18 }
 0x65a   :  { %13202 = vst [vmem:[#allocation288_spill] sm:$0xff] %v10369_v48  ;;  %v10387_v48 = vld [vmem:[#allocation2 + $0x1b0] sm:$0xff] }
 0x65b   :  { %3971 = vrot.lane.b32.xlu1 %v10375_v25, %s6639_s18  ;;  %v10379_v55 = vpop.permute.xlu0 %3721 }
 0x65c   :  { %13203 = vst [vmem:[#allocation289_spill] sm:$0xff] %v10379_v55 }
 0x65d   :  { %v10381_v0 = vpop.permute.xlu1 %3731  ;;  %3965 = vrot.lane.b32.xlu0 %v10383_v53, %s6639_s18 }
 0x65e   :  { %13204 = vst [vmem:[#allocation290_spill] sm:$0xff] %v10381_v0  ;;  %v10399_v0 = vld [vmem:[#allocation2 + $0x1d0] sm:$0xff] }
 0x65f   :  { %3975 = vrot.lane.b32.xlu1 %v10387_v48, %s6639_s18  ;;  %v10391_v35 = vpop.permute.xlu0 %3725 }
 0x660   :  { %13205 = vst [vmem:[#allocation291_spill] sm:$0xff] %v10391_v35 }
 0x661   :  { %v10393_v21 = vpop.permute.xlu1 %3735  ;;  %3969 = vrot.lane.b32.xlu0 %v10395_v62, %s6639_s18 }
 0x662   :  { %13206 = vst [vmem:[#allocation292_spill] sm:$0xff] %v10393_v21  ;;  %v10411_v21 = vld [vmem:[#allocation2 + $0x1f0] sm:$0xff] }
 0x663   :  { %3979 = vrot.lane.b32.xlu1 %v10399_v0, %s6639_s18  ;;  %v10403_v55 = vpop.permute.xlu0 %3729 }
 0x664   :  { %13207 = vst [vmem:[#allocation293_spill] sm:$0xff] %v10403_v55 }
 0x665   :  { %v10405_v6 = vpop.permute.xlu1 %3739  ;;  %3973 = vrot.lane.b32.xlu0 %v10407_v46, %s6639_s18 }
 0x666   :  { %13208 = vst [vmem:[#allocation294_spill] sm:$0xff] %v10405_v6  ;;  %v10423_v6 = vld [vmem:[#allocation2 + $0x210] sm:$0xff] }
 0x667   :  { %3983 = vrot.lane.b32.xlu1 %v10411_v21, %s6639_s18  ;;  %v10415_v35 = vpop.permute.xlu0 %3733 }
 0x668   :  { %13209 = vst [vmem:[#allocation295_spill] sm:$0xff] %v10415_v35 }
 0x669   :  { %v10417_v18 = vpop.permute.xlu1 %3743  ;;  %3977 = vrot.lane.b32.xlu0 %v10419_v27, %s6639_s18 }
 0x66a   :  { %13210 = vst [vmem:[#allocation296_spill] sm:$0xff] %v10417_v18  ;;  %v10435_v18 = vld [vmem:[#allocation2 + $0x230] sm:$0xff] }
 0x66b   :  { %3987 = vrot.lane.b32.xlu1 %v10423_v6, %s6639_s18  ;;  %v10427_v55 = vpop.permute.xlu0 %3737 }
 0x66c   :  { %13211 = vst [vmem:[#allocation297_spill] sm:$0xff] %v10427_v55 }
 0x66d   :  { %v10429_v41 = vpop.permute.xlu1 %3747  ;;  %3981 = vrot.lane.b32.xlu0 %v10431_v49, %s6639_s18 }
 0x66e   :  { %13212 = vst [vmem:[#allocation298_spill] sm:$0xff] %v10429_v41  ;;  %v10447_v41 = vld [vmem:[#allocation2 + $0x250] sm:$0xff] }
 0x66f   :  { %3991 = vrot.lane.b32.xlu1 %v10435_v18, %s6639_s18  ;;  %v10439_v35 = vpop.permute.xlu0 %3741 }
 0x670   :  { %13213 = vst [vmem:[#allocation299_spill] sm:$0xff] %v10439_v35 }
 0x671   :  { %v10441_v50 = vpop.permute.xlu1 %3751  ;;  %3985 = vrot.lane.b32.xlu0 %v10443_v5, %s6639_s18 }
 0x672   :  { %13214 = vst [vmem:[#allocation300_spill] sm:$0xff] %v10441_v50  ;;  %v10459_v50 = vld [vmem:[#allocation2 + $0x270] sm:$0xff] }
 0x673   :  { %3995 = vrot.lane.b32.xlu1 %v10447_v41, %s6639_s18  ;;  %v10451_v55 = vpop.permute.xlu0 %3745 }
 0x674   :  { %13215 = vst [vmem:[#allocation301_spill] sm:$0xff] %v10451_v55 }
 0x675   :  { %v10453_v7 = vpop.permute.xlu1 %3755  ;;  %3989 = vrot.lane.b32.xlu0 %v10455_v38, %s6639_s18 }
 0x676   :  { %13216 = vst [vmem:[#allocation302_spill] sm:$0xff] %v10453_v7  ;;  %v10471_v7 = vld [vmem:[#allocation2 + $0x290] sm:$0xff] }
 0x677   :  { %3999 = vrot.lane.b32.xlu1 %v10459_v50, %s6639_s18  ;;  %v10463_v35 = vpop.permute.xlu0 %3749 }
 0x678   :  { %13217 = vst [vmem:[#allocation303_spill] sm:$0xff] %v10463_v35 }
 0x679   :  { %v10465_v52 = vpop.permute.xlu1 %3759  ;;  %3993 = vrot.lane.b32.xlu0 %v10467_v37, %s6639_s18 }
 0x67a   :  { %13218 = vst [vmem:[#allocation304_spill] sm:$0xff] %v10465_v52  ;;  %v10483_v52 = vld [vmem:[#allocation2 + $0x2b0] sm:$0xff] }
 0x67b   :  { %4003 = vrot.lane.b32.xlu1 %v10471_v7, %s6639_s18  ;;  %v10475_v55 = vpop.permute.xlu0 %3753  ;;  %13221 = vst [vmem:[#allocation307_spill] sm:$0xff] %v10483_v52 }
 0x67c   :  { %13219 = vst [vmem:[#allocation305_spill] sm:$0xff] %v10475_v55 }
 0x67d   :  { %v10477_v28 = vpop.permute.xlu1 %3763  ;;  %3997 = vrot.lane.b32.xlu0 %v10479_v12, %s6639_s18 }
 0x67e   :  { %13220 = vst [vmem:[#allocation306_spill] sm:$0xff] %v10477_v28  ;;  %v10495_v28 = vld [vmem:[#allocation2 + $0x2d0] sm:$0xff] }
 0x67f   :  { %4007 = vrot.lane.b32.xlu1 %v10483_v52, %s6639_s18  ;;  %v10487_v35 = vpop.permute.xlu0 %3757 }
 0x680   :  { %13222 = vst [vmem:[#allocation308_spill] sm:$0xff] %v10487_v35 }
 0x681   :  { %v10489_v36 = vpop.permute.xlu1 %3767  ;;  %4001 = vrot.lane.b32.xlu0 %v10491_v16, %s6639_s18  ;;  %v10515_v16 = vld [vmem:[#allocation2 + $0x2c0] sm:$0xff] }
 0x682   :  { %13223 = vst [vmem:[#allocation309_spill] sm:$0xff] %v10489_v36  ;;  %v10507_v36 = vld [vmem:[#allocation2 + $0x2f0] sm:$0xff] }
 0x683   :  { %4011 = vrot.lane.b32.xlu1 %v10495_v28, %s6639_s18  ;;  %v10499_v55 = vpop.permute.xlu0 %3761 }
 0x684   :  { %13225 = vst [vmem:[#allocation311_spill] sm:$0xff] %v10499_v55 }
 0x685   :  { %v10501_v45 = vpop.permute.xlu1 %3771  ;;  %4005 = vrot.lane.b32.xlu0 %v10503_v17, %s6639_s18  ;;  %v10525_v17 = vld [vmem:[#allocation2 + $0x2e0] sm:$0xff] }
 0x686   :  { %13226 = vst [vmem:[#allocation312_spill] sm:$0xff] %v10501_v45 }
 0x687   :  { %4015 = vrot.lane.b32.xlu1 %v10507_v36, %s6639_s18  ;;  %v10511_v35 = vpop.permute.xlu0 %3765 }
 0x688   :  { %13228 = vst [vmem:[#allocation314_spill] sm:$0xff] %v10511_v35 }
 0x689   :  { %v10513_v52 = vpop.permute.xlu1 %3775  ;;  %4009 = vrot.lane.b32.xlu0 %v10515_v16, %s6639_s18 }
 0x68a   :  { %13229 = vst [vmem:[#allocation315_spill] sm:$0xff] %v10513_v52 }
 0x68b   :  { %4019 = vrot.lane.b32.xlu1 %v9748_v32, %s6639_s18  ;;  %v10521_v45 = vpop.permute.xlu0 %3769 }
 0x68c   :  { %13230 = vst [vmem:[#allocation316_spill] sm:$0xff] %v10521_v45 }
 0x68d   :  { %v10523_v55 = vpop.permute.xlu1 %3779  ;;  %4013 = vrot.lane.b32.xlu0 %v10525_v17, %s6639_s18 }
 0x68e   :  { %13231 = vst [vmem:[#allocation317_spill] sm:$0xff] %v10523_v55 }
 0x68f   :  { %4023 = vrot.lane.b32.xlu1 %v9756_v44, %s6639_s18  ;;  %v10531_v52 = vpop.permute.xlu0 %3773 }
 0x690   :  { %13232 = vst [vmem:[#allocation318_spill] sm:$0xff] %v10531_v52 }
 0x691   :  { %v10533_v35 = vpop.permute.xlu1 %3783  ;;  %4017 = vrot.lane.b32.xlu0 %v9930_v8, %s6639_s18 }
 0x692   :  { %13233 = vst [vmem:[#allocation319_spill] sm:$0xff] %v10533_v35 }
 0x693   :  { %4027 = vrot.lane.b32.xlu1 %v9764_v31, %s6639_s18  ;;  %v10539_v32 = vpop.permute.xlu0 %3777 }
 0x694   :  { %13234 = vst [vmem:[#allocation320_spill] sm:$0xff] %v10539_v32 }
 0x695   :  { %v10541_v55 = vpop.permute.xlu1 %3787  ;;  %4021 = vrot.lane.b32.xlu0 %v9938_v56, %s6639_s18 }
 0x696   :  { %13235 = vst [vmem:[#allocation321_spill] sm:$0xff] %v10541_v55 }
 0x697   :  { %4031 = vrot.lane.b32.xlu1 %v9774_v11, %s6639_s18  ;;  %v10547_v44 = vpop.permute.xlu0 %3781 }
 0x698   :  { %13236 = vst [vmem:[#allocation322_spill] sm:$0xff] %v10547_v44 }
 0x699   :  { %v10549_v52 = vpop.permute.xlu1 %3791  ;;  %4025 = vrot.lane.b32.xlu0 %v9944_v2, %s6639_s18 }
 0x69a   :  { %13237 = vst [vmem:[#allocation323_spill] sm:$0xff] %v10549_v52 }
 0x69b   :  { %4035 = vrot.lane.b32.xlu1 %v9784_v58, %s6639_s18  ;;  %v10555_v31 = vpop.permute.xlu0 %3785 }
 0x69c   :  { %13238 = vst [vmem:[#allocation324_spill] sm:$0xff] %v10555_v31 }
 0x69d   :  { %v10557_v8 = vpop.permute.xlu1 %3923  ;;  %4029 = vrot.lane.b32.xlu0 %v9952_v13, %s6639_s18 }
 0x69e   :  { %13239 = vst [vmem:[#allocation325_spill] sm:$0xff] %v10557_v8 }
 0x69f   :  { %4039 = vrot.lane.b32.xlu1 %v9792_v60, %s6639_s18  ;;  %v10563_v11 = vpop.permute.xlu0 %3789 }
 0x6a0   :  { %13240 = vst [vmem:[#allocation326_spill] sm:$0xff] %v10563_v11 }
 0x6a1   :  { %v3928_v56 = vpop.permute.xlu1 %3927  ;;  %4033 = vrot.lane.b32.xlu0 %v9960_v43, %s6639_s18 }
 0x6a2   :  { %v4116_v60 = vrot.slane %v3928_v56, 7 }
 0x6a3   :  { %4043 = vrot.lane.b32.xlu1 %v9802_v23, %s6639_s18  ;;  %v10569_v58 = vpop.permute.xlu0 %3921 }
 0x6a4   :  { %13241 = vst [vmem:[#allocation327_spill] sm:$0xff] %v10569_v58 }
 0x6a5   :  { %v3932_v2 = vpop.permute.xlu1 %3931  ;;  %4037 = vrot.lane.b32.xlu0 %v9966_v33, %s6639_s18  ;;  %v12775_v33 = vrot.slane %v10557_v8, 7 }
 0x6a6   :  { %v4118_v31 = vrot.slane %v3932_v2, 7 }
 0x6a7   :  { %4047 = vrot.lane.b32.xlu1 %v9812_v26, %s6639_s18  ;;  %v3926_v13 = vpop.permute.xlu0 %3925 }
 0x6a8   :  { %v4115_v52 = vrot.slane %v3926_v13, 7 }
 0x6a9   :  { %v3936_v11 = vpop.permute.xlu1 %3935  ;;  %4041 = vrot.lane.b32.xlu0 %v9973_v4, %s6639_s18 }
 0x6aa   :  { %v4237_v43 = vsel %vm1167_vm2, %v4115_v52, %v4116_v60  ;;  %v4120_v56 = vrot.slane %v3936_v11, 7  ;;  %v4238_v2 = vsel %vm1167_vm2, %v12775_v33, %v4115_v52 }
 0x6ab   :  { %4307 = vrot.lane.b32.xlu1 %v4237_v43, %s6636_s9  ;;  %v3930_v23 = vpop.permute.xlu0 %3929 }
 0x6ac   :  { %v4117_v55 = vrot.slane %v3930_v23, 7 }
 0x6ad   :  { %v3940_v35 = vpop.permute.xlu1 %3939  ;;  %4045 = vrot.lane.b32.xlu0 %v9984_v57, %s6639_s18 }
 0x6ae   :  { %v4235_v26 = vsel %vm1167_vm2, %v4117_v55, %v4118_v31  ;;  %v4122_v44 = vrot.slane %v3940_v35, 7  ;;  %v4236_v11 = vsel %vm1167_vm2, %v4116_v60, %v4117_v55 }
 0x6af   :  { %4311 = vrot.lane.b32.xlu1 %v4235_v26, %s6636_s9  ;;  %v3934_v4 = vpop.permute.xlu0 %3933 }
 0x6b0   :  { %v4119_v13 = vrot.slane %v3934_v4, 7 }
 0x6b1   :  { %v3944_v43 = vpop.permute.xlu1 %3943  ;;  %4305 = vrot.lane.b32.xlu0 %v4238_v2, %s6636_s9 }
 0x6b2   :  { %v4233_v57 = vsel %vm1167_vm2, %v4119_v13, %v4120_v56  ;;  %v4124_v2 = vrot.slane %v3944_v43, 7 }
 0x6b3   :  { %4315 = vrot.lane.b32.xlu1 %v4233_v57, %s6636_s9  ;;  %v3938_v23 = vpop.permute.xlu0 %3937  ;;  %v4234_v57 = vsel %vm1167_vm2, %v4118_v31, %v4119_v13 }
 0x6b4   :  { %v4121_v32 = vrot.slane %v3938_v23, 7 }
 0x6b5   :  { %v3948_v26 = vpop.permute.xlu1 %3947  ;;  %4309 = vrot.lane.b32.xlu0 %v4236_v11, %s6636_s9 }
 0x6b6   :  { %v4231_v52 = vsel %vm1167_vm2, %v4121_v32, %v4122_v44  ;;  %v4126_v60 = vrot.slane %v3948_v26, 7  ;;  %v4232_v11 = vsel %vm1167_vm2, %v4120_v56, %v4121_v32 }
 0x6b7   :  { %4319 = vrot.lane.b32.xlu1 %v4231_v52, %s6636_s9  ;;  %v3942_v4 = vpop.permute.xlu0 %3941 }
 0x6b8   :  { %v4123_v33 = vrot.slane %v3942_v4, 7 }
 0x6b9   :  { %v3952_v45 = vpop.permute.xlu1 %3951  ;;  %4313 = vrot.lane.b32.xlu0 %v4234_v57, %s6636_s9 }
 0x6ba   :  { %v4229_v35 = vsel %vm1167_vm2, %v4123_v33, %v4124_v2  ;;  %v4128_v43 = vrot.slane %v3952_v45, 7  ;;  %v4230_v57 = vsel %vm1167_vm2, %v4122_v44, %v4123_v33 }
 0x6bb   :  { %4323 = vrot.lane.b32.xlu1 %v4229_v35, %s6636_s9  ;;  %v3946_v55 = vpop.permute.xlu0 %3945 }
 0x6bc   :  { %v4125_v23 = vrot.slane %v3946_v55, 7 }
 0x6bd   :  { %v3956_v52 = vpop.permute.xlu1 %3955  ;;  %4317 = vrot.lane.b32.xlu0 %v4232_v11, %s6636_s9 }
 0x6be   :  { %v4227_v31 = vsel %vm1167_vm2, %v4125_v23, %v4126_v60  ;;  %v4130_v26 = vrot.slane %v3956_v52, 7  ;;  %v4228_v11 = vsel %vm1167_vm2, %v4124_v2, %v4125_v23 }
 0x6bf   :  { %4327 = vrot.lane.b32.xlu1 %v4227_v31, %s6636_s9  ;;  %v3950_v13 = vpop.permute.xlu0 %3949 }
 0x6c0   :  { %v4127_v4 = vrot.slane %v3950_v13, 7 }
 0x6c1   :  { %v3960_v35 = vpop.permute.xlu1 %3959  ;;  %4321 = vrot.lane.b32.xlu0 %v4230_v57, %s6636_s9 }
 0x6c2   :  { %v4225_v32 = vsel %vm1167_vm2, %v4127_v4, %v4128_v43  ;;  %v4132_v33 = vrot.slane %v3960_v35, 7  ;;  %v4226_v57 = vsel %vm1167_vm2, %v4126_v60, %v4127_v4 }
 0x6c3   :  { %4331 = vrot.lane.b32.xlu1 %v4225_v32, %s6636_s9  ;;  %v3954_v56 = vpop.permute.xlu0 %3953 }
 0x6c4   :  { %v4129_v55 = vrot.slane %v3954_v56, 7 }
 0x6c5   :  { %v3964_v31 = vpop.permute.xlu1 %3963  ;;  %4325 = vrot.lane.b32.xlu0 %v4228_v11, %s6636_s9 }
 0x6c6   :  { %v4223_v45 = vsel %vm1167_vm2, %v4129_v55, %v4130_v26  ;;  %v4134_v52 = vrot.slane %v3964_v31, 7  ;;  %v4224_v11 = vsel %vm1167_vm2, %v4128_v43, %v4129_v55 }
 0x6c7   :  { %4335 = vrot.lane.b32.xlu1 %v4223_v45, %s6636_s9  ;;  %v3958_v44 = vpop.permute.xlu0 %3957 }
 0x6c8   :  { %v4131_v13 = vrot.slane %v3958_v44, 7 }
 0x6c9   :  { %v3968_v32 = vpop.permute.xlu1 %3967  ;;  %4329 = vrot.lane.b32.xlu0 %v4226_v57, %s6636_s9 }
 0x6ca   :  { %v4221_v2 = vsel %vm1167_vm2, %v4131_v13, %v4132_v33  ;;  %v4136_v35 = vrot.slane %v3968_v32, 7  ;;  %v4222_v57 = vsel %vm1167_vm2, %v4130_v26, %v4131_v13 }
 0x6cb   :  { %4339 = vrot.lane.b32.xlu1 %v4221_v2, %s6636_s9  ;;  %v3962_v23 = vpop.permute.xlu0 %3961 }
 0x6cc   :  { %v4133_v56 = vrot.slane %v3962_v23, 7 }
 0x6cd   :  { %v3972_v45 = vpop.permute.xlu1 %3971  ;;  %4333 = vrot.lane.b32.xlu0 %v4224_v11, %s6636_s9 }
 0x6ce   :  { %v4219_v60 = vsel %vm1167_vm2, %v4133_v56, %v4134_v52  ;;  %v4138_v31 = vrot.slane %v3972_v45, 7  ;;  %v4220_v11 = vsel %vm1167_vm2, %v4132_v33, %v4133_v56 }
 0x6cf   :  { %4343 = vrot.lane.b32.xlu1 %v4219_v60, %s6636_s9  ;;  %v3966_v4 = vpop.permute.xlu0 %3965 }
 0x6d0   :  { %v4135_v44 = vrot.slane %v3966_v4, 7 }
 0x6d1   :  { %v3976_v2 = vpop.permute.xlu1 %3975  ;;  %4337 = vrot.lane.b32.xlu0 %v4222_v57, %s6636_s9 }
 0x6d2   :  { %v4217_v43 = vsel %vm1167_vm2, %v4135_v44, %v4136_v35  ;;  %v4140_v32 = vrot.slane %v3976_v2, 7  ;;  %v4218_v57 = vsel %vm1167_vm2, %v4134_v52, %v4135_v44 }
 0x6d3   :  { %4347 = vrot.lane.b32.xlu1 %v4217_v43, %s6636_s9  ;;  %v3970_v55 = vpop.permute.xlu0 %3969 }
 0x6d4   :  { %v4137_v23 = vrot.slane %v3970_v55, 7 }
 0x6d5   :  { %v3980_v60 = vpop.permute.xlu1 %3979  ;;  %4341 = vrot.lane.b32.xlu0 %v4220_v11, %s6636_s9 }
 0x6d6   :  { %v4215_v26 = vsel %vm1167_vm2, %v4137_v23, %v4138_v31  ;;  %v4142_v45 = vrot.slane %v3980_v60, 7  ;;  %v4216_v11 = vsel %vm1167_vm2, %v4136_v35, %v4137_v23 }
 0x6d7   :  { %4351 = vrot.lane.b32.xlu1 %v4215_v26, %s6636_s9  ;;  %v3974_v13 = vpop.permute.xlu0 %3973 }
 0x6d8   :  { %v4139_v4 = vrot.slane %v3974_v13, 7 }
 0x6d9   :  { %v3984_v43 = vpop.permute.xlu1 %3983  ;;  %4345 = vrot.lane.b32.xlu0 %v4218_v57, %s6636_s9 }
 0x6da   :  { %v4213_v33 = vsel %vm1167_vm2, %v4139_v4, %v4140_v32  ;;  %v4144_v2 = vrot.slane %v3984_v43, 7  ;;  %v4214_v57 = vsel %vm1167_vm2, %v4138_v31, %v4139_v4 }
 0x6db   :  { %4355 = vrot.lane.b32.xlu1 %v4213_v33, %s6636_s9  ;;  %v3978_v56 = vpop.permute.xlu0 %3977 }
 0x6dc   :  { %v4141_v55 = vrot.slane %v3978_v56, 7 }
 0x6dd   :  { %v3988_v26 = vpop.permute.xlu1 %3987  ;;  %4349 = vrot.lane.b32.xlu0 %v4216_v11, %s6636_s9 }
 0x6de   :  { %v4211_v52 = vsel %vm1167_vm2, %v4141_v55, %v4142_v45  ;;  %v4146_v60 = vrot.slane %v3988_v26, 7  ;;  %v4212_v11 = vsel %vm1167_vm2, %v4140_v32, %v4141_v55 }
 0x6df   :  { %4359 = vrot.lane.b32.xlu1 %v4211_v52, %s6636_s9  ;;  %v3982_v44 = vpop.permute.xlu0 %3981 }
 0x6e0   :  { %v4143_v13 = vrot.slane %v3982_v44, 7 }
 0x6e1   :  { %v3992_v33 = vpop.permute.xlu1 %3991  ;;  %4353 = vrot.lane.b32.xlu0 %v4214_v57, %s6636_s9 }
 0x6e2   :  { %v4209_v35 = vsel %vm1167_vm2, %v4143_v13, %v4144_v2  ;;  %v4148_v43 = vrot.slane %v3992_v33, 7  ;;  %v4210_v57 = vsel %vm1167_vm2, %v4142_v45, %v4143_v13 }
 0x6e3   :  { %4363 = vrot.lane.b32.xlu1 %v4209_v35, %s6636_s9  ;;  %v3986_v23 = vpop.permute.xlu0 %3985 }
 0x6e4   :  { %v4145_v56 = vrot.slane %v3986_v23, 7 }
 0x6e5   :  { %v10668_v52 = vpop.permute.xlu1 %3995  ;;  %4357 = vrot.lane.b32.xlu0 %v4212_v11, %s6636_s9 }
 0x6e6   :  { %v4207_v31 = vsel %vm1167_vm2, %v4145_v56, %v4146_v60  ;;  %v12776_v35 = vrot.slane %v10668_v52, 7  ;;  %v4208_v33 = vsel %vm1167_vm2, %v4144_v2, %v4145_v56 }
 0x6e7   :  { %4367 = vrot.lane.b32.xlu1 %v4207_v31, %s6636_s9  ;;  %v3990_v4 = vpop.permute.xlu0 %3989 }
 0x6e8   :  { %v4147_v44 = vrot.slane %v3990_v4, 7 }
 0x6e9   :  { %v10676_v26 = vpop.permute.xlu1 %3999  ;;  %4361 = vrot.lane.b32.xlu0 %v4210_v57, %s6636_s9 }
 0x6ea   :  { %v4205_v32 = vsel %vm1167_vm2, %v4147_v44, %v4148_v43  ;;  %v4206_v31 = vsel %vm1167_vm2, %v4146_v60, %v4147_v44 }
 0x6eb   :  { %4371 = vrot.lane.b32.xlu1 %v4205_v32, %s6636_s9  ;;  %v3994_v55 = vpop.permute.xlu0 %3993 }
 0x6ec   :  { %v4149_v23 = vrot.slane %v3994_v55, 7 }
 0x6ed   :  { %v10685_v11 = vpop.permute.xlu1 %4003  ;;  %4365 = vrot.lane.b32.xlu0 %v4208_v33, %s6636_s9 }
 0x6ee   :  { %v4203_v45 = vsel %vm1167_vm2, %v4149_v23, %v12776_v35  ;;  %v4204_v56 = vsel %vm1167_vm2, %v4148_v43, %v4149_v23 }
 0x6ef   :  { %4375 = vrot.lane.b32.xlu1 %v4203_v45, %s6636_s9  ;;  %v10693_v13 = vpop.permute.xlu0 %3997 }
 0x6f1   :  { %v10697_v4 = vpop.permute.xlu1 %4007  ;;  %4369 = vrot.lane.b32.xlu0 %v4206_v31, %s6636_s9 }
 0x6f3   :  { %4567 = vrot.lane.b32.xlu1 %v10246_v39, %s6640_s5  ;;  %v10702_v2 = vpop.permute.xlu0 %4001 }
 0x6f5   :  { %v10706_v57 = vpop.permute.xlu1 %4011  ;;  %4373 = vrot.lane.b32.xlu0 %v4204_v56, %s6636_s9 }
 0x6f6   :  { %13242 = vst [vmem:[#allocation328_spill] sm:$0xff] %v10706_v57 }
 0x6f7   :  { %4571 = vrot.lane.b32.xlu1 %v10255_v30, %s6640_s5  ;;  %v10711_v60 = vpop.permute.xlu0 %4005 }
 0x6f9   :  { %v10713_v44 = vpop.permute.xlu1 %4015  ;;  %4565 = vrot.lane.b32.xlu0 %v10263_v1, %s6640_s5 }
 0x6fa   :  { %13243 = vst [vmem:[#allocation329_spill] sm:$0xff] %v10713_v44  ;;  %v11124_v44 = vld [vmem:[#allocation2 + $0x228] sm:$0xff] }
 0x6fb   :  { %4575 = vrot.lane.b32.xlu1 %v10267_v51, %s6640_s5  ;;  %v10719_v39 = vpop.permute.xlu0 %4009 }
 0x6fc   :  { %13244 = vst [vmem:[#allocation330_spill] sm:$0xff] %v10719_v39 }
 0x6fd   :  { %v10721_v43 = vpop.permute.xlu1 %4019  ;;  %4569 = vrot.lane.b32.xlu0 %v10275_v34, %s6640_s5 }
 0x6fe   :  { %13245 = vst [vmem:[#allocation331_spill] sm:$0xff] %v10721_v43 }
 0x6ff   :  { %4579 = vrot.lane.b32.xlu1 %v10279_v63, %s6640_s5  ;;  %v10727_v30 = vpop.permute.xlu0 %4013 }
 0x700   :  { %13246 = vst [vmem:[#allocation332_spill] sm:$0xff] %v10727_v30 }
 0x701   :  { %v10729_v32 = vpop.permute.xlu1 %4023  ;;  %4573 = vrot.lane.b32.xlu0 %v10287_v10, %s6640_s5 }
 0x702   :  { %13247 = vst [vmem:[#allocation333_spill] sm:$0xff] %v10729_v32  ;;  %v4975_v32 = vld [vmem:[#allocation2 + $0x1e8] sm:$0xff] }
 0x703   :  { %4583 = vrot.lane.b32.xlu1 %v10291_v24, %s6640_s5  ;;  %v10735_v1 = vpop.permute.xlu0 %4017 }
 0x704   :  { %13248 = vst [vmem:[#allocation334_spill] sm:$0xff] %v10735_v1 }
 0x705   :  { %v10737_v51 = vpop.permute.xlu1 %4027  ;;  %4577 = vrot.lane.b32.xlu0 %v10299_v40, %s6640_s5 }
 0x706   :  { %13249 = vst [vmem:[#allocation335_spill] sm:$0xff] %v10737_v51 }
 0x707   :  { %4587 = vrot.lane.b32.xlu1 %v10303_v22, %s6640_s5  ;;  %v10743_v34 = vpop.permute.xlu0 %4021 }
 0x708   :  { %13250 = vst [vmem:[#allocation336_spill] sm:$0xff] %v10743_v34 }
 0x709   :  { %v10745_v63 = vpop.permute.xlu1 %4031  ;;  %4581 = vrot.lane.b32.xlu0 %v10311_v59, %s6640_s5 }
 0x70a   :  { %13251 = vst [vmem:[#allocation337_spill] sm:$0xff] %v10745_v63  ;;  %v4970_v63 = vld [vmem:[#allocation2 + $0x198] sm:$0xff] }
 0x70b   :  { %4591 = vrot.lane.b32.xlu1 %v10315_v29, %s6640_s5  ;;  %v10751_v10 = vpop.permute.xlu0 %4025 }
 0x70c   :  { %13252 = vst [vmem:[#allocation338_spill] sm:$0xff] %v10751_v10 }
 0x70d   :  { %v10753_v24 = vpop.permute.xlu1 %4035  ;;  %4585 = vrot.lane.b32.xlu0 %v10323_v42, %s6640_s5 }
 0x70e   :  { %13253 = vst [vmem:[#allocation339_spill] sm:$0xff] %v10753_v24 }
 0x70f   :  { %4595 = vrot.lane.b32.xlu1 %v10327_v9, %s6640_s5  ;;  %v10759_v40 = vpop.permute.xlu0 %4029 }
 0x710   :  { %13254 = vst [vmem:[#allocation340_spill] sm:$0xff] %v10759_v40  ;;  %v4971_v40 = vld [vmem:[#allocation2 + $0x1a8] sm:$0xff] }
 0x711   :  { %v10761_v22 = vpop.permute.xlu1 %4039  ;;  %4589 = vrot.lane.b32.xlu0 %v10335_v19, %s6640_s5 }
 0x712   :  { %13255 = vst [vmem:[#allocation341_spill] sm:$0xff] %v10761_v22 }
 0x713   :  { %4599 = vrot.lane.b32.xlu1 %v10339_v3, %s6640_s5  ;;  %v10767_v59 = vpop.permute.xlu0 %4033 }
 0x714   :  { %13256 = vst [vmem:[#allocation342_spill] sm:$0xff] %v10767_v59 }
 0x715   :  { %v10769_v29 = vpop.permute.xlu1 %4043  ;;  %4593 = vrot.lane.b32.xlu0 %v10347_v61, %s6640_s5 }
 0x716   :  { %13257 = vst [vmem:[#allocation343_spill] sm:$0xff] %v10769_v29 }
 0x717   :  { %4603 = vrot.lane.b32.xlu1 %v10351_v20, %s6640_s5  ;;  %v10775_v9 = vpop.permute.xlu0 %4037 }
 0x718   :  { %13258 = vst [vmem:[#allocation344_spill] sm:$0xff] %v10775_v9 }
 0x719   :  { %v10777_v42 = vpop.permute.xlu1 %4047  ;;  %4597 = vrot.lane.b32.xlu0 %v10359_v54, %s6640_s5 }
 0x71a   :  { %13259 = vst [vmem:[#allocation345_spill] sm:$0xff] %v10777_v42 }
 0x71b   :  { %4607 = vrot.lane.b32.xlu1 %v10363_v47, %s6640_s5  ;;  %v10783_v19 = vpop.permute.xlu0 %4041 }
 0x71c   :  { %13260 = vst [vmem:[#allocation346_spill] sm:$0xff] %v10783_v19 }
 0x71d   :  { %v10785_v3 = vpop.permute.xlu1 %4307  ;;  %4601 = vrot.lane.b32.xlu0 %v10371_v15, %s6640_s5 }
 0x71f   :  { %4611 = vrot.lane.b32.xlu1 %v10375_v25, %s6640_s5  ;;  %v10791_v61 = vpop.permute.xlu0 %4045 }
 0x720   :  { %13261 = vst [vmem:[#allocation347_spill] sm:$0xff] %v10791_v61 }
 0x721   :  { %v10793_v20 = vpop.permute.xlu1 %4311  ;;  %4605 = vrot.lane.b32.xlu0 %v10383_v53, %s6640_s5 }
 0x723   :  { %4615 = vrot.lane.b32.xlu1 %v10387_v48, %s6640_s5  ;;  %v10799_v54 = vpop.permute.xlu0 %4305 }
 0x725   :  { %v10801_v47 = vpop.permute.xlu1 %4315  ;;  %4609 = vrot.lane.b32.xlu0 %v10395_v62, %s6640_s5 }
 0x727   :  { %4619 = vrot.lane.b32.xlu1 %v10399_v0, %s6640_s5  ;;  %v10807_v25 = vpop.permute.xlu0 %4309 }
 0x729   :  { %v10809_v15 = vpop.permute.xlu1 %4319  ;;  %4613 = vrot.lane.b32.xlu0 %v10407_v46, %s6640_s5 }
 0x72b   :  { %4623 = vrot.lane.b32.xlu1 %v10411_v21, %s6640_s5  ;;  %v10815_v53 = vpop.permute.xlu0 %4313 }
 0x72d   :  { %v10817_v48 = vpop.permute.xlu1 %4323  ;;  %4617 = vrot.lane.b32.xlu0 %v10419_v27, %s6640_s5 }
 0x72e   :  { %13262 = vst [vmem:[#allocation348_spill] sm:$0xff] %v10817_v48  ;;  %v6570_v48 = vld [vmem:[#allocation2] sm:$0xff] }
 0x72f   :  { %4627 = vrot.lane.b32.xlu1 %v10423_v6, %s6640_s5  ;;  %v10823_v62 = vpop.permute.xlu0 %4317 }
 0x731   :  { %v10825_v0 = vpop.permute.xlu1 %4327  ;;  %4621 = vrot.lane.b32.xlu0 %v10431_v49, %s6640_s5 }
 0x732   :  { %13263 = vst [vmem:[#allocation349_spill] sm:$0xff] %v10825_v0  ;;  %v13312_v0 = vld [vmem:[#allocation106_spill] sm:$0xff] }
 0x733   :  { %v10829_v46 = vpop.permute.xlu0 %4321 }
 0x734   :  { %13264 = vst [vmem:[#allocation350_spill] sm:$0xff] %v10829_v46  ;;  %v13311_v46 = vld [vmem:[#allocation55_spill] sm:$0xff] }
 0x735   :  { %v10831_v21 = vpop.permute.xlu1 %4331  ;;  %4625 = vrot.lane.b32.xlu0 %v10443_v5, %s6640_s5 }
 0x736   :  { %13265 = vst [vmem:[#allocation351_spill] sm:$0xff] %v10831_v21 }
 0x737   :  { %v10835_v55 = vpop.permute.xlu0 %4325 }
 0x738   :  { %13266 = vst [vmem:[#allocation352_spill] sm:$0xff] %v10835_v55 }
 0x739   :  { %v10837_v27 = vpop.permute.xlu1 %4335 }
 0x73a   :  { %13267 = vst [vmem:[#allocation353_spill] sm:$0xff] %v10837_v27 }
 0x73b   :  { %v10839_v23 = vpop.permute.xlu0 %4329 }
 0x73c   :  { %13268 = vst [vmem:[#allocation354_spill] sm:$0xff] %v10839_v23  ;;  %v5039_v23 = vrot.slane %v4975_v32, 1 }
 0x73d   :  { %v10841_v6 = vpop.permute.xlu1 %4339 }
 0x73e   :  { %13269 = vst [vmem:[#allocation355_spill] sm:$0xff] %v10841_v6  ;;  %v5034_v6 = vrot.slane %v4970_v63, 1 }
 0x73f   :  { %v10843_v33 = vpop.permute.xlu0 %4333 }
 0x740   :  { %13270 = vst [vmem:[#allocation356_spill] sm:$0xff] %v10843_v33 }
 0x741   :  { %v10845_v45 = vpop.permute.xlu1 %4343 }
 0x742   :  { %13271 = vst [vmem:[#allocation357_spill] sm:$0xff] %v10845_v45 }
 0x743   :  { %v10847_v49 = vpop.permute.xlu0 %4337 }
 0x744   :  { %13272 = vst [vmem:[#allocation358_spill] sm:$0xff] %v10847_v49  ;;  %v5035_v49 = vrot.slane %v4971_v40, 1  ;;  %v6559_v40 = vld [vmem:[#allocation2 + $0x370] sm:$0xff] }
 0x745   :  { %v10849_v31 = vpop.permute.xlu1 %4347 }
 0x746   :  { %13273 = vst [vmem:[#allocation359_spill] sm:$0xff] %v10849_v31 }
 0x747   :  { %v10851_v56 = vpop.permute.xlu0 %4341 }
 0x748   :  { %13274 = vst [vmem:[#allocation360_spill] sm:$0xff] %v10851_v56 }
 0x749   :  { %v10853_v35 = vpop.permute.xlu1 %4351 }
 0x74a   :  { %13275 = vst [vmem:[#allocation361_spill] sm:$0xff] %v10853_v35 }
 0x74b   :  { %v10855_v5 = vpop.permute.xlu0 %4345 }
 0x74c   :  { %13276 = vst [vmem:[#allocation362_spill] sm:$0xff] %v10855_v5 }
 0x74d   :  { %v10857_v8 = vpop.permute.xlu1 %4355 }
 0x74e   :  { %13277 = vst [vmem:[#allocation363_spill] sm:$0xff] %v10857_v8 }
 0x74f   :  { %v10859_v58 = vpop.permute.xlu0 %4349 }
 0x750   :  { %13278 = vst [vmem:[#allocation364_spill] sm:$0xff] %v10859_v58 }
 0x751   :  { %v10861_v42 = vpop.permute.xlu1 %4359 }
 0x752   :  { %13279 = vst [vmem:[#allocation365_spill] sm:$0xff] %v10861_v42  ;;  %v4949_v42 = vld [vmem:[#allocation2 + $0x48] sm:$0xff] }
 0x753   :  { %v10863_v61 = vpop.permute.xlu0 %4353 }
 0x754   :  { %13280 = vst [vmem:[#allocation366_spill] sm:$0xff] %v10863_v61  ;;  %v4948_v61 = vld [vmem:[#allocation2 + $0x38] sm:$0xff] }
 0x755   :  { %v10865_v29 = vpop.permute.xlu1 %4363  ;;  %v5012_v24 = vrot.slane %v4948_v61, 1 }
 0x756   :  { %13281 = vst [vmem:[#allocation367_spill] sm:$0xff] %v10865_v29 }
 0x757   :  { %v10867_v19 = vpop.permute.xlu0 %4357 }
 0x758   :  { %13282 = vst [vmem:[#allocation368_spill] sm:$0xff] %v10867_v19 }
 0x759   :  { %v10869_v22 = vpop.permute.xlu1 %4367 }
 0x75a   :  { %13283 = vst [vmem:[#allocation369_spill] sm:$0xff] %v10869_v22  ;;  %v5013_v22 = vrot.slane %v4949_v42, 1 }
 0x75b   :  { %v10871_v9 = vpop.permute.xlu0 %4361 }
 0x75c   :  { %13284 = vst [vmem:[#allocation370_spill] sm:$0xff] %v10871_v9  ;;  %v4950_v9 = vld [vmem:[#allocation2 + $0x58] sm:$0xff] }
 0x75d   :  { %v10873_v31 = vpop.permute.xlu1 %4371 }
 0x75e   :  { %13285 = vst [vmem:[#allocation371_spill] sm:$0xff] %v10873_v31  ;;  %v4951_v31 = vld [vmem:[#allocation2 + $0x68] sm:$0xff] }
 0x75f   :  { %v10875_v35 = vpop.permute.xlu0 %4365 }
 0x760   :  { %13286 = vst [vmem:[#allocation372_spill] sm:$0xff] %v10875_v35  ;;  %v5015_v35 = vrot.slane %v4951_v31, 1 }
 0x761   :  { %v10877_v5 = vpop.permute.xlu1 %4375 }
 0x762   :  { %13287 = vst [vmem:[#allocation373_spill] sm:$0xff] %v10877_v5  ;;  %v5014_v5 = vrot.slane %v4950_v9, 1  ;;  %v4953_v9 = vld [vmem:[#allocation2 + $0x88] sm:$0xff] }
 0x763   :  { %v10879_v8 = vpop.permute.xlu0 %4369 }
 0x764   :  { %13288 = vst [vmem:[#allocation374_spill] sm:$0xff] %v10879_v8  ;;  %v5132_v8 = vsel %vm2256_vm3, %v5012_v24, %v5013_v22  ;;  %v5130_v42 = vsel %vm2256_vm3, %v5014_v5, %v5015_v35 }
 0x765   :  { %v4568_v58 = vpop.permute.xlu1 %4567 }
 0x766   :  { %4691 = vrot.lane.b32.xlu1 %v4568_v58, %s6636_s9  ;;  %v10889_v58 = vld [vmem:[#allocation2 + $0x28] sm:$0xff] }
 0x767   :  { %v10882_v29 = vpop.permute.xlu0 %4373  ;;  %13290 = vst [vmem:[#allocation376_spill] sm:$0xff] %v10889_v58 }
 0x768   :  { %13289 = vst [vmem:[#allocation375_spill] sm:$0xff] %v10882_v29 }
 0x769   :  { %v4572_v19 = vpop.permute.xlu1 %4571 }
 0x76a   :  { %4695 = vrot.lane.b32.xlu1 %v4572_v19, %s6636_s9  ;;  %v12780_v19 = vrot.slane %v10889_v58, 1 }
 0x76b   :  { %v4566_v59 = vpop.permute.xlu0 %4565 }
 0x76c   :  { %4689 = vrot.lane.b32.xlu0 %v4566_v59, %s6636_s9  ;;  %v5133_v59 = vsel %vm2256_vm3, %v12780_v19, %v5012_v24  ;;  %v4952_v24 = vld [vmem:[#allocation2 + $0x78] sm:$0xff] }
 0x76d   :  { %v5016_v31 = vrot.slane %v4952_v24, 1 }
 0x76e   :  { %5203 = vrot.lane.b32.xlu1 %v5132_v8, %s6636_s9  ;;  %v5131_v8 = vsel %vm2256_vm3, %v5013_v22, %v5014_v5  ;;  %v5017_v22 = vrot.slane %v4953_v9, 1  ;;  %v4954_v5 = vld [vmem:[#allocation2 + $0x98] sm:$0xff] }
 0x76f   :  { %v4570_v29 = vpop.permute.xlu0 %4569 }
 0x770   :  { %4693 = vrot.lane.b32.xlu0 %v4570_v29, %s6636_s9  ;;  %v4576_v29 = vpop.permute.xlu1 %4575 }
 0x772   :  { %5207 = vrot.lane.b32.xlu1 %v5130_v42, %s6636_s9  ;;  %v4955_v42 = vld [vmem:[#allocation2 + $0xa8] sm:$0xff] }
 0x773   :  { %v4574_v61 = vpop.permute.xlu0 %4573 }
 0x774   :  { %5201 = vrot.lane.b32.xlu0 %v5133_v59, %s6636_s9  ;;  %v5019_v59 = vrot.slane %v4955_v42, 1  ;;  %v4958_v42 = vld [vmem:[#allocation2 + $0xd8] sm:$0xff] }
 0x776   :  { %4631 = vrot.lane.b32.xlu1 %v10435_v18, %s6640_s5  ;;  %v4580_v18 = vpop.permute.xlu1 %4579 }
 0x778   :  { %5205 = vrot.lane.b32.xlu0 %v5131_v8, %s6636_s9  ;;  %v4578_v8 = vpop.permute.xlu0 %4577 }
 0x77a   :  { %4635 = vrot.lane.b32.xlu1 %v10447_v41, %s6640_s5  ;;  %v5018_v41 = vrot.slane %v4954_v5, 1  ;;  %v4584_v9 = vpop.permute.xlu1 %4583 }
 0x77c   :  { %4629 = vrot.lane.b32.xlu0 %v10455_v38, %s6640_s5  ;;  %v5128_v38 = vsel %vm2256_vm3, %v5016_v31, %v5017_v22  ;;  %v5127_v24 = vsel %vm2256_vm3, %v5017_v22, %v5018_v41 }
 0x77e   :  { %4699 = vrot.lane.b32.xlu1 %v4576_v29, %s6636_s9  ;;  %v5129_v29 = vsel %vm2256_vm3, %v5015_v35, %v5016_v31  ;;  %v4956_v35 = vld [vmem:[#allocation2 + $0xb8] sm:$0xff]  ;;  %v4582_v31 = vpop.permute.xlu0 %4581 }
 0x77f   :  { %v5020_v5 = vrot.slane %v4956_v35, 1 }
 0x780   :  { %4633 = vrot.lane.b32.xlu0 %v10467_v37, %s6640_s5  ;;  %v5126_v37 = vsel %vm2256_vm3, %v5018_v41, %v5019_v59 }
 0x782   :  { %4703 = vrot.lane.b32.xlu1 %v4580_v18, %s6636_s9  ;;  %v4957_v18 = vld [vmem:[#allocation2 + $0xc8] sm:$0xff] }
 0x783   :  { %v5021_v22 = vrot.slane %v4957_v18, 1  ;;  %v13292_v18 = vld [vmem:[#allocation307_spill] sm:$0xff] }
 0x784   :  { %4697 = vrot.lane.b32.xlu0 %v4574_v61, %s6636_s9  ;;  %v4588_v61 = vpop.permute.xlu1 %4587 }
 0x786   :  { %5211 = vrot.lane.b32.xlu1 %v5128_v38, %s6636_s9  ;;  %v4959_v38 = vld [vmem:[#allocation2 + $0xe8] sm:$0xff] }
 0x787   :  { %v5023_v41 = vrot.slane %v4959_v38, 1 }
 0x788   :  { %4701 = vrot.lane.b32.xlu0 %v4578_v8, %s6636_s9  ;;  %v4592_v8 = vpop.permute.xlu1 %4591 }
 0x78a   :  { %5215 = vrot.lane.b32.xlu1 %v5126_v37, %s6636_s9  ;;  %v4586_v37 = vpop.permute.xlu0 %4585 }
 0x78c   :  { %5209 = vrot.lane.b32.xlu0 %v5129_v29, %s6636_s9 }
 0x78e   :  { %4639 = vrot.lane.b32.xlu1 %v10459_v50, %s6640_s5  ;;  %v13291_v50 = vld [vmem:[#allocation310_spill] sm:$0xff]  ;;  %v4590_v35 = vpop.permute.xlu0 %4589 }
 0x790   :  { %5213 = vrot.lane.b32.xlu0 %v5127_v24, %s6636_s9  ;;  %v5125_v24 = vsel %vm2256_vm3, %v5019_v59, %v5020_v5  ;;  %v4960_v59 = vld [vmem:[#allocation2 + $0xf8] sm:$0xff] }
 0x792   :  { %4643 = vrot.lane.b32.xlu1 %v10471_v7, %s6640_s5  ;;  %v5022_v7 = vrot.slane %v4958_v42, 1  ;;  %v13293_v42 = vld [vmem:[#allocation313_spill] sm:$0xff] }
 0x794   :  { %4637 = vrot.lane.b32.xlu0 %v10479_v12, %s6640_s5  ;;  %v5124_v12 = vsel %vm2256_vm3, %v5020_v5, %v5021_v22  ;;  %v5122_v29 = vsel %vm2256_vm3, %v5022_v7, %v5023_v41  ;;  %v4961_v5 = vld [vmem:[#allocation2 + $0x108] sm:$0xff] }
 0x796   :  { %4707 = vrot.lane.b32.xlu1 %v4584_v9, %s6636_s9  ;;  %v4596_v9 = vpop.permute.xlu1 %4595 }
 0x798   :  { %4641 = vrot.lane.b32.xlu0 %v13291_v50, %s6640_s5  ;;  %v4594_v50 = vpop.permute.xlu0 %4593 }
 0x79a   :  { %4711 = vrot.lane.b32.xlu1 %v4588_v61, %s6636_s9  ;;  %v5123_v61 = vsel %vm2256_vm3, %v5021_v22, %v5022_v7  ;;  %v5024_v22 = vrot.slane %v4960_v59, 1  ;;  %v5025_v7 = vrot.slane %v4961_v5, 1 }
 0x79c   :  { %4705 = vrot.lane.b32.xlu0 %v4582_v31, %s6636_s9  ;;  %v4600_v31 = vpop.permute.xlu1 %4599 }
 0x79e   :  { %5219 = vrot.lane.b32.xlu1 %v5124_v12, %s6636_s9  ;;  %v4598_v12 = vpop.permute.xlu0 %4597 }
 0x7a0   :  { %4709 = vrot.lane.b32.xlu0 %v4586_v37, %s6636_s9  ;;  %v4604_v38 = vpop.permute.xlu1 %4603  ;;  %v4962_v37 = vld [vmem:[#allocation2 + $0x118] sm:$0xff] }
 0x7a2   :  { %5223 = vrot.lane.b32.xlu1 %v5122_v29, %s6636_s9  ;;  %v4963_v29 = vld [vmem:[#allocation2 + $0x128] sm:$0xff] }
 0x7a4   :  { %5217 = vrot.lane.b32.xlu0 %v5125_v24, %s6636_s9  ;;  %v5026_v24 = vrot.slane %v4962_v37, 1  ;;  %v6553_v37 = vld [vmem:[#allocation2 + $0x310] sm:$0xff] }
 0x7a6   :  { %4647 = vrot.lane.b32.xlu1 %v13292_v18, %s6640_s5  ;;  %v4608_v18 = vpop.permute.xlu1 %4607  ;;  %v5119_v59 = vsel %vm2256_vm3, %v5025_v7, %v5026_v24 }
 0x7a8   :  { %5221 = vrot.lane.b32.xlu0 %v5123_v61, %s6636_s9  ;;  %v4602_v61 = vpop.permute.xlu0 %4601 }
 0x7aa   :  { %4651 = vrot.lane.b32.xlu1 %v10495_v28, %s6640_s5  ;;  %v5120_v28 = vsel %vm2256_vm3, %v5024_v22, %v5025_v7  ;;  %v6554_v7 = vld [vmem:[#allocation2 + $0x300] sm:$0xff] }
 0x7ac   :  { %4645 = vrot.lane.b32.xlu0 %v13293_v42, %s6640_s5  ;;  %v4606_v42 = vpop.permute.xlu0 %4605 }
 0x7ae   :  { %4715 = vrot.lane.b32.xlu1 %v4592_v8, %s6636_s9  ;;  %v5027_v8 = vrot.slane %v4963_v29, 1 }
 0x7b0   :  { %4649 = vrot.lane.b32.xlu0 %v10515_v16, %s6640_s5  ;;  %v5118_v16 = vsel %vm2256_vm3, %v5026_v24, %v5027_v8  ;;  %v4610_v5 = vpop.permute.xlu0 %4609 }
 0x7b2   :  { %4719 = vrot.lane.b32.xlu1 %v4596_v9, %s6636_s9  ;;  %v5121_v9 = vsel %vm2256_vm3, %v5023_v41, %v5024_v22  ;;  %v4964_v41 = vld [vmem:[#allocation2 + $0x138] sm:$0xff]  ;;  %v4965_v22 = vld [vmem:[#allocation2 + $0x148] sm:$0xff] }
 0x7b3   :  { %v5029_v24 = vrot.slane %v4965_v22, 1 }
 0x7b4   :  { %4713 = vrot.lane.b32.xlu0 %v4590_v35, %s6636_s9  ;;  %v4612_v35 = vpop.permute.xlu1 %4611 }
 0x7b6   :  { %5227 = vrot.lane.b32.xlu1 %v5120_v28, %s6636_s9  ;;  %v5028_v28 = vrot.slane %v4964_v41, 1 }
 0x7b8   :  { %4717 = vrot.lane.b32.xlu0 %v4594_v50, %s6636_s9  ;;  %v10978_v50 = vpop.permute.xlu1 %4615 }
 0x7ba   :  { %5231 = vrot.lane.b32.xlu1 %v5118_v16, %s6636_s9  ;;  %v4966_v16 = vld [vmem:[#allocation2 + $0x158] sm:$0xff] }
 0x7bc   :  { %5225 = vrot.lane.b32.xlu0 %v5121_v9, %s6636_s9  ;;  %v10984_v29 = vpop.permute.xlu1 %4619  ;;  %v4967_v9 = vld [vmem:[#allocation2 + $0x168] sm:$0xff] }
 0x7be   :  { %4655 = vrot.lane.b32.xlu1 %v10507_v36, %s6640_s5  ;;  %v10986_v36 = vpop.permute.xlu0 %4613 }
 0x7c0   :  { %5229 = vrot.lane.b32.xlu0 %v5119_v59, %s6636_s9  ;;  %v5031_v59 = vrot.slane %v4967_v9, 1 }
 0x7c2   :  { %4659 = vrot.lane.b32.xlu1 %v6553_v37, %s6640_s5  ;;  %v10993_v37 = vpop.permute.xlu1 %4623  ;;  %v10995_v19 = vpop.permute.xlu0 %4617 }
 0x7c4   :  { %4653 = vrot.lane.b32.xlu0 %v10525_v17, %s6640_s5  ;;  %v5116_v17 = vsel %vm2256_vm3, %v5028_v28, %v5029_v24 }
 0x7c6   :  { %4723 = vrot.lane.b32.xlu1 %v4600_v31, %s6636_s9  ;;  %v5030_v31 = vrot.slane %v4966_v16, 1  ;;  %v11004_v41 = vpop.permute.xlu1 %4627  ;;  %v11006_v22 = vpop.permute.xlu0 %4621 }
 0x7c8   :  { %4657 = vrot.lane.b32.xlu0 %v6554_v7, %s6640_s5  ;;  %v6555_v7 = vld [vmem:[#allocation2 + $0x330] sm:$0xff] }
 0x7ca   :  { %4727 = vrot.lane.b32.xlu1 %v4604_v38, %s6636_s9  ;;  %v5114_v38 = vsel %vm2256_vm3, %v5030_v31, %v5031_v59  ;;  %v11015_v9 = vpop.permute.xlu0 %4625 }
 0x7cc   :  { %4721 = vrot.lane.b32.xlu0 %v4598_v12, %s6636_s9  ;;  %v5117_v12 = vsel %vm2256_vm3, %v5027_v8, %v5028_v28  ;;  %v6557_v28 = vld [vmem:[#allocation2 + $0x320] sm:$0xff] }
 0x7ce   :  { %5235 = vrot.lane.b32.xlu1 %v5116_v17, %s6636_s9  ;;  %v6556_v17 = vld [vmem:[#allocation2 + $0x350] sm:$0xff] }
 0x7d0   :  { %4725 = vrot.lane.b32.xlu0 %v4602_v61, %s6636_s9  ;;  %v5115_v61 = vsel %vm2256_vm3, %v5029_v24, %v5030_v31  ;;  %v4969_v24 = vld [vmem:[#allocation2 + $0x188] sm:$0xff] }
 0x7d1   :  { %v5033_v58 = vrot.slane %v4969_v24, 1 }
 0x7d2   :  { %5239 = vrot.lane.b32.xlu1 %v5114_v38, %s6636_s9 }
 0x7d4   :  { %5233 = vrot.lane.b32.xlu0 %v5117_v12, %s6636_s9  ;;  %v4968_v12 = vld [vmem:[#allocation2 + $0x178] sm:$0xff] }
 0x7d6   :  { %4663 = vrot.lane.b32.xlu1 %v6555_v7, %s6640_s5  ;;  %v6558_v7 = vld [vmem:[#allocation2 + $0x340] sm:$0xff] }
 0x7d8   :  { %v11012_v16 = vpop.permute.xlu1 %4691  ;;  %5237 = vrot.lane.b32.xlu0 %v5115_v61, %s6636_s9  ;;  %v5032_v61 = vrot.slane %v4968_v12, 1 }
 0x7da   :  { %4667 = vrot.lane.b32.xlu1 %v6556_v17, %s6640_s5 }
 0x7dc   :  { %v11018_v8 = vpop.permute.xlu1 %4695  ;;  %4661 = vrot.lane.b32.xlu0 %v6557_v28, %s6640_s5 }
 0x7de   :  { %4731 = vrot.lane.b32.xlu1 %v4608_v18, %s6636_s9  ;;  %v11022_v38 = vpop.permute.xlu0 %4689  ;;  %v5112_v18 = vsel %vm2256_vm3, %v5032_v61, %v5033_v58 }
 0x7e0   :  { %v11024_v31 = vpop.permute.xlu1 %5203  ;;  %4665 = vrot.lane.b32.xlu0 %v6558_v7, %s6640_s5 }
 0x7e2   :  { %4735 = vrot.lane.b32.xlu1 %v4612_v35, %s6636_s9  ;;  %v11028_v17 = vpop.permute.xlu0 %4693  ;;  %v5110_v35 = vsel %vm2256_vm3, %v5034_v6, %v5035_v49 }
 0x7e4   :  { %v11030_v28 = vpop.permute.xlu1 %5207  ;;  %4729 = vrot.lane.b32.xlu0 %v4606_v42, %s6636_s9  ;;  %v5113_v42 = vsel %vm2256_vm3, %v5031_v59, %v5032_v61 }
 0x7e6   :  { %5243 = vrot.lane.b32.xlu1 %v5112_v18, %s6636_s9  ;;  %v11036_v7 = vpop.permute.xlu0 %5201 }
 0x7e8   :  { %v11038_v12 = vpop.permute.xlu1 %4631  ;;  %4733 = vrot.lane.b32.xlu0 %v4610_v5, %s6636_s9  ;;  %v5111_v5 = vsel %vm2256_vm3, %v5033_v58, %v5034_v6  ;;  %v4972_v6 = vld [vmem:[#allocation2 + $0x1b8] sm:$0xff]  ;;  %v4973_v58 = vld [vmem:[#allocation2 + $0x1c8] sm:$0xff] }
 0x7e9   :  { %v5037_v51 = vrot.slane %v4973_v58, 1 }
 0x7ea   :  { %5247 = vrot.lane.b32.xlu1 %v5110_v35, %s6636_s9  ;;  %v11044_v24 = vpop.permute.xlu0 %5205  ;;  %v6560_v35 = vld [vmem:[#allocation2 + $0x390] sm:$0xff] }
 0x7ec   :  { %v11048_v63 = vpop.permute.xlu1 %4635  ;;  %5241 = vrot.lane.b32.xlu0 %v5113_v42, %s6636_s9  ;;  %v6561_v42 = vld [vmem:[#allocation2 + $0x360] sm:$0xff] }
 0x7ee   :  { %4671 = vrot.lane.b32.xlu1 %v6559_v40, %s6640_s5  ;;  %v11052_v18 = vpop.permute.xlu0 %4629 }
 0x7f0   :  { %v11056_v45 = vpop.permute.xlu1 %4699  ;;  %5245 = vrot.lane.b32.xlu0 %v5111_v5, %s6636_s9  ;;  %v6562_v5 = vld [vmem:[#allocation2 + $0x380] sm:$0xff] }
 0x7f2   :  { %4675 = vrot.lane.b32.xlu1 %v6560_v35, %s6640_s5  ;;  %v11060_v59 = vpop.permute.xlu0 %4633  ;;  %v5036_v35 = vrot.slane %v4972_v6, 1 }
 0x7f4   :  { %v11062_v61 = vpop.permute.xlu1 %4703  ;;  %4669 = vrot.lane.b32.xlu0 %v6561_v42, %s6640_s5  ;;  %v4974_v42 = vld [vmem:[#allocation2 + $0x1d8] sm:$0xff] }
 0x7f5   :  { %v5038_v21 = vrot.slane %v4974_v42, 1  ;;  %v6563_v42 = vld [vmem:[#allocation2 + $0x3b0] sm:$0xff] }
 0x7f6   :  { %4739 = vrot.lane.b32.xlu1 %v10978_v50, %s6636_s9  ;;  %v11067_v40 = vpop.permute.xlu0 %4697  ;;  %v5108_v50 = vsel %vm2256_vm3, %v5036_v35, %v5037_v51 }
 0x7f8   :  { %v11069_v56 = vpop.permute.xlu1 %5211  ;;  %4673 = vrot.lane.b32.xlu0 %v6562_v5, %s6640_s5  ;;  %v5109_v5 = vsel %vm2256_vm3, %v5035_v49, %v5036_v35 }
 0x7fa   :  { %4743 = vrot.lane.b32.xlu1 %v10984_v29, %s6636_s9  ;;  %v11074_v10 = vpop.permute.xlu0 %4701  ;;  %v5106_v29 = vsel %vm2256_vm3, %v5038_v21, %v5039_v23 }
 0x7fc   :  { %v11076_v34 = vpop.permute.xlu1 %5215  ;;  %4737 = vrot.lane.b32.xlu0 %v10986_v36, %s6636_s9 }
 0x7fe   :  { %5251 = vrot.lane.b32.xlu1 %v5108_v50, %s6636_s9  ;;  %v11083_v6 = vpop.permute.xlu0 %5209 }
 0x800   :  { %v11085_v58 = vpop.permute.xlu1 %4639  ;;  %4741 = vrot.lane.b32.xlu0 %v10995_v19, %s6636_s9  ;;  %v5107_v19 = vsel %vm2256_vm3, %v5037_v51, %v5038_v21  ;;  %v4976_v51 = vld [vmem:[#allocation2 + $0x1f8] sm:$0xff]  ;;  %v4977_v21 = vld [vmem:[#allocation2 + $0x208] sm:$0xff] }
 0x801   :  { %v5041_v43 = vrot.slane %v4977_v21, 1 }
 0x802   :  { %5255 = vrot.lane.b32.xlu1 %v5106_v29, %s6636_s9  ;;  %v11092_v36 = vpop.permute.xlu0 %5213  ;;  %v6564_v29 = vld [vmem:[#allocation2 + $0x3d0] sm:$0xff] }
 0x804   :  { %v11096_v32 = vpop.permute.xlu1 %4643  ;;  %5249 = vrot.lane.b32.xlu0 %v5109_v5, %s6636_s9  ;;  %v6565_v5 = vld [vmem:[#allocation2 + $0x3a0] sm:$0xff] }
 0x806   :  { %4679 = vrot.lane.b32.xlu1 %v6563_v42, %s6640_s5  ;;  %v11100_v50 = vpop.permute.xlu0 %4637 }
 0x808   :  { %v11104_v27 = vpop.permute.xlu1 %4707  ;;  %5253 = vrot.lane.b32.xlu0 %v5107_v19, %s6636_s9  ;;  %v6566_v19 = vld [vmem:[#allocation2 + $0x3c0] sm:$0xff] }
 0x809   :  { %13294 = vst [vmem:[#allocation310_spill] sm:$0xff] %v11104_v27 }
 0x80a   :  { %4683 = vrot.lane.b32.xlu1 %v6564_v29, %s6640_s5  ;;  %v11108_v49 = vpop.permute.xlu0 %4641  ;;  %v5040_v29 = vrot.slane %v4976_v51, 1  ;;  %v12784_v51 = vrot.slane %v11124_v44, 1 }
 0x80c   :  { %v11110_v35 = vpop.permute.xlu1 %4711  ;;  %4677 = vrot.lane.b32.xlu0 %v6565_v5, %s6640_s5  ;;  %v4978_v5 = vld [vmem:[#allocation2 + $0x218] sm:$0xff]  ;;  %v5104_v30 = vsel %vm2256_vm3, %v5040_v29, %v5041_v43 }
 0x80d   :  { %13295 = vst [vmem:[#allocation307_spill] sm:$0xff] %v11110_v35 }
 0x80e   :  { %4747 = vrot.lane.b32.xlu1 %v10993_v37, %s6636_s9  ;;  %v11115_v42 = vpop.permute.xlu0 %4705 }
 0x80f   :  { %13296 = vst [vmem:[#allocation313_spill] sm:$0xff] %v11115_v42 }
 0x810   :  { %v11117_v33 = vpop.permute.xlu1 %5219  ;;  %4681 = vrot.lane.b32.xlu0 %v6566_v19, %s6640_s5 }
 0x811   :  { %13297 = vst [vmem:[#allocation377_spill] sm:$0xff] %v11117_v33  ;;  %v5042_v33 = vrot.slane %v4978_v5, 1  ;;  %v5105_v5 = vsel %vm2256_vm3, %v5039_v23, %v5040_v29  ;;  %v13307_v23 = vld [vmem:[#allocation33_spill] sm:$0xff] }
 0x812   :  { %4751 = vrot.lane.b32.xlu1 %v11004_v41, %s6636_s9  ;;  %v11122_v1 = vpop.permute.xlu0 %4709  ;;  %v1488_v29 = vadd.f32 %v6570_v48, %v13307_v23 }
 0x813   :  { %13298 = vst [vmem:[#allocation378_spill] sm:$0xff] %v11122_v1 }
 0x814   :  { %v11126_v37 = vpop.permute.xlu1 %5223  ;;  %4745 = vrot.lane.b32.xlu0 %v11006_v22, %s6636_s9  ;;  %v5102_v22 = vsel %vm2256_vm3, %v5042_v33, %v12784_v51  ;;  %v6569_v51 = vld [vmem:[#allocation2 + $0x30] sm:$0xff]  ;;  %v1936_v55 = vadd.f32 %v13312_v0, %v1488_v29  ;;  %v13319_v0 = vld [vmem:[#allocation23_spill] sm:$0xff]  ;;  %v13321_v29 = vld [vmem:[#allocation224_spill] sm:$0xff] }
 0x815   :  { %13299 = vst [vmem:[#allocation379_spill] sm:$0xff] %v11126_v37  ;;  %v13304_v37 = vld [vmem:[#allocation36_spill] sm:$0xff] }
 0x816   :  { %5259 = vrot.lane.b32.xlu1 %v5104_v30, %s6636_s9  ;;  %v11134_v21 = vpop.permute.xlu0 %5217 }
 0x817   :  { %13300 = vst [vmem:[#allocation380_spill] sm:$0xff] %v11134_v21  ;;  %v6567_v21 = vld [vmem:[#allocation2 + $0x20] sm:$0xff] }
 0x818   :  { %v11136_v41 = vpop.permute.xlu1 %4647  ;;  %4749 = vrot.lane.b32.xlu0 %v11015_v9, %s6636_s9  ;;  %v1490_v27 = vadd.f32 %v6567_v21, %v13304_v37  ;;  %v6568_v9 = vld [vmem:[#allocation2 + $0x3f0] sm:$0xff]  ;;  %v13310_v21 = vld [vmem:[#allocation35_spill] sm:$0xff] }
 0x819   :  { %13301 = vst [vmem:[#allocation381_spill] sm:$0xff] %v11136_v41  ;;  %v6571_v37 = vld [vmem:[#allocation2 + $0x10] sm:$0xff] }
 0x81a   :  { %5263 = vrot.lane.b32.xlu1 %v5102_v22, %s6636_s9  ;;  %v11145_v19 = vpop.permute.xlu0 %5221  ;;  %v5103_v22 = vsel %vm2256_vm3, %v5041_v43, %v5042_v33  ;;  %v13313_v43 = vld [vmem:[#allocation143_spill] sm:$0xff] }
 0x81b   :  { %13302 = vst [vmem:[#allocation382_spill] sm:$0xff] %v11145_v19  ;;  %v13306_v19 = vld [vmem:[#allocation3_spill] sm:$0xff] }
 0x81c   :  { %v11149_v30 = vpop.permute.xlu1 %4651  ;;  %5257 = vrot.lane.b32.xlu0 %v5105_v5, %s6636_s9  ;;  %v1491_v35 = vadd.f32 %v6569_v51, %v13306_v19  ;;  %v13315_v19 = vld [vmem:[#allocation111_spill] sm:$0xff] }
 0x81d   :  { %13303 = vst [vmem:[#allocation383_spill] sm:$0xff] %v11149_v30  ;;  %v13308_v30 = vld [vmem:[#allocation52_spill] sm:$0xff] }
 0x81e   :  { %4687 = vrot.lane.b32.xlu1 %v6568_v9, %s6640_s5  ;;  %v11154_v42 = vpop.permute.xlu0 %4645  ;;  %v1938_v1 = vadd.f32 %v13308_v30, %v1490_v27  ;;  %v1489_v9 = vadd.f32 %v6571_v37, %v13310_v21  ;;  %v13316_v27 = vld [vmem:[#allocation26_spill] sm:$0xff]  ;;  %v6572_v21 = vld [vmem:[#allocation2 + $0x3e0] sm:$0xff] }
 0x81f   :  { %13305 = vst [vmem:[#allocation36_spill] sm:$0xff] %v11154_v42  ;;  %v1939_v42 = vadd.f32 %v13311_v46, %v1491_v35  ;;  %v2577_v30 = vadd.f32 %v13316_v27, %v1936_v55 }
 0x820   :  { %v11161_v5 = vpop.permute.xlu1 %4715  ;;  %5261 = vrot.lane.b32.xlu0 %v5103_v22, %s6636_s9  ;;  %v2579_v33 = vadd.f32 %v13313_v43, %v1938_v1  ;;  %v1937_v23 = vadd.f32 %v13315_v19, %v1489_v9  ;;  %v13318_v22 = vld [vmem:[#allocation105_spill] sm:$0xff]  ;;  %v13320_v1 = vld [vmem:[#allocation114_spill] sm:$0xff]  ;;  %v13322_v43 = vld [vmem:[#allocation263_spill] sm:$0xff] }
 0x821   :  { %13309 = vst [vmem:[#allocation3_spill] sm:$0xff] %v11161_v5  ;;  %v13317_v5 = vld [vmem:[#allocation140_spill] sm:$0xff]  ;;  %v13323_v9 = vld [vmem:[#allocation115_spill] sm:$0xff] }
 0x822   :  { %4563 = vrot.lane.b32.xlu1 %v6571_v37, %s6640_s5  ;;  %v11169_v51 = vpop.permute.xlu0 %4649  ;;  %v2580_v41 = vadd.f32 %v13317_v5, %v1939_v42  ;;  %v3219_v57 = vadd.f32 %v13318_v22, %v2579_v33  ;;  %v2578_v46 = vadd.f32 %v13319_v0, %v1937_v23  ;;  %v3217_v37 = vadd.f32 %v13321_v29, %v2577_v30  ;;  %v4980_v42 = vld [vmem:[#allocation2 + $0x238] sm:$0xff]  ;;  %v4981_v5 = vld [vmem:[#allocation2 + $0x248] sm:$0xff]  ;;  %v6424_v19 = vld [vmem:[%s12724_s2] sm:$0xff]  }
 0x823   :  { %13314 = vst [vmem:[#allocation33_spill] sm:$0xff] %v11169_v51  ;;  %v13324_v23 = vld [vmem:[#allocation260_spill] sm:$0xff]  ;;  %v5044_v0 = vrot.slane %v4980_v42, 1  ;;  %6340 = vmatprep.subr.bf16.mxu1 %v6424_v19 }
 0x824   :  { %v11175_v39 = vpop.permute.xlu1 %4719  ;;  %4685 = vrot.lane.b32.xlu0 %v6572_v21, %s6640_s5  ;;  %v3220_v35 = vadd.f32 %v13320_v1, %v2580_v41  ;;  %v3859_v51 = vadd.f32 %v13322_v43, %v3219_v57  ;;  %v3218_v33 = vadd.f32 %v13323_v9, %v2578_v46  ;;  %v13325_v41 = vld [vmem:[#allocation261_spill] sm:$0xff]  ;;  %v5045_v1 = vrot.slane %v4981_v5, 1  ;;  %6341 = vmatpush3.bf16.msra.mxu1 %v6424_v19 }
 0x825   :  { %v3857_v22 = vadd.f32 %v13325_v41, %v3217_v37  ;;  %v4151_v41 = vrot.slane %v10693_v13, 7  ;;  %v13328_v13 = vld [vmem:[#allocation9_spill] sm:$0xff] }
 0x826   :  { %4755 = vrot.lane.b32.xlu1 %v11038_v12, %s6636_s9  ;;  %v11184_v55 = vpop.permute.xlu0 %4713  ;;  %v3860_v27 = vadd.f32 %v13324_v23, %v3220_v35  ;;  %v4499_v30 = vadd.f32 %v10807_v25, %v3859_v51  ;;  %v13326_v12 = vld [vmem:[#allocation259_spill] sm:$0xff]  ;;  %v4982_v25 = vld [vmem:[#allocation2 + $0x258] sm:$0xff] }
 0x827   :  { %v3858_v21 = vadd.f32 %v13326_v12, %v3218_v33  ;;  %v4497_v29 = vadd.f32 %v10799_v54, %v3857_v22  ;;  %v5100_v54 = vsel %vm2256_vm3, %v5044_v0, %v5045_v1 }
 0x828   :  { %v11193_v57 = vpop.permute.xlu1 %5227  ;;  %4561 = vrot.lane.b32.xlu0 %v6570_v48, %s6640_s5  ;;  %v4500_v46 = vadd.f32 %v10793_v20, %v3860_v27  ;;  %v4883_v43 = vadd.f32 %v11028_v17, %v4499_v30  ;;  %v5046_v17 = vrot.slane %v4982_v25, 1 }
 0x829   :  { %v4498_v48 = vadd.f32 %v10785_v3, %v3858_v21  ;;  %v4881_v37 = vadd.f32 %v11022_v38, %v4497_v29 }
 0x82a   :  { %4759 = vrot.lane.b32.xlu1 %v11048_v63, %s6636_s9  ;;  %v11202_v35 = vpop.permute.xlu0 %4717  ;;  %v4884_v51 = vadd.f32 %v11018_v8, %v4500_v46  ;;  %v5395_v42 = vadd.f32 %v11044_v24, %v4883_v43  ;;  %v6573_v46 = vld [vmem:[#allocation2 + $0x60] sm:$0xff] }
 0x82b   :  { %v4882_v63 = vadd.f32 %v11012_v16, %v4498_v48  ;;  %v5393_v3 = vadd.f32 %v11036_v7, %v4881_v37  ;;  %v13327_v7 = vrot.slane %v11124_v44, 1  ;;  %v4152_v44 = vrot.slane %v10676_v26, 7  ;;  %v6574_v48 = vld [vmem:[#allocation2 + $0x40] sm:$0xff]  ;;  %v6575_v37 = vld [vmem:[#allocation2 + $0x70] sm:$0xff] }
 0x82c   :  { %v11208_v20 = vpop.permute.xlu1 %5231  ;;  %4753 = vrot.lane.b32.xlu0 %v11052_v18, %s6636_s9  ;;  %v5396_v5 = vadd.f32 %v11030_v28, %v4884_v51  ;;  %v5459_v24 = vmax.f32 %v5395_v42, 0.0  ;;  %v5099_v18 = vsel %vm2256_vm3, %v5045_v1, %v5046_v17  ;;  %v1494_v29 = vadd.f32 %v6573_v46, %v13328_v13  ;;  %v13329_v51 = vld [vmem:[#allocation5_spill] sm:$0xff]  ;;  %v13330_v42 = vld [vmem:[#allocation11_spill] sm:$0xff] }
 0x82d   :  { %v5394_v38 = vadd.f32 %v11024_v31, %v4882_v63  ;;  %v5457_v33 = vmax.f32 %v5393_v3, 0.0  ;;  %v5101_v31 = vsel %vm2256_vm3, %v13327_v7, %v5044_v0  ;;  %v4153_v0 = vrot.slane %v10702_v2, 7  ;;  %v13331_v63 = vld [vmem:[#allocation64_spill] sm:$0xff]  ;;  %v13334_v7 = vld [vmem:[#allocation67_spill] sm:$0xff]  ;;  %v13337_v13 = vld [vmem:[#allocation61_spill] sm:$0xff] }
 0x82e   :  { %5267 = vrot.lane.b32.xlu1 %v5100_v54, %s6636_s9  ;;  %v11218_v8 = vpop.permute.xlu0 %5225  ;;  %v5460_v16 = vmax.f32 %v5396_v5, 0.0  ;;  %v4201_v1 = vsel %vm1167_vm2, %v4151_v41, %v4152_v44  ;;  %v4154_v26 = vrot.slane %v10685_v11, 7  ;;  %v1492_v2 = vadd.f32 %v6574_v48, %v13329_v51  ;;  %v13339_v51 = vld [vmem:[#allocation155_spill] sm:$0xff]  ;;  %v13365_v11 = vld [vmem:[#allocation154_spill] sm:$0xff] }
 0x82f   :  { %v5458_v19 = vmax.f32 %v5394_v38, 0.0  ;;  %v1495_v54 = vadd.f32 %v6575_v37, %v13330_v42  ;;  %v1942_v5 = vadd.f32 %v13331_v63, %v1494_v29  ;;  %v13341_v63 = vld [vmem:[#allocation148_spill] sm:$0xff] }
 0x830   :  { %v11221_v9 = vpop.permute.xlu1 %4655  ;;  %4757 = vrot.lane.b32.xlu0 %v11060_v59, %s6636_s9  ;;  %v5522_v23 = vpack.c.bf16 %v5460_v16, %v5459_v24  ;;  %v11237_v59 = vld [vmem:[#allocation2 + $0x268] sm:$0xff]  ;;  %v4199_v38 = vsel %vm1167_vm2, %v4153_v0, %v4154_v26  ;;  %v6576_v24 = vld [vmem:[#allocation2 + $0x50] sm:$0xff]  ;;  %v13333_v16 = vld [vmem:[#allocation58_spill] sm:$0xff] }
 0x831   :  { %v5521_v22 = vpack.c.bf16 %v5458_v19, %v5457_v33  ;;  %v5047_v12 = vrot.slane %v11237_v59, 1  ;;  %v1940_v33 = vadd.f32 %v13333_v16, %v1492_v2  ;;  %v13335_v19 = vld [vmem:[#allocation153_spill] sm:$0xff]  ;;  %v13344_v16 = vld [vmem:[#allocation267_spill] sm:$0xff]  ;;  %v4156_v59 = vrot.slane %v10697_v4, 7 }
 0x832   :  { %5269 = vrot.lane.b32.xlu1 %v5099_v18, %s6636_s9  ;;  %v11228_v28 = vpop.permute.xlu0 %5229  ;;  %v13332_v18 = vld [vmem:[#allocation7_spill] sm:$0xff]  ;;  %v13340_v2 = vld [vmem:[#allocation109_spill] sm:$0xff] }
 0x833   :  { %v5098_v25 = vsel %vm2256_vm3, %v5046_v17, %v5047_v12  ;;  %v1493_v17 = vadd.f32 %v6576_v24, %v13332_v18 }
 0x834   :  { %v11234_v27 = vpop.permute.xlu1 %4659  ;;  %5265 = vrot.lane.b32.xlu0 %v5101_v31, %s6636_s9  ;;  %v1943_v31 = vadd.f32 %v13334_v7, %v1495_v54  ;;  %v4985_v7 = vld [vmem:[#allocation2 + $0x288] sm:$0xff] }
 0x835   :  { %v1941_v29 = vadd.f32 %v13337_v13, %v1493_v17  ;;  %v13347_v13 = vld [vmem:[#allocation265_spill] sm:$0xff] }
 0x836   :  { %5589 = vrot.lane.b32.xlu1 %v5522_v23, %s6636_s9  ;;  %v11241_v30 = vpop.permute.xlu0 %4653  ;;  %v2583_v23 = vadd.f32 %v13335_v19, %v1942_v5  ;;  %v2584_v37 = vadd.f32 %v13339_v51, %v1943_v31  ;;  %v4200_v31 = vsel %vm1167_vm2, %v4152_v44, %v4153_v0  ;;  %v13345_v19 = vld [vmem:[#allocation230_spill] sm:$0xff]  ;;  %v5049_v51 = vrot.slane %v4985_v7, 1 }
 0x837   :  { %v2582_v5 = vadd.f32 %v13341_v63, %v1941_v29 }
 0x838   :  { %v11245_v21 = vpop.permute.xlu1 %4723  ;;  %5587 = vrot.lane.b32.xlu0 %v5521_v22, %s6636_s9  ;;  %v3223_v42 = vadd.f32 %v13340_v2, %v2583_v23 }
 0x839   :  { %v3222_v23 = vadd.f32 %v13345_v19, %v2582_v5 }
 0x83a   :  { %4379 = vrot.lane.b32.xlu1 %v4201_v1, %s6636_s9  ;;  %v11253_v43 = vpop.permute.xlu0 %4657  ;;  %v13336_v1 = vrot.slane %v10668_v52, 7  ;;  %v13343_v52 = vld [vmem:[#allocation104_spill] sm:$0xff] }
 0x83c   :  { %v11263_v3 = vpop.permute.xlu1 %4727  ;;  %5271 = vrot.lane.b32.xlu0 %v5098_v25, %s6636_s9  ;;  %v4202_v46 = vsel %vm1167_vm2, %v13336_v1, %v4151_v41  ;;  %v13338_v25 = vld [vmem:[#allocation147_spill] sm:$0xff]  ;;  %v3863_v41 = vadd.f32 %v13344_v16, %v3223_v42  ;;  %v13346_v1 = vld [vmem:[#allocation264_spill] sm:$0xff] }
 0x83d   :  { %v2581_v48 = vadd.f32 %v13338_v25, %v1940_v33  ;;  %v4984_v33 = vld [vmem:[#allocation2 + $0x278] sm:$0xff] }
 0x83e   :  { %4383 = vrot.lane.b32.xlu1 %v4199_v38, %s6636_s9  ;;  %v11275_v22 = vpop.permute.xlu0 %4721  ;;  %v13342_v38 = vld [vmem:[#allocation231_spill] sm:$0xff]  ;;  %v4503_v25 = vadd.f32 %v10823_v62, %v3863_v41  ;;  %v4986_v62 = vld [vmem:[#allocation2 + $0x298] sm:$0xff] }
 0x83f   :  { %v3224_v24 = vadd.f32 %v13342_v38, %v2584_v37  ;;  %v3221_v18 = vadd.f32 %v13343_v52, %v2581_v48  ;;  %v13348_v37 = vld [vmem:[#allocation262_spill] sm:$0xff] }
 0x840   :  { %v11285_v54 = vpop.permute.xlu1 %5235  ;;  %4377 = vrot.lane.b32.xlu0 %v4202_v46, %s6636_s9  ;;  %v3862_v2 = vadd.f32 %v13348_v37, %v3222_v23  ;;  %v4887_v0 = vadd.f32 %v11074_v10, %v4503_v25  ;;  %v6577_v25 = vld [vmem:[#allocation2 + $0xa0] sm:$0xff]  ;;  %v13351_v37 = vld [vmem:[#allocation328_spill] sm:$0xff] }
 0x841   :  { %v3864_v46 = vadd.f32 %v13346_v1, %v3224_v24  ;;  %v3861_v29 = vadd.f32 %v13347_v13, %v3221_v18  ;;  %v12786_v4 = vrot.slane %v13351_v37, 7 }
 0x842   :  { %4763 = vrot.lane.b32.xlu1 %v11085_v58, %s6636_s9  ;;  %v11294_v17 = vpop.permute.xlu0 %4725  ;;  %v5048_v58 = vrot.slane %v4984_v33, 1  ;;  %v4502_v5 = vadd.f32 %v10801_v47, %v3862_v2  ;;  %v5399_v52 = vadd.f32 %v11092_v36, %v4887_v0 }
 0x843   :  { %v4504_v42 = vadd.f32 %v10809_v15, %v3864_v46  ;;  %v4501_v44 = vadd.f32 %v10815_v53, %v3861_v29  ;;  %v5050_v15 = vrot.slane %v4986_v62, 1  ;;  %v13349_v46 = vld [vmem:[#allocation330_spill] sm:$0xff]  ;;  %v6579_v62 = vld [vmem:[#allocation2 + $0xb0] sm:$0xff] }
 0x844   :  { %v11302_v48 = vpop.permute.xlu1 %5239  ;;  %4381 = vrot.lane.b32.xlu0 %v4200_v31, %s6636_s9  ;;  %v5096_v10 = vsel %vm2256_vm3, %v5048_v58, %v5049_v51  ;;  %v4886_v53 = vadd.f32 %v11056_v45, %v4502_v5  ;;  %v5463_v36 = vmax.f32 %v5399_v52, 0.0  ;;  %v4155_v31 = vrot.slane %v10711_v60, 7  ;;  %v13350_v60 = vld [vmem:[#allocation18_spill] sm:$0xff]  ;;  %v13353_v5 = vld [vmem:[#allocation21_spill] sm:$0xff] }
 0x845   :  { %v4888_v38 = vadd.f32 %v11062_v61, %v4504_v42  ;;  %v4885_v24 = vadd.f32 %v11067_v40, %v4501_v44  ;;  %v4157_v13 = vrot.slane %v13349_v46, 7  ;;  %v6578_v42 = vld [vmem:[#allocation2 + $0x80] sm:$0xff]  ;;  %v13352_v44 = vld [vmem:[#allocation14_spill] sm:$0xff] }
 0x846   :  { %4767 = vrot.lane.b32.xlu1 %v11096_v32, %s6636_s9  ;;  %v11311_v63 = vpop.permute.xlu0 %5233  ;;  %v5398_v40 = vadd.f32 %v11069_v56, %v4886_v53  ;;  %v5097_v56 = vsel %vm2256_vm3, %v5047_v12, %v5048_v58  ;;  %v4197_v29 = vsel %vm1167_vm2, %v4155_v31, %v4156_v59  ;;  %v1498_v58 = vadd.f32 %v6577_v25, %v13350_v60  ;;  %v13361_v60 = vld [vmem:[#allocation161_spill] sm:$0xff] }
 0x847   :  { %v5400_v32 = vadd.f32 %v11076_v34, %v4888_v38  ;;  %v5397_v47 = vadd.f32 %v11083_v6, %v4885_v24  ;;  %v1496_v0 = vadd.f32 %v6578_v42, %v13352_v44  ;;  %v1499_v38 = vadd.f32 %v6579_v62, %v13353_v5  ;;  %v13354_v24 = vld [vmem:[#allocation76_spill] sm:$0xff]  ;;  %v13364_v5 = vld [vmem:[#allocation233_spill] sm:$0xff] }
 0x848   :  { %v11317_v18 = vpop.permute.xlu1 %4663  ;;  %4761 = vrot.lane.b32.xlu0 %v11100_v50, %s6636_s9  ;;  %v5095_v50 = vsel %vm2256_vm3, %v5049_v51, %v5050_v15  ;;  %v5462_v6 = vmax.f32 %v5398_v40, 0.0  ;;  %v1946_v52 = vadd.f32 %v13354_v24, %v1498_v58  ;;  %v4195_v53 = vsel %vm1167_vm2, %v4157_v13, %v12786_v4  ;;  %v13356_v40 = vld [vmem:[#allocation70_spill] sm:$0xff]  ;;  %v13400_v4 = vld [vmem:[#allocation27_spill] sm:$0xff] }
 0x849   :  { %v5464_v45 = vmax.f32 %v5400_v32, 0.0  ;;  %v5461_v41 = vmax.f32 %v5397_v47, 0.0  ;;  %v6580_v32 = vld [vmem:[#allocation2 + $0x90] sm:$0xff]  ;;  %v13355_v47 = vld [vmem:[#allocation16_spill] sm:$0xff] }
 0x84a   :  { %5275 = vrot.lane.b32.xlu1 %v5096_v10, %s6636_s9  ;;  %v11327_v61 = vpop.permute.xlu0 %5237 }
 0x84b   :  { %v5524_v33 = vpack.c.bf16 %v5464_v45, %v5463_v36  ;;  %v5523_v19 = vpack.c.bf16 %v5462_v6, %v5461_v41  ;;  %v1944_v36 = vadd.f32 %v13356_v40, %v1496_v0  ;;  %v13358_v41 = vld [vmem:[#allocation159_spill] sm:$0xff]  ;;  %v13363_v0 = vld [vmem:[#allocation158_spill] sm:$0xff]  ;;  %v13368_v40 = vld [vmem:[#allocation232_spill] sm:$0xff] }
 0x84c   :  { %v11330_v16 = vpop.permute.xlu1 %4667  ;;  %4765 = vrot.lane.b32.xlu0 %v11108_v49, %s6636_s9  ;;  %v11346_v49 = vld [vmem:[#allocation2 + $0x2a8] sm:$0xff] }
 0x84d   :  { %v5051_v1 = vrot.slane %v11346_v49, 1 }
 0x84e   :  { %5277 = vrot.lane.b32.xlu1 %v5095_v50, %s6636_s9  ;;  %v11337_v34 = vpop.permute.xlu0 %4661  ;;  %v13357_v50 = vld [vmem:[#allocation79_spill] sm:$0xff] }
 0x84f   :  { %v5094_v2 = vsel %vm2256_vm3, %v5050_v15, %v5051_v1  ;;  %v1497_v15 = vadd.f32 %v6580_v32, %v13355_v47  ;;  %v1947_v45 = vadd.f32 %v13357_v50, %v1499_v38  ;;  %v4988_v32 = vld [vmem:[#allocation2 + $0x2b8] sm:$0xff]  ;;  %v4989_v47 = vld [vmem:[#allocation2 + $0x2c8] sm:$0xff] }
 0x850   :  { %v11343_v7 = vpop.permute.xlu1 %4731  ;;  %5273 = vrot.lane.b32.xlu0 %v5097_v56, %s6636_s9  ;;  %v2587_v56 = vadd.f32 %v13358_v41, %v1946_v52  ;;  %v13366_v52 = vld [vmem:[#allocation271_spill] sm:$0xff]  ;;  %v13369_v50 = vld [vmem:[#allocation268_spill] sm:$0xff]  ;;  %v13370_v41 = vld [vmem:[#allocation269_spill] sm:$0xff] }
 0x851   :  { %v2588_v58 = vadd.f32 %v13361_v60, %v1947_v45  ;;  %v13372_v60 = vld [vmem:[#allocation266_spill] sm:$0xff] }
 0x852   :  { %5593 = vrot.lane.b32.xlu1 %v5524_v33, %s6636_s9  ;;  %v11350_v23 = vpop.permute.xlu0 %4665  ;;  %v4198_v33 = vsel %vm1167_vm2, %v4154_v26, %v4155_v31  ;;  %v13367_v31 = vld [vmem:[#allocation381_spill] sm:$0xff] }
 0x853   :  { %v3228_v38 = vadd.f32 %v13364_v5, %v2588_v58  ;;  %v13376_v5 = vld [vmem:[#allocation383_spill] sm:$0xff] }
 0x854   :  { %v11354_v12 = vpop.permute.xlu1 %4735  ;;  %5591 = vrot.lane.b32.xlu0 %v5523_v19, %s6636_s9  ;;  %v13359_v19 = vld [vmem:[#allocation73_spill] sm:$0xff] }
 0x855   :  { %v1945_v46 = vadd.f32 %v13359_v19, %v1497_v15  ;;  %v4196_v15 = vsel %vm1167_vm2, %v4156_v59, %v4157_v13  ;;  %v3868_v45 = vadd.f32 %v13369_v50, %v3228_v38  ;;  %v13375_v13 = vld [vmem:[#allocation378_spill] sm:$0xff]  ;;  %v13381_v50 = vld [vmem:[#allocation36_spill] sm:$0xff] }
 0x856   :  { %4387 = vrot.lane.b32.xlu1 %v4197_v29, %s6636_s9  ;;  %v11362_v51 = vpop.permute.xlu0 %4729  ;;  %v13360_v29 = vld [vmem:[#allocation156_spill] sm:$0xff] }
 0x857   :  { %v2585_v25 = vadd.f32 %v13360_v29, %v1944_v36  ;;  %v2586_v62 = vadd.f32 %v13363_v0, %v1945_v46  ;;  %v5052_v29 = vrot.slane %v4988_v32, 1  ;;  %v13374_v0 = vld [vmem:[#allocation350_spill] sm:$0xff]  ;;  %v13379_v32 = vld [vmem:[#allocation313_spill] sm:$0xff] }
 0x858   :  { %v11372_v10 = vpop.permute.xlu1 %5243  ;;  %5279 = vrot.lane.b32.xlu0 %v5094_v2, %s6636_s9  ;;  %v13362_v2 = vld [vmem:[#allocation157_spill] sm:$0xff] }
 0x859   :  { %v3227_v42 = vadd.f32 %v13362_v2, %v2587_v56  ;;  %v3225_v24 = vadd.f32 %v13365_v11, %v2585_v25  ;;  %v3226_v36 = vadd.f32 %v13368_v40, %v2586_v62  ;;  %v5053_v25 = vrot.slane %v4989_v47, 1  ;;  %v13373_v2 = vld [vmem:[#allocation349_spill] sm:$0xff]  ;;  %v4990_v11 = vld [vmem:[#allocation2 + $0x2d8] sm:$0xff] }
 0x85a   :  { %4391 = vrot.lane.b32.xlu1 %v4195_v53, %s6636_s9  ;;  %v11384_v6 = vpop.permute.xlu0 %4733 }
 0x85b   :  { %v3867_v26 = vadd.f32 %v13366_v52, %v3227_v42  ;;  %v3865_v56 = vadd.f32 %v13370_v41, %v3225_v24  ;;  %v3866_v58 = vadd.f32 %v13372_v60, %v3226_v36  ;;  %v4508_v42 = vadd.f32 %v13373_v2, %v3868_v45  ;;  %v13377_v24 = vld [vmem:[#allocation348_spill] sm:$0xff] }
 0x85c   :  { %v11394_v44 = vpop.permute.xlu1 %5247  ;;  %4385 = vrot.lane.b32.xlu0 %v4198_v33, %s6636_s9  ;;  %v13371_v33 = vld [vmem:[#allocation352_spill] sm:$0xff]  ;;  %v5092_v45 = vsel %vm2256_vm3, %v5052_v29, %v5053_v25  ;;  %v5054_v41 = vrot.slane %v4990_v11, 1 }
 0x85d   :  { %v4507_v19 = vadd.f32 %v13371_v33, %v3867_v26  ;;  %v4505_v59 = vadd.f32 %v13374_v0, %v3865_v56  ;;  %v4506_v52 = vadd.f32 %v13377_v24, %v3866_v58  ;;  %v13378_v26 = vld [vmem:[#allocation307_spill] sm:$0xff]  ;;  %v13382_v56 = vld [vmem:[#allocation310_spill] sm:$0xff]  ;;  %v13384_v58 = vld [vmem:[#allocation380_spill] sm:$0xff] }
 0x85e   :  { %4771 = vrot.lane.b32.xlu1 %v13367_v31, %s6636_s9  ;;  %v11403_v53 = vpop.permute.xlu0 %5241  ;;  %v4892_v31 = vadd.f32 %v13378_v26, %v4508_v42  ;;  %v13385_v0 = vld [vmem:[#allocation377_spill] sm:$0xff]  ;;  %v5091_v11 = vsel %vm2256_vm3, %v5053_v25, %v5054_v41  ;;  %v13389_v25 = vld [vmem:[#allocation332_spill] sm:$0xff] }
 0x85f   :  { %v4891_v62 = vadd.f32 %v13375_v13, %v4507_v19  ;;  %v4889_v47 = vadd.f32 %v13379_v32, %v4505_v59  ;;  %v4890_v33 = vadd.f32 %v13382_v56, %v4506_v52  ;;  %v13383_v19 = vld [vmem:[#allocation379_spill] sm:$0xff] }
 0x860   :  { %v11411_v46 = vpop.permute.xlu1 %4671  ;;  %4389 = vrot.lane.b32.xlu0 %v4196_v15, %s6636_s9  ;;  %v13380_v15 = vld [vmem:[#allocation382_spill] sm:$0xff]  ;;  %v5404_v60 = vadd.f32 %v13383_v19, %v4892_v31  ;;  %v5093_v31 = vsel %vm2256_vm3, %v5051_v1, %v5052_v29 }
 0x861   :  { %v5403_v40 = vadd.f32 %v13380_v15, %v4891_v62  ;;  %v5401_v2 = vadd.f32 %v13384_v58, %v4889_v47  ;;  %v5402_v59 = vadd.f32 %v13385_v0, %v4890_v33  ;;  %v13391_v33 = vld [vmem:[#allocation329_spill] sm:$0xff]  ;;  %v13393_v29 = vld [vmem:[#allocation334_spill] sm:$0xff] }
 0x862   :  { %4775 = vrot.lane.b32.xlu1 %v13376_v5, %s6636_s9  ;;  %v11420_v38 = vpop.permute.xlu0 %5245  ;;  %v13387_v5 = vld [vmem:[#allocation33_spill] sm:$0xff]  ;;  %v5468_v24 = vmax.f32 %v5404_v60, 0.0  ;;  %v4160_v49 = vrot.slane %v13391_v33, 7  ;;  %v4161_v60 = vrot.slane %v13393_v29, 7  ;;  %v13398_v33 = vld [vmem:[#allocation96_spill] sm:$0xff] }
 0x863   :  { %v5467_v13 = vmax.f32 %v5403_v40, 0.0  ;;  %v5465_v52 = vmax.f32 %v5401_v2, 0.0  ;;  %v5466_v32 = vmax.f32 %v5402_v59, 0.0  ;;  %v11455_v40 = vld [vmem:[#allocation2 + $0x2e8] sm:$0xff]  ;;  %v6581_v2 = vld [vmem:[#allocation2 + $0xe0] sm:$0xff]  ;;  %v13394_v0 = vld [vmem:[#allocation29_spill] sm:$0xff] }
 0x864   :  { %v11426_v36 = vpop.permute.xlu1 %4675  ;;  %4769 = vrot.lane.b32.xlu0 %v13381_v50, %s6636_s9  ;;  %v4159_v50 = vrot.slane %v13389_v25, 7  ;;  %v12787_v19 = vrot.slane %v11455_v40, 1  ;;  %v1502_v59 = vadd.f32 %v6581_v2, %v13394_v0  ;;  %v13397_v25 = vld [vmem:[#allocation31_spill] sm:$0xff]  ;;  %v6584_v0 = vld [vmem:[#allocation2 + $0xd0] sm:$0xff] }
 0x865   :  { %v5526_v47 = vpack.c.bf16 %v5468_v24, %v5467_v13 }
 0x866   :  { %5283 = vrot.lane.b32.xlu1 %v5092_v45, %s6636_s9  ;;  %v11436_v42 = vpop.permute.xlu0 %4669  ;;  %v5525_v45 = vpack.c.bf16 %v5466_v32, %v5465_v52  ;;  %v4193_v58 = vsel %vm1167_vm2, %v4159_v50, %v4160_v49  ;;  %v5090_v24 = vsel %vm2256_vm3, %v5054_v41, %v12787_v19  ;;  %v6582_v52 = vld [vmem:[#allocation2 + $0xc0] sm:$0xff]  ;;  %v1950_v29 = vadd.f32 %v13398_v33, %v1502_v59  ;;  %v13401_v19 = vld [vmem:[#allocation86_spill] sm:$0xff] }
 0x867   :  { %v1501_v41 = vadd.f32 %v6584_v0, %v13400_v4  ;;  %v13406_v33 = vld [vmem:[#allocation91_spill] sm:$0xff] }
 0x868   :  { %v11439_v62 = vpop.permute.xlu1 %4739  ;;  %4773 = vrot.lane.b32.xlu0 %v13387_v5, %s6636_s9  ;;  %v13395_v5 = vld [vmem:[#allocation331_spill] sm:$0xff] }
 0x869   :  { %13386 = vst [vmem:[#allocation52_spill] sm:$0xff] %v11439_v62  ;;  %v13403_v62 = vld [vmem:[#allocation165_spill] sm:$0xff]  ;;  %v13408_v4 = vld [vmem:[#allocation167_spill] sm:$0xff] }
 0x86a   :  { %5285 = vrot.lane.b32.xlu1 %v5091_v11, %s6636_s9  ;;  %v11446_v26 = vpop.permute.xlu0 %4673  ;;  %v12788_v11 = vrot.slane %v13395_v5, 7 }
 0x86c   :  { %v11452_v15 = vpop.permute.xlu1 %4743  ;;  %5281 = vrot.lane.b32.xlu0 %v5093_v31, %s6636_s9  ;;  %v13396_v31 = vld [vmem:[#allocation24_spill] sm:$0xff] }
 0x86d   :  { %13388 = vst [vmem:[#allocation35_spill] sm:$0xff] %v11452_v15  ;;  %v1500_v32 = vadd.f32 %v6582_v52, %v13396_v31  ;;  %v13402_v52 = vld [vmem:[#allocation101_spill] sm:$0xff]  ;;  %v13413_v15 = vld [vmem:[#allocation275_spill] sm:$0xff] }
 0x86e   :  { %5597 = vrot.lane.b32.xlu1 %v5526_v47, %s6636_s9  ;;  %v11459_v56 = vpop.permute.xlu0 %4737  ;;  %v6583_v47 = vld [vmem:[#allocation2 + $0xf0] sm:$0xff] }
 0x86f   :  { %13390 = vst [vmem:[#allocation55_spill] sm:$0xff] %v11459_v56 }
 0x870   :  { %v11463_v1 = vpop.permute.xlu1 %5251  ;;  %5595 = vrot.lane.b32.xlu0 %v5525_v45, %s6636_s9  ;;  %v1503_v45 = vadd.f32 %v6583_v47, %v13397_v25  ;;  %v2591_v47 = vadd.f32 %v13403_v62, %v1950_v29  ;;  %v13410_v62 = vld [vmem:[#allocation164_spill] sm:$0xff] }
 0x871   :  { %13392 = vst [vmem:[#allocation106_spill] sm:$0xff] %v11463_v1  ;;  %v1948_v1 = vadd.f32 %v13401_v19, %v1500_v32  ;;  %v13409_v19 = vld [vmem:[#allocation163_spill] sm:$0xff] }
 0x872   :  { %4395 = vrot.lane.b32.xlu1 %v4193_v58, %s6636_s9  ;;  %v11471_v13 = vpop.permute.xlu0 %4741  ;;  %v4191_v58 = vsel %vm1167_vm2, %v4161_v60, %v12788_v11  ;;  %v1951_v31 = vadd.f32 %v13402_v52, %v1503_v45  ;;  %v1949_v11 = vadd.f32 %v13406_v33, %v1501_v41  ;;  %v3231_v32 = vadd.f32 %v13409_v19, %v2591_v47  ;;  %v13418_v19 = vld [vmem:[#allocation270_spill] sm:$0xff] }
 0x873   :  { %v4192_v41 = vsel %vm1167_vm2, %v4160_v49, %v4161_v60 }
 0x874   :  { %v11481_v2 = vpop.permute.xlu1 %5255  ;;  %5287 = vrot.lane.b32.xlu0 %v5090_v24, %s6636_s9  ;;  %v13405_v24 = vrot.slane %v13351_v37, 7  ;;  %v2592_v0 = vadd.f32 %v13408_v4, %v1951_v31  ;;  %v2590_v29 = vadd.f32 %v13410_v62, %v1949_v11  ;;  %v13412_v37 = vld [vmem:[#allocation249_spill] sm:$0xff]  ;;  %v13414_v31 = vld [vmem:[#allocation234_spill] sm:$0xff]  ;;  %v13417_v4 = vld [vmem:[#allocation356_spill] sm:$0xff] }
 0x875   :  { %13399 = vst [vmem:[#allocation143_spill] sm:$0xff] %v11481_v2  ;;  %v13407_v2 = vld [vmem:[#allocation162_spill] sm:$0xff]  ;;  %v13416_v11 = vld [vmem:[#allocation273_spill] sm:$0xff] }
 0x876   :  { %4399 = vrot.lane.b32.xlu1 %v4191_v58, %s6636_s9  ;;  %v11493_v59 = vpop.permute.xlu0 %5249  ;;  %v4194_v25 = vsel %vm1167_vm2, %v13405_v24, %v4159_v50  ;;  %v2589_v56 = vadd.f32 %v13407_v2, %v1948_v1  ;;  %v13411_v58 = vld [vmem:[#allocation235_spill] sm:$0xff]  ;;  %v3871_v50 = vadd.f32 %v13413_v15, %v3231_v32  ;;  %v4992_v2 = vld [vmem:[#allocation2 + $0x2f8] sm:$0xff]  ;;  %v3230_v47 = vadd.f32 %v13414_v31, %v2590_v29  ;;  %v13415_v24 = vld [vmem:[#allocation272_spill] sm:$0xff] }
 0x877   :  { %13404 = vst [vmem:[#allocation111_spill] sm:$0xff] %v11493_v59  ;;  %v3232_v52 = vadd.f32 %v13411_v58, %v2592_v0  ;;  %v4993_v15 = vld [vmem:[#allocation2 + $0x308] sm:$0xff]  ;;  %v13419_v62 = vld [vmem:[#allocation353_spill] sm:$0xff]  ;;  %v4994_v29 = vld [vmem:[#allocation2 + $0x318] sm:$0xff] }
 0x878   :  { %v11503_v45 = vpop.permute.xlu1 %4679  ;;  %4393 = vrot.lane.b32.xlu0 %v4194_v25, %s6636_s9  ;;  %v3229_v59 = vadd.f32 %v13412_v37, %v2589_v56  ;;  %v4511_v0 = vadd.f32 %v13417_v4, %v3871_v50  ;;  %v3870_v32 = vadd.f32 %v13418_v19, %v3230_v47  ;;  %v13420_v37 = vld [vmem:[#allocation354_spill] sm:$0xff]  ;;  %v13421_v50 = vld [vmem:[#allocation351_spill] sm:$0xff] }
 0x879   :  { %v3872_v25 = vadd.f32 %v13415_v24, %v3232_v52  ;;  %v5057_v52 = vrot.slane %v4993_v15, 1 }
 0x87a   :  { %4779 = vrot.lane.b32.xlu1 %v11221_v9, %s6636_s9  ;;  %v11512_v1 = vpop.permute.xlu0 %5253  ;;  %v3869_v33 = vadd.f32 %v13416_v11, %v3229_v59  ;;  %v5056_v9 = vrot.slane %v4992_v2, 1  ;;  %v4895_v60 = vadd.f32 %v11202_v35, %v4511_v0  ;;  %v4510_v31 = vadd.f32 %v13421_v50, %v3870_v32 }
 0x87b   :  { %v4512_v58 = vadd.f32 %v13419_v62, %v3872_v25  ;;  %v13423_v25 = vld [vmem:[#allocation3_spill] sm:$0xff] }
 0x87c   :  { %v11520_v56 = vpop.permute.xlu1 %4683  ;;  %4397 = vrot.lane.b32.xlu0 %v4192_v41, %s6636_s9  ;;  %v4509_v49 = vadd.f32 %v13420_v37, %v3869_v33  ;;  %v5407_v47 = vadd.f32 %v11228_v28, %v4895_v60  ;;  %v5088_v35 = vsel %vm2256_vm3, %v5056_v9, %v5057_v52  ;;  %v4894_v11 = vadd.f32 %v13423_v25, %v4510_v31  ;;  %v13426_v37 = vld [vmem:[#allocation336_spill] sm:$0xff]  ;;  %v13429_v31 = vld [vmem:[#allocation338_spill] sm:$0xff] }
 0x87d   :  { %v4896_v41 = vadd.f32 %v11175_v39, %v4512_v58 }
 0x87e   :  { %4783 = vrot.lane.b32.xlu1 %v11234_v27, %s6636_s9  ;;  %v11529_v59 = vpop.permute.xlu0 %4677  ;;  %v4893_v2 = vadd.f32 %v11184_v55, %v4509_v49  ;;  %v5058_v27 = vrot.slane %v4994_v29, 1  ;;  %v5406_v55 = vadd.f32 %v11193_v57, %v4894_v11  ;;  %v5471_v28 = vmax.f32 %v5407_v47, 0.0  ;;  %v6585_v47 = vld [vmem:[#allocation2 + $0x120] sm:$0xff] }
 0x87f   :  { %v5408_v33 = vadd.f32 %v11208_v20, %v4896_v41  ;;  %v4163_v49 = vrot.slane %v13426_v37, 7  ;;  %v4165_v41 = vrot.slane %v13429_v31, 7  ;;  %v13436_v31 = vld [vmem:[#allocation37_spill] sm:$0xff] }
 0x880   :  { %v11535_v24 = vpop.permute.xlu1 %4747  ;;  %4777 = vrot.lane.b32.xlu0 %v11241_v30, %s6636_s9  ;;  %v5405_v4 = vadd.f32 %v11218_v8, %v4893_v2  ;;  %v5087_v30 = vsel %vm2256_vm3, %v5057_v52, %v5058_v27  ;;  %v13424_v8 = vrot.slane %v11455_v40, 1  ;;  %v5470_v32 = vmax.f32 %v5406_v55, 0.0  ;;  %v13427_v52 = vld [vmem:[#allocation333_spill] sm:$0xff] }
 0x881   :  { %13422 = vst [vmem:[#allocation26_spill] sm:$0xff] %v11535_v24  ;;  %v5472_v15 = vmax.f32 %v5408_v33, 0.0  ;;  %v4164_v40 = vrot.slane %v13427_v52, 7  ;;  %v13432_v33 = vld [vmem:[#allocation335_spill] sm:$0xff]  ;;  %v6588_v52 = vld [vmem:[#allocation2 + $0x110] sm:$0xff]  ;;  %v13456_v24 = vld [vmem:[#allocation358_spill] sm:$0xff] }
 0x882   :  { %v11544_v39 = vpop.permute.xlu0 %4681  ;;  %5291 = vrot.lane.b32.xlu1 %v5088_v35, %s6636_s9  ;;  %v5469_v19 = vmax.f32 %v5405_v4, 0.0  ;;  %v5089_v57 = vsel %vm2256_vm3, %v13424_v8, %v5056_v9  ;;  %v13430_v35 = vld [vmem:[#allocation38_spill] sm:$0xff]  ;;  %v12789_v4 = vrot.slane %v13432_v33, 7  ;;  %v13434_v8 = vld [vmem:[#allocation39_spill] sm:$0xff] }
 0x883   :  { %v5528_v62 = vpack.c.bf16 %v5472_v15, %v5471_v28  ;;  %v4189_v2 = vsel %vm1167_vm2, %v4163_v49, %v4164_v40  ;;  %v1506_v25 = vadd.f32 %v6585_v47, %v13430_v35  ;;  %v6586_v28 = vld [vmem:[#allocation2 + $0x100] sm:$0xff]  ;;  %v13438_v35 = vld [vmem:[#allocation118_spill] sm:$0xff] }
 0x884   :  { %v11548_v0 = vpop.permute.xlu1 %4751  ;;  %4781 = vrot.lane.b32.xlu0 %v11253_v43, %s6636_s9  ;;  %v11564_v43 = vld [vmem:[#allocation2 + $0x328] sm:$0xff]  ;;  %v5527_v60 = vpack.c.bf16 %v5470_v32, %v5469_v19  ;;  %v6587_v19 = vld [vmem:[#allocation2 + $0x130] sm:$0xff] }
 0x885   :  { %v12790_v50 = vrot.slane %v11564_v43, 1  ;;  %v13435_v32 = vld [vmem:[#allocation116_spill] sm:$0xff] }
 0x886   :  { %v11554_v20 = vpop.permute.xlu0 %4745  ;;  %5293 = vrot.lane.b32.xlu1 %v5087_v30, %s6636_s9  ;;  %v13433_v30 = vld [vmem:[#allocation34_spill] sm:$0xff] }
 0x887   :  { %v5086_v55 = vsel %vm2256_vm3, %v5058_v27, %v12790_v50  ;;  %v1504_v15 = vadd.f32 %v6586_v28, %v13433_v30  ;;  %v1505_v27 = vadd.f32 %v6588_v52, %v13436_v31  ;;  %v13439_v30 = vld [vmem:[#allocation171_spill] sm:$0xff]  ;;  %v13442_v50 = vld [vmem:[#allocation168_spill] sm:$0xff]  ;;  %v13443_v52 = vld [vmem:[#allocation173_spill] sm:$0xff] }
 0x888   :  { %v11561_v58 = vpop.permute.xlu1 %5259  ;;  %5289 = vrot.lane.b32.xlu0 %v5089_v57, %s6636_s9  ;;  %v1507_v57 = vadd.f32 %v6587_v19, %v13434_v8 }
 0x889   :  { %13425 = vst [vmem:[#allocation140_spill] sm:$0xff] %v11561_v58 }
 0x88a   :  { %v11567_v29 = vpop.permute.xlu0 %4749  ;;  %5601 = vrot.lane.b32.xlu1 %v5528_v62, %s6636_s9  ;;  %v1954_v62 = vadd.f32 %v13435_v32, %v1506_v25  ;;  %v1955_v28 = vadd.f32 %v13438_v35, %v1507_v57  ;;  %v13440_v25 = vrot.slane %v13395_v5, 7  ;;  %v13441_v32 = vld [vmem:[#allocation112_spill] sm:$0xff]  ;;  %v13447_v5 = vld [vmem:[#allocation166_spill] sm:$0xff] }
 0x88c   :  { %v11572_v9 = vpop.permute.xlu1 %5263  ;;  %5599 = vrot.lane.b32.xlu0 %v5527_v60, %s6636_s9  ;;  %v4187_v60 = vsel %vm1167_vm2, %v4165_v41, %v12789_v4  ;;  %v2595_v19 = vadd.f32 %v13439_v30, %v1954_v62  ;;  %v1953_v4 = vadd.f32 %v13441_v32, %v1505_v27  ;;  %v2596_v31 = vadd.f32 %v13443_v52, %v1955_v28  ;;  %v13445_v62 = vld [vmem:[#allocation170_spill] sm:$0xff]  ;;  %v4997_v27 = vld [vmem:[#allocation2 + $0x348] sm:$0xff]  ;;  %v13451_v32 = vld [vmem:[#allocation277_spill] sm:$0xff] }
 0x88d   :  { %13428 = vst [vmem:[#allocation105_spill] sm:$0xff] %v11572_v9  ;;  %v13448_v9 = vld [vmem:[#allocation279_spill] sm:$0xff]  ;;  %v13449_v28 = vld [vmem:[#allocation236_spill] sm:$0xff] }
 0x88e   :  { %v11579_v11 = vpop.permute.xlu0 %5257  ;;  %4403 = vrot.lane.b32.xlu1 %v4189_v2, %s6636_s9  ;;  %v13437_v2 = vld [vmem:[#allocation107_spill] sm:$0xff]  ;;  %v2594_v35 = vadd.f32 %v13445_v62, %v1953_v4 }
 0x88f   :  { %13431 = vst [vmem:[#allocation23_spill] sm:$0xff] %v11579_v11  ;;  %v1952_v47 = vadd.f32 %v13437_v2, %v1504_v15  ;;  %v13444_v15 = vld [vmem:[#allocation251_spill] sm:$0xff] }
 0x890   :  { %v11590_v37 = vpop.permute.xlu1 %4687  ;;  %5295 = vrot.lane.b32.xlu0 %v5086_v55, %s6636_s9  ;;  %v4190_v55 = vsel %vm1167_vm2, %v13440_v25, %v4163_v49  ;;  %v3235_v2 = vadd.f32 %v13444_v15, %v2595_v19  ;;  %v3234_v19 = vadd.f32 %v13449_v28, %v2594_v35 }
 0x891   :  { %v2593_v58 = vadd.f32 %v13442_v50, %v1952_v47  ;;  %v4996_v50 = vld [vmem:[#allocation2 + $0x338] sm:$0xff]  ;;  %v4188_v47 = vsel %vm1167_vm2, %v4164_v40, %v4165_v41 }
 0x892   :  { %v11601_v8 = vpop.permute.xlu0 %5261  ;;  %4407 = vrot.lane.b32.xlu1 %v4187_v60, %s6636_s9  ;;  %v13446_v60 = vld [vmem:[#allocation237_spill] sm:$0xff]  ;;  %v3875_v49 = vadd.f32 %v13448_v9, %v3235_v2  ;;  %v5060_v9 = vrot.slane %v4996_v50, 1  ;;  %v5061_v2 = vrot.slane %v4997_v27, 1 }
 0x893   :  { %v3236_v30 = vadd.f32 %v13446_v60, %v2596_v31  ;;  %v3233_v11 = vadd.f32 %v13447_v5, %v2593_v58  ;;  %v13452_v31 = vld [vmem:[#allocation360_spill] sm:$0xff]  ;;  %v13455_v60 = vld [vmem:[#allocation357_spill] sm:$0xff] }
 0x894   :  { %v11612_v57 = vpop.permute.xlu1 %4563  ;;  %4401 = vrot.lane.b32.xlu0 %v4190_v55, %s6636_s9  ;;  %v13450_v55 = vld [vmem:[#allocation276_spill] sm:$0xff]  ;;  %v4515_v58 = vadd.f32 %v13452_v31, %v3875_v49 }
 0x895   :  { %v3876_v4 = vadd.f32 %v13450_v55, %v3236_v30  ;;  %v3873_v52 = vadd.f32 %v13451_v32, %v3233_v11  ;;  %v4998_v11 = vld [vmem:[#allocation2 + $0x358] sm:$0xff]  ;;  %v13457_v30 = vld [vmem:[#allocation355_spill] sm:$0xff] }
 0x896   :  { %v11619_v25 = vpop.permute.xlu0 %4685  ;;  %4787 = vrot.lane.b32.xlu1 %v11317_v18, %s6636_s9  ;;  %v13454_v18 = vld [vmem:[#allocation274_spill] sm:$0xff]  ;;  %v4899_v41 = vadd.f32 %v11294_v17, %v4515_v58  ;;  %v5084_v17 = vsel %vm2256_vm3, %v5060_v9, %v5061_v2 }
 0x897   :  { %v3874_v62 = vadd.f32 %v13454_v18, %v3234_v19  ;;  %v4516_v5 = vadd.f32 %v13455_v60, %v3876_v4  ;;  %v4513_v40 = vadd.f32 %v13456_v24, %v3873_v52  ;;  %v5062_v24 = vrot.slane %v4998_v11, 1 }
 0x898   :  { %v11629_v15 = vpop.permute.xlu1 %4755  ;;  %4405 = vrot.lane.b32.xlu0 %v4188_v47, %s6636_s9  ;;  %v5411_v27 = vadd.f32 %v11327_v61, %v4899_v41  ;;  %v13464_v41 = vld [vmem:[#allocation342_spill] sm:$0xff] }
 0x899   :  { %13453 = vst [vmem:[#allocation114_spill] sm:$0xff] %v11629_v15  ;;  %v4514_v49 = vadd.f32 %v13457_v30, %v3874_v62  ;;  %v4900_v47 = vadd.f32 %v11263_v3, %v4516_v5  ;;  %v4897_v50 = vadd.f32 %v11275_v22, %v4513_v40  ;;  %v13463_v5 = vld [vmem:[#allocation337_spill] sm:$0xff]  ;;  %v4169_v11 = vrot.slane %v13464_v41, 7 }
 0x89a   :  { %v11636_v35 = vpop.permute.xlu0 %4561  ;;  %4791 = vrot.lane.b32.xlu1 %v11330_v16, %s6636_s9  ;;  %v5475_v61 = vmax.f32 %v5411_v27, 0.0 }
 0x89b   :  { %v4898_v16 = vadd.f32 %v11245_v21, %v4514_v49  ;;  %v5412_v19 = vadd.f32 %v11302_v48, %v4900_v47  ;;  %v5409_v55 = vadd.f32 %v11311_v63, %v4897_v50  ;;  %v13460_v63 = vrot.slane %v11564_v43, 1  ;;  %v6589_v49 = vld [vmem:[#allocation2 + $0x160] sm:$0xff]  ;;  %v13465_v47 = vld [vmem:[#allocation42_spill] sm:$0xff] }
 0x89c   :  { %v11644_v28 = vpop.permute.xlu1 %4759  ;;  %4785 = vrot.lane.b32.xlu0 %v11337_v34, %s6636_s9  ;;  %v5083_v34 = vsel %vm2256_vm3, %v5061_v2, %v5062_v24  ;;  %v13461_v2 = vld [vmem:[#allocation340_spill] sm:$0xff]  ;;  %v4168_v43 = vrot.slane %v13463_v5, 7  ;;  %v1510_v50 = vadd.f32 %v6589_v49, %v13465_v47  ;;  %v13474_v47 = vld [vmem:[#allocation177_spill] sm:$0xff] }
 0x89d   :  { %v5410_v22 = vadd.f32 %v11285_v54, %v4898_v16  ;;  %v5476_v21 = vmax.f32 %v5412_v19, 0.0  ;;  %v5473_v32 = vmax.f32 %v5409_v55, 0.0  ;;  %v5085_v54 = vsel %vm2256_vm3, %v13460_v63, %v5060_v9  ;;  %v6590_v55 = vld [vmem:[#allocation2 + $0x140] sm:$0xff]  ;;  %v13469_v63 = vld [vmem:[#allocation124_spill] sm:$0xff] }
 0x89e   :  { %v11653_v3 = vpop.permute.xlu0 %4753  ;;  %5299 = vrot.lane.b32.xlu1 %v5084_v17, %s6636_s9  ;;  %v4167_v18 = vrot.slane %v13461_v2, 7  ;;  %v13466_v17 = vld [vmem:[#allocation339_spill] sm:$0xff]  ;;  %v13471_v2 = vld [vmem:[#allocation41_spill] sm:$0xff]  ;;  %v13472_v5 = vld [vmem:[#allocation120_spill] sm:$0xff] }
 0x89f   :  { %13458 = vst [vmem:[#allocation224_spill] sm:$0xff] %v11653_v3  ;;  %v5474_v52 = vmax.f32 %v5410_v22, 0.0  ;;  %v5530_v31 = vpack.c.bf16 %v5476_v21, %v5475_v61  ;;  %v12791_v16 = vrot.slane %v13466_v17, 7  ;;  %v13467_v22 = vld [vmem:[#allocation40_spill] sm:$0xff]  ;;  %v13468_v21 = vld [vmem:[#allocation43_spill] sm:$0xff] }
 0x8a0   :  { %v11657_v4 = vpop.permute.xlu1 %5267  ;;  %4789 = vrot.lane.b32.xlu0 %v11350_v23, %s6636_s9  ;;  %v11673_v23 = vld [vmem:[#allocation2 + $0x368] sm:$0xff]  ;;  %v4185_v30 = vsel %vm1167_vm2, %v4167_v18, %v4168_v43  ;;  %v1508_v61 = vadd.f32 %v6590_v55, %v13467_v22  ;;  %v13476_v55 = vld [vmem:[#allocation123_spill] sm:$0xff] }
 0x8a1   :  { %13459 = vst [vmem:[#allocation263_spill] sm:$0xff] %v11657_v4  ;;  %v5529_v62 = vpack.c.bf16 %v5474_v52, %v5473_v32  ;;  %v12792_v40 = vrot.slane %v11673_v23, 1 }
 0x8a2   :  { %v11663_v48 = vpop.permute.xlu0 %4757  ;;  %5301 = vrot.lane.b32.xlu1 %v5083_v34, %s6636_s9  ;;  %v6591_v34 = vld [vmem:[#allocation2 + $0x170] sm:$0xff]  ;;  %v1956_v41 = vadd.f32 %v13472_v5, %v1508_v61  ;;  %v13479_v61 = vld [vmem:[#allocation175_spill] sm:$0xff] }
 0x8a3   :  { %v5082_v19 = vsel %vm2256_vm3, %v5062_v24, %v12792_v40  ;;  %v1511_v32 = vadd.f32 %v6591_v34, %v13468_v21  ;;  %v6592_v24 = vld [vmem:[#allocation2 + $0x150] sm:$0xff]  ;;  %v13477_v34 = vld [vmem:[#allocation174_spill] sm:$0xff] }
 0x8a4   :  { %v11670_v58 = vpop.permute.xlu1 %5269  ;;  %5297 = vrot.lane.b32.xlu0 %v5085_v54, %s6636_s9  ;;  %v1958_v54 = vadd.f32 %v13469_v63, %v1510_v50  ;;  %v2597_v21 = vadd.f32 %v13477_v34, %v1956_v41  ;;  %v13478_v63 = vld [vmem:[#allocation179_spill] sm:$0xff]  ;;  %v5001_v41 = vld [vmem:[#allocation2 + $0x388] sm:$0xff]  ;;  %v13487_v34 = vld [vmem:[#allocation281_spill] sm:$0xff] }
 0x8a5   :  { %v13492_v40 = vld [vmem:[#allocation362_spill] sm:$0xff] }
 0x8a6   :  { %v11676_v60 = vpop.permute.xlu0 %5265  ;;  %5605 = vrot.lane.b32.xlu1 %v5530_v31, %s6636_s9  ;;  %v4183_v31 = vsel %vm1167_vm2, %v4169_v11, %v12791_v16  ;;  %v2599_v50 = vadd.f32 %v13474_v47, %v1958_v54  ;;  %v13480_v54 = vld [vmem:[#allocation176_spill] sm:$0xff]  ;;  %v13483_v16 = vld [vmem:[#allocation283_spill] sm:$0xff] }
 0x8a7   :  { %13462 = vst [vmem:[#allocation115_spill] sm:$0xff] %v11676_v60  ;;  %v13561_v60 = vld [vmem:[#allocation106_spill] sm:$0xff] }
 0x8a8   :  { %v5590_v9 = vpop.permute.xlu1 %5589  ;;  %5603 = vrot.lane.b32.xlu0 %v5529_v62, %s6636_s9  ;;  %v1509_v62 = vadd.f32 %v6592_v24, %v13471_v2  ;;  %v3239_v2 = vadd.f32 %v13479_v61, %v2599_v50  ;;  %v13485_v50 = vld [vmem:[#allocation238_spill] sm:$0xff] }
 0x8aa   :  { %v5588_v27 = vpop.permute.xlu0 %5587  ;;  %4411 = vrot.lane.b32.xlu1 %v4185_v30, %s6636_s9  ;;  %v13473_v30 = vld [vmem:[#allocation125_spill] sm:$0xff]  ;;  %v1957_v22 = vadd.f32 %v13476_v55, %v1509_v62  ;;  %v5000_v62 = vld [vmem:[#allocation2 + $0x378] sm:$0xff]  ;;  %v13486_v55 = vld [vmem:[#allocation280_spill] sm:$0xff] }
 0x8ab   :  { %6342 = vmatprep.mubr.msk.bf16.mxu1 %vm909_vm1, %v5588_v27  ;;  %v1959_v49 = vadd.f32 %v13473_v30, %v1511_v32 }
 0x8ac   :  { %v11696_v52 = vpop.permute.xlu1 %4379  ;;  %6343 = vmatmul.mubr.msk.bf16.vlgmr.msra.gmra.mxu1 %vm909_vm1, %v5590_v9  ;;  %5303 = vrot.lane.b32.xlu0 %v5082_v19, %s6636_s9  ;;  %v13475_v9 = vrot.slane %v13432_v33, 7  ;;  %v2598_v5 = vadd.f32 %v13480_v54, %v1957_v22  ;;  %v13482_v33 = vld [vmem:[#allocation172_spill] sm:$0xff] }
 0x8ad   :  { %13470 = vst [vmem:[#allocation260_spill] sm:$0xff] %v11696_v52  ;;  %v2600_v24 = vadd.f32 %v13478_v63, %v1959_v49  ;;  %v3237_v47 = vadd.f32 %v13482_v33, %v2597_v21  ;;  %v4184_v49 = vsel %vm1167_vm2, %v4168_v43, %v4169_v11  ;;  %v13552_v52 = vld [vmem:[#allocation143_spill] sm:$0xff] }
 0x8ae   :  { %v11708_v27 = vpop.permute.xlu0 %5271  ;;  %4415 = vrot.lane.b32.xlu1 %v4183_v31, %s6636_s9  ;;  %v4186_v19 = vsel %vm1167_vm2, %v13475_v9, %v4167_v18  ;;  %v13481_v31 = vld [vmem:[#allocation239_spill] sm:$0xff]  ;;  %v3879_v18 = vadd.f32 %v13483_v16, %v3239_v2  ;;  %v5064_v16 = vrot.slane %v5000_v62, 1  ;;  %v5065_v2 = vrot.slane %v5001_v41, 1 }
 0x8af   :  { %v3240_v30 = vadd.f32 %v13481_v31, %v2600_v24  ;;  %v3877_v63 = vadd.f32 %v13487_v34, %v3237_v47  ;;  %v13488_v24 = vld [vmem:[#allocation364_spill] sm:$0xff]  ;;  %v13491_v31 = vld [vmem:[#allocation361_spill] sm:$0xff]  ;;  %v13493_v47 = vld [vmem:[#allocation359_spill] sm:$0xff] }
 0x8b0   :  { %v11719_v32 = vpop.permute.xlu1 %4383  ;;  %4409 = vrot.lane.b32.xlu0 %v4186_v19, %s6636_s9  ;;  %v3238_v19 = vadd.f32 %v13485_v50, %v2598_v5  ;;  %v4519_v21 = vadd.f32 %v13488_v24, %v3879_v18 }
 0x8b1   :  { %v3880_v22 = vadd.f32 %v13486_v55, %v3240_v30  ;;  %v4517_v43 = vadd.f32 %v13492_v40, %v3877_v63  ;;  %v5002_v30 = vld [vmem:[#allocation2 + $0x398] sm:$0xff] }
 0x8b2   :  { %v11726_v9 = vpop.permute.xlu0 %4377  ;;  %4795 = vrot.lane.b32.xlu1 %v11411_v46, %s6636_s9  ;;  %v13490_v46 = vld [vmem:[#allocation278_spill] sm:$0xff]  ;;  %v4903_v11 = vadd.f32 %v11384_v6, %v4519_v21  ;;  %v5080_v6 = vsel %vm2256_vm3, %v5064_v16, %v5065_v2  ;;  %v5066_v40 = vrot.slane %v5002_v30, 1 }
 0x8b3   :  { %13484 = vst [vmem:[#allocation261_spill] sm:$0xff] %v11726_v9  ;;  %v3878_v54 = vadd.f32 %v13490_v46, %v3238_v19  ;;  %v4520_v33 = vadd.f32 %v13491_v31, %v3880_v22  ;;  %v4901_v62 = vadd.f32 %v11362_v51, %v4517_v43 }
 0x8b4   :  { %v11736_v61 = vpop.permute.xlu1 %4763  ;;  %4413 = vrot.lane.b32.xlu0 %v4184_v49, %s6636_s9  ;;  %v5415_v41 = vadd.f32 %v11420_v38, %v4903_v11  ;;  %v13501_v11 = vld [vmem:[#allocation346_spill] sm:$0xff] }
 0x8b5   :  { %13489 = vst [vmem:[#allocation259_spill] sm:$0xff] %v11736_v61  ;;  %v4518_v18 = vadd.f32 %v13493_v47, %v3878_v54  ;;  %v4904_v49 = vadd.f32 %v11354_v12, %v4520_v33  ;;  %v5413_v55 = vadd.f32 %v11403_v53, %v4901_v62  ;;  %v13496_v53 = vrot.slane %v11673_v23, 1  ;;  %v13500_v33 = vld [vmem:[#allocation341_spill] sm:$0xff] }
 0x8b6   :  { %v11743_v5 = vpop.permute.xlu0 %4381  ;;  %4799 = vrot.lane.b32.xlu1 %v11426_v36, %s6636_s9  ;;  %v5479_v38 = vmax.f32 %v5415_v41, 0.0  ;;  %v4172_v23 = vrot.slane %v13500_v33, 7  ;;  %v4173_v30 = vrot.slane %v13501_v11, 7  ;;  %v5006_v33 = vld [vmem:[#allocation2 + $0x3d8] sm:$0xff] }
 0x8b7   :  { %v4902_v36 = vadd.f32 %v11343_v7, %v4518_v18  ;;  %v5416_v19 = vadd.f32 %v11394_v44, %v4904_v49  ;;  %v5477_v34 = vmax.f32 %v5413_v55, 0.0  ;;  %v6593_v18 = vld [vmem:[#allocation2 + $0x1a0] sm:$0xff] }
 0x8b8   :  { %v11751_v50 = vpop.permute.xlu1 %4767  ;;  %4793 = vrot.lane.b32.xlu0 %v11436_v42, %s6636_s9  ;;  %v5079_v42 = vsel %vm2256_vm3, %v5065_v2, %v5066_v40  ;;  %v13498_v2 = vld [vmem:[#allocation344_spill] sm:$0xff]  ;;  %v13502_v49 = vld [vmem:[#allocation47_spill] sm:$0xff] }
 0x8b9   :  { %v5414_v51 = vadd.f32 %v11372_v10, %v4902_v36  ;;  %v5480_v7 = vmax.f32 %v5416_v19, 0.0  ;;  %v5081_v10 = vsel %vm2256_vm3, %v13496_v53, %v5064_v16  ;;  %v4171_v46 = vrot.slane %v13498_v2, 7  ;;  %v4946_v36 = vld [vmem:[#allocation2 + $0x18] sm:$0xff]  ;;  %v13503_v19 = vld [vmem:[#allocation343_spill] sm:$0xff]  ;;  %v13505_v53 = vld [vmem:[#allocation48_spill] sm:$0xff] }
 0x8ba   :  { %v11760_v12 = vpop.permute.xlu0 %4761  ;;  %5307 = vrot.lane.b32.xlu1 %v5080_v6, %s6636_s9  ;;  %v1514_v62 = vadd.f32 %v6593_v18, %v13502_v49  ;;  %v11794_v6 = vld [vmem:[#allocation2 + $0x8] sm:$0xff]  ;;  %v12793_v55 = vrot.slane %v13503_v19, 7  ;;  %v5004_v2 = vld [vmem:[#allocation2 + $0x3b8] sm:$0xff]  ;;  %v6596_v18 = vld [vmem:[#allocation2 + $0x190] sm:$0xff] }
 0x8bb   :  { %13494 = vst [vmem:[#allocation9_spill] sm:$0xff] %v11760_v12  ;;  %v5478_v63 = vmax.f32 %v5414_v51, 0.0  ;;  %v5532_v24 = vpack.c.bf16 %v5480_v7, %v5479_v38  ;;  %v4181_v47 = vsel %vm1167_vm2, %v4171_v46, %v4172_v23  ;;  %v6594_v38 = vld [vmem:[#allocation2 + $0x180] sm:$0xff]  ;;  %v5009_v11 = vrot.slane %v11794_v6, 1  ;;  %v13508_v49 = vld [vmem:[#allocation46_spill] sm:$0xff] }
 0x8bc   :  { %v11764_v22 = vpop.permute.xlu1 %5275  ;;  %4797 = vrot.lane.b32.xlu0 %v11446_v26, %s6636_s9  ;;  %v11780_v26 = vld [vmem:[#allocation2 + $0x3a8] sm:$0xff] }
 0x8bd   :  { %13495 = vst [vmem:[#allocation5_spill] sm:$0xff] %v11764_v22  ;;  %v5531_v54 = vpack.c.bf16 %v5478_v63, %v5477_v34  ;;  %v5067_v43 = vrot.slane %v11780_v26, 1  ;;  %v6595_v34 = vld [vmem:[#allocation2 + $0x1b0] sm:$0xff]  ;;  %v13506_v63 = vld [vmem:[#allocation128_spill] sm:$0xff] }
 0x8be   :  { %v11770_v44 = vpop.permute.xlu0 %4765  ;;  %5309 = vrot.lane.b32.xlu1 %v5079_v42, %s6636_s9  ;;  %v13504_v42 = vld [vmem:[#allocation44_spill] sm:$0xff] }
 0x8bf   :  { %v5078_v51 = vsel %vm2256_vm3, %v5066_v40, %v5067_v43  ;;  %v1512_v7 = vadd.f32 %v6594_v38, %v13504_v42  ;;  %v4179_v40 = vsel %vm1167_vm2, %v4173_v30, %v12793_v55  ;;  %v13510_v42 = vld [vmem:[#allocation129_spill] sm:$0xff]  ;;  %v13513_v55 = vrot.slane %v13466_v17, 7 }
 0x8c0   :  { %v11777_v21 = vpop.permute.xlu1 %5277  ;;  %5305 = vrot.lane.b32.xlu0 %v5081_v10, %s6636_s9  ;;  %v1515_v10 = vadd.f32 %v6595_v34, %v13505_v53  ;;  %v13511_v34 = vld [vmem:[#allocation183_spill] sm:$0xff] }
 0x8c1   :  { %13497 = vst [vmem:[#allocation11_spill] sm:$0xff] %v11777_v21  ;;  %v4182_v6 = vsel %vm1167_vm2, %v13513_v55, %v4171_v46  ;;  %v13519_v55 = vld [vmem:[#allocation376_spill] sm:$0xff] }
 0x8c2   :  { %v11783_v31 = vpop.permute.xlu0 %5273  ;;  %5609 = vrot.lane.b32.xlu1 %v5532_v24, %s6636_s9  ;;  %v1962_v24 = vadd.f32 %v13506_v63, %v1514_v62  ;;  %v1513_v62 = vadd.f32 %v6596_v18, %v13508_v49  ;;  %v5007_v63 = vld [vmem:[#allocation2 + $0x3e8] sm:$0xff]  ;;  %v5070_v18 = vrot.slane %v5006_v33, 1  ;;  %v13514_v49 = vld [vmem:[#allocation127_spill] sm:$0xff]  ;;  %v13522_v33 = vld [vmem:[#allocation182_spill] sm:$0xff] }
 0x8c3   :  { %13499 = vst [vmem:[#allocation64_spill] sm:$0xff] %v11783_v31 }
 0x8c4   :  { %v5594_v16 = vpop.permute.xlu1 %5593  ;;  %5607 = vrot.lane.b32.xlu0 %v5531_v54, %s6636_s9  ;;  %v5005_v54 = vld [vmem:[#allocation2 + $0x3c8] sm:$0xff] }
 0x8c5   :  { %v5069_v22 = vrot.slane %v5005_v54, 1 }
 0x8c6   :  { %v5592_v41 = vpop.permute.xlu0 %5591  ;;  %4419 = vrot.lane.b32.xlu1 %v4181_v47, %s6636_s9  ;;  %v5010_v47 = vrot.slane %v4946_v36, 1  ;;  %v5068_v36 = vrot.slane %v5004_v2, 1  ;;  %v13520_v2 = vrot.slane %v13519_v55, 1  ;;  %v13529_v55 = vld [vmem:[#allocation285_spill] sm:$0xff] }
 0x8c7   :  { %6346 = vmatprep.mubr.msk.bf16.mxu1 %vm909_vm1, %v5592_v41  ;;  %v13509_v41 = vld [vmem:[#allocation126_spill] sm:$0xff] }
 0x8c8   :  { %v11803_v26 = vpop.permute.xlu1 %4387  ;;  %6347 = vmatmul.mubr.msk.bf16.gmra.mxu1 %vm909_vm1, %v5594_v16  ;;  %5311 = vrot.lane.b32.xlu0 %v5078_v51, %s6636_s9  ;;  %v1960_v38 = vadd.f32 %v13509_v41, %v1512_v7  ;;  %v1963_v16 = vadd.f32 %v13510_v42, %v1515_v10  ;;  %v2603_v51 = vadd.f32 %v13511_v34, %v1962_v24  ;;  %v13515_v41 = vld [vmem:[#allocation180_spill] sm:$0xff]  ;;  %v13516_v42 = vld [vmem:[#allocation185_spill] sm:$0xff] }
 0x8c9   :  { %13507 = vst [vmem:[#allocation7_spill] sm:$0xff] %v11803_v26  ;;  %v5008_v26 = vld [vmem:[#allocation2 + $0x3f8] sm:$0xff]  ;;  %v1961_v7 = vadd.f32 %v13514_v49, %v1513_v62  ;;  %v13517_v34 = vld [vmem:[#allocation181_spill] sm:$0xff]  ;;  %v11832_v46 = vsel %vm2256_vm3, %v5009_v11, %v5010_v47  ;;  %v11838_v54 = vsel %vm2256_vm3, %v5010_v47, %v13520_v2  ;;  %v5076_v47 = vsel %vm2256_vm3, %v5068_v36, %v5069_v22  ;;  %v13530_v2 = vld [vmem:[#allocation368_spill] sm:$0xff] }
 0x8ca   :  { %v11816_v53 = vpop.permute.xlu0 %5279  ;;  %4423 = vrot.lane.b32.xlu1 %v4179_v40, %s6636_s9  ;;  %v2601_v10 = vadd.f32 %v13515_v41, %v1960_v38  ;;  %v2604_v24 = vadd.f32 %v13516_v42, %v1963_v16  ;;  %v3243_v31 = vadd.f32 %v13517_v34, %v2603_v51  ;;  %v5071_v40 = vrot.slane %v5007_v63, 1  ;;  %13521 = vst [vmem:[#allocation153_spill] sm:$0xff] %v11838_v54  ;;  %v13523_v38 = vld [vmem:[#allocation241_spill] sm:$0xff]  ;;  %v13525_v41 = vld [vmem:[#allocation287_spill] sm:$0xff] }
 0x8cb   :  { %13512 = vst [vmem:[#allocation58_spill] sm:$0xff] %v11816_v53  ;;  %v5072_v17 = vrot.slane %v5008_v26, 1  ;;  %v2602_v62 = vadd.f32 %v13522_v33, %v1961_v7  ;;  %v13524_v51 = vld [vmem:[#allocation253_spill] sm:$0xff]  ;;  %v4180_v26 = vsel %vm1167_vm2, %v4172_v23, %v4173_v30  ;;  %v11854_v7 = vsel %vm2256_vm3, %v5069_v22, %v5070_v18  ;;  %v6597_v30 = vld [vmem:[#allocation2 + $0x1c0] sm:$0xff] }
 0x8cc   :  { %v11827_v61 = vpop.permute.xlu1 %4391  ;;  %4417 = vrot.lane.b32.xlu0 %v4182_v6, %s6636_s9  ;;  %v3244_v16 = vadd.f32 %v13523_v38, %v2604_v24  ;;  %v3241_v49 = vadd.f32 %v13524_v51, %v2601_v10  ;;  %v3883_v6 = vadd.f32 %v13525_v41, %v3243_v31  ;;  %v11858_v10 = vsel %vm2256_vm3, %v5067_v43, %v5068_v36  ;;  %v13527_v31 = vld [vmem:[#allocation240_spill] sm:$0xff]  ;;  %v13532_v38 = vld [vmem:[#allocation49_spill] sm:$0xff]  ;;  %v13572_v53 = vld [vmem:[#allocation135_spill] sm:$0xff] }
 0x8cd   :  { %13518 = vst [vmem:[#allocation67_spill] sm:$0xff] %v11827_v61  ;;  %v3242_v42 = vadd.f32 %v13527_v31, %v2602_v62  ;;  %v13528_v24 = vld [vmem:[#allocation284_spill] sm:$0xff]  ;;  %v11868_v22 = vadd.f32 %v6597_v30, %v13532_v38  ;;  %v11872_v43 = vsel %vm2256_vm3, %v5070_v18, %v5071_v40  ;;  %v11876_v36 = vsel %vm2256_vm3, %v5072_v17, %v5009_v11  ;;  %v6598_v18 = vld [vmem:[#allocation2 + $0x1d0] sm:$0xff]  ;;  %v13538_v11 = vld [vmem:[#allocation50_spill] sm:$0xff] }
 0x8ce   :  { %v11844_v63 = vpop.permute.xlu0 %4385  ;;  %4803 = vrot.lane.b32.xlu1 %v11503_v45, %s6636_s9  ;;  %v3884_v34 = vadd.f32 %v13528_v24, %v3244_v16  ;;  %v3881_v45 = vadd.f32 %v13529_v55, %v3241_v49  ;;  %v4523_v33 = vadd.f32 %v13530_v2, %v3883_v6  ;;  %v11880_v62 = vsel %vm2256_vm3, %v5071_v40, %v5072_v17  ;;  %v13534_v16 = vld [vmem:[#allocation282_spill] sm:$0xff]  ;;  %v13535_v49 = vld [vmem:[#allocation365_spill] sm:$0xff]  ;;  %v6599_v2 = vld [vmem:[#allocation2 + $0x1e0] sm:$0xff] }
 0x8cf   :  { %13526 = vst [vmem:[#allocation61_spill] sm:$0xff] %v11844_v63  ;;  %13533 = vst [vmem:[#allocation155_spill] sm:$0xff] %v11880_v62  ;;  %v3882_v51 = vadd.f32 %v13534_v16, %v3242_v42  ;;  %v13536_v6 = vld [vmem:[#allocation366_spill] sm:$0xff]  ;;  %v1517_v55 = vadd.f32 %v6598_v18, %v13538_v11  ;;  %v13539_v30 = vld [vmem:[#allocation51_spill] sm:$0xff] }
 0x8d0   :  { %v11864_v23 = vpop.permute.xlu1 %4771  ;;  %4421 = vrot.lane.b32.xlu0 %v4180_v26, %s6636_s9  ;;  %v4524_v41 = vadd.f32 %v13535_v49, %v3884_v34  ;;  %v4521_v26 = vadd.f32 %v13536_v6, %v3881_v45  ;;  %v4907_v31 = vadd.f32 %v11471_v13, %v4523_v33  ;;  %v1518_v40 = vadd.f32 %v6599_v2, %v13539_v30  ;;  %v6600_v17 = vld [vmem:[#allocation2 + $0x1f0] sm:$0xff]  ;;  %v13540_v38 = vld [vmem:[#allocation54_spill] sm:$0xff]  ;;  %v6601_v16 = vld [vmem:[#allocation2 + $0x200] sm:$0xff] }
 0x8d1   :  { %13531 = vst [vmem:[#allocation147_spill] sm:$0xff] %v11864_v23  ;;  %v1519_v42 = vadd.f32 %v6600_v17, %v13540_v38  ;;  %v13541_v34 = vld [vmem:[#allocation57_spill] sm:$0xff]  ;;  %v13542_v45 = vld [vmem:[#allocation363_spill] sm:$0xff]  ;;  %v13546_v11 = vld [vmem:[#allocation60_spill] sm:$0xff] }
 0x8d2   :  { %v11886_v24 = vpop.permute.xlu0 %4389  ;;  %4807 = vrot.lane.b32.xlu1 %v11520_v56, %s6636_s9  ;;  %v1520_v49 = vadd.f32 %v6601_v16, %v13541_v34  ;;  %v4522_v6 = vadd.f32 %v13542_v45, %v3882_v51  ;;  %v13543_v13 = vld [vmem:[#allocation35_spill] sm:$0xff]  ;;  %v5419_v56 = vadd.f32 %v11512_v1, %v4907_v31  ;;  %v6602_v18 = vld [vmem:[#allocation2 + $0x210] sm:$0xff]  ;;  %v13548_v34 = vld [vmem:[#allocation66_spill] sm:$0xff] }
 0x8d3   :  { %13537 = vst [vmem:[#allocation109_spill] sm:$0xff] %v11886_v24  ;;  %v4908_v33 = vadd.f32 %v13543_v13, %v4524_v41  ;;  %v13544_v23 = vld [vmem:[#allocation55_spill] sm:$0xff]  ;;  %v1521_v2 = vadd.f32 %v6602_v18, %v13546_v11  ;;  %v6604_v16 = vld [vmem:[#allocation2 + $0x230] sm:$0xff]  ;;  %v13551_v31 = vld [vmem:[#allocation52_spill] sm:$0xff] }
 0x8d4   :  { %v4905_v54 = vadd.f32 %v13544_v23, %v4521_v26  ;;  %v11898_v63 = vpop.permute.xlu1 %4775  ;;  %4801 = vrot.lane.b32.xlu0 %v11529_v59, %s6636_s9  ;;  %v6603_v30 = vld [vmem:[#allocation2 + $0x220] sm:$0xff]  ;;  %v1523_v51 = vadd.f32 %v6604_v16, %v13548_v34  ;;  %v13549_v41 = vld [vmem:[#allocation69_spill] sm:$0xff]  ;;  %v13550_v26 = vld [vmem:[#allocation72_spill] sm:$0xff]  ;;  %v4906_v12 = vadd.f32 %v13551_v31, %v4522_v6  ;;  %v5483_v15 = vmax.f32 %v5419_v56, 0.0 }
 0x8d5   :  { %13545 = vst [vmem:[#allocation148_spill] sm:$0xff] %v11898_v63  ;;  %v13547_v17 = vld [vmem:[#allocation63_spill] sm:$0xff]  ;;  %v6606_v23 = vld [vmem:[#allocation2 + $0x250] sm:$0xff]  ;;  %v5420_v4 = vadd.f32 %v13552_v52, %v4908_v33  ;;  %v13556_v16 = vld [vmem:[#allocation78_spill] sm:$0xff] }
 0x8d6   :  { %v1522_v38 = vadd.f32 %v6603_v30, %v13547_v17  ;;  %v6605_v45 = vld [vmem:[#allocation2 + $0x240] sm:$0xff]  ;;  %v1525_v1 = vadd.f32 %v6606_v23, %v13550_v26  ;;  %v11910_v21 = vpop.permute.xlu0 %4769  ;;  %5315 = vrot.lane.b32.xlu1 %v5076_v47, %s6636_s9  ;;  %v6608_v17 = vld [vmem:[#allocation2 + $0x270] sm:$0xff]  ;;  %v13558_v26 = vld [vmem:[#allocation88_spill] sm:$0xff]  ;;  %v5418_v47 = vadd.f32 %v13561_v60, %v4906_v12 }
 0x8d7   :  { %v1524_v13 = vadd.f32 %v6605_v45, %v13549_v41  ;;  %v13553_v59 = vld [vmem:[#allocation111_spill] sm:$0xff]  ;;  %13554 = vst [vmem:[#allocation231_spill] sm:$0xff] %v11910_v21  ;;  %v1527_v34 = vadd.f32 %v6608_v17, %v13556_v16  ;;  %v6610_v23 = vld [vmem:[#allocation2 + $0x290] sm:$0xff]  ;;  %v13567_v60 = vld [vmem:[#allocation130_spill] sm:$0xff] }
 0x8d8   :  { %v5417_v63 = vadd.f32 %v13553_v59, %v4905_v54  ;;  %v6607_v18 = vld [vmem:[#allocation2 + $0x260] sm:$0xff]  ;;  %v1529_v6 = vadd.f32 %v6610_v23, %v13558_v26  ;;  %v13559_v52 = vld [vmem:[#allocation93_spill] sm:$0xff]  ;;  %v13560_v59 = vld [vmem:[#allocation98_spill] sm:$0xff]  ;;  %v11920_v62 = vpop.permute.xlu1 %5283  ;;  %4805 = vrot.lane.b32.xlu0 %v11544_v39, %s6636_s9  ;;  %v1964_v12 = vadd.f32 %v13567_v60, %v11868_v22 }
 0x8d9   :  { %v13555_v11 = vld [vmem:[#allocation75_spill] sm:$0xff]  ;;  %v6612_v54 = vld [vmem:[#allocation2 + $0x2b0] sm:$0xff]  ;;  %13562 = vst [vmem:[#allocation104_spill] sm:$0xff] %v11920_v62  ;;  %v5484_v62 = vmax.f32 %v5420_v4, 0.0 }
 0x8da   :  { %v1526_v30 = vadd.f32 %v6607_v18, %v13555_v11  ;;  %v6609_v45 = vld [vmem:[#allocation2 + $0x280] sm:$0xff]  ;;  %v1531_v21 = vadd.f32 %v6612_v54, %v13560_v59  ;;  %v6614_v16 = vld [vmem:[#allocation2 + $0x2d0] sm:$0xff]  ;;  %v5481_v61 = vmax.f32 %v5417_v63, 0.0  ;;  %v11931_v39 = vpop.permute.xlu0 %4773  ;;  %5317 = vrot.lane.b32.xlu1 %v11854_v7, %s6636_s9  ;;  %v13576_v7 = vld [vmem:[#allocation138_spill] sm:$0xff] }
 0x8db   :  { %v13557_v41 = vld [vmem:[#allocation83_spill] sm:$0xff]  ;;  %v13565_v26 = vld [vmem:[#allocation113_spill] sm:$0xff]  ;;  %v5534_v4 = vpack.c.bf16 %v5484_v62, %v5483_v15 }
 0x8dc   :  { %v1528_v9 = vadd.f32 %v6609_v45, %v13557_v41  ;;  %v6611_v31 = vld [vmem:[#allocation2 + $0x2a0] sm:$0xff]  ;;  %v13564_v45 = vld [vmem:[#allocation108_spill] sm:$0xff]  ;;  %v13566_v24 = vld [vmem:[#allocation117_spill] sm:$0xff]  ;;  %v11941_v63 = vpop.permute.xlu1 %5285  ;;  %5313 = vrot.lane.b32.xlu0 %v11858_v10, %s6636_s9 }
 0x8dd   :  { %v1530_v33 = vadd.f32 %v6611_v31, %v13559_v52  ;;  %v6613_v18 = vld [vmem:[#allocation2 + $0x2c0] sm:$0xff]  ;;  %v1533_v41 = vadd.f32 %v6614_v16, %v13564_v45  ;;  %v6616_v52 = vld [vmem:[#allocation2 + $0x2f0] sm:$0xff]  ;;  %13575 = vst [vmem:[#allocation267_spill] sm:$0xff] %v11941_v63  ;;  %v13584_v10 = vld [vmem:[#allocation150_spill] sm:$0xff] }
 0x8de   :  { %v13563_v11 = vld [vmem:[#allocation103_spill] sm:$0xff]  ;;  %v1535_v54 = vadd.f32 %v6616_v52, %v13566_v24  ;;  %v13570_v16 = vld [vmem:[#allocation133_spill] sm:$0xff]  ;;  %v1969_v24 = vadd.f32 %v13572_v53, %v1521_v2  ;;  %v13573_v52 = vld [vmem:[#allocation136_spill] sm:$0xff]  ;;  %v11952_v62 = vpop.permute.xlu0 %5281  ;;  %5613 = vrot.lane.b32.xlu1 %v5534_v4, %s6636_s9 }
 0x8df   :  { %v1532_v17 = vadd.f32 %v6613_v18, %v13563_v11  ;;  %v6615_v23 = vld [vmem:[#allocation2 + $0x2e0] sm:$0xff]  ;;  %v13569_v18 = vld [vmem:[#allocation132_spill] sm:$0xff]  ;;  %v1967_v45 = vadd.f32 %v13570_v16, %v1519_v42  ;;  %v1970_v3 = vadd.f32 %v13573_v52, %v1522_v38  ;;  %v13574_v22 = vld [vmem:[#allocation137_spill] sm:$0xff]  ;;  %13583 = vst [vmem:[#allocation230_spill] sm:$0xff] %v11952_v62 }
 0x8e0   :  { %v1534_v31 = vadd.f32 %v6615_v23, %v13565_v26  ;;  %v13568_v56 = vld [vmem:[#allocation131_spill] sm:$0xff]  ;;  %v1966_v11 = vadd.f32 %v13569_v18, %v1518_v40  ;;  %v13571_v23 = vld [vmem:[#allocation134_spill] sm:$0xff]  ;;  %v1971_v60 = vadd.f32 %v13574_v22, %v1523_v51  ;;  %v13577_v40 = vld [vmem:[#allocation141_spill] sm:$0xff]  ;;  %v1978_v22 = vadd.f32 %v13584_v10, %v1530_v33 }
 0x8e1   :  { %v1965_v59 = vadd.f32 %v13568_v56, %v1517_v55  ;;  %v1968_v26 = vadd.f32 %v13571_v23, %v1520_v49  ;;  %v5482_v55 = vmax.f32 %v5418_v47, 0.0  ;;  %v1972_v56 = vadd.f32 %v13576_v7, %v1524_v13  ;;  %v13578_v42 = vld [vmem:[#allocation142_spill] sm:$0xff]  ;;  %v13579_v49 = vld [vmem:[#allocation347_spill] sm:$0xff]  ;;  %v13580_v53 = vld [vmem:[#allocation145_spill] sm:$0xff] }
 0x8e2   :  { %v1973_v18 = vadd.f32 %v13577_v40, %v1525_v1  ;;  %v1974_v16 = vadd.f32 %v13578_v42, %v1526_v30  ;;  %v4175_v23 = vrot.slane %v13579_v49, 7  ;;  %v1975_v2 = vadd.f32 %v13580_v53, %v1527_v34  ;;  %v13581_v38 = vld [vmem:[#allocation146_spill] sm:$0xff]  ;;  %v13582_v51 = vld [vmem:[#allocation149_spill] sm:$0xff]  ;;  %v13585_v13 = vld [vmem:[#allocation151_spill] sm:$0xff] }
 0x8e3   :  { %v1976_v52 = vadd.f32 %v13581_v38, %v1528_v9  ;;  %v1977_v47 = vadd.f32 %v13582_v51, %v1529_v6  ;;  %v5533_v15 = vpack.c.bf16 %v5482_v55, %v5481_v61  ;;  %v1979_v7 = vadd.f32 %v13585_v13, %v1531_v21  ;;  %v13586_v1 = vld [vmem:[#allocation152_spill] sm:$0xff]  ;;  %v13587_v30 = vld [vmem:[#allocation345_spill] sm:$0xff]  ;;  %v13591_v6 = vld [vmem:[#allocation186_spill] sm:$0xff]  ;;  %v5598_v55 = vpop.permute.xlu1 %5597 }
 0x8e4   :  { %v1980_v40 = vadd.f32 %v13586_v1, %v1532_v17  ;;  %v4176_v42 = vrot.slane %v13587_v30, 7  ;;  %v13588_v49 = vld [vmem:[#allocation13_spill] sm:$0xff]  ;;  %v13589_v34 = vld [vmem:[#allocation20_spill] sm:$0xff]  ;;  %v2605_v61 = vadd.f32 %v13591_v6, %v1964_v12  ;;  %v13594_v21 = vld [vmem:[#allocation327_spill] sm:$0xff] }
 0x8e5   :  { %v1981_v63 = vadd.f32 %v13588_v49, %v1533_v41  ;;  %v1982_v53 = vadd.f32 %v13589_v34, %v1534_v31  ;;  %v13590_v9 = vld [vmem:[#allocation45_spill] sm:$0xff]  ;;  %5611 = vrot.lane.b32.xlu0 %v5533_v15, %s6636_s9  ;;  %v13592_v4 = vld [vmem:[#allocation188_spill] sm:$0xff]  ;;  %v4113_v13 = vrot.slane %v13594_v21, 7  ;;  %v13595_v1 = vld [vmem:[#allocation191_spill] sm:$0xff] }
 0x8e6   :  { %v1983_v38 = vadd.f32 %v13590_v9, %v1535_v54  ;;  %v2606_v51 = vadd.f32 %v13592_v4, %v1965_v59  ;;  %v13593_v33 = vld [vmem:[#allocation189_spill] sm:$0xff]  ;;  %v4177_v17 = vsel %vm1167_vm2, %v4175_v23, %v4176_v42  ;;  %v2608_v41 = vadd.f32 %v13595_v1, %v1967_v45  ;;  %v13596_v30 = vld [vmem:[#allocation192_spill] sm:$0xff]  ;;  %v13597_v49 = vld [vmem:[#allocation194_spill] sm:$0xff]  ;;  %v5596_v9 = vpop.permute.xlu0 %5595 }
 0x8e7   :  { %v2607_v10 = vadd.f32 %v13593_v33, %v1966_v11  ;;  %v2609_v31 = vadd.f32 %v13596_v30, %v1968_v26  ;;  %v2610_v54 = vadd.f32 %v13597_v49, %v1969_v24  ;;  %v13598_v34 = vld [vmem:[#allocation195_spill] sm:$0xff]  ;;  %4427 = vrot.lane.b32.xlu1 %v4177_v17, %s6636_s9  ;;  %v13599_v15 = vld [vmem:[#allocation197_spill] sm:$0xff]  ;;  %v13600_v6 = vld [vmem:[#allocation198_spill] sm:$0xff]  ;;  %6350 = vmatprep.mubr.msk.bf16.mxu1 %vm909_vm1, %v5596_v9 }
 0x8e8   :  { %v2611_v12 = vadd.f32 %v13598_v34, %v1970_v3  ;;  %v2612_v59 = vadd.f32 %v13599_v15, %v1971_v60  ;;  %v2613_v11 = vadd.f32 %v13600_v6, %v1972_v56  ;;  %v13601_v4 = vld [vmem:[#allocation200_spill] sm:$0xff]  ;;  %v13602_v21 = vld [vmem:[#allocation201_spill] sm:$0xff]  ;;  %v13603_v45 = vld [vmem:[#allocation203_spill] sm:$0xff]  ;;  %v11982_v3 = vpop.permute.xlu1 %4395  ;;  %6351 = vmatmul.mubr.msk.bf16.gmra.mxu1 %vm909_vm1, %v5598_v55 }
 0x8e9   :  { %v2614_v33 = vadd.f32 %v13601_v4, %v1973_v18  ;;  %v2615_v62 = vadd.f32 %v13602_v21, %v1974_v16  ;;  %v2616_v1 = vadd.f32 %v13603_v45, %v1975_v2  ;;  %v13604_v26 = vld [vmem:[#allocation204_spill] sm:$0xff]  ;;  %v13605_v24 = vld [vmem:[#allocation206_spill] sm:$0xff]  ;;  %5319 = vrot.lane.b32.xlu0 %v11872_v43, %s6636_s9  ;;  %v13606_v60 = vld [vmem:[#allocation207_spill] sm:$0xff] }
 0x8ea   :  { %v2617_v30 = vadd.f32 %v13604_v26, %v1976_v52  ;;  %v2618_v49 = vadd.f32 %v13605_v24, %v1977_v47  ;;  %v2619_v56 = vadd.f32 %v13606_v60, %v1978_v22  ;;  %v13607_v18 = vld [vmem:[#allocation209_spill] sm:$0xff]  ;;  %v13608_v16 = vld [vmem:[#allocation210_spill] sm:$0xff]  ;;  %v13611_v52 = vld [vmem:[#allocation212_spill] sm:$0xff]  ;;  %v11998_v43 = vpop.permute.xlu0 %5287 }
 0x8eb   :  { %v2620_v17 = vadd.f32 %v13607_v18, %v1979_v7  ;;  %v2621_v34 = vadd.f32 %v13608_v16, %v1980_v40  ;;  %v13609_v9 = vld [vmem:[#allocation325_spill] sm:$0xff]  ;;  %v2622_v47 = vadd.f32 %v13611_v52, %v1981_v63  ;;  %v13613_v21 = vld [vmem:[#allocation215_spill] sm:$0xff]  ;;  %v13614_v45 = vld [vmem:[#allocation242_spill] sm:$0xff]  ;;  %v13618_v16 = vrot.slane %v13503_v19, 7 }
 0x8ec   :  { %v13610_v15 = vrot.slane %v13609_v9, 7  ;;  %v13612_v6 = vld [vmem:[#allocation213_spill] sm:$0xff]  ;;  %v2624_v55 = vadd.f32 %v13613_v21, %v1983_v38  ;;  %v3246_v26 = vadd.f32 %v13614_v45, %v2606_v51  ;;  %v13615_v22 = vld [vmem:[#allocation243_spill] sm:$0xff]  ;;  %v13616_v40 = vld [vmem:[#allocation244_spill] sm:$0xff] }
 0x8ed   :  { %v2623_v4 = vadd.f32 %v13612_v6, %v1982_v53  ;;  %v3248_v7 = vadd.f32 %v13615_v22, %v2608_v41  ;;  %v3250_v24 = vadd.f32 %v13616_v40, %v2610_v54  ;;  %v13617_v60 = vld [vmem:[#allocation187_spill] sm:$0xff]  ;;  %v4178_v63 = vsel %vm1167_vm2, %v13618_v16, %v4175_v23  ;;  %v13619_v53 = vld [vmem:[#allocation245_spill] sm:$0xff]  ;;  %v13620_v38 = vld [vmem:[#allocation246_spill] sm:$0xff] }
 0x8ee   :  { %v4239_v2 = vsel %vm1167_vm2, %v4113_v13, %v13610_v15  ;;  %v3247_v18 = vadd.f32 %v13617_v60, %v2607_v10  ;;  %v3252_v9 = vadd.f32 %v13619_v53, %v2612_v59  ;;  %v3254_v15 = vadd.f32 %v13620_v38, %v2614_v33  ;;  %v13621_v51 = vld [vmem:[#allocation247_spill] sm:$0xff]  ;;  %v13622_v6 = vld [vmem:[#allocation100_spill] sm:$0xff]  ;;  %4425 = vrot.lane.b32.xlu0 %v4178_v63, %s6636_s9  ;;  %v13628_v33 = vld [vmem:[#allocation190_spill] sm:$0xff] }
 0x8ef   :  { %4431 = vrot.lane.b32.xlu1 %v4239_v2, %s6636_s9  ;;  %v3256_v52 = vadd.f32 %v13621_v51, %v2616_v1  ;;  %v3258_v21 = vadd.f32 %v13622_v6, %v2618_v49  ;;  %v12012_v2 = vpop.permute.xlu1 %4399  ;;  %v13623_v41 = vld [vmem:[#allocation220_spill] sm:$0xff]  ;;  %v13624_v10 = vld [vmem:[#allocation99_spill] sm:$0xff]  ;;  %v3249_v1 = vadd.f32 %v13628_v33, %v2609_v31  ;;  %v13629_v16 = vld [vmem:[#allocation193_spill] sm:$0xff]  ;;  %v12027_v51 = vpop.permute.xlu0 %4393 }
 0x8f0   :  { %v3260_v54 = vadd.f32 %v13623_v41, %v2620_v17  ;;  %v12017_v45 = vadd.f32 %v13624_v10, %v2622_v47  ;;  %v13625_v19 = vld [vmem:[#allocation184_spill] sm:$0xff]  ;;  %v13626_v23 = vld [vmem:[#allocation291_spill] sm:$0xff]  ;;  %v3251_v49 = vadd.f32 %v13629_v16, %v2611_v12  ;;  %v13632_v63 = vld [vmem:[#allocation289_spill] sm:$0xff] }
 0x8f1   :  { %v3245_v22 = vadd.f32 %v13625_v19, %v2605_v61  ;;  %v3887_v40 = vadd.f32 %v13626_v23, %v3247_v18  ;;  %v13627_v59 = vld [vmem:[#allocation228_spill] sm:$0xff]  ;;  %v13634_v41 = vld [vmem:[#allocation199_spill] sm:$0xff]  ;;  %v13635_v10 = vld [vmem:[#allocation202_spill] sm:$0xff] }
 0x8f2   :  { %v12022_v60 = vadd.f32 %v13627_v59, %v2624_v55  ;;  %v13630_v53 = vld [vmem:[#allocation196_spill] sm:$0xff]  ;;  %v4240_v55 = vsel %vm1167_vm2, %v4176_v42, %v4113_v13  ;;  %v3255_v31 = vadd.f32 %v13634_v41, %v2615_v62  ;;  %v3257_v12 = vadd.f32 %v13635_v10, %v2617_v30  ;;  %v13636_v19 = vld [vmem:[#allocation205_spill] sm:$0xff]  ;;  %v13640_v16 = vld [vmem:[#allocation370_spill] sm:$0xff] }
 0x8f3   :  { %v3253_v38 = vadd.f32 %v13630_v53, %v2613_v11  ;;  %4811 = vrot.lane.b32.xlu1 %v11590_v37, %s6636_s9  ;;  %v13631_v17 = vld [vmem:[#allocation288_spill] sm:$0xff]  ;;  %v3885_v61 = vadd.f32 %v13632_v63, %v3245_v22  ;;  %v3259_v11 = vadd.f32 %v13636_v19, %v2619_v56  ;;  %v12042_v33 = vpop.permute.xlu1 %4779  ;;  %4429 = vrot.lane.b32.xlu0 %v4240_v55, %s6636_s9  ;;  %v13638_v37 = vld [vmem:[#allocation286_spill] sm:$0xff]  ;;  %v13639_v22 = vld [vmem:[#allocation369_spill] sm:$0xff] }
 0x8f4   :  { %v3888_v47 = vadd.f32 %v13631_v17, %v3248_v7  ;;  %v13633_v6 = vld [vmem:[#allocation372_spill] sm:$0xff]  ;;  %v3886_v7 = vadd.f32 %v13638_v37, %v3246_v26  ;;  %v13641_v62 = vld [vmem:[#allocation211_spill] sm:$0xff]  ;;  %v13642_v30 = vld [vmem:[#allocation290_spill] sm:$0xff] }
 0x8f5   :  { %v4527_v18 = vadd.f32 %v13633_v6, %v3887_v40  ;;  %v13637_v23 = vld [vmem:[#allocation208_spill] sm:$0xff]  ;;  %v4525_v14 = vadd.f32 %v13640_v16, %v3885_v61  ;;  %v3263_v13 = vadd.f32 %v13641_v62, %v2623_v4  ;;  %v3890_v53 = vadd.f32 %v13642_v30, %v3250_v24  ;;  %v12053_v6 = vpop.permute.xlu0 %4397  ;;  %v13645_v26 = vld [vmem:[#allocation367_spill] sm:$0xff]  ;;  %v13646_v4 = vld [vmem:[#allocation293_spill] sm:$0xff] }
 0x8f6   :  { %v12040_v59 = vadd.f32 %v13637_v23, %v2621_v34  ;;  %v4528_v40 = vadd.f32 %v13639_v22, %v3888_v47  ;;  %v13643_v56 = vld [vmem:[#allocation292_spill] sm:$0xff]  ;;  %v13644_v34 = vld [vmem:[#allocation295_spill] sm:$0xff]  ;;  %v4526_v55 = vadd.f32 %v13645_v26, %v3886_v7  ;;  %v13647_v24 = vld [vmem:[#allocation294_spill] sm:$0xff] }
 0x8f7   :  { %v4911_v42 = vadd.f32 %v11567_v29, %v4527_v18  ;;  %v3892_v17 = vadd.f32 %v13643_v56, %v3252_v9  ;;  %v3891_v63 = vadd.f32 %v13644_v34, %v3251_v49  ;;  %4815 = vrot.lane.b32.xlu1 %v11612_v57, %s6636_s9  ;;  %v4909_v61 = vadd.f32 %v11554_v20, %v4525_v14  ;;  %v13648_v9 = vld [vmem:[#allocation373_spill] sm:$0xff]  ;;  %v13649_v49 = vld [vmem:[#allocation375_spill] sm:$0xff]  ;;  %v12065_v23 = vpop.permute.xlu1 %4783  ;;  %v13650_v57 = vld [vmem:[#allocation296_spill] sm:$0xff] }
 0x8f8   :  { %v4912_v47 = vadd.f32 %v11548_v0, %v4528_v40  ;;  %v3889_v18 = vadd.f32 %v13646_v4, %v3249_v1  ;;  %v3894_v41 = vadd.f32 %v13647_v24, %v3254_v15  ;;  %4809 = vrot.lane.b32.xlu0 %v11619_v25, %s6636_s9  ;;  %v3896_v37 = vadd.f32 %v13650_v57, %v3256_v52  ;;  %v13651_v0 = vld [vmem:[#allocation26_spill] sm:$0xff]  ;;  %v13652_v20 = vld [vmem:[#allocation105_spill] sm:$0xff]  ;;  %v13655_v15 = vld [vmem:[#allocation299_spill] sm:$0xff] }
 0x8f9   :  { %v5423_v29 = vadd.f32 %v11601_v8, %v4911_v42  ;;  %v4532_v10 = vadd.f32 %v13648_v9, %v3892_v17  ;;  %v4531_v19 = vadd.f32 %v13649_v49, %v3891_v63  ;;  %v4910_v7 = vadd.f32 %v13651_v0, %v4526_v55  ;;  %v13653_v8 = vld [vmem:[#allocation23_spill] sm:$0xff]  ;;  %v13654_v1 = vld [vmem:[#allocation297_spill] sm:$0xff]  ;;  %v12077_v30 = vpop.permute.xlu0 %4777  ;;  %v13656_v25 = vld [vmem:[#allocation298_spill] sm:$0xff] }
 0x8fa   :  { %v5424_v22 = vadd.f32 %v13652_v20, %v4912_v47  ;;  %v5421_v40 = vadd.f32 %v13653_v8, %v4909_v61  ;;  %v3893_v16 = vadd.f32 %v13654_v1, %v3253_v38  ;;  %v3895_v14 = vadd.f32 %v13655_v15, %v3255_v31  ;;  %v13657_v56 = vld [vmem:[#allocation300_spill] sm:$0xff]  ;;  %v13659_v38 = vld [vmem:[#allocation301_spill] sm:$0xff]  ;;  %v13661_v61 = vld [vmem:[#allocation374_spill] sm:$0xff] }
 0x8fb   :  { %v4916_v42 = vadd.f32 %v11644_v28, %v4532_v10  ;;  %v4915_v62 = vadd.f32 %v11663_v48, %v4531_v19  ;;  %5323 = vrot.lane.b32.xlu1 %v11876_v36, %s6636_s9  ;;  %v12082_v52 = vadd.f32 %v13656_v25, %v3258_v21  ;;  %v3900_v17 = vadd.f32 %v13657_v56, %v3260_v54  ;;  %v13658_v34 = vld [vmem:[#allocation140_spill] sm:$0xff]  ;;  %v12092_v36 = vpop.permute.xlu1 %5291  ;;  %v13660_v21 = vld [vmem:[#allocation303_spill] sm:$0xff]  ;;  %v13669_v8 = vld [vmem:[#allocation114_spill] sm:$0xff] }
 0x8fc   :  { %v5422_v63 = vadd.f32 %v13658_v34, %v4910_v7  ;;  %v5487_v26 = vmax.f32 %v5423_v29, 0.0  ;;  %v3897_v55 = vadd.f32 %v13659_v38, %v3257_v12  ;;  %v4536_v28 = vadd.f32 %v11719_v32, %v3896_v37  ;;  %4813 = vrot.lane.b32.xlu0 %v11636_v35, %s6636_s9  ;;  %v13662_v29 = vld [vmem:[#allocation308_spill] sm:$0xff]  ;;  %v13663_v35 = vld [vmem:[#allocation371_spill] sm:$0xff]  ;;  %v13665_v37 = vld [vmem:[#allocation58_spill] sm:$0xff] }
 0x8fd   :  { %v5428_v31 = vadd.f32 %v11708_v27, %v4916_v42  ;;  %v4535_v48 = vadd.f32 %v11743_v5, %v3895_v14  ;;  %v3899_v47 = vadd.f32 %v13660_v21, %v3259_v11  ;;  %v4529_v54 = vadd.f32 %v13661_v61, %v3889_v18  ;;  %v4782_v5 = vpop.permute.xlu0 %4781  ;;  %v13664_v19 = vld [vmem:[#allocation224_spill] sm:$0xff]  ;;  %v13671_v1 = vld [vmem:[#allocation261_spill] sm:$0xff]  ;;  %v13672_v42 = vld [vmem:[#allocation11_spill] sm:$0xff] }
 0x8fe   :  { %v5488_v4 = vmax.f32 %v5424_v22, 0.0  ;;  %v5485_v24 = vmax.f32 %v5421_v40, 0.0  ;;  %v3903_v9 = vadd.f32 %v13662_v29, %v3263_v13  ;;  %v5427_v12 = vadd.f32 %v11670_v58, %v4915_v62  ;;  %v13666_v13 = vld [vmem:[#allocation67_spill] sm:$0xff]  ;;  %v13667_v58 = vld [vmem:[#allocation109_spill] sm:$0xff]  ;;  %v13673_v25 = vld [vmem:[#allocation148_spill] sm:$0xff] }
 0x8ff   :  { %v4920_v27 = vadd.f32 %v11751_v50, %v4536_v28  ;;  %v4919_v32 = vadd.f32 %v11770_v44, %v4535_v48  ;;  %5325 = vrot.lane.b32.xlu1 %v11832_v46, %s6636_s9  ;;  %v4530_v10 = vadd.f32 %v13663_v35, %v3890_v53  ;;  %v5486_v49 = vmax.f32 %v5422_v63, 0.0  ;;  %v13668_v50 = vld [vmem:[#allocation155_spill] sm:$0xff]  ;;  %v5294_v44 = vpop.permute.xlu1 %5293  ;;  %v13675_v38 = vld [vmem:[#allocation260_spill] sm:$0xff]  ;;  %v13676_v28 = vld [vmem:[#allocation9_spill] sm:$0xff] }
 0x900   :  { %v5536_v11 = vpack.c.bf16 %v5488_v4, %v5487_v26  ;;  %v4913_v18 = vadd.f32 %v13664_v19, %v4529_v54  ;;  %v5492_v57 = vmax.f32 %v5428_v31, 0.0  ;;  %v4540_v7 = vadd.f32 %v13666_v13, %v3900_v17  ;;  %5321 = vrot.lane.b32.xlu0 %v13668_v50, %s6636_s9  ;;  %v13670_v40 = vld [vmem:[#allocation115_spill] sm:$0xff]  ;;  %v13680_v35 = vld [vmem:[#allocation302_spill] sm:$0xff]  ;;  %v13687_v50 = vld [vmem:[#allocation153_spill] sm:$0xff] }
 0x901   :  { %v5432_v0 = vadd.f32 %v13665_v37, %v4920_v27  ;;  %v4539_v20 = vadd.f32 %v13667_v58, %v3899_v47  ;;  %v5535_v22 = vpack.c.bf16 %v5486_v49, %v5485_v24  ;;  %v4914_v46 = vadd.f32 %v13669_v8, %v4530_v10  ;;  %v5290_v34 = vpop.permute.xlu0 %5289  ;;  %v13674_v63 = vld [vmem:[#allocation263_spill] sm:$0xff]  ;;  %v13679_v27 = vld [vmem:[#allocation64_spill] sm:$0xff]  ;;  %v13684_v37 = vld [vmem:[#allocation5_spill] sm:$0xff] }
 0x902   :  { %v5425_v53 = vadd.f32 %v13670_v40, %v4913_v18  ;;  %v4533_v15 = vadd.f32 %v13671_v1, %v3893_v16  ;;  %v5491_v14 = vmax.f32 %v5427_v12, 0.0  ;;  %v5431_v62 = vadd.f32 %v13672_v42, %v4919_v32  ;;  %v13677_v16 = vld [vmem:[#allocation304_spill] sm:$0xff]  ;;  %v13678_v29 = vld [vmem:[#allocation259_spill] sm:$0xff] }
 0x903   :  { %v4924_v56 = vadd.f32 %v13673_v25, %v4540_v7  ;;  %v4923_v17 = vadd.f32 %v11931_v39, %v4539_v20  ;;  %5617 = vrot.lane.b32.xlu1 %v5536_v11, %s6636_s9  ;;  %v5426_v26 = vadd.f32 %v13674_v63, %v4914_v46  ;;  %v4534_v31 = vadd.f32 %v13675_v38, %v3894_v41  ;;  %v5602_v39 = vpop.permute.xlu1 %5601  ;;  %v13688_v40 = vld [vmem:[#allocation147_spill] sm:$0xff] }
 0x904   :  { %v4917_v48 = vadd.f32 %v13676_v28, %v4533_v15  ;;  %v4543_v21 = vadd.f32 %v12053_v6, %v3903_v9  ;;  %v3904_v47 = vadd.f32 %v13677_v16, %v12022_v60  ;;  %v5538_v61 = vpack.c.bf16 %v5492_v57, %v5491_v14  ;;  %5615 = vrot.lane.b32.xlu0 %v5535_v22, %s6636_s9  ;;  %v13681_v9 = vld [vmem:[#allocation61_spill] sm:$0xff]  ;;  %v13682_v60 = vld [vmem:[#allocation267_spill] sm:$0xff]  ;;  %v13689_v15 = vld [vmem:[#allocation230_spill] sm:$0xff] }
 0x905   :  { %v5496_v54 = vmax.f32 %v5432_v0, 0.0  ;;  %v5436_v4 = vadd.f32 %v11998_v43, %v4924_v56  ;;  %v5489_v24 = vmax.f32 %v5425_v53, 0.0  ;;  %v4918_v12 = vadd.f32 %v13678_v29, %v4534_v31  ;;  %v5600_v19 = vpop.permute.xlu0 %5599  ;;  %v13683_v43 = vld [vmem:[#allocation305_spill] sm:$0xff]  ;;  %v13690_v56 = vld [vmem:[#allocation104_spill] sm:$0xff]  ;;  %v13692_v29 = vld [vmem:[#allocation119_spill] sm:$0xff] }
 0x906   :  { %v5429_v32 = vadd.f32 %v13679_v27, %v4917_v48  ;;  %v4927_v41 = vadd.f32 %v4782_v5, %v4543_v21  ;;  %v3902_v10 = vadd.f32 %v13680_v35, %v12017_v45  ;;  %v5495_v6 = vmax.f32 %v5431_v62, 0.0  ;;  %6354 = vmatprep.mubr.msk.bf16.mxu1 %vm909_vm1, %v5600_v19  ;;  %v13685_v45 = vld [vmem:[#allocation7_spill] sm:$0xff]  ;;  %v13693_v27 = vld [vmem:[#allocation144_spill] sm:$0xff] }
 0x907   :  { %v4537_v49 = vadd.f32 %v13681_v9, %v3897_v55  ;;  %v5435_v11 = vadd.f32 %v13682_v60, %v4923_v17  ;;  %5621 = vrot.lane.b32.xlu1 %v5538_v61, %s6636_s9  ;;  %v3901_v18 = vadd.f32 %v13683_v43, %v12040_v59  ;;  %v5490_v57 = vmax.f32 %v5426_v26, 0.0  ;;  %v13686_v55 = vld [vmem:[#allocation231_spill] sm:$0xff]  ;;  %6355 = vmatmul.mubr.msk.bf16.gmra.mxu1 %vm909_vm1, %v5602_v39  ;;  %v4404_v59 = vpop.permute.xlu1 %4403  ;;  %v13691_v61 = vld [vmem:[#allocation121_spill] sm:$0xff]  ;;  %v13696_v60 = vld [vmem:[#allocation218_spill] sm:$0xff] }
 0x908   :  { %v5430_v0 = vadd.f32 %v13684_v37, %v4918_v12  ;;  %v4544_v13 = vadd.f32 %v12012_v2, %v3904_v47  ;;  %v4538_v5 = vadd.f32 %v13685_v45, %v12082_v52  ;;  %v5540_v7 = vpack.c.bf16 %v5496_v54, %v5495_v6  ;;  %5327 = vrot.lane.b32.xlu0 %v13687_v50, %s6636_s9  ;;  %v6617_v47 = vld [vmem:[#allocation2 + $0x310] sm:$0xff]  ;;  %v6619_v35 = vld [vmem:[#allocation2 + $0x320] sm:$0xff]  ;;  %v13697_v43 = vld [vmem:[#allocation216_spill] sm:$0xff] }
 0x909   :  { %v4921_v58 = vadd.f32 %v13686_v55, %v4537_v49  ;;  %v5500_v20 = vmax.f32 %v5436_v4, 0.0  ;;  %v5537_v22 = vpack.c.bf16 %v5490_v57, %v5489_v24  ;;  %v5493_v8 = vmax.f32 %v5429_v32, 0.0  ;;  %v5296_v42 = vpop.permute.xlu0 %5295  ;;  %v6618_v24 = vld [vmem:[#allocation2 + $0x300] sm:$0xff]  ;;  %v13698_v57 = vld [vmem:[#allocation110_spill] sm:$0xff]  ;;  %v13699_v45 = vld [vmem:[#allocation53_spill] sm:$0xff] }
 0x90a   :  { %v4928_v46 = vadd.f32 %v12065_v23, %v4544_v13  ;;  %v5439_v2 = vadd.f32 %v5294_v44, %v4927_v41  ;;  %v4922_v53 = vadd.f32 %v13688_v40, %v4538_v5  ;;  %v5499_v1 = vmax.f32 %v5435_v11, 0.0  ;;  %v13695_v9 = vld [vmem:[#allocation139_spill] sm:$0xff] }
 0x90b   :  { %v5433_v52 = vadd.f32 %v13689_v15, %v4921_v58  ;;  %v4541_v14 = vadd.f32 %v12027_v51, %v3901_v18  ;;  %5625 = vrot.lane.b32.xlu1 %v5540_v7, %s6636_s9  ;;  %v5494_v62 = vmax.f32 %v5430_v0, 0.0  ;;  %v4542_v63 = vadd.f32 %v11982_v3, %v3902_v10  ;;  %v12151_v44 = vpop.permute.xlu1 %4407  ;;  %v13694_v10 = vld [vmem:[#allocation122_spill] sm:$0xff] }
 0x90c   :  { %v5440_v25 = vadd.f32 %v5296_v42, %v4928_v46  ;;  %v5434_v17 = vadd.f32 %v13690_v56, %v4922_v53  ;;  %v5542_v26 = vpack.c.bf16 %v5500_v20, %v5499_v1  ;;  %5619 = vrot.lane.b32.xlu0 %v5537_v22, %s6636_s9  ;;  %v5503_v38 = vmax.f32 %v5439_v2, 0.0  ;;  %v13700_v7 = vld [vmem:[#allocation214_spill] sm:$0xff]  ;;  %v6620_v22 = vld [vmem:[#allocation2 + $0x330] sm:$0xff]  ;;  %v13703_v2 = vld [vmem:[#allocation219_spill] sm:$0xff] }
 0x90d   :  { %v4925_v23 = vadd.f32 %v12077_v30, %v4541_v14  ;;  %v5539_v28 = vpack.c.bf16 %v5494_v62, %v5493_v8  ;;  %v5497_v51 = vmax.f32 %v5433_v52, 0.0  ;;  %v4926_v48 = vadd.f32 %v12042_v33, %v4542_v63  ;;  %v4402_v16 = vpop.permute.xlu0 %4401  ;;  %v13701_v58 = vld [vmem:[#allocation306_spill] sm:$0xff]  ;;  %v13702_v8 = vld [vmem:[#allocation4_spill] sm:$0xff]  ;;  %v13704_v53 = vld [vmem:[#allocation311_spill] sm:$0xff] }
 0x90e   :  { %v5504_v31 = vmax.f32 %v5440_v25, 0.0  ;;  %v1537_v3 = vadd.f32 %v6617_v47, %v13691_v61  ;;  %v5498_v4 = vmax.f32 %v5434_v17, 0.0  ;;  %v1536_v12 = vadd.f32 %v6618_v24, %v13692_v29  ;;  %v13705_v14 = vld [vmem:[#allocation56_spill] sm:$0xff]  ;;  %v13706_v62 = vld [vmem:[#allocation217_spill] sm:$0xff] }
 0x90f   :  { %v5437_v21 = vadd.f32 %v5290_v34, %v4925_v23  ;;  %5629 = vrot.lane.b32.xlu1 %v5542_v26, %s6636_s9  ;;  %v5438_v30 = vadd.f32 %v12092_v36, %v4926_v48  ;;  %v4788_v39 = vpop.permute.xlu1 %4787  ;;  %v1538_v6 = vadd.f32 %v6619_v35, %v13694_v10  ;;  %v1539_v46 = vadd.f32 %v6620_v22, %v13702_v8  ;;  %v13707_v26 = vld [vmem:[#allocation222_spill] sm:$0xff]  ;;  %v13717_v22 = vld [vmem:[#allocation223_spill] sm:$0xff] }
 0x910   :  { %v5544_v54 = vpack.c.bf16 %v5504_v31, %v5503_v38  ;;  %5623 = vrot.lane.b32.xlu0 %v5539_v28, %s6636_s9  ;;  %v1985_v32 = vadd.f32 %v13693_v27, %v1537_v3  ;;  %v5541_v33 = vpack.c.bf16 %v5498_v4, %v5497_v51  ;;  %v1984_v49 = vadd.f32 %v13695_v9, %v1536_v12  ;;  %v13708_v38 = vld [vmem:[#allocation314_spill] sm:$0xff] }
 0x911   :  { %v5501_v34 = vmax.f32 %v5437_v21, 0.0  ;;  %v4406_v41 = vpop.permute.xlu0 %4405  ;;  %v5502_v11 = vmax.f32 %v5438_v30, 0.0  ;;  %v1986_v5 = vadd.f32 %v13699_v45, %v1538_v6  ;;  %v1987_v42 = vadd.f32 %v13705_v14, %v1539_v46  ;;  %v13709_v21 = vld [vmem:[#allocation248_spill] sm:$0xff] }
 0x912   :  { %v2626_v36 = vadd.f32 %v13696_v60, %v1985_v32  ;;  %v2625_v18 = vadd.f32 %v13697_v43, %v1984_v49  ;;  %v6621_v49 = vld [vmem:[#allocation2 + $0x350] sm:$0xff]  ;;  %v13711_v60 = vld [vmem:[#allocation8_spill] sm:$0xff]  ;;  %v6622_v43 = vld [vmem:[#allocation2 + $0x340] sm:$0xff] }
 0x913   :  { %5633 = vrot.lane.b32.xlu1 %v5544_v54, %s6636_s9  ;;  %v4792_v19 = vpop.permute.xlu1 %4791  ;;  %v5543_v0 = vpack.c.bf16 %v5502_v11, %v5501_v34  ;;  %v2627_v40 = vadd.f32 %v13703_v2, %v1986_v5  ;;  %v2628_v23 = vadd.f32 %v13707_v26, %v1987_v42  ;;  %v13710_v54 = vld [vmem:[#allocation309_spill] sm:$0xff]  ;;  %v13715_v5 = vld [vmem:[#allocation226_spill] sm:$0xff]  ;;  %v13718_v46 = vld [vmem:[#allocation160_spill] sm:$0xff] }
 0x914   :  { %5627 = vrot.lane.b32.xlu0 %v5541_v33, %s6636_s9  ;;  %v3266_v37 = vadd.f32 %v13698_v57, %v2626_v36  ;;  %v3265_v55 = vadd.f32 %v13700_v7, %v2625_v18  ;;  %v1541_v36 = vadd.f32 %v6621_v49, %v13711_v60  ;;  %v13712_v18 = vld [vmem:[#allocation6_spill] sm:$0xff]  ;;  %v13721_v14 = vld [vmem:[#allocation312_spill] sm:$0xff] }
 0x915   :  { %v4786_v13 = vpop.permute.xlu0 %4785  ;;  %v3267_v25 = vadd.f32 %v13706_v62, %v2627_v40  ;;  %v3268_v47 = vadd.f32 %v13709_v21, %v2628_v23  ;;  %v1540_v57 = vadd.f32 %v6622_v43, %v13712_v18  ;;  %v13724_v23 = vld [vmem:[#allocation316_spill] sm:$0xff]  ;;  %v13726_v21 = vld [vmem:[#allocation225_spill] sm:$0xff] }
 0x916   :  { %v3906_v20 = vadd.f32 %v13701_v58, %v3266_v37  ;;  %v3905_v1 = vadd.f32 %v13704_v53, %v3265_v55  ;;  %v13713_v37 = vld [vmem:[#allocation62_spill] sm:$0xff]  ;;  %v6623_v58 = vld [vmem:[#allocation2 + $0x360] sm:$0xff]  ;;  %v13719_v53 = vld [vmem:[#allocation65_spill] sm:$0xff] }
 0x917   :  { %v5300_v50 = vpop.permute.xlu1 %5299  ;;  %v3907_v31 = vadd.f32 %v13708_v38, %v3267_v25  ;;  %v3908_v4 = vadd.f32 %v13710_v54, %v3268_v47  ;;  %v6624_v25 = vld [vmem:[#allocation2 + $0x370] sm:$0xff] }
 0x918   :  { %5631 = vrot.lane.b32.xlu0 %v5543_v0, %s6636_s9  ;;  %v4546_v15 = vadd.f32 %v4404_v59, %v3906_v20  ;;  %v4545_v56 = vadd.f32 %v4402_v16, %v3905_v1  ;;  %v1989_v0 = vadd.f32 %v13713_v37, %v1541_v36  ;;  %v13716_v20 = vld [vmem:[#allocation10_spill] sm:$0xff]  ;;  %v13727_v54 = vld [vmem:[#allocation81_spill] sm:$0xff] }
 0x919   :  { %v4790_v52 = vpop.permute.xlu0 %4789  ;;  %v4547_v61 = vadd.f32 %v4406_v41, %v3907_v31 }
 0x91a   :  { %v4930_v17 = vadd.f32 %v4788_v39, %v4546_v15  ;;  %v4929_v28 = vadd.f32 %v4786_v13, %v4545_v56  ;;  %v4548_v39 = vadd.f32 %v12151_v44, %v3908_v4  ;;  %v13714_v13 = vld [vmem:[#allocation59_spill] sm:$0xff]  ;;  %v2630_v7 = vadd.f32 %v13715_v5, %v1989_v0  ;;  %v13720_v15 = vld [vmem:[#allocation221_spill] sm:$0xff]  ;;  %v13722_v56 = vld [vmem:[#allocation12_spill] sm:$0xff] }
 0x91b   :  { %v5302_v63 = vpop.permute.xlu1 %5301  ;;  %v4931_v24 = vadd.f32 %v4790_v52, %v4547_v61  ;;  %v1988_v45 = vadd.f32 %v13714_v13, %v1540_v57  ;;  %v6625_v5 = vld [vmem:[#allocation2 + $0x390] sm:$0xff] }
 0x91c   :  { %v5442_v51 = vadd.f32 %v5300_v50, %v4930_v17  ;;  %v4932_v32 = vadd.f32 %v4792_v19, %v4548_v39  ;;  %v1542_v50 = vadd.f32 %v6623_v58, %v13716_v20  ;;  %v3270_v2 = vadd.f32 %v13718_v46, %v2630_v7  ;;  %v13731_v7 = vld [vmem:[#allocation17_spill] sm:$0xff]  ;;  %v13733_v46 = vld [vmem:[#allocation74_spill] sm:$0xff] }
 0x91d   :  { %v5298_v48 = vpop.permute.xlu0 %5297  ;;  %v5443_v33 = vadd.f32 %v5302_v63, %v4931_v24  ;;  %v2629_v8 = vadd.f32 %v13717_v22, %v1988_v45  ;;  %v1543_v17 = vadd.f32 %v6624_v25, %v13722_v56  ;;  %v13723_v63 = vld [vmem:[#allocation227_spill] sm:$0xff]  ;;  %v1545_v58 = vadd.f32 %v6625_v5, %v13731_v7  ;;  %v13737_v25 = vld [vmem:[#allocation229_spill] sm:$0xff] }
 0x91e   :  { %v5441_v3 = vadd.f32 %v5298_v48, %v4929_v28  ;;  %v5506_v30 = vmax.f32 %v5442_v51, 0.0  ;;  %v1990_v1 = vadd.f32 %v13719_v53, %v1542_v50  ;;  %v3910_v42 = vadd.f32 %v13721_v14, %v3270_v2  ;;  %v13725_v51 = vld [vmem:[#allocation68_spill] sm:$0xff]  ;;  %v6626_v50 = vld [vmem:[#allocation2 + $0x380] sm:$0xff] }
 0x91f   :  { %v5606_v59 = vpop.permute.xlu1 %5605  ;;  %v5507_v10 = vmax.f32 %v5443_v33, 0.0  ;;  %v3269_v52 = vadd.f32 %v13720_v15, %v2629_v8  ;;  %v1991_v48 = vadd.f32 %v13725_v51, %v1543_v17  ;;  %v13732_v22 = vld [vmem:[#allocation15_spill] sm:$0xff]  ;;  %v1993_v2 = vadd.f32 %v13733_v46, %v1545_v58  ;;  %v13738_v17 = vld [vmem:[#allocation169_spill] sm:$0xff] }
 0x920   :  { %v5505_v29 = vmax.f32 %v5441_v3, 0.0  ;;  %v2631_v26 = vadd.f32 %v13723_v63, %v1990_v1  ;;  %v1544_v8 = vadd.f32 %v6626_v50, %v13732_v22  ;;  %v13735_v1 = vld [vmem:[#allocation80_spill] sm:$0xff]  ;;  %v6627_v14 = vld [vmem:[#allocation2 + $0x3a0] sm:$0xff]  ;;  %v13741_v51 = vld [vmem:[#allocation317_spill] sm:$0xff] }
 0x921   :  { %v5604_v16 = vpop.permute.xlu0 %5603  ;;  %v3909_v38 = vadd.f32 %v13724_v23, %v3269_v52  ;;  %v2632_v4 = vadd.f32 %v13727_v54, %v1991_v48  ;;  %v2634_v15 = vadd.f32 %v13735_v1, %v1993_v2  ;;  %v13739_v23 = vld [vmem:[#allocation77_spill] sm:$0xff] }
 0x922   :  { %v5545_v12 = vpack.c.bf16 %v5506_v30, %v5505_v29  ;;  %6358 = vmatprep.mubr.msk.bf16.mxu1 %vm909_vm1, %v5604_v16  ;;  %v3271_v47 = vadd.f32 %v13726_v21, %v2631_v26  ;;  %v13728_v30 = vld [vmem:[#allocation318_spill] sm:$0xff]  ;;  %v6629_v1 = vld [vmem:[#allocation2 + $0x3d0] sm:$0xff] }
 0x923   :  { %6359 = vmatmul.mubr.msk.bf16.gmra.mxu1 %vm909_vm1, %v5606_v59  ;;  %v4412_v27 = vpop.permute.xlu1 %4411  ;;  %v3274_v63 = vadd.f32 %v13738_v17, %v2634_v15  ;;  %v13751_v15 = vld [vmem:[#allocation28_spill] sm:$0xff] }
 0x924   :  { %5635 = vrot.lane.b32.xlu0 %v5545_v12, %s6636_s9  ;;  %v4550_v31 = vadd.f32 %v4412_v27, %v3910_v42  ;;  %v3911_v24 = vadd.f32 %v13728_v30, %v3271_v47  ;;  %v13729_v12 = vld [vmem:[#allocation250_spill] sm:$0xff]  ;;  %v13736_v42 = vld [vmem:[#allocation19_spill] sm:$0xff]  ;;  %v6628_v47 = vld [vmem:[#allocation2 + $0x3b0] sm:$0xff] }
 0x925   :  { %v5304_v34 = vpop.permute.xlu0 %5303  ;;  %v3914_v48 = vadd.f32 %v13741_v51, %v3274_v63  ;;  %v13753_v17 = vld [vmem:[#allocation92_spill] sm:$0xff]  ;;  %v6631_v51 = vld [vmem:[#allocation2 + $0x3e0] sm:$0xff] }
 0x926   :  { %v5444_v41 = vadd.f32 %v5304_v34, %v4932_v32  ;;  %v3272_v32 = vadd.f32 %v13729_v12, %v2632_v4  ;;  %v13744_v4 = vld [vmem:[#allocation320_spill] sm:$0xff] }
 0x927   :  { %v4416_v35 = vpop.permute.xlu1 %4415  ;;  %v13746_v12 = vld [vmem:[#allocation256_spill] sm:$0xff] }
 0x928   :  { %v5508_v6 = vmax.f32 %v5444_v41, 0.0  ;;  %v13730_v41 = vld [vmem:[#allocation315_spill] sm:$0xff] }
 0x929   :  { %v4410_v9 = vpop.permute.xlu0 %4409 }
 0x92a   :  { %v5546_v44 = vpack.c.bf16 %v5508_v6, %v5507_v10  ;;  %v4549_v61 = vadd.f32 %v4410_v9, %v3909_v38  ;;  %v3912_v10 = vadd.f32 %v13730_v41, %v3272_v32  ;;  %v13747_v41 = vld [vmem:[#allocation84_spill] sm:$0xff] }
 0x92b   :  { %v4796_v11 = vpop.permute.xlu1 %4795 }
 0x92c   :  { %5637 = vrot.lane.b32.xlu1 %v5546_v44, %s6636_s9  ;;  %v4934_v3 = vadd.f32 %v4796_v11, %v4550_v31  ;;  %v4552_v36 = vadd.f32 %v4416_v35, %v3912_v10  ;;  %v13740_v31 = vld [vmem:[#allocation255_spill] sm:$0xff] }
 0x92d   :  { %v4414_v19 = vpop.permute.xlu0 %4413 }
 0x92e   :  { %v4551_v33 = vadd.f32 %v4414_v19, %v3911_v24 }
 0x92f   :  { %v4800_v55 = vpop.permute.xlu1 %4799 }
 0x930   :  { %v4936_v43 = vadd.f32 %v4800_v55, %v4552_v36 }
 0x931   :  { %v4794_v40 = vpop.permute.xlu0 %4793 }
 0x932   :  { %v4933_v29 = vadd.f32 %v4794_v40, %v4549_v61  ;;  %v13734_v40 = vld [vmem:[#allocation71_spill] sm:$0xff]  ;;  %v13742_v61 = vld [vmem:[#allocation22_spill] sm:$0xff] }
 0x933   :  { %v5308_v62 = vpop.permute.xlu1 %5307  ;;  %v1992_v53 = vadd.f32 %v13734_v40, %v1544_v8 }
 0x934   :  { %v5446_v16 = vadd.f32 %v5308_v62, %v4934_v3  ;;  %v1546_v62 = vadd.f32 %v6627_v14, %v13736_v42  ;;  %v1547_v3 = vadd.f32 %v6628_v47, %v13742_v61  ;;  %v1549_v14 = vadd.f32 %v6629_v1, %v13751_v15  ;;  %v13757_v47 = vld [vmem:[#allocation90_spill] sm:$0xff] }
 0x935   :  { %v4798_v28 = vpop.permute.xlu0 %4797  ;;  %v2633_v56 = vadd.f32 %v13737_v25, %v1992_v53  ;;  %v13752_v25 = vld [vmem:[#allocation25_spill] sm:$0xff] }
 0x936   :  { %v5510_v6 = vmax.f32 %v5446_v16, 0.0  ;;  %v4935_v49 = vadd.f32 %v4798_v28, %v4551_v33  ;;  %v1994_v38 = vadd.f32 %v13739_v23, %v1546_v62  ;;  %v13745_v16 = vld [vmem:[#allocation82_spill] sm:$0xff]  ;;  %v6630_v62 = vld [vmem:[#allocation2 + $0x3c0] sm:$0xff]  ;;  %v1997_v63 = vadd.f32 %v13753_v17, %v1549_v14 }
 0x937   :  { %v5310_v59 = vpop.permute.xlu1 %5309  ;;  %v3273_v28 = vadd.f32 %v13740_v31, %v2633_v56  ;;  %v1548_v56 = vadd.f32 %v6630_v62, %v13752_v25  ;;  %v6045_v25 = vld [vmem:[%s12722_s0 + $0x18] sm:$0xff] }
 0x938   :  { %v5447_v18 = vadd.f32 %v5310_v59, %v4935_v49  ;;  %v13743_v59 = vld [vmem:[#allocation85_spill] sm:$0xff] }
 0x939   :  { %v5306_v39 = vpop.permute.xlu0 %5305  ;;  %v2635_v54 = vadd.f32 %v13743_v59, %v1994_v38  ;;  %v3913_v30 = vadd.f32 %v13744_v4, %v3273_v28  ;;  %v13755_v38 = vld [vmem:[#allocation89_spill] sm:$0xff] }
 0x93a   :  { %v5445_v34 = vadd.f32 %v5306_v39, %v4933_v29  ;;  %v5511_v19 = vmax.f32 %v5447_v18, 0.0  ;;  %v1995_v39 = vadd.f32 %v13745_v16, %v1547_v3  ;;  %v2638_v31 = vadd.f32 %v13755_v38, %v1997_v63  ;;  %v13758_v3 = vld [vmem:[#allocation178_spill] sm:$0xff]  ;;  %v13759_v4 = vld [vmem:[#allocation97_spill] sm:$0xff] }
 0x93b   :  { %v5610_v27 = vpop.permute.xlu1 %5609  ;;  %v3275_v32 = vadd.f32 %v13746_v12, %v2635_v54  ;;  %v13761_v16 = vld [vmem:[#allocation321_spill] sm:$0xff] }
 0x93c   :  { %v5509_v60 = vmax.f32 %v5445_v34, 0.0  ;;  %v2636_v10 = vadd.f32 %v13747_v41, %v1995_v39  ;;  %v3278_v59 = vadd.f32 %v13758_v3, %v2638_v31  ;;  %v6632_v12 = vld [vmem:[#allocation2 + $0x3f0] sm:$0xff] }
 0x93d   :  { %v5608_v9 = vpop.permute.xlu0 %5607 }
 0x93e   :  { %v5547_v44 = vpack.c.bf16 %v5510_v6, %v5509_v60  ;;  %6362 = vmatprep.mubr.msk.bf16.mxu1 %vm909_vm1, %v5608_v9  ;;  %v13748_v6 = vld [vmem:[#allocation322_spill] sm:$0xff]  ;;  %v3918_v39 = vadd.f32 %v13761_v16, %v3278_v59 }
 0x93f   :  { %6363 = vmatmul.mubr.msk.bf16.gmra.mxu1 %vm909_vm1, %v5610_v27  ;;  %v4420_v11 = vpop.permute.xlu1 %4419  ;;  %v3915_v49 = vadd.f32 %v13748_v6, %v3275_v32  ;;  %v13762_v32 = vld [vmem:[#allocation32_spill] sm:$0xff] }
 0x940   :  { %5639 = vrot.lane.b32.xlu0 %v5547_v44, %s6636_s9  ;;  %v4554_v24 = vadd.f32 %v4420_v11, %v3914_v48  ;;  %v13749_v44 = vld [vmem:[#allocation252_spill] sm:$0xff]  ;;  %v13756_v48 = vld [vmem:[#allocation30_spill] sm:$0xff] }
 0x941   :  { %v5312_v57 = vpop.permute.xlu0 %5311 }
 0x942   :  { %v5448_v37 = vadd.f32 %v5312_v57, %v4936_v43  ;;  %v3276_v43 = vadd.f32 %v13749_v44, %v2636_v10  ;;  %v13764_v10 = vld [vmem:[#allocation324_spill] sm:$0xff]  ;;  %v13766_v44 = vld [vmem:[#allocation258_spill] sm:$0xff] }
 0x943   :  { %v4424_v0 = vpop.permute.xlu1 %4423 }
 0x944   :  { %v5512_v13 = vmax.f32 %v5448_v37, 0.0  ;;  %v13750_v37 = vld [vmem:[#allocation319_spill] sm:$0xff] }
 0x945   :  { %v4418_v45 = vpop.permute.xlu0 %4417 }
 0x946   :  { %v5548_v35 = vpack.c.bf16 %v5512_v13, %v5511_v19  ;;  %v4553_v33 = vadd.f32 %v4418_v45, %v3913_v30  ;;  %v3916_v19 = vadd.f32 %v13750_v37, %v3276_v43 }
 0x947   :  { %v4804_v20 = vpop.permute.xlu1 %4803 }
 0x948   :  { %5641 = vrot.lane.b32.xlu1 %v5548_v35, %s6636_s9  ;;  %v4938_v34 = vadd.f32 %v4804_v20, %v4554_v24  ;;  %v4556_v58 = vadd.f32 %v4424_v0, %v3916_v19  ;;  %v13760_v24 = vld [vmem:[#allocation257_spill] sm:$0xff]  ;;  %v13768_v19 = vld [vmem:[#allocation326_spill] sm:$0xff] }
 0x949   :  { %v4422_v55 = vpop.permute.xlu0 %4421 }
 0x94a   :  { %v4555_v18 = vadd.f32 %v4422_v55, %v3915_v49 }
 0x94b   :  { %v4808_v52 = vpop.permute.xlu1 %4807 }
 0x94c   :  { %v4940_v50 = vadd.f32 %v4808_v52, %v4556_v58  ;;  %v13769_v58 = vld [vmem:[#allocation254_spill] sm:$0xff] }
 0x94d   :  { %v4802_v26 = vpop.permute.xlu0 %4801 }
 0x94e   :  { %v4937_v60 = vadd.f32 %v4802_v26, %v4553_v33  ;;  %v13754_v26 = vld [vmem:[#allocation87_spill] sm:$0xff]  ;;  %v1551_v33 = vadd.f32 %v6632_v12, %v13762_v32 }
 0x94f   :  { %v5316_v21 = vpop.permute.xlu1 %5315  ;;  %v1996_v23 = vadd.f32 %v13754_v26, %v1548_v56  ;;  %v6046_v32 = vld [vmem:[%s12722_s0 + $0x20] sm:$0xff] }
 0x950   :  { %v5450_v9 = vadd.f32 %v5316_v21, %v4938_v34  ;;  %v1550_v21 = vadd.f32 %v6631_v51, %v13756_v48 }
 0x951   :  { %v4806_v29 = vpop.permute.xlu0 %4805  ;;  %v2637_v61 = vadd.f32 %v13757_v47, %v1996_v23  ;;  %v6043_v23 = vld [vmem:[%s12722_s0 + $0x8] sm:$0xff] }
 0x952   :  { %v5514_v13 = vmax.f32 %v5450_v9, 0.0  ;;  %v4939_v5 = vadd.f32 %v4806_v29, %v4555_v18  ;;  %v1998_v30 = vadd.f32 %v13759_v4, %v1550_v21 }
 0x953   :  { %v5318_v27 = vpop.permute.xlu1 %5317  ;;  %v3277_v29 = vadd.f32 %v13760_v24, %v2637_v61 }
 0x954   :  { %v5451_v22 = vadd.f32 %v5318_v27, %v4939_v5  ;;  %v13763_v27 = vld [vmem:[#allocation95_spill] sm:$0xff] }
 0x955   :  { %v5314_v36 = vpop.permute.xlu0 %5313  ;;  %v2639_v41 = vadd.f32 %v13763_v27, %v1998_v30  ;;  %v3917_v6 = vadd.f32 %v13764_v10, %v3277_v29  ;;  %v6048_v29 = vld [vmem:[%s12722_s0 + $0x30] sm:$0xff]  ;;  %v6049_v27 = vld [vmem:[%s12722_s0 + $0x38] sm:$0xff] }
 0x956   :  { %v5449_v57 = vadd.f32 %v5314_v36, %v4937_v60  ;;  %v5515_v55 = vmax.f32 %v5451_v22, 0.0  ;;  %v13765_v60 = vld [vmem:[#allocation102_spill] sm:$0xff] }
 0x957   :  { %v5614_v11 = vpop.permute.xlu1 %5613  ;;  %v1999_v9 = vadd.f32 %v13765_v60, %v1551_v33  ;;  %v3279_v43 = vadd.f32 %v13766_v44, %v2639_v41 }
 0x958   :  { %v5513_v7 = vmax.f32 %v5449_v57, 0.0 }
 0x959   :  { %v5612_v45 = vpop.permute.xlu0 %5611 }
 0x95a   :  { %v5549_v35 = vpack.c.bf16 %v5514_v13, %v5513_v7  ;;  %6366 = vmatprep.mubr.msk.bf16.mxu1 %vm909_vm1, %v5612_v45  ;;  %v3919_v13 = vadd.f32 %v13768_v19, %v3279_v43 }
 0x95b   :  { %6367 = vmatmul.mubr.msk.bf16.gmra.mxu1 %vm909_vm1, %v5614_v11  ;;  %v4428_v20 = vpop.permute.xlu1 %4427  ;;  %v13767_v11 = vld [vmem:[#allocation94_spill] sm:$0xff] }
 0x95c   :  { %5643 = vrot.lane.b32.xlu0 %v5549_v35, %s6636_s9  ;;  %v4558_v49 = vadd.f32 %v4428_v20, %v3918_v39  ;;  %v2640_v37 = vadd.f32 %v13767_v11, %v1999_v9  ;;  %v6044_v20 = vld [vmem:[%s12722_s0 + $0x10] sm:$0xff]  ;;  %v6050_v11 = vld [vmem:[%s12722_s0 + $0x40] sm:$0xff] }
 0x95d   :  { %v5320_v8 = vpop.permute.xlu0 %5319 }
 0x95e   :  { %v5452_v46 = vadd.f32 %v5320_v8, %v4940_v50  ;;  %v3280_v35 = vadd.f32 %v13769_v58, %v2640_v37 }
 0x960   :  { %v5516_v40 = vmax.f32 %v5452_v46, 0.0  ;;  %v13770_v46 = vld [vmem:[#allocation323_spill] sm:$0xff] }
 0x961   :  { %v4432_v2 = vpop.permute.xlu1 %4431  ;;  %v4426_v53 = vpop.permute.xlu0 %4425 }
 0x962   :  { %v5550_v0 = vpack.c.bf16 %v5516_v40, %v5515_v55  ;;  %v4557_v18 = vadd.f32 %v4426_v53, %v3917_v6  ;;  %v3920_v55 = vadd.f32 %v13770_v46, %v3280_v35  ;;  %v6042_v53 = vld [vmem:[%s12722_s0] sm:$0xff]  ;;  %v6047_v6 = vld [vmem:[%s12722_s0 + $0x28] sm:$0xff] }
 0x964   :  { %5645 = vrot.lane.b32.xlu1 %v5550_v0, %s6636_s9  ;;  %v4560_v56 = vadd.f32 %v4432_v2, %v3920_v55  ;;  %v6054_v55 = vld [vmem:[%s12722_s0 + $0x60] sm:$0xff] }
 0x965   :  { %v4812_v42 = vpop.permute.xlu1 %4811  ;;  %v4430_v52 = vpop.permute.xlu0 %4429 }
 0x966   :  { %v4942_v57 = vadd.f32 %v4812_v42, %v4558_v49  ;;  %v4559_v22 = vadd.f32 %v4430_v52, %v3919_v13  ;;  %v6053_v13 = vld [vmem:[%s12722_s0 + $0x58] sm:$0xff] }
 0x969   :  { %v4816_v28 = vpop.permute.xlu1 %4815 }
 0x96a   :  { %v4810_v54 = vpop.permute.xlu0 %4809  ;;  %v4944_v38 = vadd.f32 %v4816_v28, %v4560_v56 }
 0x96b   :  { %v4941_v5 = vadd.f32 %v4810_v54, %v4557_v18  ;;  %v6052_v18 = vld [vmem:[%s12722_s0 + $0x50] sm:$0xff] }
 0x96c   :  { %v6344_v40 = vpop.f32.mrf.mxu1 }
 0x96d   :  { %v5324_v34 = vpop.permute.xlu1 %5323  ;;  %v6108_v0 = vadd.f32 %v6344_v40, %v6044_v20 }
 0x96e   :  { %v4814_v36 = vpop.permute.xlu0 %4813  ;;  %v5454_v7 = vadd.f32 %v5324_v34, %v4942_v57  ;;  %v5787_v42 = vpop.f32.mrf.mxu1 }
 0x96f   :  { %v4943_v15 = vadd.f32 %v4814_v36, %v4559_v22  ;;  %6172 = vst.msk [vmem:[%s12725_s4 + $0x10] sm:$0xff] %vm202_vm0, %v6108_v0  ;;  %v6106_v52 = vadd.f32 %v6042_v53, %v5787_v42  ;;  %v6055_v0 = vld [vmem:[%s12722_s0 + $0x68] sm:$0xff] }
 0x970   :  { %v5518_v1 = vmax.f32 %v5454_v7, 0.0  ;;  %v6345_v26 = vpop.f32.mrf.mxu1 }
 0x971   :  { %v5326_v45 = vpop.permute.xlu1 %5325  ;;  %6170 = vst.msk [vmem:[%s12725_s4] sm:$0xff] %vm202_vm0, %v6106_v52  ;;  %v6109_v2 = vadd.f32 %v6345_v26, %v6045_v25  ;;  %v6058_v26 = vld [vmem:[%s12722_s0 + $0x80] sm:$0xff] }
 0x972   :  { %v5322_v50 = vpop.permute.xlu0 %5321  ;;  %v5455_v31 = vadd.f32 %v5326_v45, %v4943_v15  ;;  %v5790_v51 = vpop.f32.mrf.mxu1  ;;  %v6051_v45 = vld [vmem:[%s12722_s0 + $0x48] sm:$0xff] }
 0x973   :  { %v5453_v8 = vadd.f32 %v5322_v50, %v4941_v5  ;;  %6173 = vst.msk [vmem:[%s12725_s4 + $0x18] sm:$0xff] %vm202_vm0, %v6109_v2  ;;  %v6107_v21 = vadd.f32 %v6043_v23, %v5790_v51 }
 0x974   :  { %v5519_v61 = vmax.f32 %v5455_v31, 0.0  ;;  %v6061_v31 = vld [vmem:[%s12722_s0 + $0x98] sm:$0xff] }
 0x975   :  { %v5517_v14 = vmax.f32 %v5453_v8, 0.0  ;;  %v5618_v63 = vpop.permute.xlu1 %5617  ;;  %6171 = vst.msk [vmem:[%s12725_s4 + $0x8] sm:$0xff] %vm202_vm0, %v6107_v21  ;;  %v6056_v8 = vld [vmem:[%s12722_s0 + $0x70] sm:$0xff] }
 0x976   :  { %v5616_v62 = vpop.permute.xlu0 %5615 }
 0x977   :  { %v5551_v17 = vpack.c.bf16 %v5518_v1, %v5517_v14  ;;  %6370 = vmatprep.mubr.msk.bf16.mxu1 %vm909_vm1, %v5616_v62  ;;  %v6057_v1 = vld [vmem:[%s12722_s0 + $0x78] sm:$0xff] }
 0x978   :  { %6371 = vmatmul.mubr.msk.bf16.gmra.mxu1 %vm909_vm1, %v5618_v63  ;;  %v6060_v63 = vld [vmem:[%s12722_s0 + $0x90] sm:$0xff] }
 0x979   :  { %5647 = vrot.lane.b32.xlu0 %v5551_v17, %s6636_s9  ;;  %v5622_v59 = vpop.permute.xlu1 %5621 }
 0x97a   :  { %v5328_v48 = vpop.permute.xlu0 %5327 }
 0x97b   :  { %v5456_v47 = vadd.f32 %v5328_v48, %v4944_v38  ;;  %v6059_v48 = vld [vmem:[%s12722_s0 + $0x88] sm:$0xff] }
 0x97d   :  { %v5520_v28 = vmax.f32 %v5456_v47, 0.0  ;;  %v5626_v30 = vpop.permute.xlu1 %5625 }
 0x97e   :  { %v5620_v3 = vpop.permute.xlu0 %5619 }
 0x97f   :  { %v5552_v54 = vpack.c.bf16 %v5520_v28, %v5519_v61  ;;  %6374 = vmatprep.mubr.msk.bf16.mxu1 %vm909_vm1, %v5620_v3 }
 0x980   :  { %6375 = vmatmul.mubr.msk.bf16.gmra.mxu1 %vm909_vm1, %v5622_v59  ;;  %v6064_v59 = vld [vmem:[%s12722_s0 + $0xb0] sm:$0xff] }
 0x981   :  { %5649 = vrot.lane.b32.xlu1 %v5552_v54, %s6636_s9  ;;  %v5630_v16 = vpop.permute.xlu1 %5629 }
 0x982   :  { %v5624_v4 = vpop.permute.xlu0 %5623 }
 0x983   :  { %6378 = vmatprep.mubr.msk.bf16.mxu1 %vm909_vm1, %v5624_v4  ;;  %v6062_v4 = vld [vmem:[%s12722_s0 + $0xa0] sm:$0xff] }
 0x985   :  { %v5634_v9 = vpop.permute.xlu1 %5633 }
 0x986   :  { %v5628_v24 = vpop.permute.xlu0 %5627 }
 0x988   :  { %6379 = vmatmul.mubr.msk.bf16.gmra.mxu1 %vm909_vm1, %v5626_v30  ;;  %v6348_v12 = vpop.f32.mrf.mxu1 }
 0x989   :  { %6382 = vmatprep.mubr.msk.bf16.mxu1 %vm909_vm1, %v5628_v24  ;;  %v6112_v33 = vadd.f32 %v6348_v12, %v6048_v29  ;;  %v6065_v29 = vld [vmem:[%s12722_s0 + $0xb8] sm:$0xff]  ;;  %v6063_v12 = vld [vmem:[%s12722_s0 + $0xa8] sm:$0xff] }
 0x98a   :  { %v5632_v39 = vpop.permute.xlu0 %5631  ;;  %v5803_v34 = vpop.f32.mrf.mxu1 }
 0x98b   :  { %6176 = vst.msk [vmem:[%s12725_s4 + $0x30] sm:$0xff] %vm202_vm0, %v6112_v33  ;;  %v6110_v41 = vadd.f32 %v6046_v32, %v5803_v34 }
 0x98c   :  { %v6349_v10 = vpop.f32.mrf.mxu1 }
 0x98d   :  { %6174 = vst.msk [vmem:[%s12725_s4 + $0x20] sm:$0xff] %vm202_vm0, %v6110_v41  ;;  %v6113_v49 = vadd.f32 %v6349_v10, %v6049_v27  ;;  %v6068_v27 = vld [vmem:[%s12722_s0 + $0xd0] sm:$0xff]  ;;  %v6066_v10 = vld [vmem:[%s12722_s0 + $0xc0] sm:$0xff] }
 0x98e   :  { %v5806_v60 = vpop.f32.mrf.mxu1 }
 0x98f   :  { %6177 = vst.msk [vmem:[%s12725_s4 + $0x38] sm:$0xff] %vm202_vm0, %v6113_v49  ;;  %v6111_v36 = vadd.f32 %v6047_v6, %v5806_v60  ;;  %v6069_v60 = vld [vmem:[%s12722_s0 + $0xd8] sm:$0xff] }
 0x990   :  { %6383 = vmatmul.mubr.msk.bf16.gmra.mxu1 %vm909_vm1, %v5630_v16 }
 0x991   :  { %6386 = vmatprep.mubr.msk.bf16.mxu1 %vm909_vm1, %v5632_v39  ;;  %6175 = vst.msk [vmem:[%s12725_s4 + $0x28] sm:$0xff] %vm202_vm0, %v6111_v36 }
 0x996   :  { %v5636_v44 = vpop.permute.xlu0 %5635 }
 0x998   :  { %6387 = vmatmul.mubr.msk.bf16.gmra.mxu1 %vm909_vm1, %v5634_v9 }
 0x999   :  { %6390 = vmatprep.mubr.msk.bf16.mxu1 %vm909_vm1, %v5636_v44  ;;  %v6067_v44 = vld [vmem:[%s12722_s0 + $0xc8] sm:$0xff] }
 0x99e   :  { %v5638_v43 = vpop.permute.xlu1 %5637 }
 0x9a0   :  { %6391 = vmatmul.mubr.msk.bf16.gmra.mxu1 %vm909_vm1, %v5638_v43 }
 0x9a8   :  { %v6352_v57 = vpop.f32.mrf.mxu1 }
 0x9a9   :  { %v6116_v37 = vadd.f32 %v6352_v57, %v6052_v18 }
 0x9aa   :  { %v5819_v19 = vpop.f32.mrf.mxu1 }
 0x9ab   :  { %6180 = vst.msk [vmem:[%s12725_s4 + $0x50] sm:$0xff] %vm202_vm0, %v6116_v37  ;;  %v6114_v5 = vadd.f32 %v6050_v11, %v5819_v19  ;;  %v6072_v11 = vld [vmem:[%s12722_s0 + $0xf0] sm:$0xff]  ;;  %v6070_v19 = vld [vmem:[%s12722_s0 + $0xe0] sm:$0xff] }
 0x9ac   :  { %v6353_v7 = vpop.f32.mrf.mxu1 }
 0x9ad   :  { %6178 = vst.msk [vmem:[%s12725_s4 + $0x40] sm:$0xff] %vm202_vm0, %v6114_v5  ;;  %v6117_v58 = vadd.f32 %v6353_v7, %v6053_v13  ;;  %v6073_v7 = vld [vmem:[%s12722_s0 + $0xf8] sm:$0xff] }
 0x9ae   :  { %v5822_v35 = vpop.f32.mrf.mxu1 }
 0x9af   :  { %6181 = vst.msk [vmem:[%s12725_s4 + $0x58] sm:$0xff] %vm202_vm0, %v6117_v58  ;;  %v6115_v50 = vadd.f32 %v6051_v45, %v5822_v35  ;;  %v6071_v35 = vld [vmem:[%s12722_s0 + $0xe8] sm:$0xff] }
 0x9b1   :  { %6179 = vst.msk [vmem:[%s12725_s4 + $0x48] sm:$0xff] %vm202_vm0, %v6115_v50 }
 0x9b2   :  { %v5640_v20 = vpop.permute.xlu0 %5639 }
 0x9b3   :  { %6394 = vmatprep.mubr.msk.bf16.mxu1 %vm909_vm1, %v5640_v20 }
 0x9ba   :  { %v5642_v22 = vpop.permute.xlu1 %5641 }
 0x9bb   :  { %6395 = vmatmul.mubr.msk.bf16.gmra.mxu1 %vm909_vm1, %v5642_v22  ;;  %v6076_v22 = vld [vmem:[%s12722_s0 + $0x110] sm:$0xff] }
 0x9c7   :  { %v6356_v46 = vpop.f32.mrf.mxu1 }
 0x9c8   :  { %v6120_v40 = vadd.f32 %v6356_v46, %v6056_v8 }
 0x9c9   :  { %v5835_v53 = vpop.f32.mrf.mxu1 }
 0x9ca   :  { %6184 = vst.msk [vmem:[%s12725_s4 + $0x70] sm:$0xff] %vm202_vm0, %v6120_v40  ;;  %v6118_v15 = vadd.f32 %v6054_v55, %v5835_v53  ;;  %v6074_v55 = vld [vmem:[%s12722_s0 + $0x100] sm:$0xff] }
 0x9cb   :  { %v6357_v14 = vpop.f32.mrf.mxu1 }
 0x9cc   :  { %6182 = vst.msk [vmem:[%s12725_s4 + $0x60] sm:$0xff] %vm202_vm0, %v6118_v15  ;;  %v6121_v42 = vadd.f32 %v6357_v14, %v6057_v1  ;;  %v6077_v1 = vld [vmem:[%s12722_s0 + $0x118] sm:$0xff] }
 0x9cd   :  { %v5838_v62 = vpop.f32.mrf.mxu1 }
 0x9ce   :  { %6185 = vst.msk [vmem:[%s12725_s4 + $0x78] sm:$0xff] %vm202_vm0, %v6121_v42  ;;  %v6119_v25 = vadd.f32 %v6055_v0, %v5838_v62  ;;  %v5644_v56 = vpop.permute.xlu0 %5643  ;;  %v6075_v0 = vld [vmem:[%s12722_s0 + $0x108] sm:$0xff] }
 0x9cf   :  { %6398 = vmatprep.mubr.msk.bf16.mxu1 %vm909_vm1, %v5644_v56 }
 0x9d0   :  { %6183 = vst.msk [vmem:[%s12725_s4 + $0x68] sm:$0xff] %vm202_vm0, %v6119_v25  ;;  %v6080_v25 = vld [vmem:[%s12722_s0 + $0x130] sm:$0xff] }
 0x9d6   :  { %v5646_v17 = vpop.permute.xlu1 %5645 }
 0x9d7   :  { %6399 = vmatmul.mubr.msk.bf16.gmra.mxu1 %vm909_vm1, %v5646_v17 }
 0x9e3   :  { %v6360_v52 = vpop.f32.mrf.mxu1 }
 0x9e4   :  { %v6124_v23 = vadd.f32 %v6360_v52, %v6060_v63  ;;  %v6078_v63 = vld [vmem:[%s12722_s0 + $0x120] sm:$0xff] }
 0x9e5   :  { %v5851_v38 = vpop.f32.mrf.mxu1 }
 0x9e6   :  { %6188 = vst.msk [vmem:[%s12725_s4 + $0x90] sm:$0xff] %vm202_vm0, %v6124_v23  ;;  %v6122_v2 = vadd.f32 %v6058_v26, %v5851_v38  ;;  %v6081_v23 = vld [vmem:[%s12722_s0 + $0x138] sm:$0xff] }
 0x9e7   :  { %v6361_v51 = vpop.f32.mrf.mxu1 }
 0x9e8   :  { %6186 = vst.msk [vmem:[%s12725_s4 + $0x80] sm:$0xff] %vm202_vm0, %v6122_v2  ;;  %v6125_v21 = vadd.f32 %v6361_v51, %v6061_v31  ;;  %v6079_v2 = vld [vmem:[%s12722_s0 + $0x128] sm:$0xff] }
 0x9e9   :  { %v5854_v47 = vpop.f32.mrf.mxu1 }
 0x9ea   :  { %6189 = vst.msk [vmem:[%s12725_s4 + $0x98] sm:$0xff] %vm202_vm0, %v6125_v21  ;;  %v6123_v61 = vadd.f32 %v6059_v48, %v5854_v47  ;;  %v6084_v21 = vld [vmem:[%s12722_s0 + $0x150] sm:$0xff] }
 0x9eb   :  { %v5648_v28 = vpop.permute.xlu0 %5647 }
 0x9ec   :  { %6402 = vmatprep.mubr.msk.bf16.mxu1 %vm909_vm1, %v5648_v28  ;;  %6187 = vst.msk [vmem:[%s12725_s4 + $0x88] sm:$0xff] %vm202_vm0, %v6123_v61  ;;  %v6082_v28 = vld [vmem:[%s12722_s0 + $0x140] sm:$0xff] }
 0x9f3   :  { %v5650_v3 = vpop.permute.xlu1 %5649 }
 0x9f4   :  { %6403 = vmatmul.mubr.msk.bf16.gmra.mxu1 %vm909_vm1, %v5650_v3 }
 0x9ff   :  { %v6364_v54 = vpop.f32.mrf.mxu1 }
 0xa00   :  { %v6128_v30 = vadd.f32 %v6364_v54, %v6064_v59  ;;  %v6085_v54 = vld [vmem:[%s12722_s0 + $0x158] sm:$0xff] }
 0xa01   :  { %v5867_v24 = vpop.f32.mrf.mxu1 }
 0xa02   :  { %6192 = vst.msk [vmem:[%s12725_s4 + $0xb0] sm:$0xff] %vm202_vm0, %v6128_v30  ;;  %v6126_v16 = vadd.f32 %v6062_v4, %v5867_v24  ;;  %v6083_v24 = vld [vmem:[%s12722_s0 + $0x148] sm:$0xff] }
 0xa03   :  { %v6365_v39 = vpop.f32.mrf.mxu1 }
 0xa04   :  { %6190 = vst.msk [vmem:[%s12725_s4 + $0xa0] sm:$0xff] %vm202_vm0, %v6126_v16  ;;  %v6129_v32 = vadd.f32 %v6365_v39, %v6065_v29  ;;  %v6088_v39 = vld [vmem:[%s12722_s0 + $0x170] sm:$0xff] }
 0xa05   :  { %v5870_v33 = vpop.f32.mrf.mxu1 }
 0xa06   :  { %6193 = vst.msk [vmem:[%s12725_s4 + $0xb8] sm:$0xff] %vm202_vm0, %v6129_v32  ;;  %v6127_v34 = vadd.f32 %v6063_v12, %v5870_v33  ;;  %v6086_v33 = vld [vmem:[%s12722_s0 + $0x160] sm:$0xff] }
 0xa08   :  { %6191 = vst.msk [vmem:[%s12725_s4 + $0xa8] sm:$0xff] %vm202_vm0, %v6127_v34 }
 0xa1b   :  { %v6368_v41 = vpop.f32.mrf.mxu1 }
 0xa1c   :  { %v6132_v6 = vadd.f32 %v6368_v41, %v6068_v27  ;;  %v6089_v41 = vld [vmem:[%s12722_s0 + $0x178] sm:$0xff] }
 0xa1d   :  { %v5883_v49 = vpop.f32.mrf.mxu1 }
 0xa1e   :  { %6196 = vst.msk [vmem:[%s12725_s4 + $0xd0] sm:$0xff] %vm202_vm0, %v6132_v6  ;;  %v6130_v9 = vadd.f32 %v6066_v10, %v5883_v49  ;;  %v6087_v49 = vld [vmem:[%s12722_s0 + $0x168] sm:$0xff] }
 0xa1f   :  { %v6369_v36 = vpop.f32.mrf.mxu1 }
 0xa20   :  { %6194 = vst.msk [vmem:[%s12725_s4 + $0xc0] sm:$0xff] %vm202_vm0, %v6130_v9  ;;  %v6133_v43 = vadd.f32 %v6369_v36, %v6069_v60  ;;  %v6092_v36 = vld [vmem:[%s12722_s0 + $0x190] sm:$0xff] }
 0xa21   :  { %v5886_v18 = vpop.f32.mrf.mxu1 }
 0xa22   :  { %6197 = vst.msk [vmem:[%s12725_s4 + $0xd8] sm:$0xff] %vm202_vm0, %v6133_v43  ;;  %v6131_v57 = vadd.f32 %v6067_v44, %v5886_v18  ;;  %v6090_v18 = vld [vmem:[%s12722_s0 + $0x180] sm:$0xff] }
 0xa24   :  { %6195 = vst.msk [vmem:[%s12725_s4 + $0xc8] sm:$0xff] %vm202_vm0, %v6131_v57 }
 0xa38   :  { %v6372_v37 = vpop.f32.mrf.mxu1 }
 0xa39   :  { %v6136_v13 = vadd.f32 %v6372_v37, %v6072_v11  ;;  %v6093_v37 = vld [vmem:[%s12722_s0 + $0x198] sm:$0xff] }
 0xa3a   :  { %v5899_v5 = vpop.f32.mrf.mxu1 }
 0xa3b   :  { %6200 = vst.msk [vmem:[%s12725_s4 + $0xf0] sm:$0xff] %vm202_vm0, %v6136_v13  ;;  %v6134_v45 = vadd.f32 %v6070_v19, %v5899_v5  ;;  %v6091_v5 = vld [vmem:[%s12722_s0 + $0x188] sm:$0xff] }
 0xa3c   :  { %v6373_v58 = vpop.f32.mrf.mxu1 }
 0xa3d   :  { %6198 = vst.msk [vmem:[%s12725_s4 + $0xe0] sm:$0xff] %vm202_vm0, %v6134_v45  ;;  %v6137_v50 = vadd.f32 %v6373_v58, %v6073_v7 }
 0xa3e   :  { %v5902_v20 = vpop.f32.mrf.mxu1 }
 0xa3f   :  { %6201 = vst.msk [vmem:[%s12725_s4 + $0xf8] sm:$0xff] %vm202_vm0, %v6137_v50  ;;  %v6135_v8 = vadd.f32 %v6071_v35, %v5902_v20  ;;  %v6096_v35 = vld [vmem:[%s12722_s0 + $0x1b0] sm:$0xff]  ;;  %v6094_v20 = vld [vmem:[%s12722_s0 + $0x1a0] sm:$0xff] }
 0xa40   :  { %v6376_v46 = vpop.f32.mrf.mxu1 }
 0xa41   :  { %6199 = vst.msk [vmem:[%s12725_s4 + $0xe8] sm:$0xff] %vm202_vm0, %v6135_v8  ;;  %v6140_v40 = vadd.f32 %v6376_v46, %v6076_v22  ;;  %v6097_v46 = vld [vmem:[%s12722_s0 + $0x1b8] sm:$0xff] }
 0xa42   :  { %v5915_v53 = vpop.f32.mrf.mxu1 }
 0xa43   :  { %6204 = vst.msk [vmem:[%s12725_s4 + $0x110] sm:$0xff] %vm202_vm0, %v6140_v40  ;;  %v6138_v15 = vadd.f32 %v6074_v55, %v5915_v53  ;;  %v6095_v53 = vld [vmem:[%s12722_s0 + $0x1a8] sm:$0xff] }
 0xa44   :  { %v6377_v14 = vpop.f32.mrf.mxu1 }
 0xa45   :  { %6202 = vst.msk [vmem:[%s12725_s4 + $0x100] sm:$0xff] %vm202_vm0, %v6138_v15  ;;  %v6141_v42 = vadd.f32 %v6377_v14, %v6077_v1 }
 0xa46   :  { %v5918_v62 = vpop.f32.mrf.mxu1 }
 0xa47   :  { %6205 = vst.msk [vmem:[%s12725_s4 + $0x118] sm:$0xff] %vm202_vm0, %v6141_v42  ;;  %v6139_v56 = vadd.f32 %v6075_v0, %v5918_v62  ;;  %v6100_v0 = vld [vmem:[%s12722_s0 + $0x1d0] sm:$0xff]  ;;  %v6098_v62 = vld [vmem:[%s12722_s0 + $0x1c0] sm:$0xff] }
 0xa48   :  { %v6380_v17 = vpop.f32.mrf.mxu1 }
 0xa49   :  { %6203 = vst.msk [vmem:[%s12725_s4 + $0x108] sm:$0xff] %vm202_vm0, %v6139_v56  ;;  %v6144_v52 = vadd.f32 %v6380_v17, %v6080_v25  ;;  %v6101_v17 = vld [vmem:[%s12722_s0 + $0x1d8] sm:$0xff] }
 0xa4a   :  { %v5931_v26 = vpop.f32.mrf.mxu1 }
 0xa4b   :  { %6208 = vst.msk [vmem:[%s12725_s4 + $0x130] sm:$0xff] %vm202_vm0, %v6144_v52  ;;  %v6142_v38 = vadd.f32 %v6078_v63, %v5931_v26  ;;  %v6099_v26 = vld [vmem:[%s12722_s0 + $0x1c8] sm:$0xff] }
 0xa4c   :  { %v6381_v31 = vpop.f32.mrf.mxu1 }
 0xa4d   :  { %6206 = vst.msk [vmem:[%s12725_s4 + $0x120] sm:$0xff] %vm202_vm0, %v6142_v38  ;;  %v6145_v51 = vadd.f32 %v6381_v31, %v6081_v23 }
 0xa4e   :  { %v5934_v48 = vpop.f32.mrf.mxu1 }
 0xa4f   :  { %6209 = vst.msk [vmem:[%s12725_s4 + $0x138] sm:$0xff] %vm202_vm0, %v6145_v51  ;;  %v6143_v47 = vadd.f32 %v6079_v2, %v5934_v48  ;;  %v6104_v2 = vld [vmem:[%s12722_s0 + $0x1f0] sm:$0xff]  ;;  %v6102_v48 = vld [vmem:[%s12722_s0 + $0x1e0] sm:$0xff] }
 0xa50   :  { %v6384_v61 = vpop.f32.mrf.mxu1 }
 0xa51   :  { %6207 = vst.msk [vmem:[%s12725_s4 + $0x128] sm:$0xff] %vm202_vm0, %v6143_v47  ;;  %v6148_v3 = vadd.f32 %v6384_v61, %v6084_v21  ;;  %v6105_v61 = vld [vmem:[%s12722_s0 + $0x1f8] sm:$0xff] }
 0xa52   :  { %v5947_v59 = vpop.f32.mrf.mxu1 }
 0xa53   :  { %6212 = vst.msk [vmem:[%s12725_s4 + $0x150] sm:$0xff] %vm202_vm0, %v6148_v3  ;;  %v6146_v4 = vadd.f32 %v6082_v28, %v5947_v59  ;;  %v6103_v59 = vld [vmem:[%s12722_s0 + $0x1e8] sm:$0xff] }
 0xa54   :  { %v6385_v30 = vpop.f32.mrf.mxu1 }
 0xa55   :  { %6210 = vst.msk [vmem:[%s12725_s4 + $0x140] sm:$0xff] %vm202_vm0, %v6146_v4  ;;  %v6149_v29 = vadd.f32 %v6385_v30, %v6085_v54 }
 0xa56   :  { %v5950_v16 = vpop.f32.mrf.mxu1 }
 0xa57   :  { %6213 = vst.msk [vmem:[%s12725_s4 + $0x158] sm:$0xff] %vm202_vm0, %v6149_v29  ;;  %v6147_v12 = vadd.f32 %v6083_v24, %v5950_v16 }
 0xa58   :  { %v6388_v32 = vpop.f32.mrf.mxu1 }
 0xa59   :  { %6211 = vst.msk [vmem:[%s12725_s4 + $0x148] sm:$0xff] %vm202_vm0, %v6147_v12  ;;  %v6152_v34 = vadd.f32 %v6388_v32, %v6088_v39 }
 0xa5a   :  { %v5963_v27 = vpop.f32.mrf.mxu1 }
 0xa5b   :  { %6216 = vst.msk [vmem:[%s12725_s4 + $0x170] sm:$0xff] %vm202_vm0, %v6152_v34  ;;  %v6150_v10 = vadd.f32 %v6086_v33, %v5963_v27 }
 0xa5c   :  { %v6389_v6 = vpop.f32.mrf.mxu1 }
 0xa5d   :  { %6214 = vst.msk [vmem:[%s12725_s4 + $0x160] sm:$0xff] %vm202_vm0, %v6150_v10  ;;  %v6153_v60 = vadd.f32 %v6389_v6, %v6089_v41 }
 0xa5e   :  { %v5966_v9 = vpop.f32.mrf.mxu1 }
 0xa5f   :  { %6217 = vst.msk [vmem:[%s12725_s4 + $0x178] sm:$0xff] %vm202_vm0, %v6153_v60  ;;  %v6151_v44 = vadd.f32 %v6087_v49, %v5966_v9 }
 0xa60   :  { %v6392_v43 = vpop.f32.mrf.mxu1 }
 0xa61   :  { %6215 = vst.msk [vmem:[%s12725_s4 + $0x168] sm:$0xff] %vm202_vm0, %v6151_v44  ;;  %v6156_v57 = vadd.f32 %v6392_v43, %v6092_v36 }
 0xa62   :  { %v5979_v11 = vpop.f32.mrf.mxu1 }
 0xa63   :  { %6220 = vst.msk [vmem:[%s12725_s4 + $0x190] sm:$0xff] %vm202_vm0, %v6156_v57  ;;  %v6154_v19 = vadd.f32 %v6090_v18, %v5979_v11 }
 0xa64   :  { %v6393_v13 = vpop.f32.mrf.mxu1 }
 0xa65   :  { %6218 = vst.msk [vmem:[%s12725_s4 + $0x180] sm:$0xff] %vm202_vm0, %v6154_v19  ;;  %v6157_v7 = vadd.f32 %v6393_v13, %v6093_v37 }
 0xa66   :  { %v5982_v45 = vpop.f32.mrf.mxu1 }
 0xa67   :  { %6221 = vst.msk [vmem:[%s12725_s4 + $0x198] sm:$0xff] %vm202_vm0, %v6157_v7  ;;  %v6155_v58 = vadd.f32 %v6091_v5, %v5982_v45 }
 0xa69   :  { %6219 = vst.msk [vmem:[%s12725_s4 + $0x188] sm:$0xff] %vm202_vm0, %v6155_v58 }
 0xa7b   :  { %v6396_v50 = vpop.f32.mrf.mxu1 }
 0xa7c   :  { %v6160_v22 = vadd.f32 %v6396_v50, %v6096_v35 }
 0xa7d   :  { %v5995_v8 = vpop.f32.mrf.mxu1 }
 0xa7e   :  { %6224 = vst.msk [vmem:[%s12725_s4 + $0x1b0] sm:$0xff] %vm202_vm0, %v6160_v22  ;;  %v6158_v55 = vadd.f32 %v6094_v20, %v5995_v8 }
 0xa7f   :  { %v6397_v40 = vpop.f32.mrf.mxu1 }
 0xa80   :  { %6222 = vst.msk [vmem:[%s12725_s4 + $0x1a0] sm:$0xff] %vm202_vm0, %v6158_v55  ;;  %v6161_v1 = vadd.f32 %v6397_v40, %v6097_v46 }
 0xa81   :  { %v5998_v15 = vpop.f32.mrf.mxu1 }
 0xa82   :  { %6225 = vst.msk [vmem:[%s12725_s4 + $0x1b8] sm:$0xff] %vm202_vm0, %v6161_v1  ;;  %v6159_v14 = vadd.f32 %v6095_v53, %v5998_v15 }
 0xa84   :  { %6223 = vst.msk [vmem:[%s12725_s4 + $0x1a8] sm:$0xff] %vm202_vm0, %v6159_v14 }
 0xa97   :  { %v6400_v42 = vpop.f32.mrf.mxu1 }
 0xa98   :  { %v6164_v25 = vadd.f32 %v6400_v42, %v6100_v0 }
 0xa99   :  { %v6011_v56 = vpop.f32.mrf.mxu1 }
 0xa9a   :  { %6228 = vst.msk [vmem:[%s12725_s4 + $0x1d0] sm:$0xff] %vm202_vm0, %v6164_v25  ;;  %v6162_v63 = vadd.f32 %v6098_v62, %v6011_v56 }
 0xa9b   :  { %v6401_v52 = vpop.f32.mrf.mxu1 }
 0xa9c   :  { %6226 = vst.msk [vmem:[%s12725_s4 + $0x1c0] sm:$0xff] %vm202_vm0, %v6162_v63  ;;  %v6165_v23 = vadd.f32 %v6401_v52, %v6101_v17 }
 0xa9d   :  { %v6014_v38 = vpop.f32.mrf.mxu1 }
 0xa9e   :  { %6229 = vst.msk [vmem:[%s12725_s4 + $0x1d8] sm:$0xff] %vm202_vm0, %v6165_v23  ;;  %v6163_v31 = vadd.f32 %v6099_v26, %v6014_v38 }
 0xaa0   :  { %6227 = vst.msk [vmem:[%s12725_s4 + $0x1c8] sm:$0xff] %vm202_vm0, %v6163_v31 }
 0xab4   :  { %v6404_v51 = vpop.f32.mrf.mxu1 }
 0xab5   :  { %v6168_v21 = vadd.f32 %v6404_v51, %v6104_v2 }
 0xab6   :  { %v6027_v47 = vpop.f32.mrf.mxu1 }
 0xab7   :  { %6232 = vst.msk [vmem:[%s12725_s4 + $0x1f0] sm:$0xff] %vm202_vm0, %v6168_v21  ;;  %v6166_v28 = vadd.f32 %v6102_v48, %v6027_v47 }
 0xab8   :  { %v6405_v3 = vpop.f32.mrf.mxu1 }
 0xab9   :  { %6230 = vst.msk [vmem:[%s12725_s4 + $0x1e0] sm:$0xff] %vm202_vm0, %v6166_v28  ;;  %v6169_v54 = vadd.f32 %v6405_v3, %v6105_v61 }
 0xaba   :  { %v6030_v4 = vpop.f32.mrf.mxu1 }
 0xabb   :  { %6233 = vst.msk [vmem:[%s12725_s4 + $0x1f8] sm:$0xff] %vm202_vm0, %v6169_v54  ;;  %v6167_v30 = vadd.f32 %v6103_v59, %v6030_v4 }
 0xabd   :  { %6231 = vst.msk [vmem:[%s12725_s4 + $0x1e8] sm:$0xff] %vm202_vm0, %v6167_v30 }

</bundles_post_ra>
